<compile_context>
chip_gen: v5e
topology: v5e:2x2
jax: 0.10.0
libtpu: 0.0.40
codegen_flags: <defaults>
</compile_context>

<pallas_src>
import functools

import jax
import jax.numpy as jnp
from jax import lax
from jax.experimental import pallas as pl
from jax.experimental.pallas import tpu as pltpu

EPS = 1e-5


def _instance_norm_cols(x):
    """x: (N, C) f32. Per-column (per-channel) mean / unbiased std, one pass."""
    n = x.shape[0]
    s1 = jnp.sum(x, axis=0, keepdims=True)               # (1, C)
    s2 = jnp.sum(x * x, axis=0, keepdims=True)           # (1, C)
    mean = s1 * (1.0 / n)
    var = jnp.maximum(s2 - s1 * mean, 0.0) * (1.0 / (n - 1))
    rstd = lax.rsqrt(var + EPS)
    return (x - mean) * rstd


# ---------------------------------------------------------------------------
# Fused kernel: one grid step per (batch, query-tile).
# ---------------------------------------------------------------------------
def _mcc_kernel(tq, tk, nk,
                x_ref, s_ref,
                wf_t, bf_r, wg_m, bg_c, wh_t, bh_r, wo_t, bo_r,
                mf_t, mbf_r, mg_t, mbg_r, mfc_t, mbfc_r, mo_t, mbo_r,
                o_ref,
                f_s, g_s, h_s, m_s, l_s, acc_s):
    qi = pl.program_id(1)
    nq = pl.num_programs(1)

    # ---- per-batch precompute (first query tile only): norm + f/g/h convs --
    @pl.when(qi == 0)
    def _():
        x_t = x_ref[...]                                     # (HW, C) f32
        xn = _instance_norm_cols(x_t)
        xn_b = xn.astype(jnp.bfloat16)
        # f (queries), token-major (HW, C)
        f_t = jnp.dot(xn_b, wf_t[...],
                      preferred_element_type=jnp.float32) + bf_r[...]
        f_s[...] = f_t.astype(jnp.bfloat16)
        # g (keys), channel-major (C, HW) so the energy matmul is canonical NN
        g = lax.dot_general(wg_m[...], xn_b, (((1,), (1,)), ((), ())),
                            preferred_element_type=jnp.float32) + bg_c[...]
        g_s[...] = g.astype(jnp.bfloat16)
        # h (values), token-major (HW, C); uses *unnormalized* x (per torch)
        h_t = jnp.dot(x_t.astype(jnp.bfloat16), wh_t[...],
                      preferred_element_type=jnp.float32) + bh_r[...]
        h_s[...] = h_t.astype(jnp.bfloat16)

    # ---- Content_SA: flash attention for this query tile -------------------
    q0 = pl.multiple_of(qi * tq, tq)
    f_q = f_s[pl.ds(q0, tq), :]                              # (tq, C) bf16

    m_s[...] = jnp.full(m_s.shape, -jnp.inf, dtype=jnp.float32)
    l_s[...] = jnp.zeros(l_s.shape, dtype=jnp.float32)
    acc_s[...] = jnp.zeros(acc_s.shape, dtype=jnp.float32)

    @pl.loop(0, nk)
    def _(ki):
        k0 = pl.multiple_of(ki * tk, tk)
        g_k = g_s[:, pl.ds(k0, tk)]                          # (C, tk) bf16
        h_k = h_s[pl.ds(k0, tk), :]                          # (tk, C) bf16
        e = jnp.dot(f_q, g_k, preferred_element_type=jnp.float32)   # (tq, tk)
        m_prev = m_s[...]
        m_new = jnp.maximum(m_prev, jnp.max(e, axis=-1, keepdims=True))
        alpha = jnp.exp(m_prev - m_new)
        p = jnp.exp(e - m_new)
        l_s[...] = alpha * l_s[...] + jnp.sum(p, axis=-1, keepdims=True)
        acc_s[...] = alpha * acc_s[...] + jnp.dot(
            p.astype(jnp.bfloat16), h_k, preferred_element_type=jnp.float32)
        m_s[...] = m_new

    attn_out = acc_s[...] * pl.reciprocal(l_s[...], approx=True)    # (tq, C) f32
    csa_q = jnp.dot(attn_out.astype(jnp.bfloat16), wo_t[...],
                    preferred_element_type=jnp.float32) + bo_r[...]
    csa_q = csa_q + x_ref[pl.ds(q0, tq), :]                  # residual
    o_ref[pl.ds(q0, tq), :] = csa_q

    # ---- mcc (channel-correlation modulation): once per batch, last tile ---
    @pl.when(qi == nq - 1)
    def _():
        csa = o_ref[...]                                     # (HW, C) f32
        cn = _instance_norm_cols(csa)
        f_m = jnp.dot(cn.astype(jnp.bfloat16), mf_t[...],
                      preferred_element_type=jnp.float32) + mbf_r[...]

        s_t = s_ref[...]                                     # (HWs, C) f32
        sn = _instance_norm_cols(s_t)
        g_m = jnp.dot(sn.astype(jnp.bfloat16), mg_t[...],
                      preferred_element_type=jnp.float32) + mbg_r[...]
        g_sum = jnp.sum(g_m, axis=0, keepdims=True)          # (1, C)
        g_sq = jnp.sum(g_m * g_m, axis=0, keepdims=True)     # (1, C)
        fcs = g_sq / g_sum                                   # matches torch (no eps)

        fcs_lin = jnp.dot(fcs, mfc_t[...],
                          preferred_element_type=jnp.float32) + mbfc_r[...]
        out_m = f_m * fcs_lin                                # (HW, C)
        out_c = jnp.dot(out_m.astype(jnp.bfloat16), mo_t[...],
                        preferred_element_type=jnp.float32) + mbo_r[...]
        o_ref[...] = csa + out_c


def _fused_mcc_call(x_t, s_t, params, tq, tk):
    B, HW, C = x_t.shape
    _, HWs, _ = s_t.shape
    nq = HW // tq
    nk = HW // tk

    def w_spec():
        return pl.BlockSpec((C, C), lambda b, q: (0, 0))

    def row_spec():
        return pl.BlockSpec((1, C), lambda b, q: (0, 0))

    col_spec = pl.BlockSpec((C, 1), lambda b, q: (0, 0))
    x_spec = pl.BlockSpec((None, HW, C), lambda b, q: (b, 0, 0))
    s_spec = pl.BlockSpec((None, HWs, C), lambda b, q: (b, 0, 0))
    out_spec = pl.BlockSpec((None, HW, C), lambda b, q: (b, 0, 0))

    in_specs = [x_spec, s_spec,
                w_spec(), row_spec(), w_spec(), col_spec,    # wf^T, bf, wg, bg
                w_spec(), row_spec(), w_spec(), row_spec(),  # wh^T, bh, wo^T, bo
                w_spec(), row_spec(), w_spec(), row_spec(),  # mf^T, mbf, mg^T, mbg
                w_spec(), row_spec(), w_spec(), row_spec()]  # mfc^T, mbfc, mo^T, mbo

    kernel = functools.partial(_mcc_kernel, tq, tk, nk)
    return pl.pallas_call(
        kernel,
        out_shape=jax.ShapeDtypeStruct((B, HW, C), jnp.float32),
        grid_spec=pltpu.PrefetchScalarGridSpec(
            num_scalar_prefetch=0,
            grid=(B, nq),
            in_specs=in_specs,
            out_specs=out_spec,
            scratch_shapes=[
                pltpu.VMEM((HW, C), jnp.bfloat16),   # f (token-major)
                pltpu.VMEM((C, HW), jnp.bfloat16),   # g (channel-major)
                pltpu.VMEM((HW, C), jnp.bfloat16),   # h (token-major)
                pltpu.VMEM((tq, 1), jnp.float32),    # running max
                pltpu.VMEM((tq, 1), jnp.float32),    # running denominator
                pltpu.VMEM((tq, C), jnp.float32),    # attention accumulator
            ]),
        compiler_params=pltpu.CompilerParams(
            dimension_semantics=("parallel", "arbitrary"),
            vmem_limit_bytes=64 * 1024 * 1024),
    )(x_t, s_t, *params)


def _pick_tile(n, prefs):
    for t in prefs:
        if t <= n and n % t == 0:
            return t
    return n


# ---------------------------------------------------------------------------
# Wrapper: layout plumbing (transpose to token-major, pre-transpose weights).
# ---------------------------------------------------------------------------
@jax.jit
def mcc_module_forward(content_feat_4, style_feat_4, csa_params, mcc_params):
    B, C, H, W = content_feat_4.shape
    Bs, Cs, Hs, Ws = style_feat_4.shape
    HW, HWs = H * W, Hs * Ws

    x_t = content_feat_4.reshape(B, C, HW).transpose(0, 2, 1).astype(jnp.float32)
    s_t = style_feat_4.reshape(Bs, Cs, HWs).transpose(0, 2, 1).astype(jnp.float32)

    wf, bf, wg, bg, wh, bh, wo, bo = csa_params
    mf, mbf, mg, mbg, mfc, mbfc, mo, mbo = mcc_params

    def w_t(w):      # (C_out, C_in) -> (C_in, C_out), bf16 MXU operand
        return w.T.astype(jnp.bfloat16)

    def b_row(b):    # (C, 1) -> (1, C) f32
        return b.reshape(1, -1).astype(jnp.float32)

    params = (
        # Content_SA
        w_t(wf), b_row(bf),
        wg.astype(jnp.bfloat16), bg.reshape(-1, 1).astype(jnp.float32),
        w_t(wh), b_row(bh),
        w_t(wo), b_row(bo),
        # mcc (fc Linear kept f32: it is a tiny (1,C)@(C,C))
        w_t(mf), b_row(mbf),
        w_t(mg), b_row(mbg),
        mfc.T.astype(jnp.float32), b_row(mbfc),
        w_t(mo), b_row(mbo),
    )

    tq = _pick_tile(HW, (256, 128))
    tk = _pick_tile(HW, (512, 256, 128))
    out_t = _fused_mcc_call(x_t, s_t, params, tq, tk)        # (B, HW, C)
    return out_t.transpose(0, 2, 1).reshape(B, C, H, W)


# ---------------------------------------------------------------------------
# Pure-JAX reference (mirrors the kernel's bf16-matmul / f32-accumulate math)
# ---------------------------------------------------------------------------
def _normal_ref(x):
    B, C, H, W = x.shape
    f = x.reshape(B, C, -1)
    mean = f.mean(-1)
    std = jnp.sqrt(f.var(-1, ddof=1) + EPS)
    return (x - mean[:, :, None, None]) / std[:, :, None, None]


def _conv1x1_bf16(x, w, b):
    y = jnp.einsum('oc,bchw->bohw', w.astype(jnp.bfloat16),
                   x.astype(jnp.bfloat16),
                   preferred_element_type=jnp.float32)
    return y + b.reshape(1, -1, 1, 1)


def _csa_ref(x, wf, bf, wg, bg, wh, bh, wo, bo):
    B, C, H, W = x.shape
    F = _conv1x1_bf16(_normal_ref(x), wf, bf).reshape(B, C, H * W).transpose(0, 2, 1)
    G = _conv1x1_bf16(_normal_ref(x), wg, bg).reshape(B, C, H * W)
    energy = jnp.einsum('bic,bcj->bij', F.astype(jnp.bfloat16),
                        G.astype(jnp.bfloat16),
                        preferred_element_type=jnp.float32)
    attn = jax.nn.softmax(energy, axis=-1)
    Hf = _conv1x1_bf16(x, wh, bh).reshape(B, C, H * W)
    out = jnp.einsum('bcj,bij->bci', Hf.astype(jnp.bfloat16),
                     attn.astype(jnp.bfloat16),
                     preferred_element_type=jnp.float32).reshape(B, C, H, W)
    return _conv1x1_bf16(out, wo, bo) + x


def _mcc_ref(c, s, wf, bf, wg, bg, wfc, bfc, wo, bo):
    F = _conv1x1_bf16(_normal_ref(c), wf, bf)
    Bs, Cs, Hs, Ws = s.shape
    G = _conv1x1_bf16(_normal_ref(s), wg, bg).reshape(Bs, Cs, Hs * Ws)
    g_sum = G.sum(-1)
    fcs = (G * G).sum(-1) / g_sum
    fcs = fcs @ wfc.T + bfc.reshape(1, -1)
    out = F * fcs[:, :, None, None]
    return c + _conv1x1_bf16(out, wo, bo)


def _module_ref(c4, s4, csa_params, mcc_params):
    return _mcc_ref(_csa_ref(c4, *csa_params), s4, *mcc_params)


# ---------------------------------------------------------------------------
def init_params(key, C):
    keys = jax.random.split(key, 16)

    def w(k):
        return jax.random.normal(k, (C, C), jnp.float32) * 0.1

    def b(k):
        return jax.random.normal(k, (C, 1), jnp.float32) * 0.05

    csa_params = (w(keys[0]), b(keys[1]), w(keys[2]), b(keys[3]),
                  w(keys[4]), b(keys[5]), w(keys[6]), b(keys[7]))
    mcc_params = (w(keys[8]), b(keys[9]), w(keys[10]), b(keys[11]),
                  w(keys[12]), b(keys[13]), w(keys[14]), b(keys[15]))
    return csa_params, mcc_params


if __name__ == "__main__":
    B, C, H, W = 2, 4, 16, 16
    key = jax.random.PRNGKey(0)
    k_c, k_s, k_p = jax.random.split(key, 3)

    content_feat_4 = jax.random.normal(k_c, (B, C, H, W), jnp.float32)
    style_feat_4 = jax.random.normal(k_s, (B, C, H, W), jnp.float32)
    # MCC_Module consumes feats[-2]; build small pyramids where only [-2] matters.
    content_feats = [jnp.zeros((B, C, H, W), jnp.float32), content_feat_4,
                     jnp.zeros((B, C, H // 2, W // 2), jnp.float32)]
    style_feats = [jnp.zeros((B, C, H, W), jnp.float32), style_feat_4,
                   jnp.zeros((B, C, H // 2, W // 2), jnp.float32)]

    csa_params, mcc_params = init_params(k_p, C)

    out = mcc_module_forward(content_feats[-2], style_feats[-2],
                             csa_params, mcc_params)
    out = jax.block_until_ready(out)

    ref = _module_ref(content_feats[-2], style_feats[-2],
                      csa_params, mcc_params)
    assert out.shape == (B, C, H, W)
    assert jnp.allclose(out, ref, rtol=2e-2, atol=2e-2), "mismatch vs reference"

    print("KERNEL_OK")
</pallas_src>

<mosaic_0001>
module attributes {stable_mosaic.version = 11 : i64} {
  func.func @_mcc_kernel(%arg0: i32, %arg1: i32, %arg2: memref<1x256x4xf32, #tpu.memory_space<vmem>>, %arg3: memref<1x256x4xf32, #tpu.memory_space<vmem>>, %arg4: memref<4x4xbf16, #tpu.memory_space<vmem>>, %arg5: memref<1x4xf32, #tpu.memory_space<vmem>>, %arg6: memref<4x4xbf16, #tpu.memory_space<vmem>>, %arg7: memref<4x1xf32, #tpu.memory_space<vmem>>, %arg8: memref<4x4xbf16, #tpu.memory_space<vmem>>, %arg9: memref<1x4xf32, #tpu.memory_space<vmem>>, %arg10: memref<4x4xbf16, #tpu.memory_space<vmem>>, %arg11: memref<1x4xf32, #tpu.memory_space<vmem>>, %arg12: memref<4x4xbf16, #tpu.memory_space<vmem>>, %arg13: memref<1x4xf32, #tpu.memory_space<vmem>>, %arg14: memref<4x4xbf16, #tpu.memory_space<vmem>>, %arg15: memref<1x4xf32, #tpu.memory_space<vmem>>, %arg16: memref<4x4xf32, #tpu.memory_space<vmem>>, %arg17: memref<1x4xf32, #tpu.memory_space<vmem>>, %arg18: memref<4x4xbf16, #tpu.memory_space<vmem>>, %arg19: memref<1x4xf32, #tpu.memory_space<vmem>>, %arg20: memref<1x256x4xf32, #tpu.memory_space<vmem>>, %arg21: memref<256x4xbf16, #tpu.memory_space<vmem>>, %arg22: memref<4x256xbf16, #tpu.memory_space<vmem>>, %arg23: memref<256x4xbf16, #tpu.memory_space<vmem>>, %arg24: memref<256x1xf32, #tpu.memory_space<vmem>>, %arg25: memref<256x1xf32, #tpu.memory_space<vmem>>, %arg26: memref<256x4xf32, #tpu.memory_space<vmem>>) attributes {dimension_semantics = [#tpu.dimension_semantics<parallel>, #tpu.dimension_semantics<arbitrary>], iteration_bounds = array<i64: 2, 1>, scalar_prefetch = 0 : i64, scratch_operands = 6 : i64, tpu.core_type = #tpu.core_type<tc>, window_params = [{transform_indices = @transform_0, window_bounds = array<i64: 1, 256, 4>}, {transform_indices = @transform_1, window_bounds = array<i64: 1, 256, 4>}, {pipeline_mode = #tpu.pipeline_mode<synchronous>, transform_indices = @transform_2, window_bounds = array<i64: 4, 4>}, {pipeline_mode = #tpu.pipeline_mode<synchronous>, transform_indices = @transform_3, window_bounds = array<i64: 1, 4>}, {pipeline_mode = #tpu.pipeline_mode<synchronous>, transform_indices = @transform_4, window_bounds = array<i64: 4, 4>}, {pipeline_mode = #tpu.pipeline_mode<synchronous>, transform_indices = @transform_5, window_bounds = array<i64: 4, 1>}, {pipeline_mode = #tpu.pipeline_mode<synchronous>, transform_indices = @transform_6, window_bounds = array<i64: 4, 4>}, {pipeline_mode = #tpu.pipeline_mode<synchronous>, transform_indices = @transform_7, window_bounds = array<i64: 1, 4>}, {pipeline_mode = #tpu.pipeline_mode<synchronous>, transform_indices = @transform_8, window_bounds = array<i64: 4, 4>}, {pipeline_mode = #tpu.pipeline_mode<synchronous>, transform_indices = @transform_9, window_bounds = array<i64: 1, 4>}, {pipeline_mode = #tpu.pipeline_mode<synchronous>, transform_indices = @transform_10, window_bounds = array<i64: 4, 4>}, {pipeline_mode = #tpu.pipeline_mode<synchronous>, transform_indices = @transform_11, window_bounds = array<i64: 1, 4>}, {pipeline_mode = #tpu.pipeline_mode<synchronous>, transform_indices = @transform_12, window_bounds = array<i64: 4, 4>}, {pipeline_mode = #tpu.pipeline_mode<synchronous>, transform_indices = @transform_13, window_bounds = array<i64: 1, 4>}, {pipeline_mode = #tpu.pipeline_mode<synchronous>, transform_indices = @transform_14, window_bounds = array<i64: 4, 4>}, {pipeline_mode = #tpu.pipeline_mode<synchronous>, transform_indices = @transform_15, window_bounds = array<i64: 1, 4>}, {pipeline_mode = #tpu.pipeline_mode<synchronous>, transform_indices = @transform_16, window_bounds = array<i64: 4, 4>}, {pipeline_mode = #tpu.pipeline_mode<synchronous>, transform_indices = @transform_17, window_bounds = array<i64: 1, 4>}, {transform_indices = @transform_18, window_bounds = array<i64: 1, 256, 4>}]} {
    %c0_i32 = arith.constant 0 : i32
    %0 = arith.cmpi eq, %arg1, %c0_i32 : i32
    %1 = arith.extui %0 : i1 to i32
    %c0_i32_0 = arith.constant 0 : i32
    %2 = arith.cmpi ne, %1, %c0_i32_0 : i32
    scf.if %2 {
      %c0_46 = arith.constant 0 : index
      %c0_47 = arith.constant 0 : index
      %c0_48 = arith.constant 0 : index
      %67 = vector.load %arg2[%c0_46, %c0_47, %c0_48] : memref<1x256x4xf32, #tpu.memory_space<vmem>>, vector<1x256x4xf32>
      %68 = vector.shape_cast %67 : vector<1x256x4xf32> to vector<256x4xf32>
      %cst_49 = arith.constant dense<0.000000e+00> : vector<4xf32>
      %69 = vector.multi_reduction <add>, %68, %cst_49 [0] : vector<256x4xf32> to vector<4xf32>
      %70 = vector.shape_cast %69 : vector<4xf32> to vector<1x4xf32>
      %71 = arith.mulf %68, %68 : vector<256x4xf32>
      %cst_50 = arith.constant dense<0.000000e+00> : vector<4xf32>
      %72 = vector.multi_reduction <add>, %71, %cst_50 [0] : vector<256x4xf32> to vector<4xf32>
      %73 = vector.shape_cast %72 : vector<4xf32> to vector<1x4xf32>
      %cst_51 = arith.constant 3.906250e-03 : f32
      %74 = vector.broadcast %cst_51 : f32 to vector<1x4xf32>
      %75 = arith.mulf %70, %74 : vector<1x4xf32>
      %76 = arith.mulf %70, %75 : vector<1x4xf32>
      %77 = arith.subf %73, %76 : vector<1x4xf32>
      %cst_52 = arith.constant 0.000000e+00 : f32
      %78 = vector.broadcast %cst_52 : f32 to vector<1x4xf32>
      %79 = arith.maximumf %77, %78 : vector<1x4xf32>
      %cst_53 = arith.constant 0.00392156886 : f32
      %80 = vector.broadcast %cst_53 : f32 to vector<1x4xf32>
      %81 = arith.mulf %79, %80 : vector<1x4xf32>
      %cst_54 = arith.constant 9.99999974E-6 : f32
      %82 = vector.broadcast %cst_54 : f32 to vector<1x4xf32>
      %83 = arith.addf %81, %82 : vector<1x4xf32>
      %84 = math.rsqrt %83 : vector<1x4xf32>
      %85 = vector.broadcast %75 : vector<1x4xf32> to vector<256x4xf32>
      %86 = arith.subf %68, %85 : vector<256x4xf32>
      %87 = vector.broadcast %84 : vector<1x4xf32> to vector<256x4xf32>
      %88 = arith.mulf %86, %87 : vector<256x4xf32>
      %89 = arith.truncf %88 : vector<256x4xf32> to vector<256x4xbf16>
      %c0_55 = arith.constant 0 : index
      %c0_56 = arith.constant 0 : index
      %90 = vector.load %arg4[%c0_55, %c0_56] : memref<4x4xbf16, #tpu.memory_space<vmem>>, vector<4x4xbf16>
      %cst_57 = arith.constant dense<0.000000e+00> : vector<256x4xf32>
      %91 = tpu.matmul %89, %90, %cst_57 {dimension_numbers = #tpu.dot_dimension_numbers<[1], [0], [0], [1], [0, 0, 1, 1], [], []>} : vector<256x4xbf16>, vector<4x4xbf16>, vector<256x4xf32> -> vector<256x4xf32>
      %c0_58 = arith.constant 0 : index
      %c0_59 = arith.constant 0 : index
      %92 = vector.load %arg5[%c0_58, %c0_59] : memref<1x4xf32, #tpu.memory_space<vmem>>, vector<1x4xf32>
      %93 = vector.broadcast %92 : vector<1x4xf32> to vector<256x4xf32>
      %94 = arith.addf %91, %93 : vector<256x4xf32>
      %95 = arith.truncf %94 : vector<256x4xf32> to vector<256x4xbf16>
      %c0_60 = arith.constant 0 : index
      %c0_61 = arith.constant 0 : index
      %96 = vector.load %arg21[%c0_60, %c0_61] : memref<256x4xbf16, #tpu.memory_space<vmem>>, vector<256x4xbf16>
      tpu.vector_store %arg21[%c0_60, %c0_61], %95 {strides = array<i32>} : memref<256x4xbf16, #tpu.memory_space<vmem>>, vector<256x4xbf16>,
      %c0_62 = arith.constant 0 : index
      %c0_63 = arith.constant 0 : index
      %97 = vector.load %arg6[%c0_62, %c0_63] : memref<4x4xbf16, #tpu.memory_space<vmem>>, vector<4x4xbf16>
      %cst_64 = arith.constant dense<0.000000e+00> : vector<4x256xf32>
      %98 = tpu.matmul %97, %89, %cst_64 {dimension_numbers = #tpu.dot_dimension_numbers<[1], [1], [0], [0], [0, 0, 1, 0], [], []>} : vector<4x4xbf16>, vector<256x4xbf16>, vector<4x256xf32> -> vector<4x256xf32>
      %c0_65 = arith.constant 0 : index
      %c0_66 = arith.constant 0 : index
      %99 = vector.load %arg7[%c0_65, %c0_66] : memref<4x1xf32, #tpu.memory_space<vmem>>, vector<4x1xf32>
      %100 = vector.broadcast %99 : vector<4x1xf32> to vector<4x256xf32>
      %101 = arith.addf %98, %100 : vector<4x256xf32>
      %102 = arith.truncf %101 : vector<4x256xf32> to vector<4x256xbf16>
      %c0_67 = arith.constant 0 : index
      %c0_68 = arith.constant 0 : index
      %103 = vector.load %arg22[%c0_67, %c0_68] : memref<4x256xbf16, #tpu.memory_space<vmem>>, vector<4x256xbf16>
      tpu.vector_store %arg22[%c0_67, %c0_68], %102 {strides = array<i32>} : memref<4x256xbf16, #tpu.memory_space<vmem>>, vector<4x256xbf16>,
      %104 = arith.truncf %68 : vector<256x4xf32> to vector<256x4xbf16>
      %c0_69 = arith.constant 0 : index
      %c0_70 = arith.constant 0 : index
      %105 = vector.load %arg8[%c0_69, %c0_70] : memref<4x4xbf16, #tpu.memory_space<vmem>>, vector<4x4xbf16>
      %cst_71 = arith.constant dense<0.000000e+00> : vector<256x4xf32>
      %106 = tpu.matmul %104, %105, %cst_71 {dimension_numbers = #tpu.dot_dimension_numbers<[1], [0], [0], [1], [0, 0, 1, 1], [], []>} : vector<256x4xbf16>, vector<4x4xbf16>, vector<256x4xf32> -> vector<256x4xf32>
      %c0_72 = arith.constant 0 : index
      %c0_73 = arith.constant 0 : index
      %107 = vector.load %arg9[%c0_72, %c0_73] : memref<1x4xf32, #tpu.memory_space<vmem>>, vector<1x4xf32>
      %108 = vector.broadcast %107 : vector<1x4xf32> to vector<256x4xf32>
      %109 = arith.addf %106, %108 : vector<256x4xf32>
      %110 = arith.truncf %109 : vector<256x4xf32> to vector<256x4xbf16>
      %c0_74 = arith.constant 0 : index
      %c0_75 = arith.constant 0 : index
      %111 = vector.load %arg23[%c0_74, %c0_75] : memref<256x4xbf16, #tpu.memory_space<vmem>>, vector<256x4xbf16>
      tpu.vector_store %arg23[%c0_74, %c0_75], %110 {strides = array<i32>} : memref<256x4xbf16, #tpu.memory_space<vmem>>, vector<256x4xbf16>,
    } else {
    }
    %c256_i32 = arith.constant 256 : i32
    %3 = arith.muli %arg1, %c256_i32 : i32
    %4 = tpu.assume_multiple %3, 256 : i32
    %5 = arith.index_cast %4 : i32 to index
    %c0 = arith.constant 0 : index
    %6 = vector.load %arg21[%5, %c0] : memref<256x4xbf16, #tpu.memory_space<vmem>>, vector<256x4xbf16>
    %cst = arith.constant 0xFF800000 : f32
    %7 = vector.broadcast %cst : f32 to vector<256x1xf32>
    %c0_1 = arith.constant 0 : index
    %c0_2 = arith.constant 0 : index
    %8 = vector.load %arg24[%c0_1, %c0_2] : memref<256x1xf32, #tpu.memory_space<vmem>>, vector<256x1xf32>
    tpu.vector_store %arg24[%c0_1, %c0_2], %7 {strides = array<i32>} : memref<256x1xf32, #tpu.memory_space<vmem>>, vector<256x1xf32>,
    %cst_3 = arith.constant 0.000000e+00 : f32
    %9 = vector.broadcast %cst_3 : f32 to vector<256x1xf32>
    %c0_4 = arith.constant 0 : index
    %c0_5 = arith.constant 0 : index
    %10 = vector.load %arg25[%c0_4, %c0_5] : memref<256x1xf32, #tpu.memory_space<vmem>>, vector<256x1xf32>
    tpu.vector_store %arg25[%c0_4, %c0_5], %9 {strides = array<i32>} : memref<256x1xf32, #tpu.memory_space<vmem>>, vector<256x1xf32>,
    %cst_6 = arith.constant 0.000000e+00 : f32
    %11 = vector.broadcast %cst_6 : f32 to vector<256x4xf32>
    %c0_7 = arith.constant 0 : index
    %c0_8 = arith.constant 0 : index
    %12 = vector.load %arg26[%c0_7, %c0_8] : memref<256x4xf32, #tpu.memory_space<vmem>>, vector<256x4xf32>
    tpu.vector_store %arg26[%c0_7, %c0_8], %11 {strides = array<i32>} : memref<256x4xf32, #tpu.memory_space<vmem>>, vector<256x4xf32>,
    %c0_i32_9 = arith.constant 0 : i32
    %c1_i32 = arith.constant 1 : i32
    %13 = arith.muli %c0_i32_9, %c1_i32 : i32
    %c0_i32_10 = arith.constant 0 : i32
    %14 = arith.addi %c0_i32_10, %13 : i32
    %c256_i32_11 = arith.constant 256 : i32
    %15 = arith.muli %14, %c256_i32_11 : i32
    %16 = tpu.assume_multiple %15, 256 : i32
    %c0_12 = arith.constant 0 : index
    %17 = arith.index_cast %16 : i32 to index
    %18 = vector.load %arg22[%c0_12, %17] : memref<4x256xbf16, #tpu.memory_space<vmem>>, vector<4x256xbf16>
    %19 = arith.index_cast %16 : i32 to index
    %c0_13 = arith.constant 0 : index
    %20 = vector.load %arg23[%19, %c0_13] : memref<256x4xbf16, #tpu.memory_space<vmem>>, vector<256x4xbf16>
    %cst_14 = arith.constant dense<0.000000e+00> : vector<256x256xf32>
    %21 = tpu.matmul %6, %18, %cst_14 {dimension_numbers = #tpu.dot_dimension_numbers<[1], [0], [0], [1], [0, 0, 1, 1], [], []>} : vector<256x4xbf16>, vector<4x256xbf16>, vector<256x256xf32> -> vector<256x256xf32>
    %c0_15 = arith.constant 0 : index
    %c0_16 = arith.constant 0 : index
    %22 = vector.load %arg24[%c0_15, %c0_16] : memref<256x1xf32, #tpu.memory_space<vmem>>, vector<256x1xf32>
    %cst_17 = arith.constant dense<0xFF800000> : vector<256xf32>
    %23 = vector.multi_reduction <maximumf>, %21, %cst_17 [1] : vector<256x256xf32> to vector<256xf32>
    %24 = vector.shape_cast %23 : vector<256xf32> to vector<256x1xf32>
    %25 = arith.maximumf %22, %24 : vector<256x1xf32>
    %26 = arith.subf %22, %25 : vector<256x1xf32>
    %27 = math.exp %26 : vector<256x1xf32>
    %28 = vector.broadcast %25 : vector<256x1xf32> to vector<256x256xf32>
    %29 = arith.subf %21, %28 : vector<256x256xf32>
    %30 = math.exp %29 : vector<256x256xf32>
    %c0_18 = arith.constant 0 : index
    %c0_19 = arith.constant 0 : index
    %31 = vector.load %arg25[%c0_18, %c0_19] : memref<256x1xf32, #tpu.memory_space<vmem>>, vector<256x1xf32>
    %32 = arith.mulf %27, %31 : vector<256x1xf32>
    %cst_20 = arith.constant dense<0.000000e+00> : vector<256xf32>
    %33 = vector.multi_reduction <add>, %30, %cst_20 [1] : vector<256x256xf32> to vector<256xf32>
    %34 = vector.shape_cast %33 : vector<256xf32> to vector<256x1xf32>
    %35 = arith.addf %32, %34 : vector<256x1xf32>
    %c0_21 = arith.constant 0 : index
    %c0_22 = arith.constant 0 : index
    %36 = vector.load %arg25[%c0_21, %c0_22] : memref<256x1xf32, #tpu.memory_space<vmem>>, vector<256x1xf32>
    tpu.vector_store %arg25[%c0_21, %c0_22], %35 {strides = array<i32>} : memref<256x1xf32, #tpu.memory_space<vmem>>, vector<256x1xf32>,
    %c0_23 = arith.constant 0 : index
    %c0_24 = arith.constant 0 : index
    %37 = vector.load %arg26[%c0_23, %c0_24] : memref<256x4xf32, #tpu.memory_space<vmem>>, vector<256x4xf32>
    %38 = vector.broadcast %27 : vector<256x1xf32> to vector<256x4xf32>
    %39 = arith.mulf %38, %37 : vector<256x4xf32>
    %40 = arith.truncf %30 : vector<256x256xf32> to vector<256x256xbf16>
    %cst_25 = arith.constant dense<0.000000e+00> : vector<256x4xf32>
    %41 = tpu.matmul %40, %20, %cst_25 {dimension_numbers = #tpu.dot_dimension_numbers<[1], [0], [0], [1], [0, 0, 1, 1], [], []>} : vector<256x256xbf16>, vector<256x4xbf16>, vector<256x4xf32> -> vector<256x4xf32>
    %42 = arith.addf %39, %41 : vector<256x4xf32>
    %c0_26 = arith.constant 0 : index
    %c0_27 = arith.constant 0 : index
    %43 = vector.load %arg26[%c0_26, %c0_27] : memref<256x4xf32, #tpu.memory_space<vmem>>, vector<256x4xf32>
    tpu.vector_store %arg26[%c0_26, %c0_27], %42 {strides = array<i32>} : memref<256x4xf32, #tpu.memory_space<vmem>>, vector<256x4xf32>,
    %c0_28 = arith.constant 0 : index
    %c0_29 = arith.constant 0 : index
    %44 = vector.load %arg24[%c0_28, %c0_29] : memref<256x1xf32, #tpu.memory_space<vmem>>, vector<256x1xf32>
    tpu.vector_store %arg24[%c0_28, %c0_29], %25 {strides = array<i32>} : memref<256x1xf32, #tpu.memory_space<vmem>>, vector<256x1xf32>,
    %c1_i32_30 = arith.constant 1 : i32
    %c0_31 = arith.constant 0 : index
    %c0_32 = arith.constant 0 : index
    %45 = vector.load %arg26[%c0_31, %c0_32] : memref<256x4xf32, #tpu.memory_space<vmem>>, vector<256x4xf32>
    %c0_33 = arith.constant 0 : index
    %c0_34 = arith.constant 0 : index
    %46 = vector.load %arg25[%c0_33, %c0_34] : memref<256x1xf32, #tpu.memory_space<vmem>>, vector<256x1xf32>
    %47 = tpu.reciprocal %46 {approx = true} : vector<256x1xf32> -> vector<256x1xf32>
    %48 = vector.broadcast %47 : vector<256x1xf32> to vector<256x4xf32>
    %49 = arith.mulf %45, %48 : vector<256x4xf32>
    %50 = arith.truncf %49 : vector<256x4xf32> to vector<256x4xbf16>
    %c0_35 = arith.constant 0 : index
    %c0_36 = arith.constant 0 : index
    %51 = vector.load %arg10[%c0_35, %c0_36] : memref<4x4xbf16, #tpu.memory_space<vmem>>, vector<4x4xbf16>
    %cst_37 = arith.constant dense<0.000000e+00> : vector<256x4xf32>
    %52 = tpu.matmul %50, %51, %cst_37 {dimension_numbers = #tpu.dot_dimension_numbers<[1], [0], [0], [1], [0, 0, 1, 1], [], []>} : vector<256x4xbf16>, vector<4x4xbf16>, vector<256x4xf32> -> vector<256x4xf32>
    %c0_38 = arith.constant 0 : index
    %c0_39 = arith.constant 0 : index
    %53 = vector.load %arg11[%c0_38, %c0_39] : memref<1x4xf32, #tpu.memory_space<vmem>>, vector<1x4xf32>
    %54 = vector.broadcast %53 : vector<1x4xf32> to vector<256x4xf32>
    %55 = arith.addf %52, %54 : vector<256x4xf32>
    %c0_40 = arith.constant 0 : index
    %56 = arith.index_cast %4 : i32 to index
    %c0_41 = arith.constant 0 : index
    %57 = vector.load %arg2[%c0_40, %56, %c0_41] : memref<1x256x4xf32, #tpu.memory_space<vmem>>, vector<1x256x4xf32>
    %58 = vector.shape_cast %57 : vector<1x256x4xf32> to vector<256x4xf32>
    %59 = arith.addf %55, %58 : vector<256x4xf32>
    %c0_42 = arith.constant 0 : index
    %60 = arith.index_cast %4 : i32 to index
    %c0_43 = arith.constant 0 : index
    %61 = vector.load %arg20[%c0_42, %60, %c0_43] : memref<1x256x4xf32, #tpu.memory_space<vmem>>, vector<1x256x4xf32>
    %62 = vector.shape_cast %61 : vector<1x256x4xf32> to vector<256x4xf32>
    %63 = vector.shape_cast %59 : vector<256x4xf32> to vector<1x256x4xf32>
    tpu.vector_store %arg20[%c0_42, %60, %c0_43], %63 {strides = array<i32>} : memref<1x256x4xf32, #tpu.memory_space<vmem>>, vector<1x256x4xf32>,
    %c0_i32_44 = arith.constant 0 : i32
    %64 = arith.cmpi eq, %arg1, %c0_i32_44 : i32
    %65 = arith.extui %64 : i1 to i32
    %c0_i32_45 = arith.constant 0 : i32
    %66 = arith.cmpi ne, %65, %c0_i32_45 : i32
    scf.if %66 {
      %c0_46 = arith.constant 0 : index
      %c0_47 = arith.constant 0 : index
      %c0_48 = arith.constant 0 : index
      %67 = vector.load %arg20[%c0_46, %c0_47, %c0_48] : memref<1x256x4xf32, #tpu.memory_space<vmem>>, vector<1x256x4xf32>
      %68 = vector.shape_cast %67 : vector<1x256x4xf32> to vector<256x4xf32>
      %cst_49 = arith.constant dense<0.000000e+00> : vector<4xf32>
      %69 = vector.multi_reduction <add>, %68, %cst_49 [0] : vector<256x4xf32> to vector<4xf32>
      %70 = vector.shape_cast %69 : vector<4xf32> to vector<1x4xf32>
      %71 = arith.mulf %68, %68 : vector<256x4xf32>
      %cst_50 = arith.constant dense<0.000000e+00> : vector<4xf32>
      %72 = vector.multi_reduction <add>, %71, %cst_50 [0] : vector<256x4xf32> to vector<4xf32>
      %73 = vector.shape_cast %72 : vector<4xf32> to vector<1x4xf32>
      %cst_51 = arith.constant 3.906250e-03 : f32
      %74 = vector.broadcast %cst_51 : f32 to vector<1x4xf32>
      %75 = arith.mulf %70, %74 : vector<1x4xf32>
      %76 = arith.mulf %70, %75 : vector<1x4xf32>
      %77 = arith.subf %73, %76 : vector<1x4xf32>
      %cst_52 = arith.constant 0.000000e+00 : f32
      %78 = vector.broadcast %cst_52 : f32 to vector<1x4xf32>
      %79 = arith.maximumf %77, %78 : vector<1x4xf32>
      %cst_53 = arith.constant 0.00392156886 : f32
      %80 = vector.broadcast %cst_53 : f32 to vector<1x4xf32>
      %81 = arith.mulf %79, %80 : vector<1x4xf32>
      %cst_54 = arith.constant 9.99999974E-6 : f32
      %82 = vector.broadcast %cst_54 : f32 to vector<1x4xf32>
      %83 = arith.addf %81, %82 : vector<1x4xf32>
      %84 = math.rsqrt %83 : vector<1x4xf32>
      %85 = vector.broadcast %75 : vector<1x4xf32> to vector<256x4xf32>
      %86 = arith.subf %68, %85 : vector<256x4xf32>
      %87 = vector.broadcast %84 : vector<1x4xf32> to vector<256x4xf32>
      %88 = arith.mulf %86, %87 : vector<256x4xf32>
      %89 = arith.truncf %88 : vector<256x4xf32> to vector<256x4xbf16>
      %c0_55 = arith.constant 0 : index
      %c0_56 = arith.constant 0 : index
      %90 = vector.load %arg12[%c0_55, %c0_56] : memref<4x4xbf16, #tpu.memory_space<vmem>>, vector<4x4xbf16>
      %cst_57 = arith.constant dense<0.000000e+00> : vector<256x4xf32>
      %91 = tpu.matmul %89, %90, %cst_57 {dimension_numbers = #tpu.dot_dimension_numbers<[1], [0], [0], [1], [0, 0, 1, 1], [], []>} : vector<256x4xbf16>, vector<4x4xbf16>, vector<256x4xf32> -> vector<256x4xf32>
      %c0_58 = arith.constant 0 : index
      %c0_59 = arith.constant 0 : index
      %92 = vector.load %arg13[%c0_58, %c0_59] : memref<1x4xf32, #tpu.memory_space<vmem>>, vector<1x4xf32>
      %93 = vector.broadcast %92 : vector<1x4xf32> to vector<256x4xf32>
      %94 = arith.addf %91, %93 : vector<256x4xf32>
      %c0_60 = arith.constant 0 : index
      %c0_61 = arith.constant 0 : index
      %c0_62 = arith.constant 0 : index
      %95 = vector.load %arg3[%c0_60, %c0_61, %c0_62] : memref<1x256x4xf32, #tpu.memory_space<vmem>>, vector<1x256x4xf32>
      %96 = vector.shape_cast %95 : vector<1x256x4xf32> to vector<256x4xf32>
      %cst_63 = arith.constant dense<0.000000e+00> : vector<4xf32>
      %97 = vector.multi_reduction <add>, %96, %cst_63 [0] : vector<256x4xf32> to vector<4xf32>
      %98 = vector.shape_cast %97 : vector<4xf32> to vector<1x4xf32>
      %99 = arith.mulf %96, %96 : vector<256x4xf32>
      %cst_64 = arith.constant dense<0.000000e+00> : vector<4xf32>
      %100 = vector.multi_reduction <add>, %99, %cst_64 [0] : vector<256x4xf32> to vector<4xf32>
      %101 = vector.shape_cast %100 : vector<4xf32> to vector<1x4xf32>
      %cst_65 = arith.constant 3.906250e-03 : f32
      %102 = vector.broadcast %cst_65 : f32 to vector<1x4xf32>
      %103 = arith.mulf %98, %102 : vector<1x4xf32>
      %104 = arith.mulf %98, %103 : vector<1x4xf32>
      %105 = arith.subf %101, %104 : vector<1x4xf32>
      %cst_66 = arith.constant 0.000000e+00 : f32
      %106 = vector.broadcast %cst_66 : f32 to vector<1x4xf32>
      %107 = arith.maximumf %105, %106 : vector<1x4xf32>
      %cst_67 = arith.constant 0.00392156886 : f32
      %108 = vector.broadcast %cst_67 : f32 to vector<1x4xf32>
      %109 = arith.mulf %107, %108 : vector<1x4xf32>
      %cst_68 = arith.constant 9.99999974E-6 : f32
      %110 = vector.broadcast %cst_68 : f32 to vector<1x4xf32>
      %111 = arith.addf %109, %110 : vector<1x4xf32>
      %112 = math.rsqrt %111 : vector<1x4xf32>
      %113 = vector.broadcast %103 : vector<1x4xf32> to vector<256x4xf32>
      %114 = arith.subf %96, %113 : vector<256x4xf32>
      %115 = vector.broadcast %112 : vector<1x4xf32> to vector<256x4xf32>
      %116 = arith.mulf %114, %115 : vector<256x4xf32>
      %117 = arith.truncf %116 : vector<256x4xf32> to vector<256x4xbf16>
      %c0_69 = arith.constant 0 : index
      %c0_70 = arith.constant 0 : index
      %118 = vector.load %arg14[%c0_69, %c0_70] : memref<4x4xbf16, #tpu.memory_space<vmem>>, vector<4x4xbf16>
      %cst_71 = arith.constant dense<0.000000e+00> : vector<256x4xf32>
      %119 = tpu.matmul %117, %118, %cst_71 {dimension_numbers = #tpu.dot_dimension_numbers<[1], [0], [0], [1], [0, 0, 1, 1], [], []>} : vector<256x4xbf16>, vector<4x4xbf16>, vector<256x4xf32> -> vector<256x4xf32>
      %c0_72 = arith.constant 0 : index
      %c0_73 = arith.constant 0 : index
      %120 = vector.load %arg15[%c0_72, %c0_73] : memref<1x4xf32, #tpu.memory_space<vmem>>, vector<1x4xf32>
      %121 = vector.broadcast %120 : vector<1x4xf32> to vector<256x4xf32>
      %122 = arith.addf %119, %121 : vector<256x4xf32>
      %cst_74 = arith.constant dense<0.000000e+00> : vector<4xf32>
      %123 = vector.multi_reduction <add>, %122, %cst_74 [0] : vector<256x4xf32> to vector<4xf32>
      %124 = vector.shape_cast %123 : vector<4xf32> to vector<1x4xf32>
      %125 = arith.mulf %122, %122 : vector<256x4xf32>
      %cst_75 = arith.constant dense<0.000000e+00> : vector<4xf32>
      %126 = vector.multi_reduction <add>, %125, %cst_75 [0] : vector<256x4xf32> to vector<4xf32>
      %127 = vector.shape_cast %126 : vector<4xf32> to vector<1x4xf32>
      %128 = arith.divf %127, %124 : vector<1x4xf32>
      %c0_76 = arith.constant 0 : index
      %c0_77 = arith.constant 0 : index
      %129 = vector.load %arg16[%c0_76, %c0_77] : memref<4x4xf32, #tpu.memory_space<vmem>>, vector<4x4xf32>
      %cst_78 = arith.constant dense<0.000000e+00> : vector<1x4xf32>
      %130 = tpu.matmul %128, %129, %cst_78 {dimension_numbers = #tpu.dot_dimension_numbers<[1], [0], [0], [1], [0, 0, 1, 1], [], []>} : vector<1x4xf32>, vector<4x4xf32>, vector<1x4xf32> -> vector<1x4xf32>
      %c0_79 = arith.constant 0 : index
      %c0_80 = arith.constant 0 : index
      %131 = vector.load %arg17[%c0_79, %c0_80] : memref<1x4xf32, #tpu.memory_space<vmem>>, vector<1x4xf32>
      %132 = arith.addf %130, %131 : vector<1x4xf32>
      %133 = vector.broadcast %132 : vector<1x4xf32> to vector<256x4xf32>
      %134 = arith.mulf %94, %133 : vector<256x4xf32>
      %135 = arith.truncf %134 : vector<256x4xf32> to vector<256x4xbf16>
      %c0_81 = arith.constant 0 : index
      %c0_82 = arith.constant 0 : index
      %136 = vector.load %arg18[%c0_81, %c0_82] : memref<4x4xbf16, #tpu.memory_space<vmem>>, vector<4x4xbf16>
      %cst_83 = arith.constant dense<0.000000e+00> : vector<256x4xf32>
      %137 = tpu.matmul %135, %136, %cst_83 {dimension_numbers = #tpu.dot_dimension_numbers<[1], [0], [0], [1], [0, 0, 1, 1], [], []>} : vector<256x4xbf16>, vector<4x4xbf16>, vector<256x4xf32> -> vector<256x4xf32>
      %c0_84 = arith.constant 0 : index
      %c0_85 = arith.constant 0 : index
      %138 = vector.load %arg19[%c0_84, %c0_85] : memref<1x4xf32, #tpu.memory_space<vmem>>, vector<1x4xf32>
      %139 = vector.broadcast %138 : vector<1x4xf32> to vector<256x4xf32>
      %140 = arith.addf %137, %139 : vector<256x4xf32>
      %141 = arith.addf %68, %140 : vector<256x4xf32>
      %c0_86 = arith.constant 0 : index
      %c0_87 = arith.constant 0 : index
      %c0_88 = arith.constant 0 : index
      %142 = vector.load %arg20[%c0_86, %c0_87, %c0_88] : memref<1x256x4xf32, #tpu.memory_space<vmem>>, vector<1x256x4xf32>
      %143 = vector.shape_cast %142 : vector<1x256x4xf32> to vector<256x4xf32>
      %144 = vector.shape_cast %141 : vector<256x4xf32> to vector<1x256x4xf32>
      tpu.vector_store %arg20[%c0_86, %c0_87, %c0_88], %144 {strides = array<i32>} : memref<1x256x4xf32, #tpu.memory_space<vmem>>, vector<1x256x4xf32>,
    } else {
    }
    return
  }
  func.func @transform_0(%arg0: i32, %arg1: i32) -> (i32, i32, i32) {
    %c0_i32 = arith.constant 0 : i32
    %c0_i32_0 = arith.constant 0 : i32
    %c0_i32_1 = arith.constant 0 : i32
    return %arg0, %c0_i32, %c0_i32_0 : i32, i32, i32
  }
  func.func @transform_1(%arg0: i32, %arg1: i32) -> (i32, i32, i32) {
    %c0_i32 = arith.constant 0 : i32
    %c0_i32_0 = arith.constant 0 : i32
    %c0_i32_1 = arith.constant 0 : i32
    return %arg0, %c0_i32, %c0_i32_0 : i32, i32, i32
  }
  func.func @transform_2(%arg0: i32, %arg1: i32) -> (i32, i32) {
    %c0_i32 = arith.constant 0 : i32
    %c0_i32_0 = arith.constant 0 : i32
    %c0_i32_1 = arith.constant 0 : i32
    return %c0_i32, %c0_i32_0 : i32, i32
  }
  func.func @transform_3(%arg0: i32, %arg1: i32) -> (i32, i32) {
    %c0_i32 = arith.constant 0 : i32
    %c0_i32_0 = arith.constant 0 : i32
    %c0_i32_1 = arith.constant 0 : i32
    return %c0_i32, %c0_i32_0 : i32, i32
  }
  func.func @transform_4(%arg0: i32, %arg1: i32) -> (i32, i32) {
    %c0_i32 = arith.constant 0 : i32
    %c0_i32_0 = arith.constant 0 : i32
    %c0_i32_1 = arith.constant 0 : i32
    return %c0_i32, %c0_i32_0 : i32, i32
  }
  func.func @transform_5(%arg0: i32, %arg1: i32) -> (i32, i32) {
    %c0_i32 = arith.constant 0 : i32
    %c0_i32_0 = arith.constant 0 : i32
    %c0_i32_1 = arith.constant 0 : i32
    return %c0_i32, %c0_i32_0 : i32, i32
  }
  func.func @transform_6(%arg0: i32, %arg1: i32) -> (i32, i32) {
    %c0_i32 = arith.constant 0 : i32
    %c0_i32_0 = arith.constant 0 : i32
    %c0_i32_1 = arith.constant 0 : i32
    return %c0_i32, %c0_i32_0 : i32, i32
  }
  func.func @transform_7(%arg0: i32, %arg1: i32) -> (i32, i32) {
    %c0_i32 = arith.constant 0 : i32
    %c0_i32_0 = arith.constant 0 : i32
    %c0_i32_1 = arith.constant 0 : i32
    return %c0_i32, %c0_i32_0 : i32, i32
  }
  func.func @transform_8(%arg0: i32, %arg1: i32) -> (i32, i32) {
    %c0_i32 = arith.constant 0 : i32
    %c0_i32_0 = arith.constant 0 : i32
    %c0_i32_1 = arith.constant 0 : i32
    return %c0_i32, %c0_i32_0 : i32, i32
  }
  func.func @transform_9(%arg0: i32, %arg1: i32) -> (i32, i32) {
    %c0_i32 = arith.constant 0 : i32
    %c0_i32_0 = arith.constant 0 : i32
    %c0_i32_1 = arith.constant 0 : i32
    return %c0_i32, %c0_i32_0 : i32, i32
  }
  func.func @transform_10(%arg0: i32, %arg1: i32) -> (i32, i32) {
    %c0_i32 = arith.constant 0 : i32
    %c0_i32_0 = arith.constant 0 : i32
    %c0_i32_1 = arith.constant 0 : i32
    return %c0_i32, %c0_i32_0 : i32, i32
  }
  func.func @transform_11(%arg0: i32, %arg1: i32) -> (i32, i32) {
    %c0_i32 = arith.constant 0 : i32
    %c0_i32_0 = arith.constant 0 : i32
    %c0_i32_1 = arith.constant 0 : i32
    return %c0_i32, %c0_i32_0 : i32, i32
  }
  func.func @transform_12(%arg0: i32, %arg1: i32) -> (i32, i32) {
    %c0_i32 = arith.constant 0 : i32
    %c0_i32_0 = arith.constant 0 : i32
    %c0_i32_1 = arith.constant 0 : i32
    return %c0_i32, %c0_i32_0 : i32, i32
  }
  func.func @transform_13(%arg0: i32, %arg1: i32) -> (i32, i32) {
    %c0_i32 = arith.constant 0 : i32
    %c0_i32_0 = arith.constant 0 : i32
    %c0_i32_1 = arith.constant 0 : i32
    return %c0_i32, %c0_i32_0 : i32, i32
  }
  func.func @transform_14(%arg0: i32, %arg1: i32) -> (i32, i32) {
    %c0_i32 = arith.constant 0 : i32
    %c0_i32_0 = arith.constant 0 : i32
    %c0_i32_1 = arith.constant 0 : i32
    return %c0_i32, %c0_i32_0 : i32, i32
  }
  func.func @transform_15(%arg0: i32, %arg1: i32) -> (i32, i32) {
    %c0_i32 = arith.constant 0 : i32
    %c0_i32_0 = arith.constant 0 : i32
    %c0_i32_1 = arith.constant 0 : i32
    return %c0_i32, %c0_i32_0 : i32, i32
  }
  func.func @transform_16(%arg0: i32, %arg1: i32) -> (i32, i32) {
    %c0_i32 = arith.constant 0 : i32
    %c0_i32_0 = arith.constant 0 : i32
    %c0_i32_1 = arith.constant 0 : i32
    return %c0_i32, %c0_i32_0 : i32, i32
  }
  func.func @transform_17(%arg0: i32, %arg1: i32) -> (i32, i32) {
    %c0_i32 = arith.constant 0 : i32
    %c0_i32_0 = arith.constant 0 : i32
    %c0_i32_1 = arith.constant 0 : i32
    return %c0_i32, %c0_i32_0 : i32, i32
  }
  func.func @transform_18(%arg0: i32, %arg1: i32) -> (i32, i32, i32) {
    %c0_i32 = arith.constant 0 : i32
    %c0_i32_0 = arith.constant 0 : i32
    %c0_i32_1 = arith.constant 0 : i32
    return %arg0, %c0_i32, %c0_i32_0 : i32, i32, i32
  }
}

</mosaic_0001>

<bundles_post_ra>
// kernel: mcc_module_forward.1
= control target key start
LH: loop header
LB: loop body
LE: loop exit
PB: predicated region body
PF: predicated region fallthrough
CT: control target
= control target key end

     0   :  { %s6106_s27 = smov 0   ;;  %s6108_s28 = smov 0   ;;  %s9542_s0 = inlined_call_operand.vmem [shape: f32[2,256,4], index: 0, kind: input, shape index: {}]   ;;  %s9543_s1 = inlined_call_operand.vmem [shape: f32[2,256,4], index: 1, kind: input, shape index: {}]   ;;  %s9544_s2 = inlined_call_operand.vmem [shape: bf16[4,4], index: 2, kind: input, shape index: {}]   ;;  %s9545_s3 = inlined_call_operand.vmem [shape: f32[1,4], index: 3, kind: input, shape index: {}]   ;;  %s9546_s4 = inlined_call_operand.vmem [shape: bf16[4,4], index: 4, kind: input, shape index: {}]   ;;  %s9547_s5 = inlined_call_operand.vmem [shape: f32[4,1], index: 5, kind: input, shape index: {}]   ;;  %s9548_s6 = inlined_call_operand.vmem [shape: bf16[4,4], index: 6, kind: input, shape index: {}]   ;;  %s9549_s7 = inlined_call_operand.vmem [shape: f32[1,4], index: 7, kind: input, shape index: {}]   ;;  %s9550_s8 = inlined_call_operand.vmem [shape: bf16[4,4], index: 8, kind: input, shape index: {}]   ;;  %s9551_s9 = inlined_call_operand.vmem [shape: f32[1,4], index: 9, kind: input, shape index: {}]   ;;  %s9552_s10 = inlined_call_operand.vmem [shape: bf16[4,4], index: 10, kind: input, shape index: {}]   ;;  %s9553_s11 = inlined_call_operand.vmem [shape: f32[1,4], index: 11, kind: input, shape index: {}]   ;;  %s9554_s12 = inlined_call_operand.vmem [shape: bf16[4,4], index: 12, kind: input, shape index: {}]   ;;  %s9555_s13 = inlined_call_operand.vmem [shape: f32[1,4], index: 13, kind: input, shape index: {}]   ;;  %s9556_s14 = inlined_call_operand.vmem [shape: f32[4,4], index: 14, kind: input, shape index: {}]   ;;  %s9557_s15 = inlined_call_operand.vmem [shape: f32[1,4], index: 15, kind: input, shape index: {}]   ;;  %s9558_s16 = inlined_call_operand.vmem [shape: bf16[4,4], index: 16, kind: input, shape index: {}]   ;;  %s9559_s17 = inlined_call_operand.vmem [shape: f32[1,4], index: 17, kind: input, shape index: {}]   ;;  %s9560_s18 = inlined_call_operand.vmem [shape: f32[2,256,4], index: 18, kind: output, shape index: {}]  }
   0x1   :  { %9619 = sst [smem:[#allocation63_spill]] %s9542_s0  ;;  %s6110_s29 = smov 0  }
   0x2   :  { %9620 = sst [smem:[#allocation64_spill]] %s9543_s1 }
   0x3   :  { %9621 = sst [smem:[#allocation65_spill]] %s9544_s2 }
   0x4 LB: > { %s40_s30 = sadd.s32 1, %s6002_s28  ;;  %p5326_p0 = scmp.ge.s32.totalorder %s6006_s29, 1  ;;  %s6006_s29 = sphi %s6110_s29, %s28_s29   ;;  %s6002_s28 = sphi %s6108_s28, %s9756_s28   ;;  %s5998_s27 = sphi %s6106_s27, %s9755_s27  }
   0x5   : > { %p42_p1 = scmp.ge.s32.totalorder %s40_s30, 2  ;;  %p534_p2 = scmp.lt.s32.totalorder %s6006_s29, 3 }
   0x7   : > { %s9758_s30 = smov (%p42_p1, %s40_s30), 0  ;;  %p535_p3 = pnand %p5326_p0, %p534_p2 }
   0x9   : > { %538 = sbr.rel (%p535_p3) target bundleno = 2827 (0xb0b), region = 92 }
   0xe   : > { %s9622_s1 = sld [smem:[#allocation65_spill]]  ;;  %vm965_vm0 = vcmask 1041408   ;;  %p593_p4 = scmp.lt.s32.totalorder %s5998_s27, 1  ;;  %vm645_vm1 = vcmask 31744   ;;  %vm1090_vm5 = vcmask 27648   ;;  %vm1429_vm6 = vcmask 7168  }
   0xf   : > { %s9623_s2 = sld [smem:[#allocation63_spill]] }
  0x10   : > { %s9760_s27 = smov (!%p593_p4, %s5998_s27), 1 }
  0x11   : > { %s6128_s20 = sshll.u32 %s9760_s27, 8 }
  0x14   : > { %v912_v0 = vld [vmem:[%s9622_s1] sm:$0x3]  ;;  %s7953_s1 = scalar_lea.vmem %s9560_s18, %s6128_s20 }
  0x15   : > { %v967_v1 = vsel %vm965_vm0, %v912_v0, 0  ;;  %s6134_s23 = scalar_lea.vmem %s9623_s2, %s6128_s20  ;;  %s9737_s2 = sld [smem:[#allocation64_spill]] }
  0x16   : > { %5630 = vmatpush.bf16.msra.mxu2 %v967_v1  ;;  %976 = vmatpush.bf16.msra.mxu0 %v967_v1  ;;  %v6137_v2 = vld [vmem:[%s6134_s23] sm:$0xff]  ;;  %v6140_v3 = vld [vmem:[%s6134_s23 + $0x8] sm:$0xff]  ;;  %v6143_v4 = vld [vmem:[%s6134_s23 + $0x10] sm:$0xff] }
  0x17   : > { %v6146_v5 = vld [vmem:[%s6134_s23 + $0x18] sm:$0xff]  ;;  %v646_v6 = vsel %vm645_vm1, %v6137_v2, 0.0  ;;  %v647_v7 = vsel %vm645_vm1, %v6140_v3, 0.0  ;;  %v649_v8 = vsel %vm645_vm1, %v6143_v4, 0.0  ;;  %v6155_v9 = vld [vmem:[%s6134_s23 + $0x20] sm:$0xff]  ;;  %v6160_v12 = vld [vmem:[%s6134_s23 + $0x28] sm:$0xff]  ;;  %v715_v23 = vmul.f32 %v6137_v2, %v6137_v2 }
  0x18   : > { %v648_v10 = vadd.f32 %v647_v7, %v646_v6  ;;  %v651_v11 = vsel %vm645_vm1, %v6146_v5, 0.0  ;;  %v653_v14 = vsel %vm645_vm1, %v6155_v9, 0.0  ;;  %v6165_v15 = vld [vmem:[%s6134_s23 + $0x30] sm:$0xff]  ;;  %v655_v17 = vsel %vm645_vm1, %v6160_v12, 0.0  ;;  %v6170_v18 = vld [vmem:[%s6134_s23 + $0x38] sm:$0xff]  ;;  %v6175_v21 = vld [vmem:[%s6134_s23 + $0x40] sm:$0xff] }
  0x19   : > { %v657_v20 = vsel %vm645_vm1, %v6165_v15, 0.0  ;;  %v659_v24 = vsel %vm645_vm1, %v6170_v18, 0.0  ;;  %v716_v25 = vmul.f32 %v6140_v3, %v6140_v3  ;;  %v717_v26 = vmul.f32 %v6143_v4, %v6143_v4  ;;  %v6186_v27 = vld [vmem:[%s6134_s23 + $0x48] sm:$0xff]  ;;  %v6193_v31 = vld [vmem:[%s6134_s23 + $0x50] sm:$0xff]  ;;  %v6203_v38 = vld [vmem:[%s6134_s23 + $0x58] sm:$0xff] }
  0x1a   : > { %v650_v13 = vadd.f32 %v649_v8, %v648_v10  ;;  %v661_v29 = vsel %vm645_vm1, %v6175_v21, 0.0  ;;  %v718_v30 = vmul.f32 %v6146_v5, %v6146_v5  ;;  %v747_v33 = vsel %vm645_vm1, %v715_v23, 0.0  ;;  %v6211_v44 = vld [vmem:[%s6134_s23 + $0x60] sm:$0xff]  ;;  %v6219_v50 = vld [vmem:[%s6134_s23 + $0x68] sm:$0xff]  ;;  %v6227_v56 = vld [vmem:[%s6134_s23 + $0x70] sm:$0xff] }
  0x1b   : > { %v663_v34 = vsel %vm645_vm1, %v6186_v27, 0.0  ;;  %v719_v35 = vmul.f32 %v6155_v9, %v6155_v9  ;;  %v748_v36 = vsel %vm645_vm1, %v716_v25, 0.0  ;;  %v750_v37 = vsel %vm645_vm1, %v717_v26, 0.0  ;;  %v6235_v62 = vld [vmem:[%s6134_s23 + $0x78] sm:$0xff]  ;;  %v6243_v8 = vld [vmem:[%s6134_s23 + $0x80] sm:$0xff]  ;;  %v6259_v25 = vld [vmem:[%s6134_s23 + $0x90] sm:$0xff]  ;;  %s7962_s24 = scalar_lea.vmem %s9737_s2, %s6128_s20 }
  0x1c   : > { %v652_v16 = vadd.f32 %v651_v11, %v650_v13  ;;  %v749_v40 = vadd.f32 %v748_v36, %v747_v33  ;;  %v665_v41 = vsel %vm645_vm1, %v6193_v31, 0.0  ;;  %v720_v42 = vmul.f32 %v6160_v12, %v6160_v12  ;;  %v6267_v33 = vld [vmem:[%s6134_s23 + $0x98] sm:$0xff] }
  0x1d   : > { %v752_v43 = vsel %vm645_vm1, %v718_v30, 0.0  ;;  %v667_v47 = vsel %vm645_vm1, %v6203_v38, 0.0  ;;  %v721_v48 = vmul.f32 %v6165_v15, %v6165_v15  ;;  %v754_v49 = vsel %vm645_vm1, %v719_v35, 0.0 }
  0x1e   : > { %v654_v19 = vadd.f32 %v653_v14, %v652_v16  ;;  %v751_v46 = vadd.f32 %v750_v37, %v749_v40  ;;  %v669_v53 = vsel %vm645_vm1, %v6211_v44, 0.0  ;;  %v722_v54 = vmul.f32 %v6170_v18, %v6170_v18  ;;  %v6275_v40 = vld [vmem:[%s6134_s23 + $0xa0] sm:$0xff] }
  0x1f   : > { %v756_v55 = vsel %vm645_vm1, %v720_v42, 0.0  ;;  %v671_v59 = vsel %vm645_vm1, %v6219_v50, 0.0  ;;  %v723_v60 = vmul.f32 %v6175_v21, %v6175_v21  ;;  %v758_v61 = vsel %vm645_vm1, %v721_v48, 0.0 }
  0x20   : > { %v656_v22 = vadd.f32 %v655_v17, %v654_v19  ;;  %v753_v52 = vadd.f32 %v752_v43, %v751_v46  ;;  %v673_v1 = vsel %vm645_vm1, %v6227_v56, 0.0  ;;  %v724_v6 = vmul.f32 %v6186_v27, %v6186_v27  ;;  %v6251_v17 = vld [vmem:[%s6134_s23 + $0x88] sm:$0xff] }
  0x21   : > { %v760_v7 = vsel %vm645_vm1, %v722_v54, 0.0  ;;  %v675_v13 = vsel %vm645_vm1, %v6235_v62, 0.0  ;;  %v725_v14 = vmul.f32 %v6193_v31, %v6193_v31  ;;  %v762_v16 = vsel %vm645_vm1, %v723_v60, 0.0  ;;  %v6291_v54 = vld [vmem:[%s6134_s23 + $0xb0] sm:$0xff] }
  0x22   : > { %v658_v28 = vadd.f32 %v657_v20, %v656_v22  ;;  %v755_v58 = vadd.f32 %v754_v49, %v753_v52  ;;  %v677_v22 = vsel %vm645_vm1, %v6243_v8, 0.0  ;;  %v726_v23 = vmul.f32 %v6203_v38, %v6203_v38 }
  0x23   : > { %v727_v30 = vmul.f32 %v6211_v44, %v6211_v44  ;;  %v681_v36 = vsel %vm645_vm1, %v6259_v25, 0.0  ;;  %v728_v37 = vmul.f32 %v6219_v50, %v6219_v50  ;;  %v683_v43 = vsel %vm645_vm1, %v6267_v33, 0.0 }
  0x24   : > { %v660_v32 = vadd.f32 %v659_v24, %v658_v28  ;;  %v757_v0 = vadd.f32 %v756_v55, %v755_v58  ;;  %v764_v24 = vsel %vm645_vm1, %v724_v6, 0.0  ;;  %v730_v52 = vmul.f32 %v6235_v62, %v6235_v62 }
  0x25   : > { %v770_v46 = vsel %vm645_vm1, %v727_v30, 0.0  ;;  %v732_v6 = vmul.f32 %v6251_v17, %v6251_v17 }
  0x26   : > { %v662_v39 = vadd.f32 %v661_v29, %v660_v32  ;;  %v759_v11 = vadd.f32 %v758_v61, %v757_v0  ;;  %v679_v29 = vsel %vm645_vm1, %v6251_v17, 0.0  ;;  %v766_v32 = vsel %vm645_vm1, %v725_v14, 0.0  ;;  %v6299_v61 = vld [vmem:[%s6134_s23 + $0xb8] sm:$0xff] }
  0x27   : > { %v691_v14 = vsel %vm645_vm1, %v6299_v61, 0.0 }
  0x28   : > { %v664_v45 = vadd.f32 %v663_v34, %v662_v39  ;;  %v761_v20 = vadd.f32 %v760_v7, %v759_v11  ;;  %v768_v39 = vsel %vm645_vm1, %v726_v23, 0.0  ;;  %v776_v7 = vsel %vm645_vm1, %v730_v52, 0.0 }
  0x29   : > { %v737_v52 = vmul.f32 %v6291_v54, %v6291_v54 }
  0x2a   : > { %v666_v51 = vadd.f32 %v665_v41, %v664_v45  ;;  %v763_v28 = vadd.f32 %v762_v16, %v761_v20  ;;  %v729_v45 = vmul.f32 %v6227_v56, %v6227_v56  ;;  %v733_v16 = vmul.f32 %v6259_v25, %v6259_v25  ;;  %v6315_v20 = vld [vmem:[%s6134_s23 + $0xc8] sm:$0xff] }
  0x2c   : > { %v668_v57 = vadd.f32 %v667_v47, %v666_v51  ;;  %v765_v35 = vadd.f32 %v764_v24, %v763_v28  ;;  %v6283_v47 = vld [vmem:[%s6134_s23 + $0xa8] sm:$0xff]  ;;  %v685_v51 = vsel %vm645_vm1, %v6275_v40, 0.0  ;;  %v774_v60 = vsel %vm645_vm1, %v729_v45, 0.0 }
  0x2d   : > { %v687_v58 = vsel %vm645_vm1, %v6283_v47, 0.0  ;;  %v780_v28 = vsel %vm645_vm1, %v732_v6, 0.0 }
  0x2e   : > { %v670_v63 = vadd.f32 %v669_v53, %v668_v57  ;;  %v767_v42 = vadd.f32 %v766_v32, %v765_v35  ;;  %v772_v53 = vsel %vm645_vm1, %v728_v37, 0.0  ;;  %v735_v35 = vmul.f32 %v6275_v40, %v6275_v40  ;;  %v6331_v37 = vld [vmem:[%s6134_s23 + $0xd8] sm:$0xff] }
  0x30   : > { %v672_v10 = vadd.f32 %v671_v59, %v670_v63  ;;  %v769_v49 = vadd.f32 %v768_v39, %v767_v42  ;;  %v731_v59 = vmul.f32 %v6243_v8, %v6243_v8 }
  0x32   : > { %v674_v19 = vadd.f32 %v673_v1, %v672_v10  ;;  %v771_v57 = vadd.f32 %v770_v46, %v769_v49  ;;  %v689_v1 = vsel %vm645_vm1, %v6291_v54, 0.0  ;;  %v6307_v10 = vld [vmem:[%s6134_s23 + $0xc0] sm:$0xff] }
  0x33   : > { %v693_v24 = vsel %vm645_vm1, %v6307_v10, 0.0  ;;  %v6339_v46 = vld [vmem:[%s6134_s23 + $0xe0] sm:$0xff] }
  0x34   : > { %v676_v26 = vadd.f32 %v675_v13, %v674_v19  ;;  %v773_v0 = vadd.f32 %v772_v53, %v771_v57  ;;  %v778_v19 = vsel %vm645_vm1, %v731_v59, 0.0  ;;  %v786_v53 = vsel %vm645_vm1, %v735_v35, 0.0 }
  0x35   : > { %v701_v59 = vsel %vm645_vm1, %v6339_v46, 0.0 }
  0x36   : > { %v678_v34 = vadd.f32 %v677_v22, %v676_v26  ;;  %v775_v13 = vadd.f32 %v774_v60, %v773_v0  ;;  %v734_v26 = vmul.f32 %v6267_v33, %v6267_v33  ;;  %v738_v60 = vmul.f32 %v6299_v61, %v6299_v61  ;;  %v6355_v0 = vld [vmem:[%s6134_s23 + $0xf0] sm:$0xff] }
  0x38   : > { %v680_v41 = vadd.f32 %v679_v29, %v678_v34  ;;  %v777_v23 = vadd.f32 %v776_v7, %v775_v13  ;;  %v6323_v29 = vld [vmem:[%s6134_s23 + $0xd0] sm:$0xff]  ;;  %v695_v34 = vsel %vm645_vm1, %v6315_v20, 0.0  ;;  %v784_v45 = vsel %vm645_vm1, %v734_v26, 0.0 }
  0x39   : > { %v697_v42 = vsel %vm645_vm1, %v6323_v29, 0.0  ;;  %v790_v13 = vsel %vm645_vm1, %v737_v52, 0.0 }
  0x3a   : > { %v682_v48 = vadd.f32 %v681_v36, %v680_v41  ;;  %v779_v32 = vadd.f32 %v778_v19, %v777_v23  ;;  %v782_v36 = vsel %vm645_vm1, %v733_v16, 0.0  ;;  %v740_v23 = vmul.f32 %v6315_v20, %v6315_v20 }
  0x3c   : > { %v684_v55 = vadd.f32 %v683_v43, %v682_v48  ;;  %v781_v41 = vadd.f32 %v780_v28, %v779_v32  ;;  %v736_v43 = vmul.f32 %v6283_v47, %v6283_v47  ;;  %v741_v32 = vmul.f32 %v6323_v29, %v6323_v29 }
  0x3e   : > { %v686_v63 = vadd.f32 %v685_v51, %v684_v55  ;;  %v783_v49 = vadd.f32 %v782_v36, %v781_v41  ;;  %v699_v51 = vsel %vm645_vm1, %v6331_v37, 0.0  ;;  %v6347_v55 = vld [vmem:[%s6134_s23 + $0xe8] sm:$0xff]  ;;  %v796_v41 = vsel %vm645_vm1, %v740_v23, 0.0 }
  0x3f   : > { %v703_v7 = vsel %vm645_vm1, %v6347_v55, 0.0  ;;  %v744_v52 = vmul.f32 %v6347_v55, %v6347_v55 }
  0x40   : > { %v688_v11 = vadd.f32 %v687_v58, %v686_v63  ;;  %v785_v58 = vadd.f32 %v784_v45, %v783_v49  ;;  %v788_v63 = vsel %vm645_vm1, %v736_v43, 0.0  ;;  %v743_v45 = vmul.f32 %v6339_v46, %v6339_v46 }
  0x42   : > { %v690_v22 = vadd.f32 %v689_v1, %v688_v11  ;;  %v787_v6 = vadd.f32 %v786_v53, %v785_v58  ;;  %v739_v11 = vmul.f32 %v6307_v10, %v6307_v10 }
  0x44   : > { %v692_v30 = vadd.f32 %v691_v14, %v690_v22  ;;  %v6363_v14 = vld [vmem:[%s6134_s23 + $0xf8] sm:$0xff]  ;;  %v789_v19 = vadd.f32 %v788_v63, %v787_v6  ;;  %v705_v22 = vsel %vm645_vm1, %v6355_v0, 0.0 }
  0x45   : > { %v746_v6 = vmul.f32 %v6363_v14, %v6363_v14 }
  0x46   : > { %v694_v39 = vadd.f32 %v693_v24, %v692_v30  ;;  %v792_v24 = vsel %vm645_vm1, %v738_v60, 0.0  ;;  %v791_v28 = vadd.f32 %v790_v13, %v789_v19  ;;  %v707_v30 = vsel %vm645_vm1, %v6363_v14, 0.0 }
  0x47   : > { %v802_v60 = vsel %vm645_vm1, %v743_v45, 0.0 }
  0x48   : > { %v696_v48 = vadd.f32 %v695_v34, %v694_v39  ;;  %v794_v34 = vsel %vm645_vm1, %v739_v11, 0.0  ;;  %v793_v36 = vadd.f32 %v792_v24, %v791_v28  ;;  %v742_v39 = vmul.f32 %v6331_v37, %v6331_v37 }
  0x4a   : > { %v698_v57 = vadd.f32 %v697_v42, %v696_v48  ;;  %v795_v43 = vadd.f32 %v794_v34, %v793_v36  ;;  %v798_v48 = vsel %vm645_vm1, %v741_v32, 0.0  ;;  %v800_v53 = vsel %vm645_vm1, %v742_v39, 0.0 }
  0x4c   : > { %v700_v1 = vadd.f32 %v699_v51, %v698_v57  ;;  %v797_v51 = vadd.f32 %v796_v41, %v795_v43 }
  0x4e   : > { %v702_v16 = vadd.f32 %v701_v59, %v700_v1  ;;  %v799_v58 = vadd.f32 %v798_v48, %v797_v51  ;;  %v745_v59 = vmul.f32 %v6355_v0, %v6355_v0 }
  0x50   : > { %v704_v26 = vadd.f32 %v703_v7, %v702_v16  ;;  %v801_v1 = vadd.f32 %v800_v53, %v799_v58  ;;  %v804_v7 = vsel %vm645_vm1, %v744_v52, 0.0  ;;  %v806_v16 = vsel %vm645_vm1, %v745_v59, 0.0 }
  0x52   : > { %v706_v35 = vadd.f32 %v705_v22, %v704_v26  ;;  %v803_v13 = vadd.f32 %v802_v60, %v801_v1  ;;  %v808_v22 = vsel %vm645_vm1, %v746_v6, 0.0 }
  0x54   : > { %v708_v42 = vadd.f32 %v707_v30, %v706_v35  ;;  %v805_v19 = vadd.f32 %v804_v7, %v803_v13 }
  0x56   : > { %v709_v49 = vrot.slane %v708_v42, 4  ;;  %v807_v24 = vadd.f32 %v806_v16, %v805_v19 }
  0x58   : > { %v710_v57 = vadd.f32 %v709_v49, %v708_v42  ;;  %v809_v26 = vadd.f32 %v808_v22, %v807_v24 }
  0x5a   : > { %v711_v63 = vrot.slane %v710_v57, 2  ;;  %v810_v30 = vrot.slane %v809_v26, 4 }
  0x5c   : > { %v712_v11 = vadd.f32 %v711_v63, %v710_v57  ;;  %v811_v32 = vadd.f32 %v810_v30, %v809_v26 }
  0x5e   : > { %v713_v23 = vrot.slane %v712_v11, 1  ;;  %v812_v34 = vrot.slane %v811_v32, 2 }
  0x60   : > { %v714_v28 = vadd.f32 %v713_v23, %v712_v11  ;;  %v813_v36 = vadd.f32 %v812_v34, %v811_v32 }
  0x62   : > { %v6392_v35 = vmul.f32 0.00390625, %v714_v28  ;;  %v814_v39 = vrot.slane %v813_v36, 1 }
  0x64   : > { %v817_v41 = vmul.f32 %v6392_v35, %v714_v28  ;;  %v815_v42 = vadd.f32 %v814_v39, %v813_v36  ;;  %v852_v59 = vsub.f32 %v6275_v40, %v6392_v35  ;;  %v853_v60 = vsub.f32 %v6283_v47, %v6392_v35 }
  0x65   : > { %v846_v1 = vsub.f32 %v6227_v56, %v6392_v35  ;;  %v847_v6 = vsub.f32 %v6235_v62, %v6392_v35  ;;  %v862_v7 = vsub.f32 %v6355_v0, %v6392_v35  ;;  %v863_v11 = vsub.f32 %v6363_v14, %v6392_v35 }
  0x66   : > { %v818_v43 = vsub.f32 %v815_v42, %v817_v41  ;;  %v844_v40 = vsub.f32 %v6211_v44, %v6392_v35  ;;  %v845_v47 = vsub.f32 %v6219_v50, %v6392_v35  ;;  %v860_v34 = vsub.f32 %v6339_v46, %v6392_v35 }
  0x67   : > { %v861_v36 = vsub.f32 %v6347_v55, %v6392_v35  ;;  %v842_v46 = vsub.f32 %v6193_v31, %v6392_v35  ;;  %v843_v55 = vsub.f32 %v6203_v38, %v6392_v35 }
  0x68   : > { %v819_v45 = vmax.f32 %v818_v43, 0.0 }
  0x6a   : > { %v820_v48 = vmul.f32 0.003921569, %v819_v45  ;;  %v854_v45 = vsub.f32 %v6291_v54, %v6392_v35  ;;  %v859_v54 = vsub.f32 %v6331_v37, %v6392_v35 }
  0x6c   : > { %v821_v49 = vadd.f32 1e-05, %v820_v48 }
  0x6e   : > { %5669 = vrsqrt.f32 %v821_v49  ;;  %vm828_vm2 = vweird.f32 %v821_v49 }
  0x74   : > { %v5670_v51 = vpop.eup %5669 }
  0x75   : > { %v823_v52 = vmul.f32 %v5670_v51, %v821_v49  ;;  %vm829_vm3 = vweird.f32 %v5670_v51  ;;  %v855_v49 = vsub.f32 %v6299_v61, %v6392_v35 }
  0x76   : > { %vm830_vm4 = vmor %vm828_vm2, %vm829_vm3  ;;  %vm4959_vm3 = vcmask 1043456  }
  0x77   : > { %v824_v53 = vmul.f32 %v5670_v51, %v823_v52  ;;  %v858_v52 = vsub.f32 %v6323_v29, %v6392_v35 }
  0x79   : > { %v825_v57 = vmul.f32 0.5, %v824_v53 }
  0x7b   : > { %v826_v58 = vsub.f32 1.5, %v825_v57 }
  0x7d   : > { %v827_v63 = vmul.f32 %v5670_v51, %v826_v58 }
  0x7f   : > { %v6407_v13 = vsel %vm830_vm4, %v5670_v51, %v827_v63 }
  0x80   : > { %v884_v16 = vmul.f32 %v852_v59, %v6407_v13  ;;  %v885_v19 = vmul.f32 %v853_v60, %v6407_v13  ;;  %v878_v22 = vmul.f32 %v846_v1, %v6407_v13  ;;  %v879_v23 = vmul.f32 %v847_v6, %v6407_v13 }
  0x81   : > { %v894_v14 = vmul.f32 %v862_v7, %v6407_v13  ;;  %v895_v24 = vmul.f32 %v863_v11, %v6407_v13  ;;  %v876_v28 = vmul.f32 %v844_v40, %v6407_v13  ;;  %v877_v30 = vmul.f32 %v845_v47, %v6407_v13 }
  0x82   : > { %v6417_v0 = vpack.c.bf16 %v885_v19, %v884_v16  ;;  %v6421_v26 = vpack.c.bf16 %v879_v23, %v878_v22  ;;  %v892_v42 = vmul.f32 %v860_v34, %v6407_v13  ;;  %v893_v43 = vmul.f32 %v861_v36, %v6407_v13 }
  0x83   : > { %v6427_v32 = vpack.c.bf16 %v895_v24, %v894_v14  ;;  %v6441_v48 = vpack.c.bf16 %v877_v30, %v876_v28  ;;  %v886_v53 = vmul.f32 %v854_v45, %v6407_v13  ;;  %v874_v58 = vmul.f32 %v842_v46, %v6407_v13 }
  0x84   : > { %5343 = vmatmul.msk.bf16.vlgmr.msra.gmra.mxu2 %vm645_vm1, %v6417_v0  ;;  %v939_v39 = vsel %vm645_vm1, %v6421_v26, 0  ;;  %v6449_v51 = vpack.c.bf16 %v893_v43, %v892_v42  ;;  %v875_v59 = vmul.f32 %v843_v55, %v6407_v13  ;;  %v887_v60 = vmul.f32 %v855_v49, %v6407_v13 }
  0x85   : > { %1133 = vmatpush.bf16.xpose.msra.mxu1 %v939_v39  ;;  %v963_v41 = vsel %vm645_vm1, %v6427_v32, 0  ;;  %v936_v57 = vsel %vm645_vm1, %v6441_v48, 0  ;;  %v890_v63 = vmul.f32 %v858_v52, %v6407_v13  ;;  %v891_v29 = vmul.f32 %v859_v54, %v6407_v13 }
  0x86   : > { %1146 = vmatpush.bf16.xpose.msrb.mxu2 %v963_v41  ;;  %v960_v61 = vsel %vm645_vm1, %v6449_v51, 0  ;;  %v6465_v37 = vpack.c.bf16 %v875_v59, %v874_v58  ;;  %v840_v1 = vsub.f32 %v6175_v21, %v6392_v35  ;;  %v841_v6 = vsub.f32 %v6186_v27, %v6392_v35 }
  0x87   : > { %v907_v7 = vpack.c.bf16 %v887_v60, %v886_v53  ;;  %v909_v11 = vpack.c.bf16 %v891_v29, %v890_v63  ;;  %v856_v40 = vsub.f32 %v6307_v10, %v6392_v35  ;;  %v857_v47 = vsub.f32 %v6315_v20, %v6392_v35 }
  0x88   : > { %v933_v16 = vsel %vm645_vm1, %v6465_v37, 0  ;;  %v872_v19 = vmul.f32 %v840_v1, %v6407_v13  ;;  %v873_v22 = vmul.f32 %v841_v6, %v6407_v13  ;;  %v838_v10 = vsub.f32 %v6165_v15, %v6392_v35 }
  0x89   : > { %v957_v23 = vsel %vm645_vm1, %v909_v11, 0  ;;  %v888_v14 = vmul.f32 %v856_v40, %v6407_v13  ;;  %v889_v24 = vmul.f32 %v857_v47, %v6407_v13  ;;  %v839_v20 = vsub.f32 %v6170_v18, %v6392_v35 }
  0x8a   : > { %v6487_v28 = vpack.c.bf16 %v873_v22, %v872_v19  ;;  %v870_v34 = vmul.f32 %v838_v10, %v6407_v13  ;;  %v836_v43 = vsub.f32 %v6155_v9, %v6392_v35  ;;  %v837_v45 = vsub.f32 %v6160_v12, %v6392_v35 }
  0x8b   : > { %v908_v30 = vpack.c.bf16 %v889_v24, %v888_v14  ;;  %v871_v36 = vmul.f32 %v839_v20, %v6407_v13  ;;  %v832_v52 = vsub.f32 %v6137_v2, %v6392_v35  ;;  %v833_v54 = vsub.f32 %v6140_v3, %v6392_v35 }
  0x8c   : > { %v930_v39 = vsel %vm645_vm1, %v6487_v28, 0  ;;  %v868_v55 = vmul.f32 %v836_v43, %v6407_v13  ;;  %v869_v49 = vmul.f32 %v837_v45, %v6407_v13  ;;  %v951_v53 = vsel %vm645_vm1, %v907_v7, 0 }
  0x8d   : > { %1134 = vmatpush.bf16.xpose.msra.mxu1 %v936_v57  ;;  %v954_v41 = vsel %vm645_vm1, %v908_v30, 0  ;;  %v6494_v42 = vpack.c.bf16 %v871_v36, %v870_v34  ;;  %v864_v57 = vmul.f32 %v832_v52, %v6407_v13  ;;  %v865_v58 = vmul.f32 %v833_v54, %v6407_v13 }
  0x8e   : > { %1147 = vmatpush.bf16.xpose.msrb.mxu2 %v960_v61  ;;  %v898_v59 = vpack.c.bf16 %v869_v49, %v868_v55  ;;  %v834_v60 = vsub.f32 %v6143_v4, %v6392_v35  ;;  %v835_v61 = vsub.f32 %v6146_v5, %v6392_v35  ;;  %v850_v40 = vsub.f32 %v6259_v25, %v6392_v35 }
  0x8f   : > { %v927_v46 = vsel %vm645_vm1, %v6494_v42, 0  ;;  %v896_v63 = vpack.c.bf16 %v865_v58, %v864_v57  ;;  %v851_v47 = vsub.f32 %v6267_v33, %v6392_v35  ;;  %v848_v25 = vsub.f32 %v6243_v8, %v6392_v35  ;;  %v1183_v8 = vld [vmem:[%s9548_s6] sm:$0x3] }
  0x90   : > { %v924_v29 = vsel %vm645_vm1, %v898_v59, 0  ;;  %v866_v1 = vmul.f32 %v834_v60, %v6407_v13  ;;  %v867_v6 = vmul.f32 %v835_v61, %v6407_v13  ;;  %v882_v19 = vmul.f32 %v850_v40, %v6407_v13 }
  0x91   : > { %5333 = vmatmul.msk.bf16.vlgmr.msra.gmra.mxu0 %vm645_vm1, %v896_v63  ;;  %v883_v22 = vmul.f32 %v851_v47, %v6407_v13  ;;  %v849_v33 = vsub.f32 %v6251_v17, %v6392_v35  ;;  %v880_v24 = vmul.f32 %v848_v25, %v6407_v13  ;;  %v1237_v17 = vsel %vm965_vm0, %v1183_v8, 0  ;;  %v1123_v35 = vld [vmem:[%s9546_s4] sm:$0x3] }
  0x92   : > { %5632 = vmatpush.bf16.msra.mxu3 %v1237_v17  ;;  %v6008_v34 = vmov 0   ;;  %v1167_v36 = vpack.c.bf16 %v6140_v3, %v6137_v2  ;;  %v1174_v2 = vpack.c.bf16 %v6235_v62, %v6227_v56  ;;  %v1169_v3 = vpack.c.bf16 %v6160_v12, %v6155_v9 }
  0x93   : > { %v881_v10 = vmul.f32 %v849_v33, %v6407_v13  ;;  %v1124_v13 = vld [vmem:[%s9547_s5] sm:$0xf]  ;;  %5660 = vset.pattern.permute.xlu0 %v6008_v34  ;;  %5661 = vset.pattern.permute.xlu2 %v6008_v34 }
  0x94   : > { %5344 = vmatmul.msk.bf16.gmra.mxu2 %vm645_vm1, %v907_v7  ;;  %v948_v7 = vsel %vm645_vm1, %v6417_v0, 0  ;;  %1127 = vperm.xlu0 %5660, %v1124_v13  }
  0x95   : > { %1135 = vmatpush.bf16.xpose.msra.mxu1 %v933_v16  ;;  %v897_v16 = vpack.c.bf16 %v867_v6, %v866_v1  ;;  %v6540_v20 = vpack.c.bf16 %v881_v10, %v880_v24  ;;  %5662 = vset.pattern.permute.xlu1 %v6008_v34 }
  0x96   : > { %1148 = vmatpush.bf16.xpose.msrb.mxu2 %v957_v23  ;;  %v6528_v23 = vpack.c.bf16 %v883_v22, %v882_v19 }
  0x97   : > { %v921_v14 = vsel %vm645_vm1, %v897_v16, 0 }
  0x98   : > { %v945_v0 = vsel %vm645_vm1, %v6528_v23, 0 }
  0x9d   : > { %1136 = vmatpush.bf16.xpose.msra.mxu1 %v930_v39  ;;  %v1168_v39 = vpack.c.bf16 %v6146_v5, %v6143_v4  ;;  %v1172_v4 = vpack.c.bf16 %v6203_v38, %v6193_v31  ;;  %v1170_v5 = vpack.c.bf16 %v6170_v18, %v6165_v15  ;;  %v1171_v18 = vpack.c.bf16 %v6186_v27, %v6175_v21 }
  0x9e   : > { %1149 = vmatpush.bf16.xpose.msrb.mxu2 %v954_v41 }
  0xa1   : > { %5334 = vmatmul.msk.bf16.gmra.mxu0 %vm645_vm1, %v897_v16 }
  0xa4   : > { %5345 = vmatmul.msk.bf16.gmra.mxu2 %vm645_vm1, %v908_v30  ;;  %v942_v30 = vsel %vm645_vm1, %v6540_v20, 0 }
  0xa5   : > { %1137 = vmatpush.bf16.xpose.msra.mxu1 %v927_v46 }
  0xa6   : > { %1150 = vmatpush.bf16.xpose.msrb.mxu2 %v951_v53 }
  0xad   : > { %1138 = vmatpush.bf16.xpose.msra.mxu1 %v924_v29 }
  0xae   : > { %1151 = vmatpush.bf16.xpose.msrb.mxu2 %v948_v7 }
  0xb1   : > { %5335 = vmatmul.msk.bf16.gmra.mxu0 %vm645_vm1, %v898_v59 }
  0xb4   : > { %5346 = vmatmul.msk.bf16.gmra.mxu2 %vm645_vm1, %v909_v11  ;;  %v918_v11 = vsel %vm645_vm1, %v896_v63, 0 }
  0xb5   : > { %1139 = vmatpush.bf16.xpose.msra.mxu1 %v921_v14 }
  0xb6   : > { %1152 = vmatpush.bf16.xpose.msrb.mxu2 %v945_v0 }
  0xbd   : > { %1140 = vmatpush.bf16.xpose.msra.mxu1 %v918_v11 }
  0xbe   : > { %1153 = vmatpush.bf16.xpose.msrb.mxu2 %v942_v30 }
  0xc1   : > { %5336 = vmatmul.msk.bf16.gmra.mxu0 %vm645_vm1, %v6494_v42 }
  0xc4   : > { %5347 = vmatmul.msk.bf16.gmra.mxu2 %vm645_vm1, %v6449_v51  ;;  %5349 = vmatmul.msk.bf16.vlgmr.msra.gmra.mxu1 %vm645_vm1, %v1123_v35  ;;  %v1173_v51 = vpack.c.bf16 %v6219_v50, %v6211_v44  ;;  %v6592_v44 = vld [vmem:[%s9545_s3] ss:$0 sm:$0xff] }
  0xc5   : > { %1246 = vmatpush.bf16.msrb.mxu1 %v1237_v17 }
  0xc6   : > { %5631 = vmatpush.bf16.msra.mxu2 %v1237_v17  ;;  %5357 = vmatmul.msk.bf16.vlgmr.msra.gmra.mxu3 %vm645_vm1, %v1173_v51 }
  0xd1   : > { %5337 = vmatmul.msk.bf16.gmra.mxu0 %vm645_vm1, %v6487_v28 }
  0xd4   : > { %5348 = vmatmul.msk.bf16.gmra.mxu2 %vm645_vm1, %v6427_v32  ;;  %5351 = vmatmul.msk.bf16.vlgmr.msrb.gmra.mxu1 %vm645_vm1, %v1167_v36 }
  0xd6   : > { %5358 = vmatmul.msk.bf16.gmra.mxu3 %vm645_vm1, %v1174_v2 }
  0xe1   : > { %5338 = vmatmul.msk.bf16.gmra.mxu0 %vm645_vm1, %v6465_v37 }
  0xe4   : > { %5350 = vmatmul.msk.bf16.vlgmr.msrb.gmra.mxu2 %vm645_vm1, %v1123_v35  ;;  %5352 = vmatmul.msk.bf16.gmra.mxu1 %vm645_vm1, %v1168_v39 }
  0xf1   : > { %5339 = vmatmul.msk.bf16.gmra.mxu0 %vm645_vm1, %v6441_v48 }
  0xf4   : > { %5353 = vmatmul.msk.bf16.gmra.mxu1 %vm645_vm1, %v1169_v3  ;;  %5356 = vmatmul.msk.bf16.vlgmr.msra.gmra.mxu2 %vm645_vm1, %v1172_v4 }
 0x101   : > { %5340 = vmatmul.msk.bf16.gmra.mxu0 %vm645_vm1, %v6421_v26 }
 0x104   : > { %5354 = vmatmul.msk.bf16.gmra.mxu1 %vm645_vm1, %v1170_v5 }
 0x106   : > { %v1128_v34 = vpop.permute.xlu0 %1127 }
 0x107   : > { %v1028_v9 = vpop.f32.mrf.mxu2 }
 0x108   : > { %v1029_v12 = vadd.f32 %v6592_v44, %v1028_v9 }
 0x10a   : > { %v1078_v31 = vpack.c.bf16 %v1029_v12, %v1029_v12 }
 0x10c   : > { %1111 = vst.msk [vmem:[#allocation2 + $0x50] sm:$0xf] %vm1090_vm5, %v1078_v31 }
 0x10e   : > { %v978_v57 = vpop.f32.mrf.mxu0 }
 0x10f   : > { %v1030_v38 = vpop.f32.mrf.mxu2  ;;  %v979_v29 = vadd.f32 %v6592_v44, %v978_v57 }
 0x110   : > { %v1031_v15 = vadd.f32 %v6592_v44, %v1030_v38 }
 0x111   : > { %5341 = vmatmul.msk.bf16.gmra.mxu0 %vm645_vm1, %v6540_v20  ;;  %v1058_v40 = vpack.c.bf16 %v979_v29, %v979_v29 }
 0x112   : > { %v1079_v50 = vpack.c.bf16 %v1031_v15, %v1031_v15 }
 0x113   : > { %1091 = vst.msk [vmem:[#allocation2] sm:$0xf] %vm1090_vm5, %v1058_v40 }
 0x114   : > { %1112 = vst.msk [vmem:[#allocation2 + $0x54] sm:$0xf] %vm1090_vm5, %v1079_v50  ;;  %5355 = vmatmul.msk.bf16.gmra.mxu1 %vm645_vm1, %v1171_v18 }
 0x116   : > { %v980_v63 = vpop.f32.mrf.mxu0 }
 0x117   : > { %v1033_v56 = vpop.f32.mrf.mxu2  ;;  %v981_v1 = vadd.f32 %v6592_v44, %v980_v63 }
 0x118   : > { %v1034_v62 = vadd.f32 %v6592_v44, %v1033_v56 }
 0x119   : > { %v1059_v47 = vpack.c.bf16 %v981_v1, %v981_v1 }
 0x11a   : > { %v1080_v32 = vpack.c.bf16 %v1034_v62, %v1034_v62 }
 0x11b   : > { %1092 = vst.msk [vmem:[#allocation2 + $0x4] sm:$0xf] %vm1090_vm5, %v1059_v47 }
 0x11c   : > { %1113 = vst.msk [vmem:[#allocation2 + $0x58] sm:$0xf] %vm1090_vm5, %v1080_v32 }
 0x11e   : > { %v983_v22 = vpop.f32.mrf.mxu0 }
 0x11f   : > { %v1035_v48 = vpop.f32.mrf.mxu2 }
 0x120   : > { %v1036_v37 = vadd.f32 %v6592_v44, %v1035_v48 }
 0x121   : > { %5342 = vmatmul.msk.bf16.gmra.mxu0 %vm645_vm1, %v6528_v23  ;;  %v984_v23 = vadd.f32 %v6592_v44, %v983_v22 }
 0x122   : > { %v1081_v28 = vpack.c.bf16 %v1036_v37, %v1036_v37  ;;  %v5598_v63 = vld [vmem:[#allocation2] sm:$0xff] }
 0x123   : > { %v1060_v25 = vpack.c.bf16 %v984_v23, %v984_v23 }
 0x124   : > { %1114 = vst.msk [vmem:[#allocation2 + $0x5c] sm:$0xf] %vm1090_vm5, %v1081_v28 }
 0x125   : > { %1093 = vst.msk [vmem:[#allocation2 + $0x8] sm:$0xf] %vm1090_vm5, %v1060_v25 }
 0x126   : > { %v985_v10 = vpop.f32.mrf.mxu0 }
 0x127   : > { %v1038_v21 = vpop.f32.mrf.mxu2  ;;  %v986_v20 = vadd.f32 %v6592_v44, %v985_v10 }
 0x128   : > { %v1039_v27 = vadd.f32 %v6592_v44, %v1038_v21 }
 0x129   : > { %v1061_v8 = vpack.c.bf16 %v986_v20, %v986_v20 }
 0x12a   : > { %v1082_v41 = vpack.c.bf16 %v1039_v27, %v1039_v27  ;;  %v6657_v27 = vld [vmem:[%s9549_s7] ss:$0 sm:$0xff] }
 0x12b   : > { %1094 = vst.msk [vmem:[#allocation2 + $0xc] sm:$0xf] %vm1090_vm5, %v1061_v8 }
 0x12c   : > { %1115 = vst.msk [vmem:[#allocation2 + $0x60] sm:$0xf] %vm1090_vm5, %v1082_v41 }
 0x12e   : > { %v988_v36 = vpop.f32.mrf.mxu0 }
 0x12f   : > { %v1040_v42 = vpop.f32.mrf.mxu2  ;;  %v989_v39 = vadd.f32 %v6592_v44, %v988_v36 }
 0x130   : > { %v1041_v26 = vadd.f32 %v6592_v44, %v1040_v42 }
 0x131   : > { %v1062_v4 = vpack.c.bf16 %v989_v39, %v989_v39 }
 0x132   : > { %v1083_v43 = vpack.c.bf16 %v1041_v26, %v1041_v26 }
 0x133   : > { %1095 = vst.msk [vmem:[#allocation2 + $0x10] sm:$0xf] %vm1090_vm5, %v1062_v4 }
 0x134   : > { %1116 = vst.msk [vmem:[#allocation2 + $0x64] sm:$0xf] %vm1090_vm5, %v1083_v43 }
 0x136   : > { %v990_v38 = vpop.f32.mrf.mxu0 }
 0x137   : > { %v1043_v45 = vpop.f32.mrf.mxu2  ;;  %v991_v18 = vadd.f32 %v6592_v44, %v990_v38 }
 0x138   : > { %v1044_v46 = vadd.f32 %v6592_v44, %v1043_v45 }
 0x139   : > { %v1063_v56 = vpack.c.bf16 %v991_v18, %v991_v18 }
 0x13a   : > { %v1084_v55 = vpack.c.bf16 %v1044_v46, %v1044_v46 }
 0x13b   : > { %1096 = vst.msk [vmem:[#allocation2 + $0x14] sm:$0xf] %vm1090_vm5, %v1063_v56 }
 0x13c   : > { %1117 = vst.msk [vmem:[#allocation2 + $0x68] sm:$0xf] %vm1090_vm5, %v1084_v55 }
 0x13e   : > { %v993_v48 = vpop.f32.mrf.mxu0 }
 0x13f   : > { %v1045_v49 = vpop.f32.mrf.mxu2  ;;  %v994_v28 = vadd.f32 %v6592_v44, %v993_v48 }
 0x140   : > { %v1046_v52 = vadd.f32 %v6592_v44, %v1045_v49 }
 0x141   : > { %v1142_v53 = vpop.f32.mrf.mxu1  ;;  %v1064_v21 = vpack.c.bf16 %v994_v28, %v994_v28 }
 0x142   : > { %v1085_v54 = vpack.c.bf16 %v1046_v52, %v1046_v52  ;;  %v1143_v51 = vadd.f32 %v1142_v53, %v1128_v34 }
 0x143   : > { %1097 = vst.msk [vmem:[#allocation2 + $0x18] sm:$0xf] %vm1090_vm5, %v1064_v21 }
 0x144   : > { %1118 = vst.msk [vmem:[#allocation2 + $0x6c] sm:$0xf] %vm1090_vm5, %v1085_v54 }
 0x146   : > { %v995_v46 = vpop.f32.mrf.mxu0 }
 0x147   : > { %v1048_v58 = vpop.f32.mrf.mxu2  ;;  %v996_v54 = vadd.f32 %v6592_v44, %v995_v46 }
 0x148   : > { %v1049_v59 = vadd.f32 %v6592_v44, %v1048_v58 }
 0x149   : > { %v1144_v61 = vpop.f32.mrf.mxu1  ;;  %v1278_v13 = vpop.f32.mrf.mxu3 }
 0x14a   : > { %v1086_v60 = vpack.c.bf16 %v1049_v59, %v1049_v59  ;;  %v1279_v59 = vadd.f32 %v6657_v27, %v1278_v13  ;;  %v1065_v61 = vpack.c.bf16 %v996_v54, %v996_v54 }
 0x14c   : > { %1119 = vst.msk [vmem:[#allocation2 + $0x70] sm:$0xf] %vm1090_vm5, %v1086_v60  ;;  %v1340_v29 = vpack.c.bf16 %v1279_v59, %v1279_v59 }
 0x14d   : > { %1098 = vst.msk [vmem:[#allocation2 + $0x1c] sm:$0xf] %vm1090_vm5, %v1065_v61 }
 0x14e   : > { %1372 = vst.msk [vmem:[#allocation4 + $0x30] sm:$0xf] %vm1090_vm5, %v1340_v29 }
 0x14f   : > { %v1050_v6 = vpop.f32.mrf.mxu2 }
 0x150   : > { %v1051_v7 = vadd.f32 %v6592_v44, %v1050_v6 }
 0x151   : > { %v6628_v19 = vpop.f32.mrf.mxu1  ;;  %v1280_v12 = vpop.f32.mrf.mxu3 }
 0x152   : > { %v1087_v16 = vpack.c.bf16 %v1051_v7, %v1051_v7  ;;  %v1281_v60 = vadd.f32 %v6657_v27, %v1280_v12  ;;  %v1249_v40 = vadd.f32 %v6657_v27, %v6628_v19 }
 0x154   : > { %1120 = vst.msk [vmem:[#allocation2 + $0x74] sm:$0xf] %vm1090_vm5, %v1087_v16  ;;  %v1341_v1 = vpack.c.bf16 %v1281_v60, %v1281_v60  ;;  %v1328_v23 = vpack.c.bf16 %v1249_v40, %v1249_v40  ;;  %v5601_v59 = vld [vmem:[#allocation2 + $0x18] sm:$0xff] }
 0x156   : > { %1373 = vst.msk [vmem:[#allocation4 + $0x34] sm:$0xf] %vm1090_vm5, %v1341_v1 }
 0x157   : > { %v1053_v14 = vpop.f32.mrf.mxu2  ;;  %1360 = vst.msk [vmem:[#allocation4] sm:$0xf] %vm1090_vm5, %v1328_v23 }
 0x158   : > { %v1054_v0 = vadd.f32 %v6592_v44, %v1053_v14  ;;  %v998_v14 = vpop.f32.mrf.mxu0 }
 0x159   : > { %v6635_v24 = vpop.f32.mrf.mxu1  ;;  %v1283_v32 = vpop.f32.mrf.mxu3 }
 0x15a   : > { %v1088_v33 = vpack.c.bf16 %v1054_v0, %v1054_v0  ;;  %v1284_v26 = vadd.f32 %v6657_v27, %v1283_v32  ;;  %v1251_v47 = vadd.f32 %v6657_v27, %v6635_v24 }
 0x15c   : > { %1121 = vst.msk [vmem:[#allocation2 + $0x78] sm:$0xf] %vm1090_vm5, %v1088_v33  ;;  %v1342_v55 = vpack.c.bf16 %v1284_v26, %v1284_v26  ;;  %v1329_v0 = vpack.c.bf16 %v1251_v47, %v1251_v47  ;;  %v999_v33 = vadd.f32 %v6592_v44, %v998_v14  ;;  %v5600_v26 = vld [vmem:[#allocation2 + $0x10] sm:$0xff]  ;;  %v5933_v47 = vld [vmem:[%s6134_s23 + $0x80] sm:$0xff] }
 0x15d   : > { %v5620_v8 = vld [vmem:[#allocation4 + $0x30] sm:$0xff] }
 0x15e   : > { %1374 = vst.msk [vmem:[#allocation4 + $0x38] sm:$0xf] %vm1090_vm5, %v1342_v55  ;;  %v1066_v20 = vpack.c.bf16 %v999_v33, %v999_v33 }
 0x15f   : > { %v1055_v11 = vpop.f32.mrf.mxu2  ;;  %1361 = vst.msk [vmem:[#allocation4 + $0x4] sm:$0xf] %vm1090_vm5, %v1329_v0 }
 0x160   : > { %v1056_v30 = vadd.f32 %v6592_v44, %v1055_v11  ;;  %1099 = vst.msk [vmem:[#allocation2 + $0x20] sm:$0xf] %vm1090_vm5, %v1066_v20  ;;  %v5935_v20 = vld [vmem:[%s6134_s23 + $0x90] sm:$0xff] }
 0x161   : > { %v6641_v35 = vpop.f32.mrf.mxu1  ;;  %v1285_v43 = vpop.f32.mrf.mxu3 }
 0x162   : > { %v1089_v17 = vpack.c.bf16 %v1056_v30, %v1056_v30  ;;  %v1286_v45 = vadd.f32 %v6657_v27, %v1285_v43  ;;  %v1254_v38 = vadd.f32 %v6657_v27, %v6641_v35 }
 0x164   : > { %1122 = vst.msk [vmem:[#allocation2 + $0x7c] sm:$0xf] %vm1090_vm5, %v1089_v17  ;;  %v1343_v53 = vpack.c.bf16 %v1286_v45, %v1286_v45  ;;  %v1000_v17 = vpop.f32.mrf.mxu0 }
 0x165   : > { %v1001_v36 = vadd.f32 %v6592_v44, %v1000_v17 }
 0x166   : > { %1375 = vst.msk [vmem:[#allocation4 + $0x3c] sm:$0xf] %vm1090_vm5, %v1343_v53  ;;  %v5614_v60 = vld [vmem:[#allocation4] sm:$0xff] }
 0x167   : > { %v1155_v2 = vpop.f32.mrf.mxu2 }
 0x168   : > { %v1156_v3 = vadd.f32 %v1155_v2, %v1128_v34  ;;  %v1067_v2 = vpack.c.bf16 %v1001_v36, %v1001_v36 }
 0x169   : > { %v6646_v9 = vpop.f32.mrf.mxu1 }
 0x16a   : > { %v1159_v5 = vpack.c.bf16 %v1156_v3, %v1143_v51  ;;  %v5599_v3 = vld [vmem:[#allocation2 + $0x8] sm:$0xff]  ;;  %1100 = vst.msk [vmem:[#allocation2 + $0x24] sm:$0xf] %vm1090_vm5, %v1067_v2  ;;  %v5938_v2 = vld [vmem:[%s6134_s23 + $0xa8] sm:$0xff] }
 0x16c   : > { %v1161_v31 = vrot.slane %v1159_v5, 2  ;;  %v1003_v56 = vpop.f32.mrf.mxu0 }
 0x16d   : > { %v5621_v10 = vld [vmem:[#allocation4 + $0x38] sm:$0xff]  ;;  %v1004_v48 = vadd.f32 %v6592_v44, %v1003_v56 }
 0x16e   : > { %v1164_v15 = vsel %vm965_vm0, %v1159_v5, %v1161_v31  ;;  %3059 = vmatpush.bf16.msrb.mxu0 %v5621_v10  ;;  %v5941_v56 = vld [vmem:[%s6134_s23 + $0xc0] sm:$0xff] }
 0x16f   : > { %1166 = vst [vmem:[#allocation3] sm:$0xf] %v1164_v15  ;;  %v1157_v50 = vpop.f32.mrf.mxu2  ;;  %v1256_v15 = vadd.f32 %v6657_v27, %v6646_v9 }
 0x170   : > { %v1330_v50 = vpack.c.bf16 %v1254_v38, %v1254_v38 }
 0x171   : > { %v6651_v62 = vpop.f32.mrf.mxu1  ;;  %v5602_v40 = vld [vmem:[#allocation2 + $0x20] sm:$0xff] }
 0x172   : > { %3060 = vmatpush.bf16.msrb.mxu0 %v5620_v8  ;;  %v1259_v51 = vadd.f32 %v6657_v27, %v6651_v62  ;;  %v1331_v62 = vpack.c.bf16 %v1256_v15, %v1256_v15  ;;  %1362 = vst.msk [vmem:[#allocation4 + $0x8] sm:$0xf] %vm1090_vm5, %v1330_v50 }
 0x174   : > { %v1332_v4 = vpack.c.bf16 %v1259_v51, %v1259_v51  ;;  %1363 = vst.msk [vmem:[#allocation4 + $0xc] sm:$0xf] %vm1090_vm5, %v1331_v62  ;;  %v1005_v28 = vpop.f32.mrf.mxu0  ;;  %v5942_v62 = vld [vmem:[%s6134_s23 + $0xc8] sm:$0xff] }
 0x176   : > { %v1527_v37 = vld [vmem:[#allocation3] sm:$0xf]  ;;  %1364 = vst.msk [vmem:[#allocation4 + $0x10] sm:$0xf] %vm1090_vm5, %v1332_v4 }
 0x177   : > { %1641 = vst [vmem:[#allocation1] ss:$4 sm:$0xff] %v1527_v37  ;;  %v1273_v42 = vpop.f32.mrf.mxu2  ;;  %v1068_v37 = vpack.c.bf16 %v1004_v48, %v1004_v48 }
 0x178   : > { %v1274_v16 = vadd.f32 %v6657_v27, %v1273_v42 }
 0x179   : > { %v1260_v41 = vpop.f32.mrf.mxu1  ;;  %1101 = vst.msk [vmem:[#allocation2 + $0x28] sm:$0xf] %vm1090_vm5, %v1068_v37 }
 0x17a   : > { %v1338_v25 = vpack.c.bf16 %v1274_v16, %v1274_v16  ;;  %v1261_v39 = vadd.f32 %v6657_v27, %v1260_v41  ;;  %v1006_v41 = vadd.f32 %v6592_v44, %v1005_v28  ;;  %v5934_v16 = vld [vmem:[%s6134_s23 + $0x88] sm:$0xff] }
 0x17c   : > { %1370 = vst.msk [vmem:[#allocation4 + $0x28] sm:$0xf] %vm1090_vm5, %v1338_v25  ;;  %v1333_v5 = vpack.c.bf16 %v1261_v39, %v1261_v39  ;;  %v1069_v42 = vpack.c.bf16 %v1006_v41, %v1006_v41  ;;  %v1008_v43 = vpop.f32.mrf.mxu0  ;;  %v5937_v39 = vld [vmem:[%s6134_s23 + $0xa0] sm:$0xff] }
 0x17d   : > { %v1009_v45 = vadd.f32 %v6592_v44, %v1008_v43 }
 0x17e   : > { %v1642_v49 = vld.sshfl [vmem:[#allocation1] sm:$0xff pattern:$0x73625140]  ;;  %v1643_v52 = vld.sshfl [vmem:[#allocation1 + $0x8] sm:$0xff pattern:$0x73625140] }
 0x17f   : > { %v1693_v57 = vsel %vm965_vm0, %v1642_v49, 0  ;;  %v1695_v58 = vsel %vm965_vm0, %v1643_v52, 0  ;;  %v1275_v7 = vpop.f32.mrf.mxu2  ;;  %1365 = vst.msk [vmem:[#allocation4 + $0x14] sm:$0xf] %vm1090_vm5, %v1333_v5  ;;  %v1070_v55 = vpack.c.bf16 %v1009_v45, %v1009_v45  ;;  %v5939_v5 = vld [vmem:[%s6134_s23 + $0xb0] sm:$0xff] }
 0x180   : > { %1704 = vmatpush.bf16.msra.mxu1 %v1693_v57  ;;  %1793 = vmatpush.bf16.msrb.mxu2 %v1695_v58  ;;  %v1276_v22 = vadd.f32 %v6657_v27, %v1275_v7  ;;  %1102 = vst.msk [vmem:[#allocation2 + $0x2c] sm:$0xf] %vm1090_vm5, %v1069_v42  ;;  %v5615_v58 = vld [vmem:[#allocation4 + $0x8] sm:$0xff] }
 0x181   : > { %v1263_v6 = vpop.f32.mrf.mxu1  ;;  %1103 = vst.msk [vmem:[#allocation2 + $0x30] sm:$0xf] %vm1090_vm5, %v1070_v55  ;;  %v5943_v42 = vld [vmem:[%s6134_s23 + $0xd0] sm:$0xff] }
 0x182   : > { %v1339_v19 = vpack.c.bf16 %v1276_v22, %v1276_v22  ;;  %v1264_v11 = vadd.f32 %v6657_v27, %v1263_v6  ;;  %v1175_v22 = vpack.c.bf16 %v5934_v16, %v5933_v47  ;;  %v5948_v47 = vld [vmem:[%s6134_s23 + $0xf8] sm:$0xff] }
 0x183   : > { %5431 = vmatmul.msk.bf16.vlgmr.msra.gmra.mxu1 %vm645_vm1, %v5598_v63  ;;  %5447 = vmatmul.msk.bf16.vlgmr.msrb.gmra.mxu2 %vm645_vm1, %v5598_v63 }
 0x184   : > { %1371 = vst.msk [vmem:[#allocation4 + $0x2c] sm:$0xf] %vm1090_vm5, %v1339_v19  ;;  %v1334_v13 = vpack.c.bf16 %v1264_v11, %v1264_v11  ;;  %v1010_v54 = vpop.f32.mrf.mxu0  ;;  %5359 = vmatmul.msk.bf16.gmra.mxu3 %vm645_vm1, %v1175_v22 }
 0x185   : > { %v1011_v53 = vadd.f32 %v6592_v44, %v1010_v54 }
 0x186   : > { %1366 = vst.msk [vmem:[#allocation4 + $0x18] sm:$0xf] %vm1090_vm5, %v1334_v13  ;;  %v5616_v52 = vld [vmem:[#allocation4 + $0x10] sm:$0xff] }
 0x187   : > { %v1071_v57 = vpack.c.bf16 %v1011_v53, %v1011_v53  ;;  %v5603_v10 = vld [vmem:[#allocation2 + $0x28] sm:$0xff] }
 0x189   : > { %v1265_v24 = vpop.f32.mrf.mxu1  ;;  %1104 = vst.msk [vmem:[#allocation2 + $0x34] sm:$0xf] %vm1090_vm5, %v1071_v57  ;;  %v5945_v57 = vld [vmem:[%s6134_s23 + $0xe0] sm:$0xff] }
 0x18a   : > { %v1266_v30 = vadd.f32 %v6657_v27, %v1265_v24  ;;  %v5936_v24 = vld [vmem:[%s6134_s23 + $0x98] sm:$0xff] }
 0x18b   : > { %v5619_v31 = vld [vmem:[#allocation4 + $0x28] sm:$0xff]  ;;  %v1176_v11 = vpack.c.bf16 %v5936_v24, %v5935_v20 }
 0x18c   : > { %v1335_v34 = vpack.c.bf16 %v1266_v30, %v1266_v30  ;;  %3061 = vmatpush.bf16.msrb.mxu0 %v5619_v31  ;;  %v1013_v61 = vpop.f32.mrf.mxu0 }
 0x18d   : > { %v1014_v63 = vadd.f32 %v6592_v44, %v1013_v61 }
 0x18e   : > { %1367 = vst.msk [vmem:[#allocation4 + $0x1c] sm:$0xf] %vm1090_vm5, %v1335_v34 }
 0x18f   : > { %v1072_v29 = vpack.c.bf16 %v1014_v63, %v1014_v63 }
 0x190   : > { %v5604_v13 = vld [vmem:[#allocation2 + $0x30] sm:$0xff] }
 0x191   : > { %v1268_v12 = vpop.f32.mrf.mxu1  ;;  %1105 = vst.msk [vmem:[#allocation2 + $0x38] sm:$0xf] %vm1090_vm5, %v1072_v29  ;;  %v5609_v29 = vld [vmem:[#allocation2 + $0x58] sm:$0xff] }
 0x192   : > { %v1269_v18 = vadd.f32 %v6657_v27, %v1268_v12  ;;  %v5940_v12 = vld [vmem:[%s6134_s23 + $0xb8] sm:$0xff] }
 0x193   : > { %5432 = vmatmul.msk.bf16.gmra.mxu1 %vm645_vm1, %v5599_v3  ;;  %5448 = vmatmul.msk.bf16.gmra.mxu2 %vm645_vm1, %v5599_v3  ;;  %v1177_v3 = vpack.c.bf16 %v5938_v2, %v5937_v39  ;;  %v1178_v31 = vpack.c.bf16 %v5940_v12, %v5939_v5 }
 0x194   : > { %v1336_v32 = vpack.c.bf16 %v1269_v18, %v1269_v18  ;;  %v1015_v1 = vpop.f32.mrf.mxu0  ;;  %5360 = vmatmul.msk.bf16.gmra.mxu3 %vm645_vm1, %v1176_v11 }
 0x195   : > { %v5617_v49 = vld [vmem:[#allocation4 + $0x18] sm:$0xff]  ;;  %v1016_v6 = vadd.f32 %v6592_v44, %v1015_v1 }
 0x196   : > { %1368 = vst.msk [vmem:[#allocation4 + $0x20] sm:$0xf] %vm1090_vm5, %v1336_v32  ;;  %v1179_v32 = vpack.c.bf16 %v5942_v62, %v5941_v56  ;;  %v5612_v56 = vld [vmem:[#allocation2 + $0x70] sm:$0xff] }
 0x197   : > { %v1073_v7 = vpack.c.bf16 %v1016_v6, %v1016_v6 }
 0x199   : > { %v1270_v35 = vpop.f32.mrf.mxu1  ;;  %1106 = vst.msk [vmem:[#allocation2 + $0x3c] sm:$0xf] %vm1090_vm5, %v1073_v7 }
 0x19a   : > { %v1271_v9 = vadd.f32 %v6657_v27, %v1270_v35 }
 0x19c   : > { %v1337_v21 = vpack.c.bf16 %v1271_v9, %v1271_v9  ;;  %v1018_v23 = vpop.f32.mrf.mxu0 }
 0x19d   : > { %v1019_v14 = vadd.f32 %v6592_v44, %v1018_v23 }
 0x19e   : > { %1369 = vst.msk [vmem:[#allocation4 + $0x24] sm:$0xf] %vm1090_vm5, %v1337_v21 }
 0x19f   : > { %v1074_v0 = vpack.c.bf16 %v1019_v14, %v1019_v14 }
 0x1a0   : > { %v5605_v4 = vld [vmem:[#allocation2 + $0x38] sm:$0xff] }
 0x1a1   : > { %1107 = vst.msk [vmem:[#allocation2 + $0x40] sm:$0xf] %vm1090_vm5, %v1074_v0  ;;  %v5610_v0 = vld [vmem:[#allocation2 + $0x60] sm:$0xff] }
 0x1a3   : > { %5433 = vmatmul.msk.bf16.gmra.mxu1 %vm645_vm1, %v5600_v26  ;;  %5449 = vmatmul.msk.bf16.gmra.mxu2 %vm645_vm1, %v5600_v26  ;;  %v5944_v26 = vld [vmem:[%s6134_s23 + $0xd8] sm:$0xff] }
 0x1a4   : > { %v1020_v25 = vpop.f32.mrf.mxu0  ;;  %5361 = vmatmul.msk.bf16.gmra.mxu3 %vm645_vm1, %v1177_v3  ;;  %v1180_v43 = vpack.c.bf16 %v5944_v26, %v5943_v42 }
 0x1a5   : > { %v5618_v46 = vld [vmem:[#allocation4 + $0x20] sm:$0xff]  ;;  %v1021_v33 = vadd.f32 %v6592_v44, %v1020_v25 }
 0x1a6   : > { %3062 = vmatpush.bf16.msrb.mxu0 %v5618_v46 }
 0x1a7   : > { %v1075_v19 = vpack.c.bf16 %v1021_v33, %v1021_v33 }
 0x1a9   : > { %1108 = vst.msk [vmem:[#allocation2 + $0x44] sm:$0xf] %vm1090_vm5, %v1075_v19 }
 0x1aa   : > { %3063 = vmatpush.bf16.msrb.mxu0 %v5617_v49  ;;  %v5608_v49 = vld [vmem:[#allocation2 + $0x50] sm:$0xff] }
 0x1ac   : > { %v1023_v30 = vpop.f32.mrf.mxu0 }
 0x1ad   : > { %v1024_v8 = vadd.f32 %v6592_v44, %v1023_v30 }
 0x1ae   : > { %3064 = vmatpush.bf16.msrb.mxu0 %v5616_v52 }
 0x1af   : > { %v1076_v17 = vpack.c.bf16 %v1024_v8, %v1024_v8 }
 0x1b0   : > { %v5606_v38 = vld [vmem:[#allocation2 + $0x40] sm:$0xff] }
 0x1b1   : > { %1109 = vst.msk [vmem:[#allocation2 + $0x48] sm:$0xf] %vm1090_vm5, %v1076_v17  ;;  %v5611_v17 = vld [vmem:[#allocation2 + $0x68] sm:$0xff] }
 0x1b2   : > { %3065 = vmatpush.bf16.msrb.mxu0 %v5615_v58  ;;  %v5946_v58 = vld [vmem:[%s6134_s23 + $0xe8] sm:$0xff] }
 0x1b3   : > { %5434 = vmatmul.msk.bf16.gmra.mxu1 %vm645_vm1, %v5601_v59  ;;  %5450 = vmatmul.msk.bf16.gmra.mxu2 %vm645_vm1, %v5601_v59  ;;  %v1181_v59 = vpack.c.bf16 %v5946_v58, %v5945_v57 }
 0x1b4   : > { %v1025_v34 = vpop.f32.mrf.mxu0  ;;  %5362 = vmatmul.msk.bf16.gmra.mxu3 %vm645_vm1, %v1178_v31 }
 0x1b5   : > { %v1026_v36 = vadd.f32 %v6592_v44, %v1025_v34 }
 0x1b6   : > { %3066 = vmatpush.bf16.msrb.mxu0 %v5614_v60 }
 0x1b7   : > { %v1077_v51 = vpack.c.bf16 %v1026_v36, %v1026_v36  ;;  %v6009_v36 = vmov -inf  }
 0x1b8   : > { %1430 = vst.msk [vmem:[#allocation5] sm:$0xff] %vm1429_vm6, %v6009_v36 }
 0x1b9   : > { %1110 = vst.msk [vmem:[#allocation2 + $0x4c] sm:$0xf] %vm1090_vm5, %v1077_v51 }
 0x1ba   : > { %1431 = vst.msk [vmem:[#allocation5 + $0x8] sm:$0xff] %vm1429_vm6, %v6009_v36 }
 0x1bb   : > { %1432 = vst.msk [vmem:[#allocation5 + $0x10] sm:$0xff] %vm1429_vm6, %v6009_v36 }
 0x1bc   : > { %1433 = vst.msk [vmem:[#allocation5 + $0x18] sm:$0xff] %vm1429_vm6, %v6009_v36 }
 0x1bd   : > { %1434 = vst.msk [vmem:[#allocation5 + $0x20] sm:$0xff] %vm1429_vm6, %v6009_v36 }
 0x1be   : > { %1435 = vst.msk [vmem:[#allocation5 + $0x28] sm:$0xff] %vm1429_vm6, %v6009_v36 }
 0x1bf   : > { %1436 = vst.msk [vmem:[#allocation5 + $0x30] sm:$0xff] %vm1429_vm6, %v6009_v36 }
 0x1c0   : > { %v5607_v37 = vld [vmem:[#allocation2 + $0x48] sm:$0xff]  ;;  %1437 = vst.msk [vmem:[#allocation5 + $0x38] sm:$0xff] %vm1429_vm6, %v6009_v36 }
 0x1c1   : > { %1438 = vst.msk [vmem:[#allocation5 + $0x40] sm:$0xff] %vm1429_vm6, %v6009_v36 }
 0x1c2   : > { %1439 = vst.msk [vmem:[#allocation5 + $0x48] sm:$0xff] %vm1429_vm6, %v6009_v36 }
 0x1c3   : > { %5435 = vmatmul.msk.bf16.gmra.mxu1 %vm645_vm1, %v5602_v40  ;;  %5451 = vmatmul.msk.bf16.gmra.mxu2 %vm645_vm1, %v5602_v40  ;;  %v5947_v40 = vld [vmem:[%s6134_s23 + $0xf0] sm:$0xff]  ;;  %1440 = vst.msk [vmem:[#allocation5 + $0x50] sm:$0xff] %vm1429_vm6, %v6009_v36 }
 0x1c4   : > { %5363 = vmatmul.msk.bf16.gmra.mxu3 %vm645_vm1, %v1179_v32  ;;  %v1182_v16 = vpack.c.bf16 %v5948_v47, %v5947_v40  ;;  %1441 = vst.msk [vmem:[#allocation5 + $0x58] sm:$0xff] %vm1429_vm6, %v6009_v36  ;;  %v6010_v47 = vmov 0.0  }
 0x1c5   : > { %1442 = vst.msk [vmem:[#allocation5 + $0x60] sm:$0xff] %vm1429_vm6, %v6009_v36 }
 0x1c6   : > { %1443 = vst.msk [vmem:[#allocation5 + $0x68] sm:$0xff] %vm1429_vm6, %v6009_v36 }
 0x1c7   : > { %1444 = vst.msk [vmem:[#allocation5 + $0x70] sm:$0xff] %vm1429_vm6, %v6009_v36 }
 0x1c8   : > { %1445 = vst.msk [vmem:[#allocation5 + $0x78] sm:$0xff] %vm1429_vm6, %v6009_v36 }
 0x1c9   : > { %1446 = vst.msk [vmem:[#allocation5 + $0x80] sm:$0xff] %vm1429_vm6, %v6009_v36 }
 0x1ca   : > { %1447 = vst.msk [vmem:[#allocation5 + $0x88] sm:$0xff] %vm1429_vm6, %v6009_v36 }
 0x1cb   : > { %1448 = vst.msk [vmem:[#allocation5 + $0x90] sm:$0xff] %vm1429_vm6, %v6009_v36 }
 0x1cc   : > { %1449 = vst.msk [vmem:[#allocation5 + $0x98] sm:$0xff] %vm1429_vm6, %v6009_v36 }
 0x1cd   : > { %1450 = vst.msk [vmem:[#allocation5 + $0xa0] sm:$0xff] %vm1429_vm6, %v6009_v36 }
 0x1ce   : > { %1451 = vst.msk [vmem:[#allocation5 + $0xa8] sm:$0xff] %vm1429_vm6, %v6009_v36 }
 0x1cf   : > { %1452 = vst.msk [vmem:[#allocation5 + $0xb0] sm:$0xff] %vm1429_vm6, %v6009_v36 }
 0x1d0   : > { %1453 = vst.msk [vmem:[#allocation5 + $0xb8] sm:$0xff] %vm1429_vm6, %v6009_v36 }
 0x1d1   : > { %1454 = vst.msk [vmem:[#allocation5 + $0xc0] sm:$0xff] %vm1429_vm6, %v6009_v36 }
 0x1d2   : > { %1455 = vst.msk [vmem:[#allocation5 + $0xc8] sm:$0xff] %vm1429_vm6, %v6009_v36 }
 0x1d3   : > { %5436 = vmatmul.msk.bf16.gmra.mxu1 %vm645_vm1, %v5603_v10  ;;  %5452 = vmatmul.msk.bf16.gmra.mxu2 %vm645_vm1, %v5603_v10  ;;  %1456 = vst.msk [vmem:[#allocation5 + $0xd0] sm:$0xff] %vm1429_vm6, %v6009_v36 }
 0x1d4   : > { %5364 = vmatmul.msk.bf16.gmra.mxu3 %vm645_vm1, %v1180_v43  ;;  %1457 = vst.msk [vmem:[#allocation5 + $0xd8] sm:$0xff] %vm1429_vm6, %v6009_v36 }
 0x1d5   : > { %1458 = vst.msk [vmem:[#allocation5 + $0xe0] sm:$0xff] %vm1429_vm6, %v6009_v36 }
 0x1d6   : > { %1459 = vst.msk [vmem:[#allocation5 + $0xe8] sm:$0xff] %vm1429_vm6, %v6009_v36 }
 0x1d7   : > { %1460 = vst.msk [vmem:[#allocation5 + $0xf0] sm:$0xff] %vm1429_vm6, %v6009_v36 }
 0x1d8   : > { %1461 = vst.msk [vmem:[#allocation5 + $0xf8] sm:$0xff] %vm1429_vm6, %v6009_v36 }
 0x1d9   : > { %1496 = vst.msk [vmem:[#allocation7 + $0x8] sm:$0xff] %vm645_vm1, %v6010_v47 }
 0x1da   : > { %1462 = vst.msk [vmem:[#allocation6] sm:$0xff] %vm1429_vm6, %v6010_v47 }
 0x1db   : > { %1463 = vst.msk [vmem:[#allocation6 + $0x8] sm:$0xff] %vm1429_vm6, %v6010_v47 }
 0x1dc   : > { %1464 = vst.msk [vmem:[#allocation6 + $0x10] sm:$0xff] %vm1429_vm6, %v6010_v47 }
 0x1dd   : > { %1465 = vst.msk [vmem:[#allocation6 + $0x18] sm:$0xff] %vm1429_vm6, %v6010_v47 }
 0x1de   : > { %1466 = vst.msk [vmem:[#allocation6 + $0x20] sm:$0xff] %vm1429_vm6, %v6010_v47 }
 0x1df   : > { %1467 = vst.msk [vmem:[#allocation6 + $0x28] sm:$0xff] %vm1429_vm6, %v6010_v47 }
 0x1e0   : > { %1468 = vst.msk [vmem:[#allocation6 + $0x30] sm:$0xff] %vm1429_vm6, %v6010_v47 }
 0x1e1   : > { %1469 = vst.msk [vmem:[#allocation6 + $0x38] sm:$0xff] %vm1429_vm6, %v6010_v47 }
 0x1e2   : > { %1470 = vst.msk [vmem:[#allocation6 + $0x40] sm:$0xff] %vm1429_vm6, %v6010_v47 }
 0x1e3   : > { %5437 = vmatmul.msk.bf16.gmra.mxu1 %vm645_vm1, %v5604_v13  ;;  %5453 = vmatmul.msk.bf16.gmra.mxu2 %vm645_vm1, %v5604_v13  ;;  %1471 = vst.msk [vmem:[#allocation6 + $0x48] sm:$0xff] %vm1429_vm6, %v6010_v47 }
 0x1e4   : > { %5365 = vmatmul.msk.bf16.gmra.mxu3 %vm645_vm1, %v1181_v59  ;;  %1472 = vst.msk [vmem:[#allocation6 + $0x50] sm:$0xff] %vm1429_vm6, %v6010_v47 }
 0x1e5   : > { %1473 = vst.msk [vmem:[#allocation6 + $0x58] sm:$0xff] %vm1429_vm6, %v6010_v47 }
 0x1e6   : > { %1474 = vst.msk [vmem:[#allocation6 + $0x60] sm:$0xff] %vm1429_vm6, %v6010_v47 }
 0x1e7   : > { %1475 = vst.msk [vmem:[#allocation6 + $0x68] sm:$0xff] %vm1429_vm6, %v6010_v47 }
 0x1e8   : > { %1476 = vst.msk [vmem:[#allocation6 + $0x70] sm:$0xff] %vm1429_vm6, %v6010_v47 }
 0x1e9   : > { %1477 = vst.msk [vmem:[#allocation6 + $0x78] sm:$0xff] %vm1429_vm6, %v6010_v47 }
 0x1ea   : > { %1478 = vst.msk [vmem:[#allocation6 + $0x80] sm:$0xff] %vm1429_vm6, %v6010_v47 }
 0x1eb   : > { %1479 = vst.msk [vmem:[#allocation6 + $0x88] sm:$0xff] %vm1429_vm6, %v6010_v47 }
 0x1ec   : > { %1480 = vst.msk [vmem:[#allocation6 + $0x90] sm:$0xff] %vm1429_vm6, %v6010_v47 }
 0x1ed   : > { %1481 = vst.msk [vmem:[#allocation6 + $0x98] sm:$0xff] %vm1429_vm6, %v6010_v47 }
 0x1ee   : > { %1482 = vst.msk [vmem:[#allocation6 + $0xa0] sm:$0xff] %vm1429_vm6, %v6010_v47 }
 0x1ef   : > { %1483 = vst.msk [vmem:[#allocation6 + $0xa8] sm:$0xff] %vm1429_vm6, %v6010_v47 }
 0x1f0   : > { %1484 = vst.msk [vmem:[#allocation6 + $0xb0] sm:$0xff] %vm1429_vm6, %v6010_v47 }
 0x1f1   : > { %1485 = vst.msk [vmem:[#allocation6 + $0xb8] sm:$0xff] %vm1429_vm6, %v6010_v47 }
 0x1f2   : > { %1486 = vst.msk [vmem:[#allocation6 + $0xc0] sm:$0xff] %vm1429_vm6, %v6010_v47 }
 0x1f3   : > { %5438 = vmatmul.msk.bf16.gmra.mxu1 %vm645_vm1, %v5605_v4  ;;  %5454 = vmatmul.msk.bf16.gmra.mxu2 %vm645_vm1, %v5605_v4  ;;  %1487 = vst.msk [vmem:[#allocation6 + $0xc8] sm:$0xff] %vm1429_vm6, %v6010_v47 }
 0x1f4   : > { %5366 = vmatmul.msk.bf16.gmra.mxu3 %vm645_vm1, %v1182_v16  ;;  %v1875_v16 = vld [vmem:[#allocation5] sm:$0xff]  ;;  %1488 = vst.msk [vmem:[#allocation6 + $0xd0] sm:$0xff] %vm1429_vm6, %v6010_v47 }
 0x1f5   : > { %1489 = vst.msk [vmem:[#allocation6 + $0xd8] sm:$0xff] %vm1429_vm6, %v6010_v47 }
 0x1f6   : > { %1490 = vst.msk [vmem:[#allocation6 + $0xe0] sm:$0xff] %vm1429_vm6, %v6010_v47 }
 0x1f7   : > { %1491 = vst.msk [vmem:[#allocation6 + $0xe8] sm:$0xff] %vm1429_vm6, %v6010_v47 }
 0x1f8   : > { %1492 = vst.msk [vmem:[#allocation6 + $0xf0] sm:$0xff] %vm1429_vm6, %v6010_v47 }
 0x1f9   : > { %1493 = vst.msk [vmem:[#allocation6 + $0xf8] sm:$0xff] %vm1429_vm6, %v6010_v47 }
 0x1fa   : > { %1495 = vst.msk [vmem:[#allocation7] sm:$0xff] %vm645_vm1, %v6010_v47 }
 0x1fb   : > { %1497 = vst.msk [vmem:[#allocation7 + $0x10] sm:$0xff] %vm645_vm1, %v6010_v47 }
 0x1fc   : > { %1498 = vst.msk [vmem:[#allocation7 + $0x18] sm:$0xff] %vm645_vm1, %v6010_v47 }
 0x1fd   : > { %1499 = vst.msk [vmem:[#allocation7 + $0x20] sm:$0xff] %vm645_vm1, %v6010_v47 }
 0x1fe   : > { %1500 = vst.msk [vmem:[#allocation7 + $0x28] sm:$0xff] %vm645_vm1, %v6010_v47 }
 0x1ff   : > { %1501 = vst.msk [vmem:[#allocation7 + $0x30] sm:$0xff] %vm645_vm1, %v6010_v47 }
 0x200   : > { %v6753_v44 = vpop.f32.mrf.mxu1  ;;  %1502 = vst.msk [vmem:[#allocation7 + $0x38] sm:$0xff] %vm645_vm1, %v6010_v47 }
 0x201   : > { %1503 = vst.msk [vmem:[#allocation7 + $0x40] sm:$0xff] %vm645_vm1, %v6010_v47 }
 0x202   : > { %1504 = vst.msk [vmem:[#allocation7 + $0x48] sm:$0xff] %vm645_vm1, %v6010_v47 }
 0x203   : > { %5439 = vmatmul.msk.bf16.gmra.mxu1 %vm645_vm1, %v5606_v38  ;;  %5455 = vmatmul.msk.bf16.gmra.mxu2 %vm645_vm1, %v5606_v38  ;;  %1505 = vst.msk [vmem:[#allocation7 + $0x50] sm:$0xff] %vm645_vm1, %v6010_v47 }
 0x204   : > { %1506 = vst.msk [vmem:[#allocation7 + $0x58] sm:$0xff] %vm645_vm1, %v6010_v47 }
 0x205   : > { %1507 = vst.msk [vmem:[#allocation7 + $0x60] sm:$0xff] %vm645_vm1, %v6010_v47 }
 0x206   : > { %v6757_v15 = vpop.f32.mrf.mxu2  ;;  %1508 = vst.msk [vmem:[#allocation7 + $0x68] sm:$0xff] %vm645_vm1, %v6010_v47 }
 0x207   : > { %v1907_v18 = vmax.f32 %v6753_v44, %v6757_v15  ;;  %v1288_v10 = vpop.f32.mrf.mxu3  ;;  %1509 = vst.msk [vmem:[#allocation7 + $0x70] sm:$0xff] %vm645_vm1, %v6010_v47 }
 0x208   : > { %v6761_v50 = vpop.f32.mrf.mxu1  ;;  %v1289_v20 = vadd.f32 %v6657_v27, %v1288_v10  ;;  %1510 = vst.msk [vmem:[#allocation7 + $0x78] sm:$0xff] %vm645_vm1, %v6010_v47 }
 0x209   : > { %1908 = vmax.xlane.f32.xlu0 %v1907_v18  ;;  %1511 = vst.msk [vmem:[#allocation7 + $0x80] sm:$0xff] %vm645_vm1, %v6010_v47 }
 0x20a   : > { %v1344_v24 = vpack.c.bf16 %v1289_v20, %v1289_v20  ;;  %1512 = vst.msk [vmem:[#allocation7 + $0x88] sm:$0xff] %vm645_vm1, %v6010_v47 }
 0x20b   : > { %1513 = vst.msk [vmem:[#allocation7 + $0x90] sm:$0xff] %vm645_vm1, %v6010_v47 }
 0x20c   : > { %1376 = vst.msk [vmem:[#allocation4 + $0x40] sm:$0xf] %vm1090_vm5, %v1344_v24 }
 0x20d   : > { %1514 = vst.msk [vmem:[#allocation7 + $0x98] sm:$0xff] %vm645_vm1, %v6010_v47 }
 0x20e   : > { %v6766_v48 = vpop.f32.mrf.mxu2  ;;  %1515 = vst.msk [vmem:[#allocation7 + $0xa0] sm:$0xff] %vm645_vm1, %v6010_v47 }
 0x20f   : > { %v1910_v35 = vmax.f32 %v6761_v50, %v6766_v48  ;;  %v1290_v13 = vpop.f32.mrf.mxu3  ;;  %1516 = vst.msk [vmem:[#allocation7 + $0xa8] sm:$0xff] %vm645_vm1, %v6010_v47 }
 0x210   : > { %v6770_v9 = vpop.f32.mrf.mxu1  ;;  %v1291_v34 = vadd.f32 %v6657_v27, %v1290_v13  ;;  %1517 = vst.msk [vmem:[#allocation7 + $0xb0] sm:$0xff] %vm645_vm1, %v6010_v47 }
 0x211   : > { %1911 = vmax.xlane.f32.xlu1 %v1910_v35  ;;  %1518 = vst.msk [vmem:[#allocation7 + $0xb8] sm:$0xff] %vm645_vm1, %v6010_v47 }
 0x212   : > { %v1345_v39 = vpack.c.bf16 %v1291_v34, %v1291_v34  ;;  %1519 = vst.msk [vmem:[#allocation7 + $0xc0] sm:$0xff] %vm645_vm1, %v6010_v47 }
 0x213   : > { %5440 = vmatmul.msk.bf16.gmra.mxu1 %vm645_vm1, %v5607_v37  ;;  %5456 = vmatmul.msk.bf16.gmra.mxu2 %vm645_vm1, %v5607_v37  ;;  %1520 = vst.msk [vmem:[#allocation7 + $0xc8] sm:$0xff] %vm645_vm1, %v6010_v47 }
 0x214   : > { %1377 = vst.msk [vmem:[#allocation4 + $0x44] sm:$0xf] %vm1090_vm5, %v1345_v39 }
 0x215   : > { %1521 = vst.msk [vmem:[#allocation7 + $0xd0] sm:$0xff] %vm645_vm1, %v6010_v47 }
 0x216   : > { %v6774_v28 = vpop.f32.mrf.mxu2  ;;  %1522 = vst.msk [vmem:[#allocation7 + $0xd8] sm:$0xff] %vm645_vm1, %v6010_v47 }
 0x217   : > { %v1913_v21 = vmax.f32 %v6770_v9, %v6774_v28  ;;  %v1293_v4 = vpop.f32.mrf.mxu3  ;;  %1523 = vst.msk [vmem:[#allocation7 + $0xe0] sm:$0xff] %vm645_vm1, %v6010_v47 }
 0x218   : > { %v6778_v41 = vpop.f32.mrf.mxu1  ;;  %v1294_v5 = vadd.f32 %v6657_v27, %v1293_v4  ;;  %1524 = vst.msk [vmem:[#allocation7 + $0xe8] sm:$0xff] %vm645_vm1, %v6010_v47 }
 0x219   : > { %1914 = vmax.xlane.f32.xlu1 %v1913_v21  ;;  %1525 = vst.msk [vmem:[#allocation7 + $0xf0] sm:$0xff] %vm645_vm1, %v6010_v47 }
 0x21a   : > { %v1346_v31 = vpack.c.bf16 %v1294_v5, %v1294_v5  ;;  %1526 = vst.msk [vmem:[#allocation7 + $0xf8] sm:$0xff] %vm645_vm1, %v6010_v47 }
 0x21c   : > { %1378 = vst.msk [vmem:[#allocation4 + $0x48] sm:$0xf] %vm1090_vm5, %v1346_v31 }
 0x21e   : > { %v6783_v45 = vpop.f32.mrf.mxu2 }
 0x21f   : > { %v1916_v46 = vmax.f32 %v6778_v41, %v6783_v45  ;;  %v1295_v62 = vpop.f32.mrf.mxu3 }
 0x220   : > { %v6787_v55 = vpop.f32.mrf.mxu1  ;;  %v1296_v32 = vadd.f32 %v6657_v27, %v1295_v62 }
 0x221   : > { %1917 = vmax.xlane.f32.xlu2 %v1916_v46 }
 0x222   : > { %v1347_v35 = vpack.c.bf16 %v1296_v32, %v1296_v32 }
 0x223   : > { %5441 = vmatmul.msk.bf16.gmra.mxu1 %vm645_vm1, %v5608_v49  ;;  %5457 = vmatmul.msk.bf16.gmra.mxu2 %vm645_vm1, %v5608_v49 }
 0x224   : > { %1379 = vst.msk [vmem:[#allocation4 + $0x4c] sm:$0xf] %vm1090_vm5, %v1347_v35 }
 0x226   : > { %v6791_v52 = vpop.f32.mrf.mxu2 }
 0x227   : > { %v1919_v54 = vmax.f32 %v6787_v55, %v6791_v52  ;;  %v1298_v26 = vpop.f32.mrf.mxu3 }
 0x228   : > { %v6795_v53 = vpop.f32.mrf.mxu1  ;;  %v1299_v49 = vadd.f32 %v6657_v27, %v1298_v26 }
 0x229   : > { %1920 = vmax.xlane.f32.xlu2 %v1919_v54  ;;  %v5613_v54 = vld [vmem:[#allocation2 + $0x78] sm:$0xff] }
 0x22a   : > { %v1348_v58 = vpack.c.bf16 %v1299_v49, %v1299_v49  ;;  %v7009_v49 = vld [vmem:[#allocation5 + $0x18] sm:$0xff] }
 0x22c   : > { %1380 = vst.msk [vmem:[#allocation4 + $0x50] sm:$0xf] %vm1090_vm5, %v1348_v58 }
 0x22e   : > { %v6800_v60 = vpop.f32.mrf.mxu2 }
 0x22f   : > { %v1922_v61 = vmax.f32 %v6795_v53, %v6800_v60  ;;  %v1300_v59 = vpop.f32.mrf.mxu3 }
 0x230   : > { %v6804_v63 = vpop.f32.mrf.mxu1 }
 0x231   : > { %1923 = vmax.xlane.f32.xlu1 %v1922_v61 }
 0x233   : > { %5442 = vmatmul.msk.bf16.gmra.mxu1 %vm645_vm1, %v5609_v29  ;;  %5458 = vmatmul.msk.bf16.gmra.mxu2 %vm645_vm1, %v5609_v29  ;;  %v1301_v29 = vadd.f32 %v6657_v27, %v1300_v59 }
 0x235   : > { %v1349_v40 = vpack.c.bf16 %v1301_v29, %v1301_v29 }
 0x236   : > { %v6808_v1 = vpop.f32.mrf.mxu2 }
 0x237   : > { %v1925_v6 = vmax.f32 %v6804_v63, %v6808_v1  ;;  %1381 = vst.msk [vmem:[#allocation4 + $0x54] sm:$0xf] %vm1090_vm5, %v1349_v40  ;;  %v1303_v10 = vpop.f32.mrf.mxu3 }
 0x238   : > { %v6812_v7 = vpop.f32.mrf.mxu1  ;;  %v1304_v24 = vadd.f32 %v6657_v27, %v1303_v10  ;;  %v7036_v10 = vld [vmem:[#allocation5 + $0x20] sm:$0xff] }
 0x239   : > { %1926 = vmax.xlane.f32.xlu2 %v1925_v6 }
 0x23e   : > { %v6817_v22 = vpop.f32.mrf.mxu2 }
 0x23f   : > { %v1928_v23 = vmax.f32 %v6812_v7, %v6817_v22  ;;  %v1305_v36 = vpop.f32.mrf.mxu3 }
 0x240   : > { %v6821_v14 = vpop.f32.mrf.mxu1  ;;  %v1306_v4 = vadd.f32 %v6657_v27, %v1305_v36 }
 0x241   : > { %1929 = vmax.xlane.f32.xlu1 %v1928_v23 }
 0x242   : > { %v1351_v31 = vpack.c.bf16 %v1306_v4, %v1306_v4  ;;  %v7060_v4 = vld [vmem:[#allocation5 + $0x28] sm:$0xff] }
 0x243   : > { %5443 = vmatmul.msk.bf16.gmra.mxu1 %vm645_vm1, %v5610_v0  ;;  %5459 = vmatmul.msk.bf16.gmra.mxu2 %vm645_vm1, %v5610_v0 }
 0x244   : > { %1383 = vst.msk [vmem:[#allocation4 + $0x5c] sm:$0xf] %vm1090_vm5, %v1351_v31 }
 0x246   : > { %v6825_v25 = vpop.f32.mrf.mxu2 }
 0x247   : > { %v1931_v33 = vmax.f32 %v6821_v14, %v6825_v25  ;;  %v1308_v35 = vpop.f32.mrf.mxu3 }
 0x248   : > { %v6829_v19 = vpop.f32.mrf.mxu1 }
 0x249   : > { %1932 = vmax.xlane.f32.xlu0 %v1931_v33 }
 0x24e   : > { %v6833_v11 = vpop.f32.mrf.mxu2 }
 0x24f   : > { %v1934_v30 = vmax.f32 %v6829_v19, %v6833_v11  ;;  %v1310_v59 = vpop.f32.mrf.mxu3 }
 0x250   : > { %v6837_v8 = vpop.f32.mrf.mxu1 }
 0x251   : > { %1935 = vmax.xlane.f32.xlu2 %v1934_v30  ;;  %v1350_v30 = vpack.c.bf16 %v1304_v24, %v1304_v24 }
 0x253   : > { %5444 = vmatmul.msk.bf16.gmra.mxu1 %vm645_vm1, %v5611_v17  ;;  %5460 = vmatmul.msk.bf16.gmra.mxu2 %vm645_vm1, %v5611_v17  ;;  %v1876_v17 = vld [vmem:[#allocation5 + $0x8] sm:$0xff]  ;;  %1382 = vst.msk [vmem:[#allocation4 + $0x58] sm:$0xf] %vm1090_vm5, %v1350_v30 }
 0x256   : > { %v6844_v51 = vpop.f32.mrf.mxu2 }
 0x257   : > { %v1937_v2 = vmax.f32 %v6837_v8, %v6844_v51  ;;  %v1313_v30 = vpop.f32.mrf.mxu3 }
 0x258   : > { %v6852_v3 = vpop.f32.mrf.mxu1 }
 0x259   : > { %1938 = vmax.xlane.f32.xlu2 %v1937_v2 }
 0x25e   : > { %v6866_v12 = vpop.f32.mrf.mxu2 }
 0x25f   : > { %v1940_v38 = vmax.f32 %v6852_v3, %v6866_v12 }
 0x260   : > { %v6874_v18 = vpop.f32.mrf.mxu1 }
 0x261   : > { %1941 = vmax.xlane.f32.xlu1 %v1940_v38  ;;  %v6988_v38 = vld [vmem:[#allocation5 + $0x10] sm:$0xff] }
 0x263   : > { %5445 = vmatmul.msk.bf16.gmra.mxu1 %vm645_vm1, %v5612_v56  ;;  %5461 = vmatmul.msk.bf16.gmra.mxu2 %vm645_vm1, %v5612_v56 }
 0x266   : > { %v6890_v37 = vpop.f32.mrf.mxu2 }
 0x267   : > { %v1943_v21 = vmax.f32 %v6874_v18, %v6890_v37 }
 0x268   : > { %v6898_v42 = vpop.f32.mrf.mxu1 }
 0x269   : > { %9624 = vst [vmem:[#allocation8_spill] sm:$0xff] %v6898_v42  ;;  %1944 = vmax.xlane.f32.xlu0 %v1943_v21  ;;  %v1309_v21 = vadd.f32 %v6657_v27, %v1308_v35 }
 0x26e   : > { %v6911_v43 = vpop.f32.mrf.mxu2 }
 0x26f   : > { %9625 = vst [vmem:[#allocation9_spill] sm:$0xff] %v6911_v43  ;;  %v1946_v46 = vmax.f32 %v6898_v42, %v6911_v43 }
 0x270   : > { %v6924_v57 = vpop.f32.mrf.mxu1 }
 0x271   : > { %1947 = vmax.xlane.f32.xlu2 %v1946_v46  ;;  %9626 = vst [vmem:[#allocation10_spill] sm:$0xff] %v6924_v57  ;;  %v1352_v46 = vpack.c.bf16 %v1309_v21, %v1309_v21 }
 0x273   : > { %5446 = vmatmul.msk.bf16.gmra.mxu1 %vm645_vm1, %v5613_v54  ;;  %5462 = vmatmul.msk.bf16.gmra.mxu2 %vm645_vm1, %v5613_v54  ;;  %1384 = vst.msk [vmem:[#allocation4 + $0x60] sm:$0xf] %vm1090_vm5, %v1352_v46  ;;  %v7086_v46 = vld [vmem:[#allocation5 + $0x30] sm:$0xff] }
 0x276   : > { %v6936_v61 = vpop.f32.mrf.mxu2 }
 0x277   : > { %9627 = vst [vmem:[#allocation11_spill] sm:$0xff] %v6936_v61  ;;  %v1949_v6 = vmax.f32 %v6924_v57, %v6936_v61 }
 0x278   : > { %v6951_v23 = vpop.f32.mrf.mxu1 }
 0x279   : > { %1950 = vmax.xlane.f32.xlu1 %v1949_v6  ;;  %v1311_v6 = vadd.f32 %v6657_v27, %v1310_v59 }
 0x27c   : > { %v1909_v0 = vpop.xlane.xlu0 %1908 }
 0x27d   : > { %v2003_v33 = vmax.f32 %v1875_v16, %v1909_v0 }
 0x27e   : > { %v6957_v20 = vpop.f32.mrf.mxu2 }
 0x27f   : > { %3301 = vst.msk [vmem:[#allocation5] sm:$0xff] %vm1429_vm6, %v2003_v33  ;;  %v2035_v56 = vsub.f32 %v1875_v16, %v2003_v33  ;;  %v1353_v16 = vpack.c.bf16 %v1311_v6, %v1311_v6 }
 0x280   : > { %v6974_v39 = vpop.f32.mrf.mxu1 }
 0x281   : > { %9628 = vst [vmem:[#allocation12_spill] sm:$0xff] %v6974_v39  ;;  %v2067_v26 = vmul.f32 1.442695, %v2035_v56  ;;  %v1315_v56 = vpop.f32.mrf.mxu3 }
 0x282   : > { %1385 = vst.msk [vmem:[#allocation4 + $0x64] sm:$0xf] %vm1090_vm5, %v1353_v16  ;;  %v1316_v35 = vadd.f32 %v6657_v27, %v1315_v56 }
 0x283   : > { %5671 = vpow2.f32 %v2067_v26 }
 0x284   : > { %v1912_v13 = vpop.xlane.xlu1 %1911  ;;  %v1355_v21 = vpack.c.bf16 %v1316_v35, %v1316_v35 }
 0x285   : > { %v2004_v34 = vmax.f32 %v1876_v17, %v1912_v13  ;;  %v1314_v13 = vadd.f32 %v6657_v27, %v1313_v30  ;;  %v7112_v30 = vld [vmem:[#allocation5 + $0x38] sm:$0xff] }
 0x286   : > { %v6976_v2 = vpop.f32.mrf.mxu2  ;;  %1387 = vst.msk [vmem:[#allocation4 + $0x6c] sm:$0xf] %vm1090_vm5, %v1355_v21 }
 0x287   : > { %9629 = vst [vmem:[#allocation13_spill] sm:$0xff] %v6976_v2  ;;  %v1955_v5 = vmax.f32 %v6974_v39, %v6976_v2  ;;  %v2036_v29 = vsub.f32 %v1876_v17, %v2004_v34  ;;  %v1354_v36 = vpack.c.bf16 %v1314_v13, %v1314_v13 }
 0x288   : > { %3302 = vst.msk [vmem:[#allocation5 + $0x8] sm:$0xff] %vm1429_vm6, %v2004_v34  ;;  %v7083_v26 = vpop.f32.mrf.mxu1 }
 0x289   : > { %2133 = vperm.xlu2 %5661, %v2003_v33   ;;  %1956 = vmax.xlane.f32.xlu0 %v1955_v5  ;;  %v7030_v0 = vpop.eup %5671  ;;  %v2069_v33 = vmul.f32 1.442695, %v2036_v29  ;;  %1386 = vst.msk [vmem:[#allocation4 + $0x68] sm:$0xf] %vm1090_vm5, %v1354_v36  ;;  %v1318_v29 = vpop.f32.mrf.mxu3 }
 0x28a   : > { %9630 = vst [vmem:[#allocation14_spill] sm:$0xff] %v7030_v0  ;;  %v1319_v16 = vadd.f32 %v6657_v27, %v1318_v29 }
 0x28b   : > { %5673 = vpow2.f32 %v2069_v33  ;;  %9632 = vst [vmem:[#allocation16_spill] sm:$0xff] %v7083_v26  ;;  %v1952_v33 = vmax.f32 %v6951_v23, %v6957_v20 }
 0x28c   : > { %v1915_v62 = vpop.xlane.xlu1 %1914 }
 0x28d   : > { %v6996_v32 = vmax.f32 %v6988_v38, %v1915_v62 }
 0x28f   : > { %3303 = vst.msk [vmem:[#allocation5 + $0x10] sm:$0xff] %vm1429_vm6, %v6996_v32 }
 0x290   : > { %v7116_v13 = vpop.f32.mrf.mxu1 }
 0x291   : > { %v7064_v5 = vpop.eup %5673  ;;  %9634 = vst [vmem:[#allocation18_spill] sm:$0xff] %v7116_v13  ;;  %v1320_v56 = vpop.f32.mrf.mxu3 }
 0x292   : > { %2138 = vperm.xlu1 %5662, %v2004_v34   ;;  %9631 = vst [vmem:[#allocation15_spill] sm:$0xff] %v7064_v5 }
 0x294   : > { %v1918_v54 = vpop.xlane.xlu2 %1917 }
 0x295   : > { %v7017_v58 = vmax.f32 %v7009_v49, %v1918_v54  ;;  %v7088_v54 = vpop.f32.mrf.mxu2 }
 0x296   : > { %9633 = vst [vmem:[#allocation17_spill] sm:$0xff] %v7088_v54 }
 0x297   : > { %3304 = vst.msk [vmem:[#allocation5 + $0x18] sm:$0xff] %vm1429_vm6, %v7017_v58 }
 0x29a   : > { %2741 = vperm.xlu1 %5662, %v7030_v0  }
 0x29c   : > { %v1921_v24 = vpop.xlane.xlu2 %1920 }
 0x29d   : > { %2143 = vperm.xlu0 %5660, %v6996_v32   ;;  %v7044_v17 = vmax.f32 %v7036_v10, %v1921_v24  ;;  %v1356_v24 = vpack.c.bf16 %v1319_v16, %v1319_v16  ;;  %v7139_v16 = vld [vmem:[#allocation5 + $0x40] sm:$0xff] }
 0x29f   : > { %3305 = vst.msk [vmem:[#allocation5 + $0x20] sm:$0xff] %vm1429_vm6, %v7044_v17 }
 0x2a0   : > { %1388 = vst.msk [vmem:[#allocation4 + $0x70] sm:$0xf] %vm1090_vm5, %v1356_v24  ;;  %v1323_v24 = vpop.f32.mrf.mxu3 }
 0x2a4   : > { %v1924_v31 = vpop.xlane.xlu1 %1923 }
 0x2a5   : > { %2746 = vperm.xlu0 %5660, %v7064_v5   ;;  %v7070_v62 = vmax.f32 %v7060_v4, %v1924_v31  ;;  %v7120_v31 = vpop.f32.mrf.mxu2 }
 0x2a6   : > { %9635 = vst [vmem:[#allocation19_spill] sm:$0xff] %v7120_v31  ;;  %v1961_v21 = vmax.f32 %v7116_v13, %v7120_v31 }
 0x2a7   : > { %3306 = vst.msk [vmem:[#allocation5 + $0x28] sm:$0xff] %vm1429_vm6, %v7070_v62 }
 0x2a8   : > { %v1325_v34 = vpop.f32.mrf.mxu3 }
 0x2ac   : > { %v1927_v59 = vpop.xlane.xlu2 %1926 }
 0x2ad   : > { %2148 = vperm.xlu0 %5660, %v7017_v58   ;;  %v7096_v6 = vmax.f32 %v7086_v46, %v1927_v59  ;;  %v1321_v59 = vadd.f32 %v6657_v27, %v1320_v56  ;;  %v1324_v56 = vadd.f32 %v6657_v27, %v1323_v24 }
 0x2af   : > { %3307 = vst.msk [vmem:[#allocation5 + $0x30] sm:$0xff] %vm1429_vm6, %v7096_v6  ;;  %v1357_v29 = vpack.c.bf16 %v1321_v59, %v1321_v59  ;;  %v1958_v59 = vmax.f32 %v7083_v26, %v7088_v54  ;;  %v9641_v26 = vsub.f32 %v7009_v49, %v7017_v58  ;;  %v5625_v49 = vld [vmem:[#allocation4 + $0x58] sm:$0xff]  ;;  %v7234_v58 = vld [vmem:[#allocation5 + $0x68] sm:$0xff] }
 0x2b1   : > { %1389 = vst.msk [vmem:[#allocation4 + $0x74] sm:$0xf] %vm1090_vm5, %v1357_v29  ;;  %v7161_v29 = vld [vmem:[#allocation5 + $0x48] sm:$0xff]  ;;  %v2073_v2 = vmul.f32 1.442695, %v9641_v26 }
 0x2b2   : > { %1953 = vmax.xlane.f32.xlu2 %v1952_v33 }
 0x2b4   : > { %v1930_v36 = vpop.xlane.xlu1 %1929 }
 0x2b5   : > { %v7123_v35 = vmax.f32 %v7112_v30, %v1930_v36 }
 0x2b7   : > { %3308 = vst.msk [vmem:[#allocation5 + $0x38] sm:$0xff] %vm1429_vm6, %v7123_v35 }
 0x2b8   : > { %v5628_v54 = vld [vmem:[#allocation4 + $0x70] sm:$0xff] }
 0x2ba   : > { %1962 = vmax.xlane.f32.xlu2 %v1961_v21  ;;  %v1358_v21 = vpack.c.bf16 %v1324_v56, %v1324_v56 }
 0x2bc   : > { %v1933_v33 = vpop.xlane.xlu0 %1932  ;;  %1390 = vst.msk [vmem:[#allocation4 + $0x78] sm:$0xf] %vm1090_vm5, %v1358_v21  ;;  %v1326_v21 = vadd.f32 %v6657_v27, %v1325_v34  ;;  %v7190_v34 = vld [vmem:[#allocation5 + $0x50] sm:$0xff] }
 0x2bd   : > { %v7146_v36 = vmax.f32 %v7139_v16, %v1933_v33  ;;  %v2037_v33 = vsub.f32 %v6988_v38, %v6996_v32  ;;  %v7180_v32 = vpop.f32.mrf.mxu2 }
 0x2be   : > { %9636 = vst [vmem:[#allocation20_spill] sm:$0xff] %v7180_v32 }
 0x2bf   : > { %3309 = vst.msk [vmem:[#allocation5 + $0x40] sm:$0xff] %vm1429_vm6, %v7146_v36  ;;  %v2071_v38 = vmul.f32 1.442695, %v2037_v33 }
 0x2c1   : > { %5675 = vpow2.f32 %v2071_v38 }
 0x2c2   : > { %5677 = vpow2.f32 %v2073_v2  ;;  %v5624_v2 = vld [vmem:[#allocation4 + $0x50] sm:$0xff] }
 0x2c4   : > { %1959 = vmax.xlane.f32.xlu1 %v1958_v59  ;;  %v1936_v24 = vpop.xlane.xlu2 %1935  ;;  %v1359_v59 = vpack.c.bf16 %v1326_v21, %v1326_v21 }
 0x2c5   : > { %v7171_v56 = vmax.f32 %v7161_v29, %v1936_v24  ;;  %v7184_v24 = vpop.f32.mrf.mxu1  ;;  %v7206_v38 = vpop.f32.mrf.mxu2 }
 0x2c6   : > { %9637 = vst [vmem:[#allocation21_spill] sm:$0xff] %v7184_v24  ;;  %v1964_v27 = vmax.f32 %v7184_v24, %v7180_v32 }
 0x2c7   : > { %3310 = vst.msk [vmem:[#allocation5 + $0x48] sm:$0xff] %vm1429_vm6, %v7171_v56  ;;  %v7204_v40 = vpop.eup %5675 }
 0x2c8   : > { %1391 = vst.msk [vmem:[#allocation4 + $0x7c] sm:$0xf] %vm1090_vm5, %v1359_v59  ;;  %v7236_v26 = vpop.eup %5677 }
 0x2c9   : > { %9638 = vst [vmem:[#allocation22_spill] sm:$0xff] %v7204_v40 }
 0x2ca   : > { %9639 = vst [vmem:[#allocation23_spill] sm:$0xff] %v7206_v38 }
 0x2cb   : > { %9643 = vst [vmem:[#allocation25_spill] sm:$0xff] %v7236_v26 }
 0x2cc   : > { %1965 = vmax.xlane.f32.xlu1 %v1964_v27  ;;  %v1939_v33 = vpop.xlane.xlu2 %1938  ;;  %v7209_v27 = vld [vmem:[#allocation5 + $0x58] sm:$0xff] }
 0x2cd   : > { %v7198_v21 = vmax.f32 %v7190_v34, %v1939_v33  ;;  %v7211_v31 = vpop.f32.mrf.mxu1 }
 0x2ce   : > { %9640 = vst [vmem:[#allocation24_spill] sm:$0xff] %v7211_v31  ;;  %v1967_v13 = vmax.f32 %v7211_v31, %v7206_v38 }
 0x2cf   : > { %3311 = vst.msk [vmem:[#allocation5 + $0x50] sm:$0xff] %vm1429_vm6, %v7198_v21  ;;  %v5629_v59 = vld [vmem:[#allocation4 + $0x78] sm:$0xff] }
 0x2d0   : > { %3148 = vmatpush.bf16.msrb.mxu3 %v5629_v59  ;;  %v7224_v59 = vld [vmem:[#allocation5 + $0x60] sm:$0xff] }
 0x2d2   : > { %2751 = vperm.xlu2 %5661, %v7204_v40   ;;  %v5627_v40 = vld [vmem:[#allocation4 + $0x68] sm:$0xff] }
 0x2d4   : > { %v1942_v33 = vpop.xlane.xlu1 %1941  ;;  %3149 = vmatpush.bf16.msrb.mxu3 %v5628_v54  ;;  %v9642_v54 = vsub.f32 %v7036_v10, %v7044_v17 }
 0x2d5   : > { %v7216_v47 = vmax.f32 %v7209_v27, %v1942_v33 }
 0x2d6   : > { %v2075_v31 = vmul.f32 1.442695, %v9642_v54 }
 0x2d7   : > { %1968 = vmax.xlane.f32.xlu0 %v1967_v13  ;;  %3312 = vst.msk [vmem:[#allocation5 + $0x58] sm:$0xff] %vm1429_vm6, %v7216_v47  ;;  %v5626_v13 = vld [vmem:[#allocation4 + $0x60] sm:$0xff] }
 0x2d8   : > { %3150 = vmatpush.bf16.msrb.mxu3 %v5627_v40  ;;  %5679 = vpow2.f32 %v2075_v31 }
 0x2da   : > { %2153 = vperm.xlu2 %5661, %v7044_v17   ;;  %v7246_v17 = vld [vmem:[#allocation5 + $0x70] sm:$0xff] }
 0x2db   : > { %9645 = vst [vmem:[#allocation27_spill] sm:$0xff] %v7246_v17 }
 0x2dc   : > { %v1945_v38 = vpop.xlane.xlu0 %1944  ;;  %3151 = vmatpush.bf16.msrb.mxu3 %v5626_v13  ;;  %v5623_v13 = vld [vmem:[#allocation4 + $0x48] sm:$0xff] }
 0x2dd   : > { %v7227_v33 = vmax.f32 %v7224_v59, %v1945_v38 }
 0x2de   : > { %v7244_v10 = vpop.eup %5679 }
 0x2df   : > { %3313 = vst.msk [vmem:[#allocation5 + $0x60] sm:$0xff] %vm1429_vm6, %v7227_v33 }
 0x2e0   : > { %3152 = vmatpush.bf16.msrb.mxu3 %v5625_v49  ;;  %9644 = vst [vmem:[#allocation26_spill] sm:$0xff] %v7244_v10  ;;  %v5622_v49 = vld [vmem:[#allocation4 + $0x40] sm:$0xff] }
 0x2e4   : > { %v1948_v40 = vpop.xlane.xlu2 %1947  ;;  %3153 = vmatpush.bf16.msrb.mxu3 %v5624_v2 }
 0x2e5   : > { %v7239_v38 = vmax.f32 %v7234_v58, %v1948_v40  ;;  %2756 = vperm.xlu1 %5662, %v7236_v26  }
 0x2e7   : > { %3314 = vst.msk [vmem:[#allocation5 + $0x68] sm:$0xff] %vm1429_vm6, %v7239_v38 }
 0x2e8   : > { %3154 = vmatpush.bf16.msrb.mxu3 %v5623_v13  ;;  %v7258_v13 = vpop.f32.mrf.mxu2 }
 0x2e9   : > { %9646 = vst [vmem:[#allocation28_spill] sm:$0xff] %v7258_v13 }
 0x2eb   : > { %2761 = vperm.xlu0 %5660, %v7244_v10  }
 0x2ec   : > { %v2134_v31 = vpop.permute.xlu2 %2133  ;;  %v1951_v54 = vpop.xlane.xlu1 %1950  ;;  %3155 = vmatpush.bf16.msrb.mxu3 %v5622_v49 }
 0x2ed   : > { %v2291_v40 = vsub.f32 %v6753_v44, %v2134_v31  ;;  %v2292_v26 = vsub.f32 %v6757_v15, %v2134_v31  ;;  %2158 = vperm.xlu1 %5662, %v7070_v62   ;;  %v7253_v39 = vmax.f32 %v7246_v17, %v1951_v54  ;;  %v2041_v44 = vsub.f32 %v7086_v46, %v7096_v6  ;;  %v7262_v15 = vpop.f32.mrf.mxu1 }
 0x2ee   : > { %9647 = vst [vmem:[#allocation29_spill] sm:$0xff] %v7262_v15 }
 0x2ef   : > { %v2355_v2 = vmul.f32 1.442695, %v2291_v40  ;;  %v2357_v5 = vmul.f32 1.442695, %v2292_v26  ;;  %3315 = vst.msk [vmem:[#allocation5 + $0x70] sm:$0xff] %vm1429_vm6, %v7253_v39  ;;  %v7266_v26 = vld [vmem:[#allocation5 + $0x80] sm:$0xff] }
 0x2f0   : > { %v2079_v10 = vmul.f32 1.442695, %v2041_v44  ;;  %9648 = vst [vmem:[#allocation30_spill] sm:$0xff] %v7266_v26 }
 0x2f1   : > { %5681 = vpow2.f32 %v2355_v2  ;;  %v7272_v2 = vpop.f32.mrf.mxu2 }
 0x2f2   : > { %5683 = vpow2.f32 %v2357_v5  ;;  %9650 = vst [vmem:[#allocation32_spill] sm:$0xff] %v7272_v2 }
 0x2f3   : > { %2163 = vperm.xlu0 %5660, %v7096_v6   ;;  %5685 = vpow2.f32 %v2079_v10 }
 0x2f5   : > { %v7276_v46 = vpop.f32.mrf.mxu1 }
 0x2f6   : > { %9651 = vst [vmem:[#allocation33_spill] sm:$0xff] %v7276_v46  ;;  %v1973_v6 = vmax.f32 %v7276_v46, %v7272_v2 }
 0x2f7   : > { %v5682_v31 = vpop.eup %5681 }
 0x2f8   : > { %v5684_v54 = vpop.eup %5683 }
 0x2f9   : > { %v7264_v40 = vadd.f32 %v5684_v54, %v5682_v31  ;;  %v7280_v44 = vpop.eup %5685 }
 0x2fa   : > { %9652 = vst [vmem:[#allocation34_spill] sm:$0xff] %v7280_v44 }
 0x2fb   : > { %2168 = vperm.xlu0 %5660, %v7123_v35  }
 0x2fc   : > { %v1957_v5 = vpop.xlane.xlu0 %1956 }
 0x2fd   : > { %v7270_v49 = vmax.f32 %v7266_v26, %v1957_v5 }
 0x2ff   : > { %9649 = vst [vmem:[#allocation31_spill] sm:$0xff] %v7270_v49 }
 0x300   : > { %3317 = vst.msk [vmem:[#allocation5 + $0x80] sm:$0xff] %vm1429_vm6, %v7270_v49 }
 0x303   : > { %2771 = vperm.xlu0 %5660, %v7280_v44   ;;  %1974 = vmax.xlane.f32.xlu2 %v1973_v6 }
 0x304   : > { %v2139_v10 = vpop.permute.xlu1 %2138 }
 0x305   : > { %v2293_v32 = vsub.f32 %v6761_v50, %v2139_v10  ;;  %v2294_v5 = vsub.f32 %v6766_v48, %v2139_v10  ;;  %v1970_v50 = vmax.f32 %v7262_v15, %v7258_v13 }
 0x307   : > { %v2359_v26 = vmul.f32 1.442695, %v2293_v32  ;;  %v2361_v24 = vmul.f32 1.442695, %v2294_v5 }
 0x309   : > { %5687 = vpow2.f32 %v2359_v26  ;;  %v7302_v26 = vpop.f32.mrf.mxu2 }
 0x30a   : > { %5689 = vpow2.f32 %v2361_v24 }
 0x30f   : > { %v5688_v0 = vpop.eup %5687  ;;  %v2144_v61 = vpop.permute.xlu0 %2143 }
 0x310   : > { %v5690_v57 = vpop.eup %5689  ;;  %v2295_v17 = vsub.f32 %v6770_v9, %v2144_v61  ;;  %v2296_v2 = vsub.f32 %v6774_v28, %v2144_v61  ;;  %v2931_v46 = vpack.c.bf16 %v5688_v0, %v5682_v31 }
 0x311   : > { %v2932_v43 = vpack.c.bf16 %v5690_v57, %v5684_v54  ;;  %v7287_v44 = vadd.f32 %v5690_v57, %v5688_v0 }
 0x312   : > { %v2363_v6 = vmul.f32 1.442695, %v2295_v17  ;;  %v2365_v42 = vmul.f32 1.442695, %v2296_v2  ;;  %3067 = vmatmul.bf16.vlgmr.msrb.gmra.mxu0 %v2931_v46  ;;  %v7300_v17 = vld [vmem:[#allocation5 + $0x78] sm:$0xff]  ;;  %v7307_v46 = vpop.f32.mrf.mxu1 }
 0x313   : > { %3156 = vmatmul.bf16.vlgmr.msrb.gmra.mxu3 %v2932_v43  ;;  %v1976_v10 = vmax.f32 %v7307_v46, %v7302_v26 }
 0x314   : > { %5691 = vpow2.f32 %v2363_v6 }
 0x315   : > { %5693 = vpow2.f32 %v2365_v42  ;;  %v2040_v42 = vsub.f32 %v7060_v4, %v7070_v62  ;;  %v7311_v62 = vld [vmem:[#allocation5 + $0x90] sm:$0xff] }
 0x316   : > { %9653 = vst [vmem:[#allocation35_spill] sm:$0xff] %v7311_v62 }
 0x317   : > { %v7291_v48 = vpop.permute.xlu0 %2746  ;;  %1971 = vmax.xlane.f32.xlu1 %v1970_v50  ;;  %v2077_v31 = vmul.f32 1.442695, %v2040_v42 }
 0x31a   : > { %v5692_v32 = vpop.eup %5691  ;;  %v7331_v42 = vpop.f32.mrf.mxu1 }
 0x31b   : > { %v5694_v9 = vpop.eup %5693  ;;  %2178 = vperm.xlu2 %5661, %v7171_v56   ;;  %9656 = vst [vmem:[#allocation38_spill] sm:$0xff] %v7331_v42 }
 0x31c   : > { %v7294_v28 = vadd.f32 %v5694_v9, %v5692_v32 }
 0x31f   : > { %v2149_v57 = vpop.permute.xlu0 %2148 }
 0x320   : > { %v2297_v61 = vsub.f32 %v6778_v41, %v2149_v57  ;;  %v2298_v0 = vsub.f32 %v6783_v45, %v2149_v57 }
 0x322   : > { %v2367_v43 = vmul.f32 1.442695, %v2297_v61  ;;  %v2369_v24 = vmul.f32 1.442695, %v2298_v0  ;;  %v7322_v0 = vpop.permute.xlu1 %2741 }
 0x324   : > { %5695 = vpow2.f32 %v2367_v43 }
 0x325   : > { %5697 = vpow2.f32 %v2369_v24  ;;  %v1954_v54 = vpop.xlane.xlu2 %1953 }
 0x326   : > { %v7305_v2 = vmax.f32 %v7300_v17, %v1954_v54  ;;  %5699 = vpow2.f32 %v2077_v31  ;;  %v7337_v54 = vld [vmem:[#allocation5 + $0x88] sm:$0xff] }
 0x327   : > { %9657 = vst [vmem:[#allocation39_spill] sm:$0xff] %v7337_v54 }
 0x328   : > { %3316 = vst.msk [vmem:[#allocation5 + $0x78] sm:$0xff] %vm1429_vm6, %v7305_v2 }
 0x32a   : > { %v5696_v41 = vpop.eup %5695 }
 0x32b   : > { %v5698_v45 = vpop.eup %5697  ;;  %v2933_v4 = vpack.c.bf16 %v5696_v41, %v5692_v32  ;;  %v7324_v32 = vpop.f32.mrf.mxu2 }
 0x32c   : > { %v2934_v5 = vpack.c.bf16 %v5698_v45, %v5694_v9  ;;  %v7315_v6 = vadd.f32 %v5698_v45, %v5696_v41  ;;  %v7320_v61 = vpop.eup %5699  ;;  %9655 = vst [vmem:[#allocation37_spill] sm:$0xff] %v7324_v32  ;;  %v2042_v9 = vsub.f32 %v7112_v30, %v7123_v35  ;;  %v1979_v43 = vmax.f32 %v7331_v42, %v7324_v32 }
 0x32d   : > { %3072 = vmatmul.bf16.gmra.mxu0 %v2933_v4  ;;  %v1963_v50 = vpop.xlane.xlu2 %1962  ;;  %1977 = vmax.xlane.f32.xlu0 %v1976_v10  ;;  %9654 = vst [vmem:[#allocation36_spill] sm:$0xff] %v7320_v61  ;;  %v2043_v30 = vsub.f32 %v7139_v16, %v7146_v36  ;;  %v7347_v10 = vld [vmem:[#allocation5 + $0x98] sm:$0xff] }
 0x32e   : > { %3161 = vmatmul.bf16.gmra.mxu3 %v2934_v5  ;;  %v7318_v57 = vmax.f32 %v7311_v62, %v1963_v50  ;;  %v2081_v24 = vmul.f32 1.442695, %v2042_v9 }
 0x32f   : > { %v2083_v35 = vmul.f32 1.442695, %v2043_v30 }
 0x330   : > { %3319 = vst.msk [vmem:[#allocation5 + $0x90] sm:$0xff] %vm1429_vm6, %v7318_v57  ;;  %2766 = vperm.xlu1 %5662, %v7320_v61   ;;  %5701 = vpow2.f32 %v2081_v24 }
 0x331   : > { %5703 = vpow2.f32 %v2083_v35 }
 0x335   : > { %v7335_v31 = vpop.permute.xlu2 %2751  ;;  %1980 = vmax.xlane.f32.xlu0 %v1979_v43  ;;  %v7353_v43 = vpop.f32.mrf.mxu2 }
 0x336   : > { %v7351_v9 = vpop.eup %5701  ;;  %9658 = vst [vmem:[#allocation40_spill] sm:$0xff] %v7353_v43 }
 0x337   : > { %v1960_v41 = vpop.xlane.xlu1 %1959 }
 0x338   : > { %v7340_v45 = vmax.f32 %v7337_v54, %v1960_v41  ;;  %2173 = vperm.xlu1 %5662, %v7146_v36   ;;  %v7359_v36 = vpop.f32.mrf.mxu1 }
 0x339   : > { %9659 = vst [vmem:[#allocation41_spill] sm:$0xff] %v7359_v36 }
 0x33a   : > { %3318 = vst.msk [vmem:[#allocation5 + $0x88] sm:$0xff] %vm1429_vm6, %v7340_v45 }
 0x33d   : > { %v2154_v4 = vpop.permute.xlu2 %2153 }
 0x33e   : > { %v2299_v5 = vsub.f32 %v6787_v55, %v2154_v4  ;;  %v2300_v50 = vsub.f32 %v6791_v52, %v2154_v4  ;;  %v2044_v55 = vsub.f32 %v7161_v29, %v7171_v56  ;;  %v1982_v52 = vmax.f32 %v7359_v36, %v7353_v43  ;;  %v7367_v4 = vpop.eup %5703 }
 0x33f   : > { %v1966_v41 = vpop.xlane.xlu1 %1965  ;;  %9660 = vst [vmem:[#allocation42_spill] sm:$0xff] %v7367_v4 }
 0x340   : > { %v2371_v24 = vmul.f32 1.442695, %v2299_v5  ;;  %v2373_v62 = vmul.f32 1.442695, %v2300_v50  ;;  %2776 = vperm.xlu1 %5662, %v7351_v9   ;;  %v7357_v16 = vmax.f32 %v7347_v10, %v1966_v41  ;;  %v2085_v30 = vmul.f32 1.442695, %v2044_v55  ;;  %v7393_v32 = vpop.f32.mrf.mxu1 }
 0x341   : > { %v7370_v50 = vld [vmem:[#allocation5 + $0xa0] sm:$0xff]  ;;  %9664 = vst [vmem:[#allocation46_spill] sm:$0xff] %v7393_v32 }
 0x342   : > { %5705 = vpow2.f32 %v2371_v24  ;;  %3320 = vst.msk [vmem:[#allocation5 + $0x98] sm:$0xff] %vm1429_vm6, %v7357_v16 }
 0x343   : > { %5707 = vpow2.f32 %v2373_v62  ;;  %9661 = vst [vmem:[#allocation43_spill] sm:$0xff] %v7370_v50 }
 0x344   : > { %1983 = vmax.xlane.f32.xlu2 %v1982_v52  ;;  %5709 = vpow2.f32 %v2085_v30 }
 0x348   : > { %v5706_v5 = vpop.eup %5705  ;;  %2781 = vperm.xlu1 %5662, %v7367_v4  }
 0x349   : > { %v5708_v35 = vpop.eup %5707  ;;  %2183 = vperm.xlu0 %5660, %v7198_v21  }
 0x34a   : > { %v1969_v29 = vpop.xlane.xlu0 %1968  ;;  %v7373_v56 = vadd.f32 %v5708_v35, %v5706_v5  ;;  %v7380_v62 = vpop.eup %5709 }
 0x34b   : > { %v7376_v41 = vmax.f32 %v7370_v50, %v1969_v29  ;;  %9662 = vst [vmem:[#allocation44_spill] sm:$0xff] %v7380_v62  ;;  %v7391_v50 = vpop.f32.mrf.mxu2 }
 0x34c   : > { %9663 = vst [vmem:[#allocation45_spill] sm:$0xff] %v7391_v50 }
 0x34d   : > { %3321 = vst.msk [vmem:[#allocation5 + $0xa0] sm:$0xff] %vm1429_vm6, %v7376_v41 }
 0x351   : > { %2786 = vperm.xlu0 %5660, %v7380_v62  }
 0x357   : > { %v7383_v24 = vpop.permute.xlu1 %2756 }
 0x359   : > { %2188 = vperm.xlu0 %5660, %v7216_v47  }
 0x35c   : > { %2193 = vperm.xlu2 %5661, %v7227_v33  }
 0x35d   : > { %v7387_v55 = vpop.permute.xlu0 %2761 }
 0x35f   : > { %v2159_v52 = vpop.permute.xlu1 %2158 }
 0x360   : > { %v2301_v30 = vsub.f32 %v6795_v53, %v2159_v52  ;;  %v2302_v29 = vsub.f32 %v6800_v60, %v2159_v52  ;;  %v7397_v52 = vpop.f32.mrf.mxu2 }
 0x362   : > { %v2375_v61 = vmul.f32 1.442695, %v2301_v30  ;;  %v2377_v54 = vmul.f32 1.442695, %v2302_v29 }
 0x364   : > { %5711 = vpow2.f32 %v2375_v61 }
 0x365   : > { %5713 = vpow2.f32 %v2377_v54  ;;  %v2164_v62 = vpop.permute.xlu0 %2163  ;;  %v7401_v54 = vpop.f32.mrf.mxu1 }
 0x366   : > { %v2303_v42 = vsub.f32 %v6804_v63, %v2164_v62  ;;  %v2304_v4 = vsub.f32 %v6808_v1, %v2164_v62 }
 0x368   : > { %v2379_v13 = vmul.f32 1.442695, %v2303_v42  ;;  %v2381_v15 = vmul.f32 1.442695, %v2304_v4  ;;  %v7411_v62 = vpop.f32.mrf.mxu2 }
 0x369   : > { %9667 = vst [vmem:[#allocation49_spill] sm:$0xff] %v7411_v62 }
 0x36a   : > { %v5712_v43 = vpop.eup %5711  ;;  %5715 = vpow2.f32 %v2379_v13 }
 0x36b   : > { %v5714_v53 = vpop.eup %5713  ;;  %5717 = vpow2.f32 %v2381_v15  ;;  %v2935_v60 = vpack.c.bf16 %v5712_v43, %v5706_v5  ;;  %v1985_v15 = vmax.f32 %v7393_v32, %v7391_v50 }
 0x36c   : > { %v2936_v30 = vpack.c.bf16 %v5714_v53, %v5708_v35  ;;  %v7399_v29 = vadd.f32 %v5714_v53, %v5712_v43  ;;  %v7409_v35 = vld [vmem:[#allocation5 + $0xb0] sm:$0xff] }
 0x36d   : > { %3077 = vmatmul.bf16.gmra.mxu0 %v2935_v60  ;;  %v2169_v61 = vpop.permute.xlu0 %2168  ;;  %9666 = vst [vmem:[#allocation48_spill] sm:$0xff] %v7409_v35  ;;  %v7416_v60 = vpop.f32.mrf.mxu1 }
 0x36e   : > { %3166 = vmatmul.bf16.gmra.mxu3 %v2936_v30  ;;  %v2305_v63 = vsub.f32 %v6812_v7, %v2169_v61  ;;  %v2306_v1 = vsub.f32 %v6817_v22, %v2169_v61  ;;  %9668 = vst [vmem:[#allocation50_spill] sm:$0xff] %v7416_v60  ;;  %v2045_v61 = vsub.f32 %v7190_v34, %v7198_v21 }
 0x370   : > { %v5716_v42 = vpop.eup %5715  ;;  %v2383_v4 = vmul.f32 1.442695, %v2305_v63  ;;  %v2385_v13 = vmul.f32 1.442695, %v2306_v1  ;;  %v7426_v50 = vpop.f32.mrf.mxu2 }
 0x371   : > { %v5718_v5 = vpop.eup %5717  ;;  %9669 = vst [vmem:[#allocation51_spill] sm:$0xff] %v7426_v50 }
 0x372   : > { %5719 = vpow2.f32 %v2383_v4  ;;  %1986 = vmax.xlane.f32.xlu1 %v1985_v15  ;;  %v7407_v43 = vadd.f32 %v5718_v5, %v5716_v42 }
 0x373   : > { %5721 = vpow2.f32 %v2385_v13  ;;  %v2087_v13 = vmul.f32 1.442695, %v2045_v61 }
 0x374   : > { %9665 = vst [vmem:[#allocation47_spill] sm:$0xff] %v7407_v43  ;;  %v1988_v43 = vmax.f32 %v7401_v54, %v7397_v52 }
 0x375   : > { %5723 = vpow2.f32 %v2087_v13  ;;  %v7430_v34 = vpop.f32.mrf.mxu1  ;;  %v2048_v13 = vsub.f32 %v7234_v58, %v7239_v38 }
 0x376   : > { %v1975_v53 = vpop.xlane.xlu2 %1974  ;;  %9670 = vst [vmem:[#allocation52_spill] sm:$0xff] %v7430_v34  ;;  %v1994_v21 = vmax.f32 %v7430_v34, %v7426_v50  ;;  %v7465_v50 = vld [vmem:[#allocation5 + $0xb8] sm:$0xff] }
 0x377   : > { %v7414_v7 = vmax.f32 %v7409_v35, %v1975_v53  ;;  %9673 = vst [vmem:[#allocation55_spill] sm:$0xff] %v7465_v50 }
 0x378   : > { %v5720_v22 = vpop.eup %5719 }
 0x379   : > { %v5722_v30 = vpop.eup %5721  ;;  %3323 = vst.msk [vmem:[#allocation5 + $0xb0] sm:$0xff] %vm1429_vm6, %v7414_v7  ;;  %v2937_v1 = vpack.c.bf16 %v5720_v22, %v5716_v42  ;;  %v7438_v42 = vld [vmem:[#allocation5 + $0xa8] sm:$0xff] }
 0x37a   : > { %v7422_v63 = vadd.f32 %v5722_v30, %v5720_v22  ;;  %v2938_v4 = vpack.c.bf16 %v5722_v30, %v5718_v5  ;;  %9671 = vst [vmem:[#allocation53_spill] sm:$0xff] %v7438_v42 }
 0x37d   : > { %3082 = vmatmul.bf16.gmra.mxu0 %v2937_v1 }
 0x37e   : > { %3171 = vmatmul.bf16.gmra.mxu3 %v2938_v4  ;;  %v2179_v15 = vpop.permute.xlu2 %2178 }
 0x37f   : > { %v2309_v53 = vsub.f32 %v6829_v19, %v2179_v15  ;;  %v2310_v35 = vsub.f32 %v6833_v11, %v2179_v15  ;;  %v7434_v19 = vpop.eup %5723  ;;  %v2046_v11 = vsub.f32 %v7209_v27, %v7216_v47  ;;  %v2707_v27 = vld [vmem:[#allocation7] sm:$0xff]  ;;  %v7461_v15 = vpop.permute.xlu0 %2771 }
 0x380   : > { %v2899_v1 = vmul.f32 %v7322_v0, %v2707_v27 }
 0x381   : > { %v2391_v32 = vmul.f32 1.442695, %v2309_v53  ;;  %v2393_v36 = vmul.f32 1.442695, %v2310_v35 }
 0x383   : > { %5725 = vpow2.f32 %v2391_v32  ;;  %1989 = vmax.xlane.f32.xlu0 %v1988_v43  ;;  %v2089_v43 = vmul.f32 1.442695, %v2046_v11  ;;  %v2708_v11 = vld [vmem:[#allocation7 + $0x8] sm:$0xff] }
 0x384   : > { %5727 = vpow2.f32 %v2393_v36  ;;  %v2900_v0 = vmul.f32 %v7291_v48, %v2708_v11  ;;  %v7480_v48 = vld [vmem:[#allocation5 + $0xc0] sm:$0xff] }
 0x385   : > { %1995 = vmax.xlane.f32.xlu2 %v1994_v21  ;;  %5729 = vpow2.f32 %v2089_v43  ;;  %v2093_v21 = vmul.f32 1.442695, %v2048_v13  ;;  %9675 = vst [vmem:[#allocation57_spill] sm:$0xff] %v7480_v48 }
 0x387   : > { %5731 = vpow2.f32 %v2093_v21 }
 0x389   : > { %v7440_v5 = vpop.eup %5725 }
 0x38a   : > { %v7442_v35 = vpop.eup %5727  ;;  %v1972_v22 = vpop.xlane.xlu1 %1971 }
 0x38b   : > { %v7445_v32 = vmax.f32 %v7438_v42, %v1972_v22  ;;  %2791 = vperm.xlu1 %5662, %v7434_v19   ;;  %v7450_v36 = vadd.f32 %v7442_v35, %v7440_v5  ;;  %v7455_v30 = vpop.eup %5729 }
 0x38d   : > { %9672 = vst [vmem:[#allocation54_spill] sm:$0xff] %v7445_v32 }
 0x38e   : > { %3322 = vst.msk [vmem:[#allocation5 + $0xa8] sm:$0xff] %vm1429_vm6, %v7445_v32 }
 0x38f   : > { %v3068_v47 = vpop.f32.mrf.mxu0 }
 0x393   : > { %2198 = vperm.xlu1 %5662, %v7239_v38  }
 0x396   : > { %v3157_v61 = vpop.f32.mrf.mxu3 }
 0x397   : > { %v3158_v4 = vadd.f32 %v3157_v61, %v3068_v47  ;;  %2796 = vperm.xlu0 %5660, %v7455_v30   ;;  %v3070_v22 = vpop.f32.mrf.mxu0 }
 0x399   : > { %v3237_v53 = vadd.f32 %v3158_v4, %v2899_v1  ;;  %v7478_v1 = vpop.eup %5731 }
 0x39b   : > { %3269 = vst.msk [vmem:[#allocation7] sm:$0xff] %vm645_vm1, %v3237_v53 }
 0x39d   : > { %2208 = vperm.xlu2 %5661, %v7305_v2  }
 0x39e   : > { %v3159_v43 = vpop.f32.mrf.mxu3 }
 0x39f   : > { %v3160_v27 = vadd.f32 %v3159_v43, %v3070_v22  ;;  %2203 = vperm.xlu0 %5660, %v7253_v39  }
 0x3a0   : > { %v1978_v58 = vpop.xlane.xlu0 %1977 }
 0x3a1   : > { %v3238_v38 = vadd.f32 %v3160_v27, %v2900_v0  ;;  %v7470_v47 = vmax.f32 %v7465_v50, %v1978_v58  ;;  %v2709_v0 = vld [vmem:[#allocation7 + $0x10] sm:$0xff] }
 0x3a2   : > { %v7472_v61 = vpop.permute.xlu1 %2766 }
 0x3a3   : > { %9674 = vst [vmem:[#allocation56_spill] sm:$0xff] %v7470_v47 }
 0x3a4   : > { %3270 = vst.msk [vmem:[#allocation7 + $0x8] sm:$0xff] %vm645_vm1, %v3238_v38  ;;  %v2901_v38 = vmul.f32 %v7335_v31, %v2709_v0 }
 0x3a5   : > { %3324 = vst.msk [vmem:[#allocation5 + $0xb8] sm:$0xff] %vm1429_vm6, %v7470_v47  ;;  %2213 = vperm.xlu2 %5661, %v7270_v49  }
 0x3a7   : > { %2806 = vperm.xlu0 %5660, %v7478_v1  }
 0x3a8   : > { %v1981_v4 = vpop.xlane.xlu0 %1980 }
 0x3a9   : > { %v7484_v13 = vmax.f32 %v7480_v48, %v1981_v4  ;;  %v7491_v48 = vld [vmem:[#allocation5 + $0xc8] sm:$0xff] }
 0x3aa   : > { %v2174_v53 = vpop.permute.xlu1 %2173  ;;  %v3073_v27 = vpop.f32.mrf.mxu0  ;;  %9676 = vst [vmem:[#allocation58_spill] sm:$0xff] %v7491_v48 }
 0x3ab   : > { %3325 = vst.msk [vmem:[#allocation5 + $0xc0] sm:$0xff] %vm1429_vm6, %v7484_v13  ;;  %v2307_v21 = vsub.f32 %v6821_v14, %v2174_v53  ;;  %v2308_v11 = vsub.f32 %v6825_v25, %v2174_v53  ;;  %v2710_v14 = vld [vmem:[#allocation7 + $0x18] sm:$0xff] }
 0x3ad   : > { %v2387_v22 = vmul.f32 1.442695, %v2307_v21  ;;  %v2389_v43 = vmul.f32 1.442695, %v2308_v11 }
 0x3af   : > { %5733 = vpow2.f32 %v2387_v22  ;;  %v2902_v22 = vmul.f32 %v7383_v24, %v2710_v14  ;;  %v7509_v24 = vpop.f32.mrf.mxu2 }
 0x3b0   : > { %5735 = vpow2.f32 %v2389_v43 }
 0x3b1   : > { %v3162_v58 = vpop.f32.mrf.mxu3 }
 0x3b2   : > { %v3163_v50 = vadd.f32 %v3162_v58, %v3073_v27  ;;  %v3075_v31 = vpop.f32.mrf.mxu0  ;;  %v7511_v58 = vpop.f32.mrf.mxu1 }
 0x3b4   : > { %v3239_v4 = vadd.f32 %v3163_v50, %v2901_v38 }
 0x3b5   : > { %v5734_v49 = vpop.eup %5733 }
 0x3b6   : > { %3271 = vst.msk [vmem:[#allocation7 + $0x10] sm:$0xff] %vm645_vm1, %v3239_v4  ;;  %v5736_v34 = vpop.eup %5735  ;;  %v2939_v25 = vpack.c.bf16 %v7440_v5, %v5734_v49  ;;  %v1991_v5 = vmax.f32 %v7416_v60, %v7411_v62 }
 0x3b7   : > { %v1984_v42 = vpop.xlane.xlu2 %1983  ;;  %v2940_v21 = vpack.c.bf16 %v7442_v35, %v5736_v34  ;;  %v7499_v11 = vadd.f32 %v5736_v34, %v5734_v49 }
 0x3b8   : > { %v7496_v53 = vmax.f32 %v7491_v48, %v1984_v42  ;;  %3087 = vmatmul.bf16.gmra.mxu0 %v2939_v25 }
 0x3b9   : > { %v3164_v50 = vpop.f32.mrf.mxu3  ;;  %3176 = vmatmul.bf16.gmra.mxu3 %v2940_v21 }
 0x3ba   : > { %9677 = vst [vmem:[#allocation59_spill] sm:$0xff] %v7496_v53  ;;  %v3165_v43 = vadd.f32 %v3164_v50, %v3075_v31  ;;  %v7521_v21 = vpop.f32.mrf.mxu1 }
 0x3bb   : > { %3326 = vst.msk [vmem:[#allocation5 + $0xc8] sm:$0xff] %vm1429_vm6, %v7496_v53  ;;  %v2184_v0 = vpop.permute.xlu0 %2183 }
 0x3bc   : > { %v3240_v42 = vadd.f32 %v3165_v43, %v2902_v22  ;;  %v2311_v27 = vsub.f32 %v6837_v8, %v2184_v0  ;;  %v2312_v49 = vsub.f32 %v6844_v51, %v2184_v0  ;;  %v2047_v8 = vsub.f32 %v7224_v59, %v7227_v33  ;;  %v7519_v51 = vpop.f32.mrf.mxu2  ;;  %v7528_v59 = vpop.permute.xlu1 %2776 }
 0x3bd   : > { %1992 = vmax.xlane.f32.xlu1 %v1991_v5  ;;  %v2000_v0 = vmax.f32 %v7521_v21, %v7519_v51 }
 0x3be   : > { %3272 = vst.msk [vmem:[#allocation7 + $0x18] sm:$0xff] %vm645_vm1, %v3240_v42  ;;  %v2395_v34 = vmul.f32 1.442695, %v2311_v27  ;;  %v2397_v35 = vmul.f32 1.442695, %v2312_v49 }
 0x3bf   : > { %v2091_v31 = vmul.f32 1.442695, %v2047_v8  ;;  %v7538_v8 = vld [vmem:[#allocation5 + $0xd0] sm:$0xff] }
 0x3c0   : > { %5737 = vpow2.f32 %v2395_v34  ;;  %9678 = vst [vmem:[#allocation60_spill] sm:$0xff] %v7538_v8 }
 0x3c1   : > { %5739 = vpow2.f32 %v2397_v35 }
 0x3c2   : > { %5741 = vpow2.f32 %v2091_v31 }
 0x3c3   : > { %v7513_v38 = vpop.permute.xlu0 %2786 }
 0x3c4   : > { %v7536_v35 = vpop.permute.xlu1 %2781 }
 0x3c6   : > { %v5738_v4 = vpop.eup %5737 }
 0x3c7   : > { %v5740_v14 = vpop.eup %5739 }
 0x3c8   : > { %v7517_v25 = vadd.f32 %v5740_v14, %v5738_v4  ;;  %v7530_v33 = vpop.eup %5741 }
 0x3cb   : > { %v2189_v50 = vpop.permute.xlu0 %2188 }
 0x3cc   : > { %v2313_v22 = vsub.f32 %v6852_v3, %v2189_v50  ;;  %v2314_v43 = vsub.f32 %v6866_v12, %v2189_v50 }
 0x3ce   : > { %v2399_v5 = vmul.f32 1.442695, %v2313_v22  ;;  %v2401_v42 = vmul.f32 1.442695, %v2314_v43  ;;  %2001 = vmax.xlane.f32.xlu2 %v2000_v0 }
 0x3d0   : > { %5743 = vpow2.f32 %v2399_v5 }
 0x3d1   : > { %5745 = vpow2.f32 %v2401_v42  ;;  %2548 = vadd.xlane.f32.xlu0 %v7264_v40  ;;  %v7549_v42 = vld [vmem:[#allocation5 + $0xd8] sm:$0xff] }
 0x3d2   : > { %9679 = vst [vmem:[#allocation61_spill] sm:$0xff] %v7549_v42 }
 0x3d6   : > { %v5744_v27 = vpop.eup %5743  ;;  %2801 = vperm.xlu1 %5662, %v7530_v33  }
 0x3d7   : > { %v5746_v3 = vpop.eup %5745  ;;  %v2941_v12 = vpack.c.bf16 %v5744_v27, %v5738_v4 }
 0x3d8   : > { %v2942_v49 = vpack.c.bf16 %v5746_v3, %v5740_v14  ;;  %v7533_v34 = vadd.f32 %v5746_v3, %v5744_v27  ;;  %v2194_v14 = vpop.permute.xlu2 %2193  ;;  %v7552_v3 = vld [vmem:[#allocation5 + $0xe8] sm:$0xff] }
 0x3d9   : > { %3092 = vmatmul.bf16.gmra.mxu0 %v2941_v12  ;;  %2551 = vadd.xlane.f32.xlu0 %v7287_v44  ;;  %v2711_v44 = vld [vmem:[#allocation7 + $0x20] sm:$0xff]  ;;  %9680 = vst [vmem:[#allocation62_spill] sm:$0xff] %v7552_v3  ;;  %v2712_v12 = vld [vmem:[#allocation7 + $0x28] sm:$0xff] }
 0x3da   : > { %3181 = vmatmul.bf16.gmra.mxu3 %v2942_v49  ;;  %v2903_v22 = vmul.f32 %v7387_v55, %v2711_v44 }
 0x3e5   : > { %v1987_v40 = vpop.xlane.xlu1 %1986 }
 0x3e6   : > { %v7541_v31 = vmax.f32 %v7538_v8, %v1987_v40  ;;  %2228 = vperm.xlu2 %5661, %v7357_v16  }
 0x3e8   : > { %3327 = vst.msk [vmem:[#allocation5 + $0xd0] sm:$0xff] %vm1429_vm6, %v7541_v31 }
 0x3ea   : > { %v3078_v4 = vpop.f32.mrf.mxu0 }
 0x3ed   : > { %2223 = vperm.xlu0 %5660, %v7318_v57  }
 0x3ee   : > { %2238 = vperm.xlu2 %5661, %v7445_v32  }
 0x3f1   : > { %v3167_v50 = vpop.f32.mrf.mxu3 }
 0x3f2   : > { %v3168_v43 = vadd.f32 %v3167_v50, %v3078_v4  ;;  %v3080_v5 = vpop.f32.mrf.mxu0  ;;  %v2904_v4 = vmul.f32 %v7472_v61, %v2712_v12  ;;  %v2316_v61 = vsub.f32 %v6890_v37, %v2194_v14 }
 0x3f4   : > { %v3241_v0 = vadd.f32 %v3168_v43, %v2903_v22  ;;  %v2405_v60 = vmul.f32 1.442695, %v2316_v61 }
 0x3f6   : > { %3273 = vst.msk [vmem:[#allocation7 + $0x20] sm:$0xff] %vm645_vm1, %v3241_v0  ;;  %v1990_v27 = vpop.xlane.xlu0 %1989  ;;  %v1997_v0 = vmax.f32 %v7511_v58, %v7509_v24 }
 0x3f7   : > { %v7555_v49 = vmax.f32 %v7549_v42, %v1990_v27  ;;  %v2713_v27 = vld [vmem:[#allocation7 + $0x30] sm:$0xff]  ;;  %v2315_v42 = vsub.f32 %v6874_v18, %v2194_v14  ;;  %v9681_v18 = vld [vmem:[#allocation8_spill] sm:$0xff]  ;;  %v9682_v14 = vld [vmem:[#allocation9_spill] sm:$0xff] }
 0x3f8   : > { %v1996_v40 = vpop.xlane.xlu2 %1995 }
 0x3f9   : > { %3328 = vst.msk [vmem:[#allocation5 + $0xd8] sm:$0xff] %vm1429_vm6, %v7555_v49  ;;  %v3169_v8 = vpop.f32.mrf.mxu3  ;;  %v7560_v55 = vmax.f32 %v7552_v3, %v1996_v40  ;;  %v2403_v48 = vmul.f32 1.442695, %v2315_v42 }
 0x3fa   : > { %v3170_v44 = vadd.f32 %v3169_v8, %v3080_v5  ;;  %v3083_v43 = vpop.f32.mrf.mxu0 }
 0x3fb   : > { %3330 = vst.msk [vmem:[#allocation5 + $0xe8] sm:$0xff] %vm1429_vm6, %v7560_v55 }
 0x3fc   : > { %v3242_v50 = vadd.f32 %v3170_v44, %v2904_v4  ;;  %v2905_v4 = vmul.f32 %v7461_v15, %v2713_v27 }
 0x3fd   : > { %v7565_v22 = vpop.permute.xlu1 %2791 }
 0x3fe   : > { %3274 = vst.msk [vmem:[#allocation7 + $0x28] sm:$0xff] %vm645_vm1, %v3242_v50 }
 0x400   : > { %v2209_v40 = vpop.permute.xlu2 %2208  ;;  %1998 = vmax.xlane.f32.xlu1 %v1997_v0 }
 0x401   : > { %v3172_v8 = vpop.f32.mrf.mxu3  ;;  %v2321_v5 = vsub.f32 %v6951_v23, %v2209_v40  ;;  %v2322_v12 = vsub.f32 %v6957_v20, %v2209_v40  ;;  %v2714_v23 = vld [vmem:[#allocation7 + $0x38] sm:$0xff] }
 0x402   : > { %v3173_v44 = vadd.f32 %v3172_v8, %v3083_v43  ;;  %v3085_v20 = vpop.f32.mrf.mxu0  ;;  %v9683_v43 = vld [vmem:[#allocation27_spill] sm:$0xff]  ;;  %v2906_v8 = vmul.f32 %v7528_v59, %v2714_v23  ;;  %v2050_v59 = vsub.f32 %v7300_v17, %v7305_v2 }
 0x403   : > { %v2415_v50 = vmul.f32 1.442695, %v2321_v5  ;;  %v2417_v3 = vmul.f32 1.442695, %v2322_v12  ;;  %v2049_v27 = vsub.f32 %v9683_v43, %v7253_v39 }
 0x404   : > { %v3243_v62 = vadd.f32 %v3173_v44, %v2905_v4 }
 0x405   : > { %5747 = vpow2.f32 %v2415_v50  ;;  %v2199_v32 = vpop.permute.xlu1 %2198  ;;  %v2095_v12 = vmul.f32 1.442695, %v2049_v27  ;;  %v2097_v27 = vmul.f32 1.442695, %v2050_v59 }
 0x406   : > { %3275 = vst.msk [vmem:[#allocation7 + $0x30] sm:$0xff] %vm645_vm1, %v3243_v62  ;;  %5749 = vpow2.f32 %v2417_v3  ;;  %v2317_v37 = vsub.f32 %v9681_v18, %v2199_v32  ;;  %v2318_v0 = vsub.f32 %v9682_v14, %v2199_v32 }
 0x407   : > { %5751 = vpow2.f32 %v2403_v48 }
 0x408   : > { %v2407_v40 = vmul.f32 1.442695, %v2317_v37  ;;  %v2409_v15 = vmul.f32 1.442695, %v2318_v0  ;;  %5753 = vpow2.f32 %v2405_v60  ;;  %v9684_v37 = vld [vmem:[#allocation10_spill] sm:$0xff]  ;;  %v9685_v0 = vld [vmem:[#allocation11_spill] sm:$0xff] }
 0x409   : > { %v3174_v42 = vpop.f32.mrf.mxu3  ;;  %v7580_v61 = vpop.permute.xlu0 %2796 }
 0x40a   : > { %5755 = vpow2.f32 %v2407_v40  ;;  %v3175_v62 = vadd.f32 %v3174_v42, %v3085_v20 }
 0x40b   : > { %v5748_v3 = vpop.eup %5747  ;;  %5757 = vpow2.f32 %v2409_v15 }
 0x40c   : > { %v5750_v5 = vpop.eup %5749  ;;  %v3244_v32 = vadd.f32 %v3175_v62, %v2906_v8  ;;  %5759 = vpow2.f32 %v2095_v12 }
 0x40d   : > { %v7583_v48 = vadd.f32 %v5750_v5, %v5748_v3  ;;  %v7585_v4 = vpop.eup %5751 }
 0x40e   : > { %3276 = vst.msk [vmem:[#allocation7 + $0x38] sm:$0xff] %vm645_vm1, %v3244_v32  ;;  %v7588_v39 = vpop.eup %5753 }
 0x410   : > { %v5756_v60 = vpop.eup %5755 }
 0x411   : > { %v5758_v44 = vpop.eup %5757  ;;  %v2204_v50 = vpop.permute.xlu0 %2203  ;;  %v2943_v18 = vpack.c.bf16 %v5756_v60, %v7585_v4 }
 0x412   : > { %v2319_v14 = vsub.f32 %v9684_v37, %v2204_v50  ;;  %v2320_v23 = vsub.f32 %v9685_v0, %v2204_v50  ;;  %v2944_v20 = vpack.c.bf16 %v5758_v44, %v7588_v39  ;;  %v7596_v40 = vadd.f32 %v5758_v44, %v5756_v60  ;;  %v7598_v42 = vpop.eup %5759 }
 0x413   : > { %3097 = vmatmul.bf16.gmra.mxu0 %v2943_v18 }
 0x414   : > { %v2411_v15 = vmul.f32 1.442695, %v2319_v14  ;;  %v2413_v43 = vmul.f32 1.442695, %v2320_v23  ;;  %3186 = vmatmul.bf16.gmra.mxu3 %v2944_v20  ;;  %v7625_v14 = vld [vmem:[#allocation5 + $0xf8] sm:$0xff]  ;;  %v2483_v23 = vld [vmem:[#allocation6] sm:$0xff] }
 0x415   : > { %9687 = vst [vmem:[#allocation9_spill] sm:$0xff] %v7625_v14 }
 0x416   : > { %5761 = vpow2.f32 %v2411_v15 }
 0x417   : > { %5763 = vpow2.f32 %v2413_v43  ;;  %2560 = vadd.xlane.f32.xlu0 %v7373_v56  ;;  %2569 = vadd.xlane.f32.xlu2 %v7422_v63  ;;  %v7610_v56 = vld [vmem:[#allocation5 + $0xe0] sm:$0xff]  ;;  %v2716_v43 = vld [vmem:[#allocation7 + $0x48] sm:$0xff] }
 0x418   : > { %5765 = vpow2.f32 %v2097_v27  ;;  %9686 = vst [vmem:[#allocation8_spill] sm:$0xff] %v7610_v56  ;;  %v9688_v27 = vld [vmem:[#allocation14_spill] sm:$0xff] }
 0x419   : > { %2811 = vperm.xlu1 %5662, %v7598_v42   ;;  %v7622_v59 = vpop.permute.xlu0 %2806 }
 0x41c   : > { %v5762_v17 = vpop.eup %5761 }
 0x41d   : > { %v5764_v2 = vpop.eup %5763  ;;  %v2945_v32 = vpack.c.bf16 %v5748_v3, %v5762_v17  ;;  %v7619_v3 = vpop.permute.xlu2 %2213 }
 0x41e   : > { %v7603_v8 = vadd.f32 %v5764_v2, %v5762_v17  ;;  %v7605_v62 = vpop.eup %5765  ;;  %v2946_v12 = vpack.c.bf16 %v5750_v5, %v5764_v2  ;;  %v2715_v5 = vld [vmem:[#allocation7 + $0x40] sm:$0xff]  ;;  %v2515_v17 = vmul.f32 %v9688_v27, %v2483_v23  ;;  %v9691_v27 = vld [vmem:[#allocation15_spill] sm:$0xff] }
 0x41f   : > { %v2907_v18 = vmul.f32 %v7536_v35, %v2715_v5  ;;  %v9690_v23 = vld [vmem:[#allocation20_spill] sm:$0xff] }
 0x421   : > { %2816 = vperm.xlu1 %5662, %v7605_v62  }
 0x423   : > { %3102 = vmatmul.bf16.gmra.mxu0 %v2945_v32 }
 0x424   : > { %3191 = vmatmul.bf16.gmra.mxu3 %v2946_v12 }
 0x429   : > { %2218 = vperm.xlu1 %5662, %v7340_v45  }
 0x42b   : > { %2233 = vperm.xlu0 %5660, %v7376_v41  }
 0x42f   : > { %2248 = vperm.xlu2 %5661, %v7470_v47  }
 0x430   : > { %v1993_v63 = vpop.xlane.xlu1 %1992 }
 0x431   : > { %v7614_v60 = vmax.f32 %v7610_v56, %v1993_v63  ;;  %v2908_v63 = vmul.f32 %v7513_v38, %v2716_v43 }
 0x433   : > { %3329 = vst.msk [vmem:[#allocation5 + $0xe0] sm:$0xff] %vm1429_vm6, %v7614_v60  ;;  %2243 = vperm.xlu0 %5660, %v7414_v7  }
 0x435   : > { %v3088_v44 = vpop.f32.mrf.mxu0 }
 0x43b   : > { %2258 = vperm.xlu0 %5660, %v7496_v53  }
 0x43c   : > { %v3177_v50 = vpop.f32.mrf.mxu3 }
 0x43d   : > { %v3178_v37 = vadd.f32 %v3177_v50, %v3088_v44  ;;  %v3090_v32 = vpop.f32.mrf.mxu0  ;;  %v2484_v50 = vld [vmem:[#allocation6 + $0x8] sm:$0xff] }
 0x43f   : > { %v3245_v0 = vadd.f32 %v3178_v37, %v2907_v18  ;;  %v9689_v37 = vld [vmem:[#allocation21_spill] sm:$0xff] }
 0x441   : > { %v2002_v20 = vpop.xlane.xlu2 %2001  ;;  %3277 = vst.msk [vmem:[#allocation7 + $0x40] sm:$0xff] %vm645_vm1, %v3245_v0 }
 0x442   : > { %v7629_v15 = vmax.f32 %v7625_v14, %v2002_v20  ;;  %v2516_v14 = vmul.f32 %v9691_v27, %v2484_v50 }
 0x444   : > { %3332 = vst.msk [vmem:[#allocation5 + $0xf8] sm:$0xff] %vm1429_vm6, %v7629_v15  ;;  %v2549_v2 = vpop.xlane.xlu0 %2548  ;;  %v3179_v35 = vpop.f32.mrf.mxu3 }
 0x445   : > { %v2643_v12 = vadd.f32 %v2549_v2, %v2515_v17  ;;  %v3180_v5 = vadd.f32 %v3179_v35, %v3090_v32  ;;  %v2717_v32 = vld [vmem:[#allocation7 + $0x50] sm:$0xff] }
 0x447   : > { %2675 = vst.msk [vmem:[#allocation6] sm:$0xff] %vm1429_vm6, %v2643_v12  ;;  %v3246_v44 = vadd.f32 %v3180_v5, %v2908_v63  ;;  %v2054_v12 = vsub.f32 %v7347_v10, %v7357_v16 }
 0x449   : > { %v2229_v18 = vpop.permute.xlu2 %2228  ;;  %3278 = vst.msk [vmem:[#allocation7 + $0x48] sm:$0xff] %vm645_vm1, %v3246_v44 }
 0x44a   : > { %v2329_v0 = vsub.f32 %v9689_v37, %v2229_v18  ;;  %v2330_v20 = vsub.f32 %v9690_v23, %v2229_v18  ;;  %v7660_v18 = vld [vmem:[#allocation5 + $0xf0] sm:$0xff]  ;;  %v2490_v23 = vld [vmem:[#allocation6 + $0x38] sm:$0xff] }
 0x44c   : > { %v2431_v56 = vmul.f32 1.442695, %v2329_v0  ;;  %v2433_v53 = vmul.f32 1.442695, %v2330_v20  ;;  %v2552_v47 = vpop.xlane.xlu0 %2551  ;;  %v2487_v0 = vld [vmem:[#allocation6 + $0x20] sm:$0xff]  ;;  %v9692_v20 = vld [vmem:[#allocation26_spill] sm:$0xff] }
 0x44d   : > { %v2644_v17 = vadd.f32 %v2552_v47, %v2516_v14  ;;  %v2519_v27 = vmul.f32 %v9692_v20, %v2487_v0 }
 0x44e   : > { %5767 = vpow2.f32 %v2431_v56 }
 0x44f   : > { %5769 = vpow2.f32 %v2433_v53  ;;  %2676 = vst.msk [vmem:[#allocation6 + $0x8] sm:$0xff] %vm1429_vm6, %v2644_v17  ;;  %v2909_v53 = vmul.f32 %v7565_v22, %v2717_v32  ;;  %v2802_v22 = vpop.permute.xlu1 %2801  ;;  %v2522_v17 = vmul.f32 %v7351_v9, %v2490_v23 }
 0x453   : > { %2554 = vadd.xlane.f32.xlu1 %v7294_v28  ;;  %v2718_v28 = vld [vmem:[#allocation7 + $0x58] sm:$0xff] }
 0x454   : > { %v7642_v38 = vpop.eup %5767 }
 0x455   : > { %v7644_v43 = vpop.eup %5769 }
 0x456   : > { %v7648_v2 = vadd.f32 %v7644_v43, %v7642_v38  ;;  %v3093_v35 = vpop.f32.mrf.mxu0 }
 0x458   : > { %2572 = vadd.xlane.f32.xlu2 %v7499_v11  ;;  %v2910_v11 = vmul.f32 %v7580_v61, %v2718_v28 }
 0x45b   : > { %2557 = vadd.xlane.f32.xlu1 %v7315_v6  ;;  %v2105_v6 = vmul.f32 1.442695, %v2054_v12 }
 0x45d   : > { %v3182_v47 = vpop.f32.mrf.mxu3  ;;  %5771 = vpow2.f32 %v2105_v6 }
 0x45e   : > { %v3183_v56 = vadd.f32 %v3182_v47, %v3093_v35  ;;  %v3095_v63 = vpop.f32.mrf.mxu0 }
 0x45f   : > { %v2224_v61 = vpop.permute.xlu0 %2223 }
 0x460   : > { %v3247_v14 = vadd.f32 %v3183_v56, %v2909_v53 }
 0x462   : > { %3279 = vst.msk [vmem:[#allocation7 + $0x50] sm:$0xff] %vm645_vm1, %v3247_v14 }
 0x463   : > { %v7662_v37 = vpop.eup %5771 }
 0x465   : > { %v3184_v5 = vpop.f32.mrf.mxu3  ;;  %2578 = vadd.xlane.f32.xlu0 %v7517_v25  ;;  %v7672_v25 = vpop.permute.xlu2 %2238 }
 0x466   : > { %v3185_v44 = vadd.f32 %v3184_v5, %v3095_v63 }
 0x468   : > { %v3248_v50 = vadd.f32 %v3185_v44, %v2910_v11  ;;  %v2719_v11 = vld [vmem:[#allocation7 + $0x60] sm:$0xff] }
 0x469   : > { %v2911_v20 = vmul.f32 %v2802_v22, %v2719_v11 }
 0x46a   : > { %3280 = vst.msk [vmem:[#allocation7 + $0x58] sm:$0xff] %vm645_vm1, %v3248_v50  ;;  %v9693_v50 = vld [vmem:[#allocation12_spill] sm:$0xff] }
 0x46b   : > { %v2323_v6 = vsub.f32 %v9693_v50, %v7619_v3  ;;  %v2720_v50 = vld [vmem:[#allocation7 + $0x68] sm:$0xff] }
 0x470   : > { %2253 = vperm.xlu2 %5661, %v7484_v13  }
 0x473   : > { %v1999_v10 = vpop.xlane.xlu1 %1998 }
 0x474   : > { %v7665_v16 = vmax.f32 %v7660_v18, %v1999_v10  ;;  %2836 = vperm.xlu1 %5662, %v7662_v37   ;;  %v9694_v10 = vld [vmem:[#allocation13_spill] sm:$0xff] }
 0x475   : > { %v2324_v0 = vsub.f32 %v9694_v10, %v7619_v3  ;;  %v9697_v3 = vld [vmem:[#allocation18_spill] sm:$0xff] }
 0x476   : > { %3331 = vst.msk [vmem:[#allocation5 + $0xf0] sm:$0xff] %vm1429_vm6, %v7665_v16 }
 0x478   : > { %2263 = vperm.xlu2 %5661, %v7541_v31  }
 0x479   : > { %2268 = vperm.xlu0 %5660, %v7555_v49  }
 0x48a   : > { %v2561_v32 = vpop.xlane.xlu0 %2560  ;;  %v2570_v35 = vpop.xlane.xlu2 %2569 }
 0x48b   : > { %v2647_v47 = vadd.f32 %v2561_v32, %v2519_v27  ;;  %v2650_v53 = vadd.f32 %v2570_v35, %v2522_v17  ;;  %v2812_v56 = vpop.permute.xlu1 %2811  ;;  %v2419_v17 = vmul.f32 1.442695, %v2323_v6  ;;  %v2421_v32 = vmul.f32 1.442695, %v2324_v0 }
 0x48d   : > { %2679 = vst.msk [vmem:[#allocation6 + $0x20] sm:$0xff] %vm1429_vm6, %v2647_v47  ;;  %v9695_v47 = vld [vmem:[#allocation16_spill] sm:$0xff] }
 0x48e   : > { %2682 = vst.msk [vmem:[#allocation6 + $0x38] sm:$0xff] %vm1429_vm6, %v2650_v53 }
 0x490   : > { %v3098_v14 = vpop.f32.mrf.mxu0 }
 0x492   : > { %v2249_v28 = vpop.permute.xlu2 %2248 }
 0x493   : > { %v2337_v12 = vsub.f32 %v7307_v46, %v2249_v28  ;;  %v2338_v63 = vsub.f32 %v7302_v26, %v2249_v28  ;;  %v7680_v5 = vpop.permute.xlu1 %2816  ;;  %v9696_v28 = vld [vmem:[#allocation17_spill] sm:$0xff] }
 0x495   : > { %v2447_v44 = vmul.f32 1.442695, %v2337_v12  ;;  %v2449_v9 = vmul.f32 1.442695, %v2338_v63 }
 0x497   : > { %5773 = vpow2.f32 %v2447_v44  ;;  %v3187_v23 = vpop.f32.mrf.mxu3  ;;  %v2327_v44 = vsub.f32 %v9697_v3, %v2224_v61 }
 0x498   : > { %5775 = vpow2.f32 %v2449_v9  ;;  %v3188_v27 = vadd.f32 %v3187_v23, %v3098_v14  ;;  %v3100_v26 = vpop.f32.mrf.mxu0  ;;  %v9698_v14 = vld [vmem:[#allocation19_spill] sm:$0xff] }
 0x499   : > { %5777 = vpow2.f32 %v2419_v17  ;;  %v2328_v11 = vsub.f32 %v9698_v14, %v2224_v61  ;;  %v2583_v61 = vadd.f32 %v7588_v39, %v7585_v4  ;;  %v9701_v4 = vld [vmem:[#allocation47_spill] sm:$0xff] }
 0x49a   : > { %v3249_v46 = vadd.f32 %v3188_v27, %v2911_v20  ;;  %5779 = vpow2.f32 %v2421_v32  ;;  %v2912_v20 = vmul.f32 %v7622_v59, %v2720_v50  ;;  %v2721_v32 = vld [vmem:[#allocation7 + $0x70] sm:$0xff] }
 0x49b   : > { %v2219_v35 = vpop.permute.xlu1 %2218  ;;  %v2429_v17 = vmul.f32 1.442695, %v2328_v11  ;;  %v2913_v3 = vmul.f32 %v2812_v56, %v2721_v32  ;;  %v9703_v11 = vld [vmem:[#allocation23_spill] sm:$0xff] }
 0x49c   : > { %3281 = vst.msk [vmem:[#allocation7 + $0x60] sm:$0xff] %vm645_vm1, %v3249_v46  ;;  %v2325_v53 = vsub.f32 %v9695_v47, %v2219_v35  ;;  %v2326_v12 = vsub.f32 %v9696_v28, %v2219_v35  ;;  %v2427_v46 = vmul.f32 1.442695, %v2327_v44  ;;  %v9699_v28 = vld [vmem:[#allocation33_spill] sm:$0xff]  ;;  %v9702_v44 = vld [vmem:[#allocation24_spill] sm:$0xff]  ;;  %v2722_v32 = vld [vmem:[#allocation7 + $0x78] sm:$0xff] }
 0x49d   : > { %v7689_v63 = vpop.eup %5773  ;;  %v2234_v10 = vpop.permute.xlu0 %2233 }
 0x49e   : > { %v7692_v22 = vpop.eup %5775  ;;  %v2423_v9 = vmul.f32 1.442695, %v2325_v53  ;;  %v2425_v6 = vmul.f32 1.442695, %v2326_v12  ;;  %2563 = vadd.xlane.f32.xlu1 %v7399_v29  ;;  %v9700_v12 = vld [vmem:[#allocation32_spill] sm:$0xff]  ;;  %v2331_v14 = vsub.f32 %v9702_v44, %v2234_v10 }
 0x49f   : > { %v3189_v0 = vpop.f32.mrf.mxu3  ;;  %v7698_v23 = vadd.f32 %v7692_v22, %v7689_v63  ;;  %v7704_v29 = vpop.eup %5777 }
 0x4a0   : > { %5781 = vpow2.f32 %v2423_v9  ;;  %v3190_v27 = vadd.f32 %v3189_v0, %v3100_v26  ;;  %v7707_v47 = vpop.eup %5779  ;;  %v3103_v59 = vpop.f32.mrf.mxu0  ;;  %v2332_v9 = vsub.f32 %v9703_v11, %v2234_v10 }
 0x4a1   : > { %5783 = vpow2.f32 %v2425_v6  ;;  %2590 = vadd.xlane.f32.xlu2 %v7603_v8 }
 0x4a2   : > { %v3250_v35 = vadd.f32 %v3190_v27, %v2912_v20  ;;  %5785 = vpow2.f32 %v2427_v46  ;;  %v2437_v10 = vmul.f32 1.442695, %v2332_v9 }
 0x4a3   : > { %2584 = vadd.xlane.f32.xlu0 %v2583_v61  ;;  %5787 = vpow2.f32 %v2429_v17 }
 0x4a4   : > { %3282 = vst.msk [vmem:[#allocation7 + $0x68] sm:$0xff] %vm645_vm1, %v3250_v35 }
 0x4a5   : > { %v2244_v26 = vpop.permute.xlu0 %2243 }
 0x4a6   : > { %v5782_v53 = vpop.eup %5781  ;;  %v2335_v8 = vsub.f32 %v9699_v28, %v2244_v26  ;;  %v2336_v50 = vsub.f32 %v9700_v12, %v2244_v26  ;;  %2566 = vadd.xlane.f32.xlu1 %v9701_v4  ;;  %v2435_v28 = vmul.f32 1.442695, %v2331_v14 }
 0x4a7   : > { %v5784_v39 = vpop.eup %5783  ;;  %v3192_v6 = vpop.f32.mrf.mxu3  ;;  %v2947_v0 = vpack.c.bf16 %v5782_v53, %v7704_v29 }
 0x4a8   : > { %v2443_v20 = vmul.f32 1.442695, %v2335_v8  ;;  %v2445_v27 = vmul.f32 1.442695, %v2336_v50  ;;  %v3193_v46 = vadd.f32 %v3192_v6, %v3103_v59  ;;  %v2948_v61 = vpack.c.bf16 %v5784_v39, %v7707_v47  ;;  %v5786_v26 = vpop.eup %5785  ;;  %v9704_v8 = vld [vmem:[#allocation41_spill] sm:$0xff]  ;;  %v9705_v59 = vld [vmem:[#allocation40_spill] sm:$0xff] }
 0x4a9   : > { %3107 = vmatmul.bf16.gmra.mxu0 %v2947_v0  ;;  %v2598_v17 = vadd.f32 %v5784_v39, %v5782_v53  ;;  %v5788_v56 = vpop.eup %5787  ;;  %v2914_v53 = vmul.f32 %v7680_v5, %v2722_v32  ;;  %v3105_v39 = vpop.f32.mrf.mxu0 }
 0x4aa   : > { %5789 = vpow2.f32 %v2443_v20  ;;  %v3251_v35 = vadd.f32 %v3193_v46, %v2913_v3  ;;  %3196 = vmatmul.bf16.gmra.mxu3 %v2948_v61  ;;  %v2601_v0 = vadd.f32 %v5788_v56, %v5786_v26  ;;  %v2949_v46 = vpack.c.bf16 %v7642_v38, %v5786_v26 }
 0x4ab   : > { %5791 = vpow2.f32 %v2445_v27  ;;  %2599 = vadd.xlane.f32.xlu2 %v2598_v17  ;;  %v9706_v17 = vld [vmem:[#allocation29_spill] sm:$0xff] }
 0x4ac   : > { %3283 = vst.msk [vmem:[#allocation7 + $0x70] sm:$0xff] %vm645_vm1, %v3251_v35  ;;  %5793 = vpow2.f32 %v2435_v28  ;;  %v2333_v35 = vsub.f32 %v9706_v17, %v7672_v25  ;;  %v2950_v28 = vpack.c.bf16 %v7644_v43, %v5788_v56 }
 0x4ad   : > { %v2259_v12 = vpop.permute.xlu0 %2258  ;;  %5795 = vpow2.f32 %v2437_v10  ;;  %v9707_v10 = vld [vmem:[#allocation28_spill] sm:$0xff] }
 0x4ae   : > { %v2341_v50 = vsub.f32 %v9704_v8, %v2259_v12  ;;  %v2342_v4 = vsub.f32 %v9705_v59, %v2259_v12  ;;  %2575 = vadd.xlane.f32.xlu1 %v7450_v36  ;;  %v2334_v12 = vsub.f32 %v9707_v10, %v7672_v25  ;;  %v2439_v38 = vmul.f32 1.442695, %v2333_v35  ;;  %v9708_v59 = vld [vmem:[#allocation22_spill] sm:$0xff]  ;;  %v9710_v35 = vld [vmem:[#allocation25_spill] sm:$0xff] }
 0x4af   : > { %v3194_v3 = vpop.f32.mrf.mxu3 }
 0x4b0   : > { %v7721_v44 = vpop.eup %5789  ;;  %v2455_v14 = vmul.f32 1.442695, %v2341_v50  ;;  %v2457_v11 = vmul.f32 1.442695, %v2342_v4  ;;  %v3195_v9 = vadd.f32 %v3194_v3, %v3105_v39  ;;  %v2441_v26 = vmul.f32 1.442695, %v2334_v12 }
 0x4b1   : > { %v7723_v6 = vpop.eup %5791  ;;  %v2485_v50 = vld [vmem:[#allocation6 + $0x10] sm:$0xff]  ;;  %v2491_v3 = vld [vmem:[#allocation6 + $0x40] sm:$0xff] }
 0x4b2   : > { %5797 = vpow2.f32 %v2455_v14  ;;  %v3252_v20 = vadd.f32 %v3195_v9, %v2914_v53  ;;  %v7727_v27 = vadd.f32 %v7723_v6, %v7721_v44  ;;  %v5794_v36 = vpop.eup %5793  ;;  %v2517_v43 = vmul.f32 %v9708_v59, %v2485_v50  ;;  %v9709_v9 = vld [vmem:[#allocation42_spill] sm:$0xff] }
 0x4b3   : > { %5799 = vpow2.f32 %v2457_v11  ;;  %2602 = vadd.xlane.f32.xlu2 %v2601_v0  ;;  %v5796_v5 = vpop.eup %5795  ;;  %v3369_v11 = vld [vmem:[#allocation6 + $0x20] sm:$0xff]  ;;  %v2523_v0 = vmul.f32 %v9709_v9, %v2491_v3  ;;  %v2493_v59 = vld [vmem:[#allocation6 + $0x50] sm:$0xff] }
 0x4b4   : > { %3284 = vst.msk [vmem:[#allocation7 + $0x78] sm:$0xff] %vm645_vm1, %v3252_v20  ;;  %v2607_v8 = vadd.f32 %v5796_v5, %v5794_v36  ;;  %5801 = vpow2.f32 %v2439_v38  ;;  %v2486_v20 = vld [vmem:[#allocation6 + $0x18] sm:$0xff] }
 0x4b5   : > { %5803 = vpow2.f32 %v2441_v26  ;;  %v9712_v26 = vld [vmem:[#allocation37_spill] sm:$0xff] }
 0x4b6   : > { %2581 = vadd.xlane.f32.xlu1 %v7533_v34  ;;  %5805 = vrcp.f32 %v3369_v11 }
 0x4b7   : > { %2283 = vperm.xlu0 %5660, %v7665_v16  }
 0x4b8   : > { %v7733_v61 = vpop.eup %5797 }
 0x4b9   : > { %v7738_v32 = vpop.eup %5799  ;;  %3112 = vmatmul.bf16.gmra.mxu0 %v2949_v46 }
 0x4ba   : > { %3201 = vmatmul.bf16.gmra.mxu3 %v2950_v28  ;;  %v7744_v34 = vadd.f32 %v7738_v32, %v7733_v61  ;;  %v7747_v56 = vpop.eup %5801  ;;  %v2518_v28 = vmul.f32 %v9710_v35, %v2486_v20 }
 0x4bb   : > { %2608 = vadd.xlane.f32.xlu2 %v2607_v8  ;;  %v7749_v53 = vpop.eup %5803  ;;  %v2951_v39 = vpack.c.bf16 %v7747_v56, %v5794_v36  ;;  %v9711_v8 = vld [vmem:[#allocation38_spill] sm:$0xff] }
 0x4bc   : > { %v2952_v14 = vpack.c.bf16 %v7749_v53, %v5796_v5  ;;  %v5806_v5 = vpop.eup %5805 }
 0x4c6   : > { %v2555_v4 = vpop.xlane.xlu1 %2554 }
 0x4c7   : > { %v2645_v25 = vadd.f32 %v2555_v4, %v2517_v43 }
 0x4c9   : > { %2677 = vst.msk [vmem:[#allocation6 + $0x10] sm:$0xff] %vm1429_vm6, %v2645_v25  ;;  %3117 = vmatmul.bf16.gmra.mxu0 %v2951_v39  ;;  %v2525_v25 = vmul.f32 %v7434_v19, %v2493_v59  ;;  %v2953_v39 = vpack.c.bf16 %v7689_v63, %v7721_v44 }
 0x4ca   : > { %3206 = vmatmul.bf16.gmra.mxu3 %v2952_v14  ;;  %v2954_v14 = vpack.c.bf16 %v7692_v22, %v7723_v6 }
 0x4cb   : > { %v2573_v46 = vpop.xlane.xlu2 %2572 }
 0x4cc   : > { %v2651_v17 = vadd.f32 %v2573_v46, %v2523_v0  ;;  %v9713_v0 = vld [vmem:[#allocation46_spill] sm:$0xff]  ;;  %v9714_v46 = vld [vmem:[#allocation45_spill] sm:$0xff] }
 0x4ce   : > { %2683 = vst.msk [vmem:[#allocation6 + $0x40] sm:$0xff] %vm1429_vm6, %v2651_v17  ;;  %v2558_v10 = vpop.xlane.xlu1 %2557 }
 0x4cf   : > { %v2646_v36 = vadd.f32 %v2558_v10, %v2518_v28  ;;  %2273 = vperm.xlu1 %5662, %v7614_v60  }
 0x4d1   : > { %2678 = vst.msk [vmem:[#allocation6 + $0x18] sm:$0xff] %vm1429_vm6, %v2646_v36 }
 0x4d3   : > { %3451 = vperm.xlu2 %5661, %v5806_v5   ;;  %v2254_v12 = vpop.permute.xlu2 %2253 }
 0x4d4   : > { %v2339_v38 = vsub.f32 %v9711_v8, %v2254_v12  ;;  %v2340_v50 = vsub.f32 %v9712_v26, %v2254_v12 }
 0x4d6   : > { %v2451_v43 = vmul.f32 1.442695, %v2339_v38  ;;  %v2453_v4 = vmul.f32 1.442695, %v2340_v50 }
 0x4d8   : > { %5807 = vpow2.f32 %v2451_v43  ;;  %v2579_v3 = vpop.xlane.xlu0 %2578 }
 0x4d9   : > { %5809 = vpow2.f32 %v2453_v4  ;;  %v2653_v11 = vadd.f32 %v2579_v3, %v2525_v25  ;;  %3122 = vmatmul.bf16.gmra.mxu0 %v2953_v39  ;;  %v3367_v25 = vld [vmem:[#allocation6 + $0x10] sm:$0xff] }
 0x4da   : > { %3211 = vmatmul.bf16.gmra.mxu3 %v2954_v14 }
 0x4db   : > { %2685 = vst.msk [vmem:[#allocation6 + $0x50] sm:$0xff] %vm1429_vm6, %v2653_v11  ;;  %v2264_v9 = vpop.permute.xlu2 %2263  ;;  %v9715_v11 = vld [vmem:[#allocation39_spill] sm:$0xff] }
 0x4dc   : > { %v2343_v20 = vsub.f32 %v9713_v0, %v2264_v9  ;;  %v2344_v17 = vsub.f32 %v9714_v46, %v2264_v9  ;;  %v2052_v9 = vsub.f32 %v9715_v11, %v7340_v45  ;;  %v2488_v0 = vld [vmem:[#allocation6 + $0x28] sm:$0xff] }
 0x4de   : > { %v5808_v19 = vpop.eup %5807  ;;  %v2459_v35 = vmul.f32 1.442695, %v2343_v20  ;;  %v2461_v28 = vmul.f32 1.442695, %v2344_v17  ;;  %v2101_v20 = vmul.f32 1.442695, %v2052_v9 }
 0x4df   : > { %v5810_v63 = vpop.eup %5809  ;;  %v2955_v10 = vpack.c.bf16 %v7733_v61, %v5808_v19  ;;  %v2497_v17 = vld [vmem:[#allocation6 + $0x70] sm:$0xff] }
 0x4e0   : > { %5811 = vpow2.f32 %v2459_v35  ;;  %v7769_v44 = vadd.f32 %v5810_v63, %v5808_v19  ;;  %v2956_v36 = vpack.c.bf16 %v7738_v32, %v5810_v63  ;;  %v2529_v63 = vmul.f32 %v7598_v42, %v2497_v17  ;;  %v2494_v17 = vld [vmem:[#allocation6 + $0x58] sm:$0xff] }
 0x4e1   : > { %5813 = vpow2.f32 %v2461_v28  ;;  %2593 = vadd.xlane.f32.xlu0 %v7583_v48  ;;  %v3365_v48 = vld [vmem:[#allocation6] sm:$0xff] }
 0x4e2   : > { %v2495_v28 = vld [vmem:[#allocation6 + $0x60] sm:$0xff] }
 0x4e6   : > { %v5812_v22 = vpop.eup %5811  ;;  %v7782_v3 = vpop.permute.xlu1 %2836 }
 0x4e7   : > { %v5814_v6 = vpop.eup %5813 }
 0x4e8   : > { %v7774_v5 = vadd.f32 %v5814_v6, %v5812_v22 }
 0x4e9   : > { %3127 = vmatmul.bf16.gmra.mxu0 %v2955_v10 }
 0x4ea   : > { %3216 = vmatmul.bf16.gmra.mxu3 %v2956_v36  ;;  %v2527_v36 = vmul.f32 %v7530_v33, %v2495_v28 }
 0x4eb   : > { %v2269_v12 = vpop.permute.xlu0 %2268 }
 0x4ec   : > { %v2345_v8 = vsub.f32 %v7401_v54, %v2269_v12  ;;  %v2346_v38 = vsub.f32 %v7397_v52, %v2269_v12  ;;  %v3366_v54 = vld [vmem:[#allocation6 + $0x8] sm:$0xff]  ;;  %v2489_v12 = vld [vmem:[#allocation6 + $0x30] sm:$0xff] }
 0x4ee   : > { %v2463_v26 = vmul.f32 1.442695, %v2345_v8  ;;  %v2465_v50 = vmul.f32 1.442695, %v2346_v38 }
 0x4f0   : > { %5815 = vpow2.f32 %v2463_v26 }
 0x4f1   : > { %5817 = vpow2.f32 %v2465_v50  ;;  %v9718_v50 = vld [vmem:[#allocation34_spill] sm:$0xff] }
 0x4f2   : > { %5819 = vrcp.f32 %v3365_v48  ;;  %v2521_v48 = vmul.f32 %v9718_v50, %v2489_v12 }
 0x4f3   : > { %5821 = vrcp.f32 %v3366_v54  ;;  %v2492_v54 = vld [vmem:[#allocation6 + $0x48] sm:$0xff] }
 0x4f4   : > { %5823 = vrcp.f32 %v3367_v25 }
 0x4f5   : > { %2288 = vperm.xlu0 %5660, %v7629_v15   ;;  %5825 = vpow2.f32 %v2101_v20 }
 0x4f6   : > { %v5816_v59 = vpop.eup %5815 }
 0x4f7   : > { %v5818_v61 = vpop.eup %5817  ;;  %v2957_v32 = vpack.c.bf16 %v5816_v59, %v5812_v22  ;;  %v9717_v22 = vld [vmem:[#allocation35_spill] sm:$0xff] }
 0x4f8   : > { %v2958_v43 = vpack.c.bf16 %v5818_v61, %v5814_v6  ;;  %v7779_v4 = vadd.f32 %v5818_v61, %v5816_v59  ;;  %v5820_v52 = vpop.eup %5819  ;;  %v2053_v6 = vsub.f32 %v9717_v22, %v7318_v57  ;;  %v2500_v61 = vld [vmem:[#allocation6 + $0x88] sm:$0xff] }
 0x4f9   : > { %2587 = vadd.xlane.f32.xlu1 %v7596_v40  ;;  %3132 = vmatmul.bf16.gmra.mxu0 %v2957_v32  ;;  %v5822_v39 = vpop.eup %5821  ;;  %v9716_v40 = vld [vmem:[#allocation36_spill] sm:$0xff]  ;;  %v9719_v32 = vld [vmem:[#allocation43_spill] sm:$0xff] }
 0x4fa   : > { %3221 = vmatmul.bf16.gmra.mxu3 %v2958_v43  ;;  %v5824_v14 = vpop.eup %5823  ;;  %v2520_v46 = vmul.f32 %v9716_v40, %v2488_v0  ;;  %v2103_v26 = vmul.f32 1.442695, %v2053_v6  ;;  %v2055_v43 = vsub.f32 %v9719_v32, %v7376_v41  ;;  %v2501_v40 = vld [vmem:[#allocation6 + $0x90] sm:$0xff] }
 0x4fb   : > { %v7796_v59 = vpop.eup %5825 }
 0x4fc   : > { %5827 = vpow2.f32 %v2103_v26  ;;  %v2532_v33 = vmul.f32 %v7796_v59, %v2500_v61  ;;  %v2107_v25 = vmul.f32 1.442695, %v2055_v43  ;;  %v2503_v26 = vld [vmem:[#allocation6 + $0xa0] sm:$0xff] }
 0x4fd   : > { %3431 = vperm.xlu0 %5660, %v5820_v52  }
 0x4fe   : > { %5829 = vpow2.f32 %v2107_v25 }
 0x502   : > { %v7804_v0 = vpop.eup %5827 }
 0x504   : > { %v7809_v22 = vpop.eup %5829 }
 0x505   : > { %3436 = vperm.xlu0 %5660, %v5822_v39  }
 0x50d   : > { %3441 = vperm.xlu0 %5660, %v5824_v14   ;;  %v9720_v14 = vld [vmem:[#allocation44_spill] sm:$0xff] }
 0x50e   : > { %v2524_v11 = vmul.f32 %v9720_v14, %v2492_v54 }
 0x511   : > { %v2564_v19 = vpop.xlane.xlu1 %2563 }
 0x512   : > { %v2648_v35 = vadd.f32 %v2564_v19, %v2520_v46  ;;  %2278 = vperm.xlu1 %5662, %v7560_v55   ;;  %v2533_v46 = vmul.f32 %v7804_v0, %v2501_v40  ;;  %v2726_v40 = vld [vmem:[#allocation7 + $0x98] sm:$0xff] }
 0x514   : > { %2680 = vst.msk [vmem:[#allocation6 + $0x28] sm:$0xff] %vm1429_vm6, %v2648_v35  ;;  %v2591_v45 = vpop.xlane.xlu2 %2590 }
 0x515   : > { %v2657_v10 = vadd.f32 %v2591_v45, %v2529_v63  ;;  %v2526_v63 = vmul.f32 %v7455_v30, %v2494_v17  ;;  %v2918_v17 = vmul.f32 %v7782_v3, %v2726_v40 }
 0x516   : > { %v2585_v8 = vpop.xlane.xlu0 %2584 }
 0x517   : > { %2689 = vst.msk [vmem:[#allocation6 + $0x70] sm:$0xff] %vm1429_vm6, %v2657_v10  ;;  %v2655_v38 = vadd.f32 %v2585_v8, %v2527_v36  ;;  %v3372_v10 = vld [vmem:[#allocation6 + $0x38] sm:$0xff] }
 0x519   : > { %2687 = vst.msk [vmem:[#allocation6 + $0x60] sm:$0xff] %vm1429_vm6, %v2655_v38  ;;  %v2567_v42 = vpop.xlane.xlu1 %2566 }
 0x51a   : > { %v2649_v57 = vadd.f32 %v2567_v42, %v2521_v48  ;;  %v2535_v42 = vmul.f32 %v7809_v22, %v2503_v26 }
 0x51c   : > { %2681 = vst.msk [vmem:[#allocation6 + $0x30] sm:$0xff] %vm1429_vm6, %v2649_v57 }
 0x51e   : > { %v2600_v52 = vpop.xlane.xlu2 %2599 }
 0x51f   : > { %v2660_v39 = vadd.f32 %v2600_v52, %v2532_v33 }
 0x521   : > { %2692 = vst.msk [vmem:[#allocation6 + $0x88] sm:$0xff] %vm1429_vm6, %v2660_v39  ;;  %v2576_v9 = vpop.xlane.xlu1 %2575  ;;  %v2595_v39 = vadd.f32 %v7707_v47, %v7704_v29 }
 0x522   : > { %v2652_v20 = vadd.f32 %v2576_v9, %v2524_v11  ;;  %v3368_v9 = vld [vmem:[#allocation6 + $0x18] sm:$0xff] }
 0x523   : > { %v3371_v41 = vld [vmem:[#allocation6 + $0x30] sm:$0xff] }
 0x524   : > { %2684 = vst.msk [vmem:[#allocation6 + $0x48] sm:$0xff] %vm1429_vm6, %v2652_v20  ;;  %5831 = vrcp.f32 %v3371_v41  ;;  %v2610_v20 = vadd.f32 %v7749_v53, %v7747_v56  ;;  %v2498_v53 = vld [vmem:[#allocation6 + $0x78] sm:$0xff] }
 0x525   : > { %5833 = vrcp.f32 %v3372_v10  ;;  %v3637_v10 = vld [vmem:[%s9550_s8] sm:$0x3] }
 0x526   : > { %v2603_v19 = vpop.xlane.xlu2 %2602  ;;  %v3108_v35 = vpop.f32.mrf.mxu0 }
 0x527   : > { %v2661_v28 = vadd.f32 %v2603_v19, %v2533_v46 }
 0x529   : > { %2693 = vst.msk [vmem:[#allocation6 + $0x90] sm:$0xff] %vm1429_vm6, %v2661_v28  ;;  %v2284_v6 = vpop.permute.xlu0 %2283  ;;  %v2582_v45 = vpop.xlane.xlu1 %2581 }
 0x52a   : > { %v5832_v36 = vpop.eup %5831  ;;  %v2351_v12 = vsub.f32 %v7511_v58, %v2284_v6  ;;  %v2352_v8 = vsub.f32 %v7509_v24, %v2284_v6  ;;  %v2654_v38 = vadd.f32 %v2582_v45, %v2526_v63  ;;  %v2530_v6 = vmul.f32 %v7605_v62, %v2498_v53 }
 0x52b   : > { %3461 = vperm.xlu2 %5661, %v5832_v36   ;;  %v5834_v24 = vpop.eup %5833  ;;  %v3373_v36 = vld [vmem:[#allocation6 + $0x40] sm:$0xff] }
 0x52c   : > { %v2475_v50 = vmul.f32 1.442695, %v2351_v12  ;;  %v2477_v48 = vmul.f32 1.442695, %v2352_v8  ;;  %2686 = vst.msk [vmem:[#allocation6 + $0x58] sm:$0xff] %vm1429_vm6, %v2654_v38 }
 0x52d   : > { %v3197_v30 = vpop.f32.mrf.mxu3 }
 0x52e   : > { %5835 = vpow2.f32 %v2475_v50  ;;  %v7816_v57 = vadd.f32 %v3197_v30, %v3108_v35  ;;  %v2609_v61 = vpop.xlane.xlu2 %2608  ;;  %v7818_v58 = vpop.f32.mrf.mxu0  ;;  %v3370_v35 = vld [vmem:[#allocation6 + $0x28] sm:$0xff] }
 0x52f   : > { %5837 = vpow2.f32 %v2477_v48  ;;  %v2663_v32 = vadd.f32 %v2609_v61, %v2535_v42  ;;  %v2496_v50 = vld [vmem:[#allocation6 + $0x68] sm:$0xff] }
 0x530   : > { %5839 = vrcp.f32 %v3368_v9  ;;  %v3374_v48 = vld [vmem:[#allocation6 + $0x48] sm:$0xff]  ;;  %v2528_v61 = vmul.f32 %v7478_v1, %v2496_v50 }
 0x531   : > { %2695 = vst.msk [vmem:[#allocation6 + $0xa0] sm:$0xff] %vm1429_vm6, %v2663_v32  ;;  %5841 = vrcp.f32 %v3370_v35  ;;  %v3334_v1 = vld [vmem:[#allocation7 + $0x8] sm:$0xff] }
 0x532   : > { %5843 = vrcp.f32 %v3373_v36  ;;  %v3377_v36 = vld [vmem:[#allocation6 + $0x60] sm:$0xff] }
 0x533   : > { %3466 = vperm.xlu2 %5661, %v5834_v24   ;;  %5845 = vrcp.f32 %v3374_v48 }
 0x534   : > { %v7821_v43 = vpop.eup %5835 }
 0x535   : > { %v7823_v33 = vpop.eup %5837  ;;  %v7825_v54 = vpop.f32.mrf.mxu3 }
 0x536   : > { %v7829_v52 = vadd.f32 %v7823_v33, %v7821_v43  ;;  %v3113_v25 = vpop.f32.mrf.mxu0  ;;  %v5840_v28 = vpop.eup %5839 }
 0x537   : > { %2605 = vadd.xlane.f32.xlu0 %v7648_v2  ;;  %v5842_v63 = vpop.eup %5841 }
 0x538   : > { %v5844_v12 = vpop.eup %5843 }
 0x53c   : > { %2596 = vadd.xlane.f32.xlu1 %v2595_v39 }
 0x53d   : > { %v3202_v14 = vpop.f32.mrf.mxu3 }
 0x53e   : > { %v7834_v11 = vadd.f32 %v3202_v14, %v3113_v25  ;;  %v3115_v41 = vpop.f32.mrf.mxu0  ;;  %v5846_v25 = vpop.eup %5845  ;;  %v3333_v14 = vld [vmem:[#allocation7] sm:$0xff] }
 0x541   : > { %v2274_v8 = vpop.permute.xlu1 %2273 }
 0x544   : > { %2611 = vadd.xlane.f32.xlu1 %v2610_v20 }
 0x545   : > { %v3204_v46 = vpop.f32.mrf.mxu3 }
 0x546   : > { %v3205_v2 = vadd.f32 %v3204_v46, %v3115_v41  ;;  %v3118_v29 = vpop.f32.mrf.mxu0  ;;  %v9721_v46 = vld [vmem:[#allocation54_spill] sm:$0xff] }
 0x548   : > { %v3256_v19 = vadd.f32 %v3205_v2, %v2918_v17  ;;  %v9722_v17 = vld [vmem:[#allocation53_spill] sm:$0xff] }
 0x549   : > { %v2056_v2 = vsub.f32 %v9722_v17, %v9721_v46 }
 0x54a   : > { %3288 = vst.msk [vmem:[#allocation7 + $0x98] sm:$0xff] %vm645_vm1, %v3256_v19  ;;  %v9723_v19 = vld [vmem:[#allocation50_spill] sm:$0xff] }
 0x54b   : > { %3446 = vperm.xlu0 %5660, %v5840_v28   ;;  %v2347_v35 = vsub.f32 %v9723_v19, %v2274_v8  ;;  %v9724_v28 = vld [vmem:[#allocation49_spill] sm:$0xff] }
 0x54c   : > { %2614 = vadd.xlane.f32.xlu1 %v7727_v27  ;;  %v3691_v27 = vsel %vm965_vm0, %v3637_v10, 0  ;;  %v9726_v10 = vld [vmem:[#allocation51_spill] sm:$0xff] }
 0x54d   : > { %v3207_v47 = vpop.f32.mrf.mxu3  ;;  %3700 = vmatpush.bf16.msrb.mxu1 %v3691_v27  ;;  %v2467_v53 = vmul.f32 1.442695, %v2347_v35  ;;  %v2502_v35 = vld [vmem:[#allocation6 + $0x98] sm:$0xff] }
 0x54e   : > { %v7841_v56 = vadd.f32 %v3207_v47, %v3118_v29  ;;  %v2348_v29 = vsub.f32 %v9724_v28, %v2274_v8  ;;  %v2109_v47 = vmul.f32 1.442695, %v2056_v2  ;;  %v2534_v28 = vmul.f32 %v7662_v37, %v2502_v35  ;;  %v2504_v37 = vld [vmem:[#allocation6 + $0xa8] sm:$0xff]  ;;  %v2507_v35 = vld [vmem:[#allocation6 + $0xc0] sm:$0xff] }
 0x553   : > { %3456 = vperm.xlu0 %5660, %v5842_v63   ;;  %v2469_v63 = vmul.f32 1.442695, %v2348_v29 }
 0x554   : > { %v2594_v3 = vpop.xlane.xlu0 %2593 }
 0x555   : > { %v2658_v45 = vadd.f32 %v2594_v3, %v2530_v6  ;;  %v9725_v3 = vld [vmem:[#allocation52_spill] sm:$0xff] }
 0x557   : > { %2690 = vst.msk [vmem:[#allocation6 + $0x78] sm:$0xff] %vm1429_vm6, %v2658_v45 }
 0x55c   : > { %2620 = vadd.xlane.f32.xlu2 %v7769_v44 }
 0x565   : > { %3471 = vperm.xlu1 %5662, %v5844_v12  }
 0x567   : > { %v2289_v38 = vpop.permute.xlu0 %2288 }
 0x568   : > { %v2353_v62 = vsub.f32 %v7521_v21, %v2289_v38  ;;  %v2354_v26 = vsub.f32 %v7519_v51, %v2289_v38 }
 0x56a   : > { %v2479_v30 = vmul.f32 1.442695, %v2353_v62  ;;  %v2481_v42 = vmul.f32 1.442695, %v2354_v26 }
 0x56c   : > { %5847 = vpow2.f32 %v2479_v30  ;;  %v2588_v32 = vpop.xlane.xlu1 %2587 }
 0x56d   : > { %5849 = vpow2.f32 %v2481_v42  ;;  %v2656_v44 = vadd.f32 %v2588_v32, %v2528_v61  ;;  %v3376_v61 = vld [vmem:[#allocation6 + $0x58] sm:$0xff]  ;;  %v3382_v32 = vld [vmem:[#allocation6 + $0x88] sm:$0xff] }
 0x56e   : > { %5851 = vpow2.f32 %v2109_v47  ;;  %v2499_v47 = vld [vmem:[#allocation6 + $0x80] sm:$0xff] }
 0x56f   : > { %2688 = vst.msk [vmem:[#allocation6 + $0x68] sm:$0xff] %vm1429_vm6, %v2656_v44  ;;  %v3432_v24 = vpop.permute.xlu0 %3431  ;;  %5853 = vpow2.f32 %v2467_v53 }
 0x570   : > { %v3589_v20 = vmul.f32 %v3432_v24, %v3333_v14  ;;  %5855 = vpow2.f32 %v2469_v63  ;;  %v9728_v24 = vld [vmem:[#allocation31_spill] sm:$0xff] }
 0x572   : > { %v7854_v39 = vpop.eup %5847 }
 0x573   : > { %v7856_v21 = vpop.eup %5849 }
 0x574   : > { %3476 = vperm.xlu2 %5661, %v5846_v25   ;;  %v7860_v51 = vadd.f32 %v7856_v21, %v7854_v39  ;;  %v5852_v12 = vpop.eup %5851  ;;  %v9729_v25 = vld [vmem:[#allocation30_spill] sm:$0xff] }
 0x575   : > { %v7873_v8 = vpop.eup %5853  ;;  %v2051_v14 = vsub.f32 %v9729_v25, %v9728_v24 }
 0x576   : > { %v7877_v62 = vpop.eup %5855 }
 0x577   : > { %v3437_v9 = vpop.permute.xlu0 %3436 }
 0x578   : > { %v3590_v40 = vmul.f32 %v3437_v9, %v3334_v1  ;;  %v2961_v9 = vpack.c.bf16 %v7854_v39, %v7821_v43 }
 0x57a   : > { %v3621_v41 = vpack.c.bf16 %v3590_v40, %v3589_v20  ;;  %v2099_v20 = vmul.f32 1.442695, %v2051_v14  ;;  %v9730_v40 = vld [vmem:[#allocation56_spill] sm:$0xff] }
 0x57c   : > { %5527 = vmatmul.msk.bf16.vlgmr.msrb.gmra.mxu1 %vm645_vm1, %v3621_v41  ;;  %2826 = vperm.xlu2 %5661, %v7796_v59   ;;  %v9731_v41 = vld [vmem:[#allocation55_spill] sm:$0xff] }
 0x57d   : > { %2617 = vadd.xlane.f32.xlu0 %v7698_v23  ;;  %v2058_v46 = vsub.f32 %v9731_v41, %v9730_v40 }
 0x57f   : > { %v3442_v17 = vpop.permute.xlu0 %3441  ;;  %v2113_v19 = vmul.f32 1.442695, %v2058_v46  ;;  %v9733_v46 = vld [vmem:[#allocation59_spill] sm:$0xff] }
 0x584   : > { %v2279_v6 = vpop.permute.xlu1 %2278  ;;  %2831 = vperm.xlu2 %5661, %v7804_v0   ;;  %v9727_v0 = vld [vmem:[#allocation48_spill] sm:$0xff] }
 0x585   : > { %v2349_v45 = vsub.f32 %v9725_v3, %v2279_v6  ;;  %v2350_v59 = vsub.f32 %v9726_v10, %v2279_v6  ;;  %2626 = vadd.xlane.f32.xlu0 %v7774_v5  ;;  %v2057_v38 = vsub.f32 %v9727_v0, %v7414_v7  ;;  %v3375_v5 = vld [vmem:[#allocation6 + $0x50] sm:$0xff]  ;;  %v3452_v3 = vpop.permute.xlu2 %3451  ;;  %v9732_v0 = vld [vmem:[#allocation57_spill] sm:$0xff] }
 0x587   : > { %v2471_v27 = vmul.f32 1.442695, %v2349_v45  ;;  %v2473_v23 = vmul.f32 1.442695, %v2350_v59  ;;  %v2111_v30 = vmul.f32 1.442695, %v2057_v38  ;;  %v2536_v45 = vmul.f32 %v5852_v12, %v2504_v37 }
 0x588   : > { %v2059_v38 = vsub.f32 %v9732_v0, %v7484_v13 }
 0x589   : > { %5857 = vpow2.f32 %v2471_v27 }
 0x58a   : > { %5859 = vpow2.f32 %v2473_v23 }
 0x58b   : > { %5861 = vrcp.f32 %v3377_v36  ;;  %v2505_v36 = vld [vmem:[#allocation6 + $0xb0] sm:$0xff] }
 0x58c   : > { %2846 = vperm.xlu2 %5661, %v5852_v12   ;;  %5863 = vrcp.f32 %v3375_v5  ;;  %v3335_v5 = vld [vmem:[#allocation7 + $0x10] sm:$0xff]  ;;  %v3385_v12 = vld [vmem:[#allocation6 + $0xa0] sm:$0xff] }
 0x58d   : > { %5865 = vpow2.f32 %v2111_v30  ;;  %v3336_v30 = vld [vmem:[#allocation7 + $0x18] sm:$0xff] }
 0x58e   : > { %5867 = vrcp.f32 %v3376_v61 }
 0x58f   : > { %v7879_v26 = vpop.eup %5857  ;;  %2623 = vadd.xlane.f32.xlu1 %v7744_v34  ;;  %5869 = vrcp.f32 %v3382_v32 }
 0x590   : > { %v7882_v50 = vpop.eup %5859  ;;  %v2959_v48 = vpack.c.bf16 %v7879_v26, %v7873_v8  ;;  %5871 = vpow2.f32 %v2099_v20 }
 0x591   : > { %v2960_v42 = vpack.c.bf16 %v7882_v50, %v7877_v62  ;;  %v5862_v7 = vpop.eup %5861  ;;  %5873 = vpow2.f32 %v2113_v19  ;;  %v3338_v19 = vld [vmem:[#allocation7 + $0x28] sm:$0xff] }
 0x592   : > { %3137 = vmatmul.bf16.gmra.mxu0 %v2959_v48  ;;  %v5864_v34 = vpop.eup %5863  ;;  %v3462_v48 = vpop.permute.xlu2 %3461 }
 0x593   : > { %3226 = vmatmul.bf16.gmra.mxu3 %v2960_v42  ;;  %v5866_v44 = vpop.eup %5865 }
 0x594   : > { %3491 = vperm.xlu2 %5661, %v5862_v7   ;;  %v5868_v1 = vpop.eup %5867  ;;  %v3591_v7 = vmul.f32 %v3442_v17, %v3335_v5 }
 0x595   : > { %v5870_v2 = vpop.eup %5869 }
 0x596   : > { %v7898_v39 = vpop.eup %5871 }
 0x597   : > { %2629 = vadd.xlane.f32.xlu1 %v7779_v4  ;;  %v2962_v4 = vpack.c.bf16 %v7856_v21, %v7823_v33  ;;  %v2531_v33 = vmul.f32 %v7898_v39, %v2499_v47  ;;  %v3378_v21 = vld [vmem:[#allocation6 + $0x68] sm:$0xff]  ;;  %v7902_v53 = vpop.eup %5873 }
 0x598   : > { %5875 = vrcp.f32 %v3378_v21 }
 0x599   : > { %3481 = vperm.xlu0 %5660, %v5864_v34   ;;  %v2537_v34 = vmul.f32 %v5866_v44, %v2505_v36 }
 0x59a   : > { %v3467_v20 = vpop.permute.xlu2 %3466 }
 0x59c   : > { %2851 = vperm.xlu2 %5661, %v5866_v44   ;;  %v2634_v44 = vadd.f32 %v7882_v50, %v7879_v26  ;;  %v3379_v26 = vld [vmem:[#allocation6 + $0x70] sm:$0xff] }
 0x59e   : > { %v5876_v10 = vpop.eup %5875 }
 0x5a1   : > { %3486 = vperm.xlu0 %5660, %v5868_v1   ;;  %v2115_v1 = vmul.f32 1.442695, %v2059_v38 }
 0x5a2   : > { %3142 = vmatmul.bf16.gmra.mxu0 %v2961_v9 }
 0x5a3   : > { %3231 = vmatmul.bf16.gmra.mxu3 %v2962_v4  ;;  %v9734_v4 = vld [vmem:[#allocation58_spill] sm:$0xff] }
 0x5a4   : > { %3516 = vperm.xlu2 %5661, %v5870_v2   ;;  %v2060_v17 = vsub.f32 %v9734_v4, %v9733_v46  ;;  %v2728_v46 = vld [vmem:[#allocation7 + $0xa8] sm:$0xff]  ;;  %v3120_v4 = vpop.f32.mrf.mxu0 }
 0x5aa   : > { %v2606_v43 = vpop.xlane.xlu0 %2605 }
 0x5ab   : > { %v2662_v29 = vadd.f32 %v2606_v43, %v2534_v28  ;;  %v3337_v43 = vld [vmem:[#allocation7 + $0x20] sm:$0xff] }
 0x5ac   : > { %v3593_v47 = vmul.f32 %v3452_v3, %v3337_v43  ;;  %v3340_v3 = vld [vmem:[#allocation7 + $0x38] sm:$0xff] }
 0x5ad   : > { %2694 = vst.msk [vmem:[#allocation6 + $0x98] sm:$0xff] %vm1429_vm6, %v2662_v29  ;;  %v2117_v29 = vmul.f32 1.442695, %v2060_v17 }
 0x5af   : > { %v2597_v63 = vpop.xlane.xlu1 %2596 }
 0x5b0   : > { %v2659_v6 = vadd.f32 %v2597_v63, %v2531_v33  ;;  %2856 = vperm.xlu1 %5662, %v7902_v53  }
 0x5b2   : > { %2691 = vst.msk [vmem:[#allocation6 + $0x80] sm:$0xff] %vm1429_vm6, %v2659_v6 }
 0x5b7   : > { %v2612_v59 = vpop.xlane.xlu1 %2611 }
 0x5b8   : > { %v2664_v27 = vadd.f32 %v2612_v59, %v2536_v45  ;;  %3496 = vperm.xlu1 %5662, %v5876_v10   ;;  %v3596_v10 = vmul.f32 %v3467_v20, %v3340_v3  ;;  %v3339_v59 = vld [vmem:[#allocation7 + $0x30] sm:$0xff] }
 0x5b9   : > { %v3381_v23 = vld [vmem:[#allocation6 + $0x80] sm:$0xff]  ;;  %v3595_v0 = vmul.f32 %v3462_v48, %v3339_v59  ;;  %v3783_v3 = vld [vmem:[%s6134_s23] sm:$0xff] }
 0x5ba   : > { %2696 = vst.msk [vmem:[#allocation6 + $0xa8] sm:$0xff] %vm1429_vm6, %v2664_v27  ;;  %5877 = vrcp.f32 %v3381_v23  ;;  %v2724_v27 = vld [vmem:[#allocation7 + $0x88] sm:$0xff]  ;;  %v3380_v23 = vld [vmem:[#allocation6 + $0x78] sm:$0xff] }
 0x5bb   : > { %5879 = vrcp.f32 %v3385_v12 }
 0x5bd   : > { %v3447_v42 = vpop.permute.xlu0 %3446 }
 0x5be   : > { %v3592_v61 = vmul.f32 %v3447_v42, %v3336_v30  ;;  %v3200_v30 = vadd.f32 %v7825_v54, %v7818_v58  ;;  %v3624_v42 = vpack.c.bf16 %v3596_v10, %v3595_v0  ;;  %v3341_v54 = vld [vmem:[#allocation7 + $0x40] sm:$0xff]  ;;  %v2508_v0 = vld [vmem:[#allocation6 + $0xc8] sm:$0xff] }
 0x5bf   : > { %v2615_v32 = vpop.xlane.xlu1 %2614 }
 0x5c0   : > { %v5878_v24 = vpop.eup %5877  ;;  %v3622_v25 = vpack.c.bf16 %v3592_v61, %v3591_v7  ;;  %v2665_v14 = vadd.f32 %v2615_v32, %v2537_v34  ;;  %v2725_v34 = vld [vmem:[#allocation7 + $0x90] sm:$0xff]  ;;  %v9735_v32 = vld [vmem:[#allocation60_spill] sm:$0xff] }
 0x5c1   : > { %3511 = vperm.xlu1 %5662, %v5878_v24   ;;  %v3386_v9 = vld [vmem:[#allocation6 + $0xa8] sm:$0xff]  ;;  %v5880_v13 = vpop.eup %5879  ;;  %v2061_v48 = vsub.f32 %v9735_v32, %v7541_v31  ;;  %v7967_v32 = vld [vmem:[%s7962_s24] sm:$0xff] }
 0x5c2   : > { %2697 = vst.msk [vmem:[#allocation6 + $0xb0] sm:$0xff] %vm1429_vm6, %v2665_v14  ;;  %5528 = vmatmul.msk.bf16.gmra.mxu1 %vm645_vm1, %v3622_v25  ;;  %5881 = vrcp.f32 %v3386_v9  ;;  %v3342_v9 = vld [vmem:[#allocation7 + $0x48] sm:$0xff] }
 0x5c3   : > { %5883 = vpow2.f32 %v2115_v1  ;;  %v2119_v1 = vmul.f32 1.442695, %v2061_v48  ;;  %v7970_v48 = vld [vmem:[%s7962_s24 + $0x8] sm:$0xff] }
 0x5c4   : > { %5885 = vpow2.f32 %v2117_v29 }
 0x5c5   : > { %v3457_v41 = vpop.permute.xlu0 %3456  ;;  %5887 = vrcp.f32 %v3379_v26 }
 0x5c6   : > { %v3594_v28 = vmul.f32 %v3457_v41, %v3338_v19  ;;  %v3383_v41 = vld [vmem:[#allocation6 + $0x90] sm:$0xff] }
 0x5c8   : > { %v5882_v40 = vpop.eup %5881  ;;  %v3623_v63 = vpack.c.bf16 %v3594_v28, %v3593_v47  ;;  %v2631_v28 = vadd.f32 %v7877_v62, %v7873_v8  ;;  %v7940_v8 = vld [vmem:[%s9551_s9] ss:$0 sm:$0xff] }
 0x5c9   : > { %3536 = vperm.xlu2 %5661, %v5882_v40   ;;  %3531 = vperm.xlu1 %5662, %v5880_v13   ;;  %v5884_v2 = vpop.eup %5883  ;;  %v3387_v37 = vld [vmem:[#allocation6 + $0xb0] sm:$0xff]  ;;  %v2506_v40 = vld [vmem:[#allocation6 + $0xb8] sm:$0xff] }
 0x5ca   : > { %v2539_v33 = vmul.f32 %v5884_v2, %v2507_v35  ;;  %v7917_v45 = vpop.eup %5885  ;;  %5889 = vrcp.f32 %v3387_v37  ;;  %v2538_v17 = vmul.f32 %v7902_v53, %v2506_v40  ;;  %v2509_v53 = vld [vmem:[#allocation6 + $0xd0] sm:$0xff]  ;;  %v4427_v40 = vmul.f32 %v7967_v32, %v7967_v32 }
 0x5cb   : > { %2635 = vadd.xlane.f32.xlu0 %v2634_v44  ;;  %v5888_v36 = vpop.eup %5887  ;;  %5891 = vrcp.f32 %v3380_v23  ;;  %v3209_v44 = vpop.f32.mrf.mxu3  ;;  %v2729_v23 = vld [vmem:[#allocation7 + $0xb0] sm:$0xff] }
 0x5cc   : > { %5893 = vpow2.f32 %v2119_v1  ;;  %v4358_v1 = vsel %vm645_vm1, %v7967_v32, 0.0 }
 0x5cd   : > { %5895 = vrcp.f32 %v3383_v41  ;;  %v4428_v41 = vmul.f32 %v7970_v48, %v7970_v48 }
 0x5cf   : > { %v2621_v21 = vpop.xlane.xlu2 %2620 }
 0x5d0   : > { %v2667_v6 = vadd.f32 %v2621_v21, %v2539_v33  ;;  %v5890_v5 = vpop.eup %5889  ;;  %v3384_v33 = vld [vmem:[#allocation6 + $0x98] sm:$0xff] }
 0x5d1   : > { %2861 = vperm.xlu1 %5662, %v5884_v2   ;;  %v5892_v12 = vpop.eup %5891  ;;  %v3210_v2 = vadd.f32 %v3209_v44, %v3120_v4  ;;  %5897 = vrcp.f32 %v3384_v33 }
 0x5d2   : > { %2699 = vst.msk [vmem:[#allocation6 + $0xc0] sm:$0xff] %vm1429_vm6, %v2667_v6  ;;  %5529 = vmatmul.msk.bf16.gmra.mxu1 %vm645_vm1, %v3623_v63  ;;  %v9736_v63 = vld [vmem:[#allocation61_spill] sm:$0xff] }
 0x5d3   : > { %v2062_v6 = vsub.f32 %v9736_v63, %v7555_v49  ;;  %v3212_v49 = vpop.f32.mrf.mxu3 }
 0x5d5   : > { %v2121_v59 = vmul.f32 1.442695, %v2062_v6  ;;  %v8012_v6 = vld [vmem:[%s7962_s24 + $0x28] sm:$0xff] }
 0x5d7   : > { %v3477_v50 = vpop.permute.xlu2 %3476  ;;  %v3472_v14 = vpop.permute.xlu1 %3471  ;;  %5899 = vpow2.f32 %v2121_v59 }
 0x5d8   : > { %v3597_v13 = vmul.f32 %v3472_v14, %v3341_v54  ;;  %v3598_v20 = vmul.f32 %v3477_v50, %v3342_v9  ;;  %v7978_v9 = vld [vmem:[%s7962_s24 + $0x10] sm:$0xff] }
 0x5d9   : > { %2866 = vperm.xlu1 %5662, %v7917_v45  }
 0x5df   : > { %3501 = vperm.xlu0 %5660, %v5888_v36   ;;  %v2827_v38 = vpop.permute.xlu2 %2826 }
 0x5e0   : > { %v2916_v7 = vmul.f32 %v2827_v38, %v2724_v27  ;;  %v3123_v38 = vpop.f32.mrf.mxu0 }
 0x5e1   : > { %3541 = vperm.xlu1 %5662, %v5890_v5  }
 0x5e2   : > { %v3254_v61 = vadd.f32 %v3200_v30, %v2916_v7  ;;  %5530 = vmatmul.msk.bf16.gmra.mxu1 %vm645_vm1, %v3624_v42  ;;  %v3213_v30 = vadd.f32 %v3212_v49, %v3123_v38  ;;  %v3389_v7 = vld [vmem:[#allocation6 + $0xc0] sm:$0xff] }
 0x5e3   : > { %5901 = vrcp.f32 %v3389_v7  ;;  %v8021_v49 = vld [vmem:[%s7962_s24 + $0x30] sm:$0xff] }
 0x5e4   : > { %3286 = vst.msk [vmem:[#allocation7 + $0x88] sm:$0xff] %vm645_vm1, %v3254_v61  ;;  %v4369_v38 = vsel %vm645_vm1, %v8021_v49, 0.0 }
 0x5e7   : > { %3506 = vperm.xlu0 %5660, %v5892_v12   ;;  %v2832_v24 = vpop.permute.xlu2 %2831  ;;  %v2540_v12 = vmul.f32 %v7917_v45, %v2508_v0 }
 0x5e8   : > { %v2917_v25 = vmul.f32 %v2832_v24, %v2725_v34  ;;  %v3784_v34 = vld [vmem:[%s6134_s23 + $0x8] sm:$0xff] }
 0x5ea   : > { %v3255_v58 = vadd.f32 %v7834_v11, %v2917_v25  ;;  %v3625_v11 = vpack.c.bf16 %v3598_v20, %v3597_v13  ;;  %v4361_v20 = vsel %vm645_vm1, %v7978_v9, 0.0 }
 0x5ec   : > { %3287 = vst.msk [vmem:[#allocation7 + $0x90] sm:$0xff] %vm645_vm1, %v3255_v58  ;;  %v4359_v58 = vsel %vm645_vm1, %v7970_v48, 0.0 }
 0x5ed   : > { %v4360_v45 = vadd.f32 %v4359_v58, %v4358_v1 }
 0x5ef   : > { %2821 = vperm.xlu0 %5660, %v7898_v39   ;;  %v2847_v31 = vpop.permute.xlu2 %2846  ;;  %v7934_v39 = vpop.eup %5893  ;;  %v4362_v4 = vadd.f32 %v4361_v20, %v4360_v45 }
 0x5f0   : > { %v2920_v19 = vmul.f32 %v2847_v31, %v2728_v46  ;;  %v2618_v35 = vpop.xlane.xlu0 %2617  ;;  %v5896_v47 = vpop.eup %5895  ;;  %v2541_v21 = vmul.f32 %v7934_v39, %v2509_v53  ;;  %v7989_v46 = vld [vmem:[%s7962_s24 + $0x18] sm:$0xff] }
 0x5f1   : > { %v2666_v43 = vadd.f32 %v2618_v35, %v2538_v17  ;;  %v5898_v36 = vpop.eup %5897  ;;  %v2510_v17 = vld [vmem:[#allocation6 + $0xd8] sm:$0xff]  ;;  %v4460_v35 = vsel %vm645_vm1, %v4428_v41, 0.0  ;;  %v3343_v41 = vld [vmem:[#allocation7 + $0x50] sm:$0xff] }
 0x5f2   : > { %v3258_v29 = vadd.f32 %v3210_v2, %v2920_v19  ;;  %2632 = vadd.xlane.f32.xlu2 %v2631_v28  ;;  %5531 = vmatmul.msk.bf16.gmra.mxu1 %vm645_vm1, %v3625_v11  ;;  %v7991_v31 = vpop.eup %5899  ;;  %v4363_v2 = vsel %vm645_vm1, %v7989_v46, 0.0  ;;  %v4429_v11 = vmul.f32 %v7978_v9, %v7978_v9  ;;  %v4459_v19 = vsel %vm645_vm1, %v4427_v40, 0.0  ;;  %v8003_v28 = vld [vmem:[%s7962_s24 + $0x20] sm:$0xff] }
 0x5f3   : > { %2698 = vst.msk [vmem:[#allocation6 + $0xb8] sm:$0xff] %vm1429_vm6, %v2666_v43  ;;  %v4364_v43 = vadd.f32 %v4363_v2, %v4362_v4  ;;  %v4365_v53 = vsel %vm645_vm1, %v8003_v28, 0.0  ;;  %v2542_v63 = vmul.f32 %v7991_v31, %v2510_v17 }
 0x5f4   : > { %3290 = vst.msk [vmem:[#allocation7 + $0xa8] sm:$0xff] %vm645_vm1, %v3258_v29  ;;  %v4461_v29 = vadd.f32 %v4460_v35, %v4459_v19  ;;  %v4462_v33 = vsel %vm645_vm1, %v4429_v11, 0.0  ;;  %v3344_v19 = vld [vmem:[#allocation7 + $0x58] sm:$0xff] }
 0x5f7   : > { %3521 = vperm.xlu0 %5660, %v5896_v47   ;;  %v7942_v62 = vpop.permute.xlu2 %3491  ;;  %v4430_v47 = vmul.f32 %v7989_v46, %v7989_v46 }
 0x5f8   : > { %v2627_v26 = vpop.xlane.xlu0 %2626 }
 0x5f9   : > { %v2669_v50 = vadd.f32 %v2627_v26, %v2541_v21  ;;  %v3702_v37 = vpop.f32.mrf.mxu1  ;;  %v5902_v21 = vpop.eup %5901  ;;  %v4463_v26 = vadd.f32 %v4462_v33, %v4461_v29 }
 0x5fa   : > { %v3703_v10 = vadd.f32 %v7940_v8, %v3702_v37  ;;  %v3388_v44 = vld [vmem:[#allocation6 + $0xb8] sm:$0xff]  ;;  %v4367_v37 = vsel %vm645_vm1, %v8012_v6, 0.0 }
 0x5fb   : > { %2701 = vst.msk [vmem:[#allocation6 + $0xd0] sm:$0xff] %vm1429_vm6, %v2669_v50  ;;  %5903 = vrcp.f32 %v3388_v44 }
 0x5fc   : > { %v3815_v27 = vadd.f32 %v3783_v3, %v3703_v10  ;;  %v4431_v3 = vmul.f32 %v8003_v28, %v8003_v28  ;;  %v4464_v10 = vsel %vm645_vm1, %v4430_v47, 0.0 }
 0x5fe   : > { %3848 = vst.msk [vmem:[%s7953_s1] sm:$0xff] %vm645_vm1, %v3815_v27 }
 0x5ff   : > { %3526 = vperm.xlu0 %5660, %v5898_v36   ;;  %v2852_v5 = vpop.permute.xlu2 %2851  ;;  %v4465_v36 = vadd.f32 %v4464_v10, %v4463_v26 }
 0x600   : > { %v2921_v42 = vmul.f32 %v2852_v5, %v2729_v23  ;;  %v4432_v5 = vmul.f32 %v8012_v6, %v8012_v6 }
 0x601   : > { %v3704_v61 = vpop.f32.mrf.mxu1 }
 0x602   : > { %v3259_v24 = vadd.f32 %v3213_v30, %v2921_v42  ;;  %v3705_v25 = vadd.f32 %v7940_v8, %v3704_v61  ;;  %v2624_v14 = vpop.xlane.xlu1 %2623  ;;  %v4466_v30 = vsel %vm645_vm1, %v4431_v3, 0.0  ;;  %v8030_v42 = vld [vmem:[%s7962_s24 + $0x38] sm:$0xff]  ;;  %v5904_v61 = vpop.eup %5903 }
 0x603   : > { %v2668_v54 = vadd.f32 %v2624_v14, %v2540_v12  ;;  %v4467_v7 = vadd.f32 %v4466_v30, %v4465_v36  ;;  %v4433_v12 = vmul.f32 %v8021_v49, %v8021_v49  ;;  %v8079_v30 = vld [vmem:[%s7962_s24 + $0x68] sm:$0xff] }
 0x604   : > { %3291 = vst.msk [vmem:[#allocation7 + $0xb0] sm:$0xff] %vm645_vm1, %v3259_v24  ;;  %v3816_v13 = vadd.f32 %v3784_v34, %v3705_v25  ;;  %v4371_v34 = vsel %vm645_vm1, %v8030_v42, 0.0  ;;  %v4468_v24 = vsel %vm645_vm1, %v4432_v5, 0.0  ;;  %v8038_v25 = vld [vmem:[%s7962_s24 + $0x40] sm:$0xff] }
 0x605   : > { %2700 = vst.msk [vmem:[#allocation6 + $0xc8] sm:$0xff] %vm1429_vm6, %v2668_v54  ;;  %v4469_v1 = vadd.f32 %v4468_v24, %v4467_v7  ;;  %v4373_v58 = vsel %vm645_vm1, %v8038_v25, 0.0  ;;  %v4434_v54 = vmul.f32 %v8030_v42, %v8030_v42  ;;  %v4470_v45 = vsel %vm645_vm1, %v4433_v12, 0.0 }
 0x606   : > { %3849 = vst.msk [vmem:[%s7953_s1 + $0x8] sm:$0xff] %vm645_vm1, %v3816_v13  ;;  %v8046_v13 = vld [vmem:[%s7962_s24 + $0x48] sm:$0xff]  ;;  %v4435_v4 = vmul.f32 %v8038_v25, %v8038_v25 }
 0x607   : > { %2841 = vperm.xlu0 %5660, %v7809_v22   ;;  %v4366_v22 = vadd.f32 %v4365_v53, %v4364_v43  ;;  %v4471_v40 = vadd.f32 %v4470_v45, %v4469_v1  ;;  %v4375_v44 = vsel %vm645_vm1, %v8046_v13, 0.0  ;;  %v4472_v17 = vsel %vm645_vm1, %v4434_v54, 0.0  ;;  %v8054_v43 = vld [vmem:[%s7962_s24 + $0x50] sm:$0xff] }
 0x608   : > { %v4377_v33 = vsel %vm645_vm1, %v8054_v43, 0.0  ;;  %v4437_v10 = vmul.f32 %v8054_v43, %v8054_v43  ;;  %v4440_v45 = vmul.f32 %v8079_v30, %v8079_v30 }
 0x609   : > { %v4368_v23 = vadd.f32 %v4367_v37, %v4366_v22  ;;  %v4473_v53 = vadd.f32 %v4472_v17, %v4471_v40  ;;  %v8062_v22 = vld [vmem:[%s7962_s24 + $0x58] sm:$0xff]  ;;  %v9738_v40 = vld [vmem:[#allocation8_spill] sm:$0xff] }
 0x60a   : > { %v2630_v50 = vpop.xlane.xlu1 %2629  ;;  %3551 = vperm.xlu2 %5661, %v5902_v21   ;;  %v4436_v21 = vmul.f32 %v8046_v13, %v8046_v13  ;;  %v4379_v3 = vsel %vm645_vm1, %v8062_v22, 0.0  ;;  %v4478_v5 = vsel %vm645_vm1, %v4437_v10, 0.0 }
 0x60b   : > { %v2670_v59 = vadd.f32 %v2630_v50, %v2542_v63  ;;  %v3482_v27 = vpop.permute.xlu0 %3481  ;;  %2638 = vadd.xlane.f32.xlu1 %v7829_v52  ;;  %v4370_v52 = vadd.f32 %v4369_v38, %v4368_v23  ;;  %v4474_v63 = vsel %vm645_vm1, %v4435_v4, 0.0  ;;  %v4438_v38 = vmul.f32 %v8062_v22, %v8062_v22 }
 0x60c   : > { %v3390_v0 = vld [vmem:[#allocation6 + $0xc8] sm:$0xff]  ;;  %v3599_v11 = vmul.f32 %v3482_v27, %v3343_v41  ;;  %v4475_v50 = vadd.f32 %v4474_v63, %v4473_v53  ;;  %v8070_v27 = vld [vmem:[%s7962_s24 + $0x60] sm:$0xff]  ;;  %v2063_v41 = vsub.f32 %v9738_v40, %v7614_v60  ;;  %v3214_v53 = vpop.f32.mrf.mxu3 }
 0x60d   : > { %2702 = vst.msk [vmem:[#allocation6 + $0xd8] sm:$0xff] %vm1429_vm6, %v2670_v59  ;;  %5905 = vrcp.f32 %v3390_v0  ;;  %v4372_v14 = vadd.f32 %v4371_v34, %v4370_v52  ;;  %v4476_v59 = vsel %vm645_vm1, %v4436_v21, 0.0  ;;  %v4381_v0 = vsel %vm645_vm1, %v8070_v27, 0.0  ;;  %v2730_v60 = vld [vmem:[#allocation7 + $0xb8] sm:$0xff] }
 0x60e   : > { %v4477_v36 = vadd.f32 %v4476_v59, %v4475_v50  ;;  %v4383_v34 = vsel %vm645_vm1, %v8079_v30, 0.0  ;;  %v4439_v12 = vmul.f32 %v8070_v27, %v8070_v27  ;;  %v4480_v24 = vsel %vm645_vm1, %v4438_v38, 0.0 }
 0x60f   : > { %3546 = vperm.xlu0 %5660, %v5904_v61   ;;  %v4374_v20 = vadd.f32 %v4373_v58, %v4372_v14  ;;  %v8087_v14 = vld [vmem:[%s7962_s24 + $0x70] sm:$0xff]  ;;  %v2123_v63 = vmul.f32 1.442695, %v2063_v41  ;;  %v8140_v41 = vld [vmem:[%s7962_s24 + $0xa0] sm:$0xff] }
 0x610   : > { %v4479_v7 = vadd.f32 %v4478_v5, %v4477_v36  ;;  %v4385_v54 = vsel %vm645_vm1, %v8087_v14, 0.0 }
 0x611   : > { %v4376_v29 = vadd.f32 %v4375_v44, %v4374_v20  ;;  %v4482_v20 = vsel %vm645_vm1, %v4439_v12, 0.0  ;;  %v8098_v44 = vld [vmem:[%s7962_s24 + $0x78] sm:$0xff] }
 0x612   : > { %v4481_v58 = vadd.f32 %v4480_v24, %v4479_v7 }
 0x613   : > { %v5906_v2 = vpop.eup %5905  ;;  %v3487_v35 = vpop.permute.xlu0 %3486  ;;  %v4378_v26 = vadd.f32 %v4377_v33, %v4376_v29  ;;  %v4442_v33 = vmul.f32 %v8098_v44, %v8098_v44 }
 0x614   : > { %v3600_v47 = vmul.f32 %v3487_v35, %v3344_v19  ;;  %3556 = vperm.xlu2 %5661, %v5906_v2   ;;  %v3392_v61 = vld [vmem:[#allocation6 + $0xd8] sm:$0xff]  ;;  %v4483_v17 = vadd.f32 %v4482_v20, %v4481_v58  ;;  %v4441_v2 = vmul.f32 %v8087_v14, %v8087_v14  ;;  %v8131_v58 = vld [vmem:[%s7962_s24 + $0x98] sm:$0xff] }
 0x615   : > { %v4380_v23 = vadd.f32 %v4379_v3, %v4378_v26  ;;  %5907 = vrcp.f32 %v3392_v61  ;;  %v8106_v19 = vld [vmem:[%s7962_s24 + $0x80] sm:$0xff]  ;;  %v8114_v26 = vld [vmem:[%s7962_s24 + $0x88] sm:$0xff]  ;;  %v3125_v3 = vpop.f32.mrf.mxu0  ;;  %v4488_v36 = vsel %vm645_vm1, %v4442_v33, 0.0  ;;  %v4395_v20 = vsel %vm645_vm1, %v8131_v58, 0.0 }
 0x616   : > { %v3626_v37 = vpack.c.bf16 %v3600_v47, %v3599_v11  ;;  %v4484_v11 = vsel %vm645_vm1, %v4440_v45, 0.0  ;;  %v4389_v47 = vsel %vm645_vm1, %v8106_v19, 0.0  ;;  %v4486_v21 = vsel %vm645_vm1, %v4441_v2, 0.0 }
 0x617   : > { %v4382_v52 = vadd.f32 %v4381_v0, %v4380_v23  ;;  %v4485_v29 = vadd.f32 %v4484_v11, %v4483_v17  ;;  %v4391_v59 = vsel %vm645_vm1, %v8114_v26, 0.0  ;;  %v4443_v23 = vmul.f32 %v8106_v19, %v8106_v19 }
 0x618   : > { %5532 = vmatmul.msk.bf16.gmra.mxu1 %vm645_vm1, %v3626_v37  ;;  %v3215_v38 = vadd.f32 %v3214_v53, %v3125_v3  ;;  %v4444_v12 = vmul.f32 %v8114_v26, %v8114_v26  ;;  %5909 = vpow2.f32 %v2123_v63  ;;  %v4446_v2 = vmul.f32 %v8131_v58, %v8131_v58 }
 0x619   : > { %v4384_v1 = vadd.f32 %v4383_v34, %v4382_v52  ;;  %v4487_v37 = vadd.f32 %v4486_v21, %v4485_v29  ;;  %v8122_v52 = vld [vmem:[%s7962_s24 + $0x90] sm:$0xff]  ;;  %v4490_v24 = vsel %vm645_vm1, %v4443_v23, 0.0  ;;  %v4447_v63 = vmul.f32 %v8140_v41, %v8140_v41 }
 0x61a   : > { %v4393_v34 = vsel %vm645_vm1, %v8122_v52, 0.0  ;;  %v4492_v40 = vsel %vm645_vm1, %v4444_v12, 0.0 }
 0x61b   : > { %v4386_v4 = vadd.f32 %v4385_v54, %v4384_v1  ;;  %v5908_v0 = vpop.eup %5907  ;;  %v4489_v61 = vadd.f32 %v4488_v36, %v4487_v37 }
 0x61c   : > { %2871 = vperm.xlu2 %5661, %v7934_v39   ;;  %v4387_v39 = vsel %vm645_vm1, %v8098_v44, 0.0 }
 0x61d   : > { %v4388_v35 = vadd.f32 %v4387_v39, %v4386_v4  ;;  %v4491_v45 = vadd.f32 %v4490_v24, %v4489_v61  ;;  %v4397_v39 = vsel %vm645_vm1, %v8140_v41, 0.0  ;;  %v4498_v61 = vsel %vm645_vm1, %v4447_v63, 0.0 }
 0x61e   : > { %v8155_v37 = vpop.eup %5909 }
 0x61f   : > { %v4390_v50 = vadd.f32 %v4389_v47, %v4388_v35  ;;  %v4493_v17 = vadd.f32 %v4492_v40, %v4491_v45  ;;  %v8148_v35 = vld [vmem:[%s7962_s24 + $0xa8] sm:$0xff]  ;;  %v3346_v47 = vld [vmem:[#allocation7 + $0x68] sm:$0xff]  ;;  %v8179_v45 = vld [vmem:[%s7962_s24 + $0xc0] sm:$0xff] }
 0x620   : > { %v4399_v21 = vsel %vm645_vm1, %v8148_v35, 0.0 }
 0x621   : > { %v4392_v7 = vadd.f32 %v4391_v59, %v4390_v50  ;;  %v4496_v50 = vsel %vm645_vm1, %v4446_v2, 0.0  ;;  %v8159_v59 = vld [vmem:[%s7962_s24 + $0xb0] sm:$0xff]  ;;  %v8187_v2 = vld [vmem:[%s7962_s24 + $0xc8] sm:$0xff] }
 0x622   : > { %v2857_v10 = vpop.permute.xlu1 %2856 }
 0x623   : > { %v2922_v5 = vmul.f32 %v2857_v10, %v2730_v60  ;;  %v4394_v54 = vadd.f32 %v4393_v34, %v4392_v7  ;;  %v3345_v60 = vld [vmem:[#allocation7 + $0x60] sm:$0xff]  ;;  %v4448_v7 = vmul.f32 %v8148_v35, %v8148_v35  ;;  %v8170_v34 = vld [vmem:[%s7962_s24 + $0xb8] sm:$0xff] }
 0x624   : > { %2876 = vperm.xlu1 %5662, %v7991_v31   ;;  %3566 = vperm.xlu2 %5661, %v5908_v0   ;;  %v4445_v31 = vmul.f32 %v8122_v52, %v8122_v52  ;;  %v3601_v3 = vmul.f32 %v7942_v62, %v3345_v60  ;;  %v9739_v0 = vld [vmem:[#allocation62_spill] sm:$0xff]  ;;  %v4451_v60 = vmul.f32 %v8179_v45, %v8179_v45 }
 0x625   : > { %v3260_v1 = vadd.f32 %v3215_v38, %v2922_v5  ;;  %v4396_v4 = vadd.f32 %v4395_v20, %v4394_v54  ;;  %v2064_v38 = vsub.f32 %v9739_v0, %v7560_v55  ;;  %v4401_v5 = vsel %vm645_vm1, %v8159_v59, 0.0 }
 0x626   : > { %v4494_v11 = vsel %vm645_vm1, %v4445_v31, 0.0  ;;  %v4449_v55 = vmul.f32 %v8159_v59, %v8159_v59  ;;  %v4500_v54 = vsel %vm645_vm1, %v4448_v7, 0.0 }
 0x627   : > { %3292 = vst.msk [vmem:[#allocation7 + $0xb8] sm:$0xff] %vm645_vm1, %v3260_v1  ;;  %v4398_v29 = vadd.f32 %v4397_v39, %v4396_v4  ;;  %v4495_v53 = vadd.f32 %v4494_v11, %v4493_v17  ;;  %v4403_v1 = vsel %vm645_vm1, %v8170_v34, 0.0  ;;  %v2125_v40 = vmul.f32 1.442695, %v2064_v38 }
 0x628   : > { %v4405_v4 = vsel %vm645_vm1, %v8179_v45, 0.0  ;;  %v4450_v17 = vmul.f32 %v8170_v34, %v8170_v34  ;;  %v4502_v39 = vsel %vm645_vm1, %v4449_v55, 0.0 }
 0x629   : > { %v4400_v23 = vadd.f32 %v4399_v21, %v4398_v29  ;;  %v4497_v36 = vadd.f32 %v4496_v50, %v4495_v53  ;;  %v4407_v53 = vsel %vm645_vm1, %v8187_v2, 0.0  ;;  %v8197_v21 = vld [vmem:[%s7962_s24 + $0xd0] sm:$0xff]  ;;  %5911 = vpow2.f32 %v2125_v40 }
 0x62a   : > { %v3497_v33 = vpop.permute.xlu1 %3496  ;;  %v4453_v7 = vmul.f32 %v8197_v21, %v8197_v21 }
 0x62b   : > { %v3602_v10 = vmul.f32 %v3497_v33, %v3346_v47  ;;  %v4402_v12 = vadd.f32 %v4401_v5, %v4400_v23  ;;  %v4499_v24 = vadd.f32 %v4498_v61, %v4497_v36  ;;  %v4504_v47 = vsel %vm645_vm1, %v4450_v17, 0.0  ;;  %v8205_v36 = vld [vmem:[%s7962_s24 + $0xd8] sm:$0xff] }
 0x62c   : > { %2881 = vperm.xlu2 %5661, %v8155_v37   ;;  %v4506_v23 = vsel %vm645_vm1, %v4451_v60, 0.0  ;;  %v4411_v5 = vsel %vm645_vm1, %v8205_v36, 0.0  ;;  %v4454_v55 = vmul.f32 %v8205_v36, %v8205_v36  ;;  %v2512_v17 = vld [vmem:[#allocation6 + $0xe8] sm:$0xff] }
 0x62d   : > { %v3627_v62 = vpack.c.bf16 %v3602_v10, %v3601_v3  ;;  %v4404_v20 = vadd.f32 %v4403_v1, %v4402_v12  ;;  %v4501_v31 = vadd.f32 %v4500_v54, %v4499_v24  ;;  %v4409_v3 = vsel %vm645_vm1, %v8197_v21, 0.0  ;;  %v4356_v60 = vld [vmem:[%s7962_s24 + $0xf0] sm:$0xff] }
 0x62e   : > { %v4452_v10 = vmul.f32 %v8187_v2, %v8187_v2  ;;  %v4510_v54 = vsel %vm645_vm1, %v4453_v7, 0.0 }
 0x62f   : > { %5533 = vmatmul.msk.bf16.gmra.mxu1 %vm645_vm1, %v3627_v62  ;;  %v4406_v11 = vadd.f32 %v4405_v4, %v4404_v20  ;;  %v4503_v29 = vadd.f32 %v4502_v39, %v4501_v31  ;;  %v8213_v62 = vld [vmem:[%s7962_s24 + $0xe0] sm:$0xff]  ;;  %v8222_v20 = vld [vmem:[%s7962_s24 + $0xe8] sm:$0xff]  ;;  %v8224_v4 = vpop.eup %5911 }
 0x630   : > { %v4508_v61 = vsel %vm645_vm1, %v4452_v10, 0.0  ;;  %9740 = vst [vmem:[#allocation27_spill] sm:$0xff] %v8213_v62  ;;  %v4413_v1 = vsel %vm645_vm1, %v8213_v62, 0.0  ;;  %v4415_v39 = vsel %vm645_vm1, %v8222_v20, 0.0  ;;  %v2544_v10 = vmul.f32 %v8224_v4, %v2512_v17 }
 0x631   : > { %v4408_v63 = vadd.f32 %v4407_v53, %v4406_v11  ;;  %v4505_v50 = vadd.f32 %v4504_v47, %v4503_v29  ;;  %9741 = vst [vmem:[#allocation10_spill] sm:$0xff] %v8222_v20  ;;  %v4455_v11 = vmul.f32 %v8213_v62, %v8213_v62  ;;  %v4512_v29 = vsel %vm645_vm1, %v4454_v55, 0.0 }
 0x633   : > { %v8194_v33 = vpop.permute.xlu1 %3511  ;;  %v4410_v0 = vadd.f32 %v4409_v3, %v4408_v63  ;;  %v4507_v38 = vadd.f32 %v4506_v23, %v4505_v50  ;;  %v4417_v63 = vsel %vm645_vm1, %v4356_v60, 0.0  ;;  %v4456_v50 = vmul.f32 %v8222_v20, %v8222_v20  ;;  %v4357_v23 = vld [vmem:[%s7962_s24 + $0xf8] sm:$0xff] }
 0x634   : > { %v4514_v3 = vsel %vm645_vm1, %v4455_v11, 0.0  ;;  %v4419_v7 = vsel %vm645_vm1, %v4357_v23, 0.0  ;;  %v4458_v11 = vmul.f32 %v4357_v23, %v4357_v23 }
 0x635   : > { %v4412_v12 = vadd.f32 %v4411_v5, %v4410_v0  ;;  %v4509_v24 = vadd.f32 %v4508_v61, %v4507_v38  ;;  %v4457_v61 = vmul.f32 %v4356_v60, %v4356_v60 }
 0x637   : > { %v4414_v31 = vadd.f32 %v4413_v1, %v4412_v12  ;;  %v4511_v40 = vadd.f32 %v4510_v54, %v4509_v24  ;;  %v4516_v12 = vsel %vm645_vm1, %v4456_v50, 0.0  ;;  %v3217_v24 = vpop.f32.mrf.mxu3  ;;  %v3785_v54 = vld [vmem:[%s6134_s23 + $0x10] sm:$0xff]  ;;  %v4518_v17 = vsel %vm645_vm1, %v4457_v61, 0.0 }
 0x638   : > { %v4520_v50 = vsel %vm645_vm1, %v4458_v11, 0.0 }
 0x639   : > { %2641 = vadd.xlane.f32.xlu0 %v7860_v51  ;;  %v4416_v51 = vadd.f32 %v4415_v39, %v4414_v31  ;;  %v4513_v47 = vadd.f32 %v4512_v29, %v4511_v40  ;;  %v3128_v29 = vpop.f32.mrf.mxu0 }
 0x63b   : > { %v8231_v53 = vpop.permute.xlu1 %3531  ;;  %v4418_v0 = vadd.f32 %v4417_v63, %v4416_v51  ;;  %v4515_v38 = vadd.f32 %v4514_v3, %v4513_v47  ;;  %v2731_v51 = vld [vmem:[#allocation7 + $0xc0] sm:$0xff] }
 0x63d   : > { %v4420_v31 = vadd.f32 %v4419_v7, %v4418_v0  ;;  %v4517_v40 = vadd.f32 %v4516_v12, %v4515_v38 }
 0x63e   : > { %v2636_v5 = vpop.xlane.xlu0 %2635 }
 0x63f   : > { %v2672_v1 = vadd.f32 %v2636_v5, %v2544_v10  ;;  %v3707_v55 = vpop.f32.mrf.mxu1  ;;  %v4421_v47 = vrot.slane %v4420_v31, 4  ;;  %v4519_v60 = vadd.f32 %v4518_v17, %v4517_v40  ;;  %v3391_v10 = vld [vmem:[#allocation6 + $0xd0] sm:$0xff]  ;;  %v3218_v5 = vadd.f32 %v3217_v24, %v3128_v29 }
 0x640   : > { %v3708_v39 = vadd.f32 %v7940_v8, %v3707_v55  ;;  %5913 = vrcp.f32 %v3391_v10  ;;  %v3786_v55 = vld [vmem:[%s6134_s23 + $0x18] sm:$0xff] }
 0x641   : > { %2704 = vst.msk [vmem:[#allocation6 + $0xe8] sm:$0xff] %vm1429_vm6, %v2672_v1  ;;  %v4422_v0 = vadd.f32 %v4421_v47, %v4420_v31  ;;  %v4521_v38 = vadd.f32 %v4520_v50, %v4519_v60  ;;  %v3219_v31 = vpop.f32.mrf.mxu3  ;;  %v3130_v29 = vpop.f32.mrf.mxu0 }
 0x642   : > { %v3817_v63 = vadd.f32 %v3785_v54, %v3708_v39  ;;  %v2732_v39 = vld [vmem:[#allocation7 + $0xc8] sm:$0xff]  ;;  %v3220_v50 = vadd.f32 %v3219_v31, %v3130_v29  ;;  %v3347_v29 = vld [vmem:[#allocation7 + $0x70] sm:$0xff] }
 0x643   : > { %v2862_v3 = vpop.permute.xlu1 %2861  ;;  %v4423_v7 = vrot.slane %v4422_v0, 2  ;;  %v4522_v61 = vrot.slane %v4521_v38, 4 }
 0x644   : > { %3850 = vst.msk [vmem:[%s7953_s1 + $0x10] sm:$0xff] %vm645_vm1, %v3817_v63  ;;  %v2923_v23 = vmul.f32 %v2862_v3, %v2731_v51 }
 0x645   : > { %v4424_v20 = vadd.f32 %v4423_v7, %v4422_v0  ;;  %v4523_v62 = vadd.f32 %v4522_v61, %v4521_v38  ;;  %v2065_v38 = vsub.f32 %v7660_v18, %v7665_v16  ;;  %v3787_v61 = vld [vmem:[%s6134_s23 + $0x20] sm:$0xff]  ;;  %v8264_v18 = vpop.permute.xlu2 %3516 }
 0x646   : > { %v3261_v12 = vadd.f32 %v3218_v5, %v2923_v23  ;;  %v5914_v63 = vpop.eup %5913 }
 0x647   : > { %v3709_v1 = vpop.f32.mrf.mxu1  ;;  %v4425_v24 = vrot.slane %v4424_v20, 1  ;;  %v4524_v11 = vrot.slane %v4523_v62, 2 }
 0x648   : > { %3293 = vst.msk [vmem:[#allocation7 + $0xc0] sm:$0xff] %vm645_vm1, %v3261_v12  ;;  %v3710_v54 = vadd.f32 %v7940_v8, %v3709_v1  ;;  %v3394_v40 = vld [vmem:[#allocation6 + $0xe8] sm:$0xff] }
 0x649   : > { %5915 = vrcp.f32 %v3394_v40  ;;  %v4426_v47 = vadd.f32 %v4425_v24, %v4424_v20  ;;  %v4525_v60 = vadd.f32 %v4524_v11, %v4523_v62  ;;  %v3788_v24 = vld [vmem:[%s6134_s23 + $0x28] sm:$0xff] }
 0x64a   : > { %v3818_v17 = vadd.f32 %v3786_v55, %v3710_v54  ;;  %v2127_v54 = vmul.f32 1.442695, %v2065_v38 }
 0x64b   : > { %v2867_v51 = vpop.permute.xlu1 %2866  ;;  %v4526_v10 = vrot.slane %v4525_v60, 1  ;;  %v8254_v0 = vmul.f32 0.00390625, %v4426_v47 }
 0x64c   : > { %3851 = vst.msk [vmem:[%s7953_s1 + $0x18] sm:$0xff] %vm645_vm1, %v3818_v17  ;;  %v2924_v3 = vmul.f32 %v2867_v51, %v2732_v39  ;;  %5917 = vpow2.f32 %v2127_v54  ;;  %v3348_v51 = vld [vmem:[#allocation7 + $0x78] sm:$0xff] }
 0x64d   : > { %3561 = vperm.xlu0 %5660, %v5914_v63   ;;  %v4527_v12 = vadd.f32 %v4526_v10, %v4525_v60  ;;  %v4529_v62 = vmul.f32 %v8254_v0, %v4426_v47  ;;  %v8273_v10 = vpop.permute.xlu2 %3536 }
 0x64e   : > { %v3262_v5 = vadd.f32 %v3220_v50, %v2924_v3 }
 0x64f   : > { %v5916_v23 = vpop.eup %5915  ;;  %v3712_v7 = vpop.f32.mrf.mxu1  ;;  %v4530_v55 = vsub.f32 %v4527_v12, %v4529_v62 }
 0x650   : > { %3294 = vst.msk [vmem:[#allocation7 + $0xc8] sm:$0xff] %vm645_vm1, %v3262_v5  ;;  %v3713_v20 = vadd.f32 %v7940_v8, %v3712_v7  ;;  %3576 = vperm.xlu1 %5662, %v5916_v23   ;;  %v3789_v23 = vld [vmem:[%s6134_s23 + $0x30] sm:$0xff] }
 0x651   : > { %v3502_v1 = vpop.permute.xlu0 %3501  ;;  %v4531_v31 = vmax.f32 %v4530_v55, 0.0  ;;  %v2723_v7 = vld [vmem:[#allocation7 + $0x80] sm:$0xff] }
 0x652   : > { %v3819_v40 = vadd.f32 %v3787_v61, %v3713_v20  ;;  %v3603_v60 = vmul.f32 %v3502_v1, %v3347_v29  ;;  %v8269_v3 = vpop.eup %5917  ;;  %v2511_v20 = vld [vmem:[#allocation6 + $0xe0] sm:$0xff] }
 0x653   : > { %v4532_v16 = vmul.f32 0.003921569, %v4531_v31  ;;  %v2543_v31 = vmul.f32 %v8155_v37, %v2511_v20  ;;  %v4545_v37 = vsub.f32 %v7970_v48, %v8254_v0 }
 0x654   : > { %3852 = vst.msk [vmem:[%s7953_s1 + $0x20] sm:$0xff] %vm645_vm1, %v3819_v40 }
 0x655   : > { %2886 = vperm.xlu0 %5660, %v8224_v4   ;;  %v4533_v11 = vadd.f32 1e-05, %v4532_v16 }
 0x657   : > { %v3714_v39 = vpop.f32.mrf.mxu1  ;;  %5919 = vrsqrt.f32 %v4533_v11  ;;  %vm4540_vm7 = vweird.f32 %v4533_v11 }
 0x658   : > { %v3715_v17 = vadd.f32 %v7940_v8, %v3714_v39 }
 0x659   : > { %v3507_v47 = vpop.permute.xlu0 %3506 }
 0x65a   : > { %v3820_v63 = vadd.f32 %v3788_v24, %v3715_v17  ;;  %v3604_v50 = vmul.f32 %v3507_v47, %v3348_v51  ;;  %v3790_v51 = vld [vmem:[%s6134_s23 + $0x38] sm:$0xff] }
 0x65c   : > { %3853 = vst.msk [vmem:[%s7953_s1 + $0x28] sm:$0xff] %vm645_vm1, %v3820_v63  ;;  %v3628_v4 = vpack.c.bf16 %v3604_v50, %v3603_v60 }
 0x65d   : > { %2891 = vperm.xlu0 %5660, %v8269_v3   ;;  %v5920_v38 = vpop.eup %5919 }
 0x65e   : > { %5534 = vmatmul.msk.bf16.gmra.mxu1 %vm645_vm1, %v3628_v4  ;;  %v4535_v12 = vmul.f32 %v5920_v38, %v4533_v11  ;;  %vm4541_vm8 = vweird.f32 %v5920_v38  ;;  %v4624_v4 = vld [vmem:[%s9554_s12] sm:$0x3] }
 0x65f   : > { %v3717_v5 = vpop.f32.mrf.mxu1  ;;  %vm4542_vm9 = vmor %vm4540_vm7, %vm4541_vm8 }
 0x660   : > { %v3718_v61 = vadd.f32 %v7940_v8, %v3717_v5  ;;  %v4536_v54 = vmul.f32 %v5920_v38, %v4535_v12 }
 0x661   : > { %v2822_v62 = vpop.permute.xlu0 %2821 }
 0x662   : > { %v3821_v1 = vadd.f32 %v3789_v23, %v3718_v61  ;;  %v2915_v55 = vmul.f32 %v2822_v62, %v2723_v7  ;;  %v4537_v16 = vmul.f32 0.5, %v4536_v54  ;;  %v4678_v23 = vsel %vm965_vm0, %v4624_v4, 0  ;;  %v9742_v54 = vld [vmem:[#allocation9_spill] sm:$0xff] }
 0x663   : > { %4687 = vmatpush.bf16.msra.mxu0 %v4678_v23  ;;  %v4547_v4 = vsub.f32 %v7989_v46, %v8254_v0 }
 0x664   : > { %3854 = vst.msk [vmem:[%s7953_s1 + $0x30] sm:$0xff] %vm645_vm1, %v3821_v1  ;;  %v3253_v40 = vadd.f32 %v7816_v57, %v2915_v55  ;;  %v4538_v17 = vsub.f32 1.5, %v4537_v16  ;;  %v4544_v57 = vsub.f32 %v7967_v32, %v8254_v0  ;;  %v3350_v32 = vld [vmem:[#allocation7 + $0x88] sm:$0xff]  ;;  %v3791_v1 = vld [vmem:[%s6134_s23 + $0x40] sm:$0xff] }
 0x665   : > { %v2633_v39 = vpop.xlane.xlu2 %2632  ;;  %v3606_v62 = vmul.f32 %v8264_v18, %v3350_v32  ;;  %v3133_v32 = vpop.f32.mrf.mxu0 }
 0x666   : > { %3285 = vst.msk [vmem:[#allocation7 + $0x80] sm:$0xff] %vm645_vm1, %v3253_v40  ;;  %v2671_v24 = vadd.f32 %v2633_v39, %v2543_v31  ;;  %v4539_v60 = vmul.f32 %v5920_v38, %v4538_v17  ;;  %v2066_v40 = vsub.f32 %v9742_v54, %v7629_v15  ;;  %v2727_v15 = vld [vmem:[#allocation7 + $0xa0] sm:$0xff] }
 0x667   : > { %v3719_v29 = vpop.f32.mrf.mxu1 }
 0x668   : > { %2703 = vst.msk [vmem:[#allocation6 + $0xe0] sm:$0xff] %vm1429_vm6, %v2671_v24  ;;  %v3720_v47 = vadd.f32 %v7940_v8, %v3719_v29  ;;  %v8294_v5 = vsel %vm4542_vm9, %v5920_v38, %v4539_v60  ;;  %v2129_v18 = vmul.f32 1.442695, %v2066_v40  ;;  %v8315_v29 = vpop.permute.xlu1 %3541 }
 0x669   : > { %v3522_v63 = vpop.permute.xlu0 %3521  ;;  %v4576_v11 = vmul.f32 %v4544_v57, %v8294_v5  ;;  %v4577_v7 = vmul.f32 %v4545_v37, %v8294_v5  ;;  %v3222_v57 = vpop.f32.mrf.mxu3 }
 0x66a   : > { %v3822_v50 = vadd.f32 %v3790_v51, %v3720_v47  ;;  %v3792_v47 = vld [vmem:[%s6134_s23 + $0x48] sm:$0xff] }
 0x66b   : > { %v4608_v12 = vpack.c.bf16 %v4577_v7, %v4576_v11  ;;  %v2513_v7 = vld [vmem:[#allocation6 + $0xf0] sm:$0xff] }
 0x66c   : > { %3855 = vst.msk [vmem:[%s7953_s1 + $0x38] sm:$0xff] %vm645_vm1, %v3822_v50  ;;  %v4546_v50 = vsub.f32 %v7978_v9, %v8254_v0  ;;  %v2545_v54 = vmul.f32 %v8269_v3, %v2513_v7 }
 0x66d   : > { %v8301_v61 = vpop.permute.xlu2 %3551  ;;  %v3349_v48 = vld [vmem:[#allocation7 + $0x80] sm:$0xff]  ;;  %5559 = vmatmul.msk.bf16.vlgmr.msra.gmra.mxu0 %vm645_vm1, %v4608_v12  ;;  %v2733_v12 = vld [vmem:[#allocation7 + $0xd0] sm:$0xff] }
 0x66e   : > { %v3605_v38 = vmul.f32 %v8194_v33, %v3349_v48  ;;  %v3352_v48 = vld [vmem:[#allocation7 + $0x98] sm:$0xff] }
 0x66f   : > { %v3722_v20 = vpop.f32.mrf.mxu1  ;;  %v3393_v55 = vld [vmem:[#allocation6 + $0xe0] sm:$0xff] }
 0x670   : > { %v3723_v31 = vadd.f32 %v7940_v8, %v3722_v20  ;;  %v3629_v16 = vpack.c.bf16 %v3606_v62, %v3605_v38  ;;  %5921 = vrcp.f32 %v3393_v55  ;;  %v4578_v62 = vmul.f32 %v4546_v50, %v8294_v5  ;;  %v3351_v55 = vld [vmem:[#allocation7 + $0x90] sm:$0xff]  ;;  %v2735_v50 = vld [vmem:[#allocation7 + $0xe0] sm:$0xff] }
 0x671   : > { %v3527_v39 = vpop.permute.xlu0 %3526  ;;  %5923 = vpow2.f32 %v2129_v18  ;;  %v4579_v38 = vmul.f32 %v4547_v4, %v8294_v5  ;;  %v3224_v3 = vpop.f32.mrf.mxu3 }
 0x672   : > { %v3823_v24 = vadd.f32 %v3791_v1, %v3723_v31  ;;  %5535 = vmatmul.msk.bf16.gmra.mxu1 %vm645_vm1, %v3629_v16  ;;  %v3608_v20 = vmul.f32 %v3527_v39, %v3352_v48  ;;  %v3223_v31 = vadd.f32 %v3222_v57, %v3133_v32  ;;  %v3607_v16 = vmul.f32 %v3522_v63, %v3351_v55  ;;  %v3354_v32 = vld [vmem:[#allocation7 + $0xa8] sm:$0xff] }
 0x673   : > { %v4609_v46 = vpack.c.bf16 %v4579_v38, %v4578_v62  ;;  %v4549_v57 = vsub.f32 %v8012_v6, %v8254_v0  ;;  %v3610_v38 = vmul.f32 %v8273_v10, %v3354_v32 }
 0x674   : > { %3856 = vst.msk [vmem:[%s7953_s1 + $0x40] sm:$0xff] %vm645_vm1, %v3823_v24  ;;  %v3630_v39 = vpack.c.bf16 %v3608_v20, %v3607_v16 }
 0x675   : > { %v8313_v33 = vpop.permute.xlu2 %3556 }
 0x676   : > { %v5922_v17 = vpop.eup %5921 }
 0x677   : > { %v3724_v51 = vpop.f32.mrf.mxu1  ;;  %3571 = vperm.xlu2 %5661, %v5922_v17   ;;  %v8329_v40 = vpop.eup %5923 }
 0x678   : > { %v3725_v60 = vadd.f32 %v7940_v8, %v3724_v51  ;;  %v3135_v51 = vpop.f32.mrf.mxu0 }
 0x679   : > { %v2842_v37 = vpop.permute.xlu0 %2841  ;;  %v3225_v10 = vadd.f32 %v3224_v3, %v3135_v51 }
 0x67a   : > { %v3824_v23 = vadd.f32 %v3792_v47, %v3725_v60  ;;  %v2919_v11 = vmul.f32 %v2842_v37, %v2727_v15  ;;  %v4548_v60 = vsub.f32 %v8003_v28, %v8254_v0  ;;  %v3227_v37 = vpop.f32.mrf.mxu3 }
 0x67c   : > { %3857 = vst.msk [vmem:[%s7953_s1 + $0x48] sm:$0xff] %vm645_vm1, %v3824_v23  ;;  %v3257_v1 = vadd.f32 %v7841_v56, %v2919_v11  ;;  %v4580_v4 = vmul.f32 %v4548_v60, %v8294_v5  ;;  %v4581_v23 = vmul.f32 %v4549_v57, %v8294_v5  ;;  %v3794_v60 = vld [vmem:[%s6134_s23 + $0x58] sm:$0xff] }
 0x67d   : > { %v2872_v9 = vpop.permute.xlu2 %2871  ;;  %5560 = vmatmul.msk.bf16.gmra.mxu0 %vm645_vm1, %v4609_v46 }
 0x67e   : > { %3289 = vst.msk [vmem:[#allocation7 + $0xa0] sm:$0xff] %vm645_vm1, %v3257_v1  ;;  %v2925_v24 = vmul.f32 %v2872_v9, %v2733_v12  ;;  %v2639_v18 = vpop.xlane.xlu1 %2638  ;;  %v4610_v12 = vpack.c.bf16 %v4581_v23, %v4580_v4  ;;  %v3793_v9 = vld [vmem:[%s6134_s23 + $0x50] sm:$0xff]  ;;  %v2514_v23 = vld [vmem:[#allocation6 + $0xf8] sm:$0xff] }
 0x67f   : > { %v2673_v17 = vadd.f32 %v2639_v18, %v2545_v54  ;;  %2896 = vperm.xlu2 %5661, %v8329_v40   ;;  %v2546_v32 = vmul.f32 %v8329_v40, %v2514_v23 }
 0x680   : > { %v3263_v56 = vadd.f32 %v3223_v31, %v2925_v24  ;;  %v3138_v7 = vpop.f32.mrf.mxu0 }
 0x681   : > { %2705 = vst.msk [vmem:[#allocation6 + $0xf0] sm:$0xff] %vm1429_vm6, %v2673_v17  ;;  %v3228_v62 = vadd.f32 %v3227_v37, %v3138_v7  ;;  %v3547_v24 = vpop.permute.xlu0 %3546  ;;  %v4550_v17 = vsub.f32 %v8021_v49, %v8254_v0  ;;  %v3358_v7 = vld [vmem:[#allocation7 + $0xc8] sm:$0xff] }
 0x682   : > { %3295 = vst.msk [vmem:[#allocation7 + $0xd0] sm:$0xff] %vm645_vm1, %v3263_v56  ;;  %5536 = vmatmul.msk.bf16.gmra.mxu1 %vm645_vm1, %v3630_v39  ;;  %v4551_v39 = vsub.f32 %v8030_v42, %v8254_v0  ;;  %v3356_v56 = vld [vmem:[#allocation7 + $0xb8] sm:$0xff]  ;;  %v8366_v42 = vld [vmem:[%s9551_s9] ss:$0 sm:$0xff] }
 0x683   : > { %v3612_v51 = vmul.f32 %v3547_v24, %v3356_v56 }
 0x684   : > { %v4583_v3 = vmul.f32 %v4551_v39, %v8294_v5 }
 0x685   : > { %v8337_v63 = vpop.permute.xlu2 %3566  ;;  %v3353_v15 = vld [vmem:[#allocation7 + $0xa0] sm:$0xff] }
 0x686   : > { %v3609_v11 = vmul.f32 %v8231_v53, %v3353_v15  ;;  %v2734_v53 = vld [vmem:[#allocation7 + $0xd8] sm:$0xff] }
 0x688   : > { %v3395_v47 = vld [vmem:[#allocation6 + $0xf0] sm:$0xff]  ;;  %v3631_v1 = vpack.c.bf16 %v3610_v38, %v3609_v11  ;;  %v4553_v11 = vsub.f32 %v8046_v13, %v8254_v0 }
 0x689   : > { %5925 = vrcp.f32 %v3395_v47  ;;  %v3355_v47 = vld [vmem:[#allocation7 + $0xb0] sm:$0xff] }
 0x68a   : > { %v3611_v49 = vmul.f32 %v8315_v29, %v3355_v47  ;;  %v4552_v29 = vsub.f32 %v8038_v25, %v8254_v0 }
 0x68d   : > { %v2882_v48 = vpop.permute.xlu2 %2881  ;;  %5561 = vmatmul.msk.bf16.gmra.mxu0 %vm645_vm1, %v4610_v12  ;;  %v4585_v12 = vmul.f32 %v4553_v11, %v8294_v5  ;;  %v2737_v11 = vld [vmem:[#allocation7 + $0xf0] sm:$0xff] }
 0x68e   : > { %v2927_v28 = vmul.f32 %v2882_v48, %v2735_v50  ;;  %v3632_v50 = vpack.c.bf16 %v3612_v51, %v3611_v49  ;;  %v4584_v48 = vmul.f32 %v4552_v29, %v8294_v5 }
 0x68f   : > { %v5926_v20 = vpop.eup %5925 }
 0x690   : > { %v3265_v6 = vadd.f32 %v3228_v62, %v2927_v28  ;;  %3581 = vperm.xlu1 %5662, %v5926_v20   ;;  %v3614_v62 = vmul.f32 %v8313_v33, %v3358_v7  ;;  %v3795_v20 = vld [vmem:[%s6134_s23 + $0x60] sm:$0xff]  ;;  %v4612_v13 = vpack.c.bf16 %v4585_v12, %v4584_v48 }
 0x692   : > { %3297 = vst.msk [vmem:[#allocation7 + $0xe0] sm:$0xff] %vm645_vm1, %v3265_v6  ;;  %5537 = vmatmul.msk.bf16.gmra.mxu1 %vm645_vm1, %v3631_v1  ;;  %v3357_v6 = vld [vmem:[#allocation7 + $0xc0] sm:$0xff] }
 0x695   : > { %v3727_v55 = vpop.f32.mrf.mxu1 }
 0x696   : > { %v3728_v54 = vadd.f32 %v7940_v8, %v3727_v55  ;;  %v2877_v46 = vpop.permute.xlu1 %2876  ;;  %v4582_v8 = vmul.f32 %v4550_v17, %v8294_v5 }
 0x697   : > { %v2926_v31 = vmul.f32 %v2877_v46, %v2734_v53  ;;  %v3613_v53 = vmul.f32 %v8301_v61, %v3357_v6  ;;  %v4554_v61 = vsub.f32 %v8054_v43, %v8254_v0  ;;  %v3229_v43 = vpop.f32.mrf.mxu3 }
 0x698   : > { %v3825_v16 = vadd.f32 %v3793_v9, %v3728_v54  ;;  %v4611_v57 = vpack.c.bf16 %v4583_v3, %v4582_v8  ;;  %v3796_v9 = vld [vmem:[%s6134_s23 + $0x68] sm:$0xff]  ;;  %v3359_v8 = vld [vmem:[#allocation7 + $0xd0] sm:$0xff] }
 0x699   : > { %v3264_v18 = vadd.f32 %v3225_v10, %v2926_v31  ;;  %v3633_v55 = vpack.c.bf16 %v3614_v62, %v3613_v53  ;;  %v4555_v31 = vsub.f32 %v8062_v22, %v8254_v0  ;;  %v3140_v22 = vpop.f32.mrf.mxu0  ;;  %v2738_v53 = vld [vmem:[#allocation7 + $0xf8] sm:$0xff] }
 0x69a   : > { %3858 = vst.msk [vmem:[%s7953_s1 + $0x50] sm:$0xff] %vm645_vm1, %v3825_v16  ;;  %v4586_v16 = vmul.f32 %v4554_v61, %v8294_v5  ;;  %v3797_v61 = vld [vmem:[%s6134_s23 + $0x70] sm:$0xff] }
 0x69b   : > { %3296 = vst.msk [vmem:[#allocation7 + $0xd8] sm:$0xff] %vm645_vm1, %v3264_v18  ;;  %v4587_v24 = vmul.f32 %v4555_v31, %v8294_v5 }
 0x69d   : > { %v3729_v15 = vpop.f32.mrf.mxu1  ;;  %5562 = vmatmul.msk.bf16.gmra.mxu0 %vm645_vm1, %v4611_v57  ;;  %v4613_v39 = vpack.c.bf16 %v4587_v24, %v4586_v16  ;;  %v3230_v57 = vadd.f32 %v3229_v43, %v3140_v22 }
 0x69e   : > { %v3730_v37 = vadd.f32 %v8366_v42, %v3729_v15  ;;  %v2736_v15 = vld [vmem:[#allocation7 + $0xe8] sm:$0xff] }
 0x69f   : > { %v3232_v29 = vpop.f32.mrf.mxu3 }
 0x6a0   : > { %v3826_v4 = vadd.f32 %v3794_v60, %v3730_v37  ;;  %v4556_v37 = vsub.f32 %v8070_v27, %v8254_v0 }
 0x6a2   : > { %3859 = vst.msk [vmem:[%s7953_s1 + $0x58] sm:$0xff] %vm645_vm1, %v3826_v4  ;;  %5538 = vmatmul.msk.bf16.gmra.mxu1 %vm645_vm1, %v3632_v50  ;;  %v3360_v17 = vld [vmem:[#allocation7 + $0xd8] sm:$0xff]  ;;  %v4557_v50 = vsub.f32 %v8079_v30, %v8254_v0  ;;  %v4588_v23 = vmul.f32 %v4556_v37, %v8294_v5  ;;  %v3361_v30 = vld [vmem:[#allocation7 + $0xe0] sm:$0xff] }
 0x6a3   : > { %v3616_v51 = vmul.f32 %v8337_v63, %v3360_v17 }
 0x6a4   : > { %v4589_v63 = vmul.f32 %v4557_v50, %v8294_v5  ;;  %v3800_v50 = vld [vmem:[%s6134_s23 + $0x88] sm:$0xff] }
 0x6a6   : > { %v4614_v7 = vpack.c.bf16 %v4589_v63, %v4588_v23  ;;  %v4562_v23 = vsub.f32 %v8122_v52, %v8254_v0  ;;  %v4563_v63 = vsub.f32 %v8131_v58, %v8254_v0 }
 0x6ac   : > { %v2642_v38 = vpop.xlane.xlu0 %2641  ;;  %v3732_v28 = vpop.f32.mrf.mxu1 }
 0x6ad   : > { %v2674_v1 = vadd.f32 %v2642_v38, %v2546_v32  ;;  %v3733_v25 = vadd.f32 %v8366_v42, %v3732_v28  ;;  %5563 = vmatmul.msk.bf16.gmra.mxu0 %vm645_vm1, %v4612_v13  ;;  %v3143_v32 = vpop.f32.mrf.mxu0  ;;  %v3234_v13 = vpop.f32.mrf.mxu3 }
 0x6ae   : > { %v3233_v12 = vadd.f32 %v3232_v29, %v3143_v32 }
 0x6af   : > { %2706 = vst.msk [vmem:[#allocation6 + $0xf8] sm:$0xff] %vm1429_vm6, %v2674_v1  ;;  %v3827_v40 = vadd.f32 %v3795_v20, %v3733_v25 }
 0x6b1   : > { %3860 = vst.msk [vmem:[%s7953_s1 + $0x60] sm:$0xff] %vm645_vm1, %v3827_v40 }
 0x6b2   : > { %5539 = vmatmul.msk.bf16.gmra.mxu1 %vm645_vm1, %v3633_v55 }
 0x6b4   : > { %v3734_v33 = vpop.f32.mrf.mxu1 }
 0x6b5   : > { %v3735_v54 = vadd.f32 %v8366_v42, %v3734_v33  ;;  %v3145_v40 = vpop.f32.mrf.mxu0  ;;  %v4558_v33 = vsub.f32 %v8087_v14, %v8254_v0 }
 0x6b6   : > { %v3396_v46 = vld [vmem:[#allocation6 + $0xf8] sm:$0xff] }
 0x6b7   : > { %v3828_v10 = vadd.f32 %v3796_v9, %v3735_v54  ;;  %5927 = vrcp.f32 %v3396_v46  ;;  %v4559_v9 = vsub.f32 %v8098_v44, %v8254_v0  ;;  %v3235_v54 = vadd.f32 %v3234_v13, %v3145_v40 }
 0x6b8   : > { %v4590_v31 = vmul.f32 %v4558_v33, %v8294_v5  ;;  %v3803_v33 = vld [vmem:[%s6134_s23 + $0xa0] sm:$0xff] }
 0x6b9   : > { %3861 = vst.msk [vmem:[%s7953_s1 + $0x68] sm:$0xff] %vm645_vm1, %v3828_v10  ;;  %v4591_v16 = vmul.f32 %v4559_v9, %v8294_v5 }
 0x6bb   : > { %v4615_v17 = vpack.c.bf16 %v4591_v16, %v4590_v31  ;;  %v4567_v31 = vsub.f32 %v8170_v34, %v8254_v0 }
 0x6bd   : > { %v5928_v18 = vpop.eup %5927  ;;  %5564 = vmatmul.msk.bf16.gmra.mxu0 %vm645_vm1, %v4613_v39  ;;  %v3798_v39 = vld [vmem:[%s6134_s23 + $0x78] sm:$0xff] }
 0x6be   : > { %3586 = vperm.xlu0 %5660, %v5928_v18  }
 0x6bf   : > { %v3562_v56 = vpop.permute.xlu0 %3561 }
 0x6c0   : > { %v3615_v3 = vmul.f32 %v3562_v56, %v3359_v8 }
 0x6c2   : > { %v3634_v47 = vpack.c.bf16 %v3616_v51, %v3615_v3  ;;  %v3577_v28 = vpop.permute.xlu1 %3576  ;;  %v4560_v3 = vsub.f32 %v8106_v19, %v8254_v0  ;;  %v4561_v51 = vsub.f32 %v8114_v26, %v8254_v0 }
 0x6c4   : > { %5540 = vmatmul.msk.bf16.gmra.mxu1 %vm645_vm1, %v3634_v47  ;;  %v4592_v47 = vmul.f32 %v4560_v3, %v8294_v5  ;;  %v4593_v43 = vmul.f32 %v4561_v51, %v8294_v5  ;;  %v3806_v51 = vld [vmem:[%s6134_s23 + $0xb8] sm:$0xff] }
 0x6c7   : > { %v2887_v60 = vpop.permute.xlu0 %2886 }
 0x6c8   : > { %v2928_v49 = vmul.f32 %v2887_v60, %v2736_v15  ;;  %v4616_v15 = vpack.c.bf16 %v4593_v43, %v4592_v47 }
 0x6ca   : > { %v3266_v4 = vadd.f32 %v3230_v57, %v2928_v49  ;;  %v3799_v57 = vld [vmem:[%s6134_s23 + $0x80] sm:$0xff] }
 0x6cc   : > { %3298 = vst.msk [vmem:[#allocation7 + $0xe8] sm:$0xff] %vm645_vm1, %v3266_v4 }
 0x6cd   : > { %5565 = vmatmul.msk.bf16.gmra.mxu0 %vm645_vm1, %v4614_v7  ;;  %v4595_v7 = vmul.f32 %v4563_v63, %v8294_v5  ;;  %v3807_v63 = vld [vmem:[%s6134_s23 + $0xc0] sm:$0xff] }
 0x6cf   : > { %v2892_v48 = vpop.permute.xlu0 %2891 }
 0x6d0   : > { %v2929_v62 = vmul.f32 %v2892_v48, %v2737_v11  ;;  %v4594_v11 = vmul.f32 %v4562_v23, %v8294_v5 }
 0x6d1   : > { %v3572_v27 = vpop.permute.xlu2 %3571 }
 0x6d2   : > { %v3267_v38 = vadd.f32 %v3233_v12, %v2929_v62  ;;  %v3617_v1 = vmul.f32 %v3572_v27, %v3361_v30  ;;  %v4617_v48 = vpack.c.bf16 %v4595_v7, %v4594_v11  ;;  %v3801_v62 = vld [vmem:[%s6134_s23 + $0x90] sm:$0xff] }
 0x6d3   : > { %v3362_v20 = vld [vmem:[#allocation7 + $0xe8] sm:$0xff] }
 0x6d4   : > { %3299 = vst.msk [vmem:[#allocation7 + $0xf0] sm:$0xff] %vm645_vm1, %v3267_v38  ;;  %v3618_v6 = vmul.f32 %v3577_v28, %v3362_v20  ;;  %v3802_v28 = vld [vmem:[%s6134_s23 + $0x98] sm:$0xff]  ;;  %v4564_v20 = vsub.f32 %v8140_v41, %v8254_v0 }
 0x6d6   : > { %v3635_v25 = vpack.c.bf16 %v3618_v6, %v3617_v1  ;;  %v4565_v6 = vsub.f32 %v8148_v35, %v8254_v0 }
 0x6d8   : > { %5541 = vmatmul.msk.bf16.gmra.mxu1 %vm645_vm1, %v3635_v25  ;;  %v4596_v25 = vmul.f32 %v4564_v20, %v8294_v5  ;;  %v4597_v13 = vmul.f32 %v4565_v6, %v8294_v5  ;;  %v4571_v20 = vsub.f32 %v8205_v36, %v8254_v0 }
 0x6d9   : > { %v2897_v55 = vpop.permute.xlu2 %2896 }
 0x6da   : > { %v2930_v46 = vmul.f32 %v2897_v55, %v2738_v53  ;;  %v4618_v40 = vpack.c.bf16 %v4597_v13, %v4596_v25  ;;  %v4603_v25 = vmul.f32 %v4571_v20, %v8294_v5 }
 0x6db   : > { %v3737_v10 = vpop.f32.mrf.mxu1 }
 0x6dc   : > { %v3268_v24 = vadd.f32 %v3235_v54, %v2930_v46  ;;  %v3738_v18 = vadd.f32 %v8366_v42, %v3737_v10  ;;  %v3804_v46 = vld [vmem:[%s6134_s23 + $0xa8] sm:$0xff] }
 0x6dd   : > { %5566 = vmatmul.msk.bf16.gmra.mxu0 %vm645_vm1, %v4615_v17 }
 0x6de   : > { %3300 = vst.msk [vmem:[#allocation7 + $0xf8] sm:$0xff] %vm645_vm1, %v3268_v24  ;;  %v3829_v14 = vadd.f32 %v3797_v61, %v3738_v18  ;;  %v4566_v61 = vsub.f32 %v8159_v59, %v8254_v0  ;;  %v4599_v18 = vmul.f32 %v4567_v31, %v8294_v5 }
 0x6e0   : > { %3862 = vst.msk [vmem:[%s7953_s1 + $0x70] sm:$0xff] %vm645_vm1, %v3829_v14  ;;  %v4598_v24 = vmul.f32 %v4566_v61, %v8294_v5 }
 0x6e2   : > { %v4619_v14 = vpack.c.bf16 %v4599_v18, %v4598_v24  ;;  %v3810_v18 = vld [vmem:[%s6134_s23 + $0xd8] sm:$0xff] }
 0x6e3   : > { %v3739_v44 = vpop.f32.mrf.mxu1 }
 0x6e4   : > { %v3740_v56 = vadd.f32 %v8366_v42, %v3739_v44 }
 0x6e5   : > { %v3364_v11 = vld [vmem:[#allocation7 + $0xf8] sm:$0xff] }
 0x6e6   : > { %v3830_v8 = vadd.f32 %v3798_v39, %v3740_v56  ;;  %v3805_v39 = vld [vmem:[%s6134_s23 + $0xb0] sm:$0xff] }
 0x6e8   : > { %3863 = vst.msk [vmem:[%s7953_s1 + $0x78] sm:$0xff] %vm645_vm1, %v3830_v8  ;;  %v4181_v8 = vld [vmem:[%s9552_s10] sm:$0x3] }
 0x6e9   : > { %v4235_v47 = vsel %vm965_vm0, %v4181_v8, 0 }
 0x6ea   : > { %v8434_v22 = vpop.f32.mrf.mxu0  ;;  %4244 = vmatpush.bf16.msra.mxu2 %v4235_v47 }
 0x6ed   : > { %5567 = vmatmul.msk.bf16.gmra.mxu0 %vm645_vm1, %v4616_v15  ;;  %v4568_v15 = vsub.f32 %v8179_v45, %v8254_v0  ;;  %v3363_v45 = vld [vmem:[#allocation7 + $0xf0] sm:$0xff] }
 0x6ef   : > { %v3742_v60 = vpop.f32.mrf.mxu1 }
 0x6f0   : > { %v3743_v49 = vadd.f32 %v8366_v42, %v3742_v60  ;;  %v4569_v60 = vsub.f32 %v8187_v2, %v8254_v0 }
 0x6f2   : > { %v3831_v37 = vadd.f32 %v3799_v57, %v3743_v49  ;;  %v8441_v19 = vpop.f32.mrf.mxu0  ;;  %v4600_v49 = vmul.f32 %v4568_v15, %v8294_v5 }
 0x6f4   : > { %3864 = vst.msk [vmem:[%s7953_s1 + $0x80] sm:$0xff] %vm645_vm1, %v3831_v37  ;;  %v4601_v37 = vmul.f32 %v4569_v60, %v8294_v5  ;;  %v9743_v60 = vld [vmem:[#allocation27_spill] sm:$0xff] }
 0x6f7   : > { %v3744_v26 = vpop.f32.mrf.mxu1 }
 0x6f8   : > { %v3745_v4 = vadd.f32 %v8366_v42, %v3744_v26 }
 0x6fa   : > { %v3832_v29 = vadd.f32 %v3800_v50, %v3745_v4  ;;  %v8453_v32 = vpop.f32.mrf.mxu0  ;;  %v4620_v50 = vpack.c.bf16 %v4601_v37, %v4600_v49  ;;  %v9744_v37 = vld [vmem:[#allocation10_spill] sm:$0xff] }
 0x6fc   : > { %3865 = vst.msk [vmem:[%s7953_s1 + $0x88] sm:$0xff] %vm645_vm1, %v3832_v29 }
 0x6fd   : > { %5568 = vmatmul.msk.bf16.gmra.mxu0 %vm645_vm1, %v4617_v48 }
 0x6ff   : > { %v3747_v12 = vpop.f32.mrf.mxu1 }
 0x700   : > { %v3748_v52 = vadd.f32 %v8366_v42, %v3747_v12 }
 0x702   : > { %v3833_v27 = vadd.f32 %v3801_v62, %v3748_v52  ;;  %v8460_v58 = vpop.f32.mrf.mxu0  ;;  %v3582_v4 = vpop.permute.xlu1 %3581 }
 0x703   : > { %v3619_v7 = vmul.f32 %v3582_v4, %v3363_v45 }
 0x704   : > { %3866 = vst.msk [vmem:[%s7953_s1 + $0x90] sm:$0xff] %vm645_vm1, %v3833_v27 }
 0x707   : > { %v3749_v38 = vpop.f32.mrf.mxu1 }
 0x708   : > { %v3750_v30 = vadd.f32 %v8366_v42, %v3749_v38  ;;  %v3808_v38 = vld [vmem:[%s6134_s23 + $0xc8] sm:$0xff] }
 0x70a   : > { %v3834_v1 = vadd.f32 %v3802_v28, %v3750_v30  ;;  %v8472_v53 = vpop.f32.mrf.mxu0  ;;  %v4570_v30 = vsub.f32 %v8197_v21, %v8254_v0  ;;  %v8540_v21 = vld [vmem:[%s9555_s13] ss:$0 sm:$0xff] }
 0x70b   : > { %v4700_v8 = vadd.f32 %v8540_v21, %v8472_v53  ;;  %v4573_v53 = vsub.f32 %v9744_v37, %v8254_v0 }
 0x70c   : > { %3867 = vst.msk [vmem:[%s7953_s1 + $0x98] sm:$0xff] %vm645_vm1, %v3834_v1  ;;  %v4602_v1 = vmul.f32 %v4570_v30, %v8294_v5 }
 0x70d   : > { %5569 = vmatmul.msk.bf16.gmra.mxu0 %vm645_vm1, %v4618_v40  ;;  %v4776_v4 = vsel %vm645_vm1, %v4700_v8, 0.0 }
 0x70e   : > { %v4621_v40 = vpack.c.bf16 %v4603_v25, %v4602_v1  ;;  %v3811_v25 = vld [vmem:[%s6134_s23 + $0xe0] sm:$0xff] }
 0x70f   : > { %v3752_v55 = vpop.f32.mrf.mxu1 }
 0x710   : > { %v3753_v41 = vadd.f32 %v8366_v42, %v3752_v55  ;;  %v3809_v55 = vld [vmem:[%s6134_s23 + $0xd0] sm:$0xff] }
 0x712   : > { %v3835_v9 = vadd.f32 %v3803_v33, %v3753_v41  ;;  %v8479_v35 = vpop.f32.mrf.mxu0 }
 0x713   : > { %v4702_v15 = vadd.f32 %v8540_v21, %v8479_v35 }
 0x714   : > { %3868 = vst.msk [vmem:[%s7953_s1 + $0xa0] sm:$0xff] %vm645_vm1, %v3835_v9  ;;  %v4690_v9 = vadd.f32 %v8540_v21, %v8434_v22 }
 0x716   : > { %v4769_v31 = vsel %vm645_vm1, %v4690_v9, 0.0 }
 0x717   : > { %v3754_v54 = vpop.f32.mrf.mxu1 }
 0x718   : > { %v3755_v10 = vadd.f32 %v8366_v42, %v3754_v54  ;;  %v4692_v54 = vadd.f32 %v8540_v21, %v8441_v19 }
 0x71a   : > { %v3836_v16 = vadd.f32 %v3804_v46, %v3755_v10  ;;  %v8491_v17 = vpop.f32.mrf.mxu0  ;;  %v4838_v10 = vmul.f32 %v4690_v9, %v4690_v9  ;;  %v4839_v61 = vmul.f32 %v4692_v54, %v4692_v54 }
 0x71c   : > { %3869 = vst.msk [vmem:[%s7953_s1 + $0xa8] sm:$0xff] %vm645_vm1, %v3836_v16  ;;  %v4770_v16 = vsel %vm645_vm1, %v4692_v54, 0.0  ;;  %v4870_v22 = vsel %vm645_vm1, %v4838_v10, 0.0 }
 0x71d   : > { %5570 = vmatmul.msk.bf16.gmra.mxu0 %vm645_vm1, %v4619_v14  ;;  %v4771_v19 = vadd.f32 %v4770_v16, %v4769_v31 }
 0x71f   : > { %v3757_v44 = vpop.f32.mrf.mxu1 }
 0x720   : > { %v3758_v59 = vadd.f32 %v8366_v42, %v3757_v44  ;;  %v4871_v44 = vsel %vm645_vm1, %v4839_v61, 0.0 }
 0x722   : > { %v3837_v56 = vadd.f32 %v3805_v39, %v3758_v59  ;;  %v8498_v34 = vpop.f32.mrf.mxu0  ;;  %v4695_v59 = vadd.f32 %v8540_v21, %v8453_v32 }
 0x724   : > { %3870 = vst.msk [vmem:[%s7953_s1 + $0xb0] sm:$0xff] %vm645_vm1, %v3837_v56  ;;  %v4697_v56 = vadd.f32 %v8540_v21, %v8460_v58  ;;  %v4772_v47 = vsel %vm645_vm1, %v4695_v59, 0.0 }
 0x725   : > { %v4773_v32 = vadd.f32 %v4772_v47, %v4771_v19 }
 0x726   : > { %v4774_v49 = vsel %vm645_vm1, %v4697_v56, 0.0  ;;  %v4841_v58 = vmul.f32 %v4697_v56, %v4697_v56 }
 0x727   : > { %v3759_v3 = vpop.f32.mrf.mxu1  ;;  %v4775_v35 = vadd.f32 %v4774_v49, %v4773_v32 }
 0x728   : > { %v3760_v43 = vadd.f32 %v8366_v42, %v3759_v3 }
 0x72a   : > { %v3838_v57 = vadd.f32 %v3806_v51, %v3760_v43  ;;  %v8514_v26 = vpop.f32.mrf.mxu0  ;;  %v4872_v51 = vadd.f32 %v4871_v44, %v4870_v22  ;;  %v4840_v43 = vmul.f32 %v4695_v59, %v4695_v59 }
 0x72c   : > { %3871 = vst.msk [vmem:[%s7953_s1 + $0xb8] sm:$0xff] %vm645_vm1, %v3838_v57  ;;  %v4572_v57 = vsub.f32 %v9743_v60, %v8254_v0 }
 0x72d   : > { %5571 = vmatmul.msk.bf16.gmra.mxu0 %vm645_vm1, %v4620_v50  ;;  %v4873_v50 = vsel %vm645_vm1, %v4840_v43, 0.0 }
 0x72e   : > { %v4874_v45 = vadd.f32 %v4873_v50, %v4872_v51  ;;  %v4604_v20 = vmul.f32 %v4572_v57, %v8294_v5  ;;  %v3812_v57 = vld [vmem:[%s6134_s23 + $0xe8] sm:$0xff] }
 0x72f   : > { %v3762_v23 = vpop.f32.mrf.mxu1 }
 0x730   : > { %v3763_v2 = vadd.f32 %v8366_v42, %v3762_v23  ;;  %v3587_v29 = vpop.permute.xlu0 %3586  ;;  %v4842_v23 = vmul.f32 %v4700_v8, %v4700_v8 }
 0x731   : > { %v3620_v48 = vmul.f32 %v3587_v29, %v3364_v11  ;;  %v4843_v29 = vmul.f32 %v4702_v15, %v4702_v15 }
 0x732   : > { %v3839_v12 = vadd.f32 %v3807_v63, %v3763_v2  ;;  %v8521_v52 = vpop.f32.mrf.mxu0  ;;  %v4705_v63 = vadd.f32 %v8540_v21, %v8491_v17  ;;  %v4875_v2 = vsel %vm645_vm1, %v4841_v58, 0.0  ;;  %v4877_v11 = vsel %vm645_vm1, %v4842_v23, 0.0 }
 0x733   : > { %v3636_v62 = vpack.c.bf16 %v3620_v48, %v3619_v7  ;;  %v4778_v7 = vsel %vm645_vm1, %v4702_v15, 0.0  ;;  %v4879_v17 = vsel %vm645_vm1, %v4843_v29, 0.0  ;;  %v4712_v9 = vadd.f32 %v8540_v21, %v8521_v52 }
 0x734   : > { %3872 = vst.msk [vmem:[%s7953_s1 + $0xc0] sm:$0xff] %vm645_vm1, %v3839_v12  ;;  %v4844_v48 = vmul.f32 %v4705_v63, %v4705_v63  ;;  %v4707_v12 = vadd.f32 %v8540_v21, %v8498_v34  ;;  %v4605_v34 = vmul.f32 %v4573_v53, %v8294_v5 }
 0x735   : > { %5542 = vmatmul.msk.bf16.gmra.mxu1 %vm645_vm1, %v3636_v62  ;;  %v4876_v62 = vadd.f32 %v4875_v2, %v4874_v45  ;;  %v4786_v52 = vsel %vm645_vm1, %v4712_v9, 0.0  ;;  %v5951_v2 = vld [vmem:[%s7962_s24 + $0xf8] sm:$0xff] }
 0x736   : > { %v4845_v30 = vmul.f32 %v4707_v12, %v4707_v12  ;;  %v4622_v59 = vpack.c.bf16 %v4605_v34, %v4604_v20  ;;  %v4575_v29 = vsub.f32 %v5951_v2, %v8254_v0 }
 0x737   : > { %v3764_v27 = vpop.f32.mrf.mxu1 }
 0x738   : > { %v3765_v28 = vadd.f32 %v8366_v42, %v3764_v27  ;;  %v4777_v27 = vadd.f32 %v4776_v4, %v4775_v35  ;;  %v4883_v16 = vsel %vm645_vm1, %v4845_v30, 0.0 }
 0x73a   : > { %v3840_v6 = vadd.f32 %v3808_v38, %v3765_v28  ;;  %v8534_v13 = vpop.f32.mrf.mxu0  ;;  %v4710_v38 = vadd.f32 %v8540_v21, %v8514_v26  ;;  %v4780_v28 = vsel %vm645_vm1, %v4705_v63, 0.0  ;;  %v4881_v26 = vsel %vm645_vm1, %v4844_v48, 0.0 }
 0x73c   : > { %3873 = vst.msk [vmem:[%s7953_s1 + $0xc8] sm:$0xff] %vm645_vm1, %v3840_v6  ;;  %v4784_v61 = vsel %vm645_vm1, %v4710_v38, 0.0 }
 0x73d   : > { %5572 = vmatmul.msk.bf16.gmra.mxu0 %vm645_vm1, %v4621_v40  ;;  %v4878_v40 = vadd.f32 %v4877_v11, %v4876_v62 }
 0x73f   : > { %v4880_v54 = vadd.f32 %v4879_v17, %v4878_v40  ;;  %v8646_v40 = vld [vmem:[%s7953_s1] sm:$0xff] }
 0x741   : > { %v3767_v36 = vpop.f32.mrf.mxu1 }
 0x742   : > { %v3768_v33 = vadd.f32 %v8366_v42, %v3767_v36  ;;  %v8548_v46 = vpop.f32.mrf.mxu0  ;;  %v4779_v36 = vadd.f32 %v4778_v7, %v4777_v27 }
 0x744   : > { %v3841_v41 = vadd.f32 %v3809_v55, %v3768_v33  ;;  %v4846_v55 = vmul.f32 %v4710_v38, %v4710_v38  ;;  %v4781_v10 = vadd.f32 %v4780_v28, %v4779_v36  ;;  %v4607_v38 = vmul.f32 %v4575_v29, %v8294_v5  ;;  %v8651_v36 = vld [vmem:[%s7953_s1 + $0x18] sm:$0xff] }
 0x746   : > { %3874 = vst.msk [vmem:[%s7953_s1 + $0xd0] sm:$0xff] %vm645_vm1, %v3841_v41  ;;  %v4782_v41 = vsel %vm645_vm1, %v4707_v12, 0.0  ;;  %v4885_v44 = vsel %vm645_vm1, %v4846_v55, 0.0  ;;  %v3984_v55 = vmul.f32 %v8646_v40, %v8646_v40 }
 0x747   : > { %v4783_v22 = vadd.f32 %v4782_v41, %v4781_v10  ;;  %v3987_v41 = vmul.f32 %v8651_v36, %v8651_v36 }
 0x749   : > { %v3769_v24 = vpop.f32.mrf.mxu1  ;;  %v4785_v8 = vadd.f32 %v4784_v61, %v4783_v22  ;;  %v3915_v61 = vsel %vm645_vm1, %v8646_v40, 0.0  ;;  %v8679_v22 = vld [vmem:[%s7953_s1 + $0x30] sm:$0xff] }
 0x74a   : > { %v3770_v14 = vadd.f32 %v8366_v42, %v3769_v24  ;;  %v4719_v3 = vpop.f32.mrf.mxu0  ;;  %v4847_v24 = vmul.f32 %v4712_v9, %v4712_v9 }
 0x74b   : > { %v4720_v43 = vadd.f32 %v8540_v21, %v4719_v3  ;;  %v5950_v3 = vld [vmem:[%s7962_s24 + $0xf0] sm:$0xff] }
 0x74c   : > { %v3842_v39 = vadd.f32 %v3810_v18, %v3770_v14  ;;  %v4715_v18 = vadd.f32 %v8540_v21, %v8534_v13  ;;  %v4882_v14 = vadd.f32 %v4881_v26, %v4880_v54  ;;  %v4887_v51 = vsel %vm645_vm1, %v4847_v24, 0.0  ;;  %v8666_v54 = vld [vmem:[%s7953_s1 + $0x28] sm:$0xff] }
 0x74d   : > { %5573 = vmatmul.msk.bf16.gmra.mxu0 %vm645_vm1, %v4622_v59  ;;  %v4850_v53 = vmul.f32 %v4720_v43, %v4720_v43  ;;  %v4574_v23 = vsub.f32 %v5950_v3, %v8254_v0  ;;  %v4792_v35 = vsel %vm645_vm1, %v4720_v43, 0.0  ;;  %v4021_v59 = vsel %vm645_vm1, %v3987_v41, 0.0 }
 0x74e   : > { %3875 = vst.msk [vmem:[%s7953_s1 + $0xd8] sm:$0xff] %vm645_vm1, %v3842_v39  ;;  %v4848_v19 = vmul.f32 %v4715_v18, %v4715_v18  ;;  %v4717_v39 = vadd.f32 %v8540_v21, %v8548_v46  ;;  %v4884_v56 = vadd.f32 %v4883_v16, %v4882_v14  ;;  %v4788_v13 = vsel %vm645_vm1, %v4715_v18, 0.0 }
 0x74f   : > { %v4787_v46 = vadd.f32 %v4786_v52, %v4785_v8  ;;  %v4893_v48 = vsel %vm645_vm1, %v4850_v53, 0.0  ;;  %v4606_v27 = vmul.f32 %v4574_v23, %v8294_v5  ;;  %v4016_v18 = vsel %vm645_vm1, %v3984_v55, 0.0  ;;  %v8705_v53 = vld [vmem:[%s7953_s1 + $0x48] sm:$0xff] }
 0x750   : > { %v4849_v47 = vmul.f32 %v4717_v39, %v4717_v39  ;;  %v4886_v32 = vadd.f32 %v4885_v44, %v4884_v56  ;;  %v4889_v58 = vsel %vm645_vm1, %v4848_v19, 0.0  ;;  %v4790_v37 = vsel %vm645_vm1, %v4717_v39, 0.0  ;;  %v8687_v56 = vld [vmem:[%s7953_s1 + $0x38] sm:$0xff] }
 0x751   : > { %v4789_v4 = vadd.f32 %v4788_v13, %v4787_v46  ;;  %v4623_v28 = vpack.c.bf16 %v4607_v38, %v4606_v27  ;;  %v3920_v44 = vsel %vm645_vm1, %v8651_v36, 0.0  ;;  %v3989_v19 = vmul.f32 %v8666_v54, %v8666_v54 }
 0x752   : > { %v8588_v6 = vpop.f32.mrf.mxu0  ;;  %v4888_v50 = vadd.f32 %v4887_v51, %v4886_v32  ;;  %v4891_v45 = vsel %vm645_vm1, %v4849_v47, 0.0  ;;  %v3990_v13 = vmul.f32 %v8679_v22, %v8679_v22  ;;  %v3991_v46 = vmul.f32 %v8687_v56, %v8687_v56 }
 0x753   : > { %v4791_v7 = vadd.f32 %v4790_v37, %v4789_v4  ;;  %v3926_v37 = vsel %vm645_vm1, %v8679_v22, 0.0  ;;  %v3932_v55 = vsel %vm645_vm1, %v8705_v53, 0.0 }
 0x754   : > { %v4890_v11 = vadd.f32 %v4889_v58, %v4888_v50  ;;  %v4025_v58 = vsel %vm645_vm1, %v3989_v19, 0.0  ;;  %v4027_v4 = vsel %vm645_vm1, %v3990_v13, 0.0  ;;  %v4029_v29 = vsel %vm645_vm1, %v3991_v46, 0.0  ;;  %v8747_v19 = vld [vmem:[%s7953_s1 + $0x70] sm:$0xff] }
 0x755   : > { %v3772_v1 = vpop.f32.mrf.mxu1  ;;  %v8626_v62 = vadd.f32 %v4792_v35, %v4791_v7  ;;  %v3998_v46 = vmul.f32 %v8747_v19, %v8747_v19 }
 0x756   : > { %v3773_v33 = vadd.f32 %v8366_v42, %v3772_v1  ;;  %v4892_v12 = vadd.f32 %v4891_v45, %v4890_v11  ;;  %v8640_v1 = vld [vmem:[%s7953_s1 + $0x8] sm:$0xff]  ;;  %v8713_v45 = vld [vmem:[%s7953_s1 + $0x50] sm:$0xff]  ;;  %v3993_v11 = vmul.f32 %v8705_v53, %v8705_v53 }
 0x757   : > { %v3985_v5 = vmul.f32 %v8640_v1, %v8640_v1  ;;  %v3916_v26 = vsel %vm645_vm1, %v8640_v1, 0.0 }
 0x758   : > { %v3843_v31 = vadd.f32 %v3811_v25, %v3773_v33  ;;  %v8632_v0 = vadd.f32 %v4893_v48, %v4892_v12  ;;  %v8643_v25 = vld [vmem:[%s7953_s1 + $0x10] sm:$0xff]  ;;  %v8658_v33 = vld [vmem:[%s7953_s1 + $0x20] sm:$0xff]  ;;  %v3917_v24 = vadd.f32 %v3916_v26, %v3915_v61  ;;  %v8723_v12 = vld [vmem:[%s7953_s1 + $0x58] sm:$0xff]  ;;  %v4033_v41 = vsel %vm645_vm1, %v3993_v11, 0.0 }
 0x759   : > { %v3986_v34 = vmul.f32 %v8643_v25, %v8643_v25  ;;  %v4017_v9 = vsel %vm645_vm1, %v3985_v5, 0.0  ;;  %v3988_v16 = vmul.f32 %v8658_v33, %v8658_v33  ;;  %v3922_v8 = vsel %vm645_vm1, %v8658_v33, 0.0 }
 0x75a   : > { %3876 = vst.msk [vmem:[%s7953_s1 + $0xe0] sm:$0xff] %vm645_vm1, %v3843_v31  ;;  %v8611_v15 = vpop.f32.mrf.mxu0  ;;  %v3918_v31 = vsel %vm645_vm1, %v8643_v25, 0.0  ;;  %v4018_v52 = vadd.f32 %v4017_v9, %v4016_v18  ;;  %v3995_v9 = vmul.f32 %v8723_v12, %v8723_v12  ;;  %v4043_v11 = vsel %vm645_vm1, %v3998_v46, 0.0  ;;  %v8807_v46 = vld [vmem:[%s7953_s1 + $0xa0] sm:$0xff] }
 0x75b   : > { %v4019_v14 = vsel %vm645_vm1, %v3986_v34, 0.0  ;;  %v3919_v39 = vadd.f32 %v3918_v31, %v3917_v24  ;;  %v4023_v43 = vsel %vm645_vm1, %v3988_v16, 0.0  ;;  %v8731_v34 = vld [vmem:[%s7953_s1 + $0x60] sm:$0xff]  ;;  %v3934_v31 = vsel %vm645_vm1, %v8713_v45, 0.0  ;;  %v8739_v16 = vld [vmem:[%s7953_s1 + $0x68] sm:$0xff] }
 0x75c   : > { %v4020_v51 = vadd.f32 %v4019_v14, %v4018_v52  ;;  %v3996_v14 = vmul.f32 %v8731_v34, %v8731_v34  ;;  %v3936_v52 = vsel %vm645_vm1, %v8723_v12, 0.0  ;;  %v3938_v13 = vsel %vm645_vm1, %v8731_v34, 0.0 }
 0x75d   : > { %v3774_v60 = vpop.f32.mrf.mxu1  ;;  %5574 = vmatmul.msk.bf16.gmra.mxu0 %vm645_vm1, %v4623_v28  ;;  %v3921_v47 = vadd.f32 %v3920_v44, %v3919_v39  ;;  %v3994_v28 = vmul.f32 %v8713_v45, %v8713_v45 }
 0x75e   : > { %v3775_v49 = vadd.f32 %v8366_v42, %v3774_v60  ;;  %v8695_v60 = vld [vmem:[%s7953_s1 + $0x40] sm:$0xff]  ;;  %v4022_v32 = vadd.f32 %v4021_v59, %v4020_v51  ;;  %v4037_v59 = vsel %vm645_vm1, %v3995_v9, 0.0  ;;  %v8789_v9 = vld [vmem:[%s7953_s1 + $0x98] sm:$0xff] }
 0x75f   : > { %v3992_v3 = vmul.f32 %v8695_v60, %v8695_v60  ;;  %v3930_v48 = vsel %vm645_vm1, %v8695_v60, 0.0  ;;  %v4035_v18 = vsel %vm645_vm1, %v3994_v28, 0.0 }
 0x760   : > { %v3844_v63 = vadd.f32 %v3812_v57, %v3775_v49  ;;  %v3924_v57 = vsel %vm645_vm1, %v8666_v54, 0.0  ;;  %v3923_v49 = vadd.f32 %v3922_v8, %v3921_v47  ;;  %v4024_v50 = vadd.f32 %v4023_v43, %v4022_v32  ;;  %v8755_v47 = vld [vmem:[%s7953_s1 + $0x78] sm:$0xff] }
 0x761   : > { %v4031_v38 = vsel %vm645_vm1, %v3992_v3, 0.0  ;;  %v3997_v8 = vmul.f32 %v8739_v16, %v8739_v16  ;;  %v4039_v32 = vsel %vm645_vm1, %v3996_v14, 0.0  ;;  %v3999_v3 = vmul.f32 %v8755_v47, %v8755_v47 }
 0x762   : > { %3877 = vst.msk [vmem:[%s7953_s1 + $0xe8] sm:$0xff] %vm645_vm1, %v3844_v63  ;;  %v8630_v17 = vpop.f32.mrf.mxu0  ;;  %v3925_v23 = vadd.f32 %v3924_v57, %v3923_v49  ;;  %v3928_v63 = vsel %vm645_vm1, %v8687_v56, 0.0  ;;  %v4026_v2 = vadd.f32 %v4025_v58, %v4024_v50  ;;  %v3940_v58 = vsel %vm645_vm1, %v8739_v16, 0.0 }
 0x764   : > { %v3927_v7 = vadd.f32 %v3926_v37, %v3925_v23  ;;  %v4028_v27 = vadd.f32 %v4027_v4, %v4026_v2  ;;  %v8765_v37 = vld [vmem:[%s7953_s1 + $0x80] sm:$0xff]  ;;  %v4041_v4 = vsel %vm645_vm1, %v3997_v8, 0.0  ;;  %v8773_v2 = vld [vmem:[%s7953_s1 + $0x88] sm:$0xff]  ;;  %v4722_v8 = vadd.f32 %v8540_v21, %v8588_v6 }
 0x765   : > { %v3948_v14 = vsel %vm645_vm1, %v8773_v2, 0.0 }
 0x766   : > { %v3929_v5 = vadd.f32 %v3928_v63, %v3927_v7  ;;  %v4030_v26 = vadd.f32 %v4029_v29, %v4028_v27  ;;  %v3942_v63 = vsel %vm645_vm1, %v8747_v19, 0.0  ;;  %v4000_v7 = vmul.f32 %v8765_v37, %v8765_v37 }
 0x767   : > { %v3944_v27 = vsel %vm645_vm1, %v8755_v47, 0.0  ;;  %v4794_v6 = vsel %vm645_vm1, %v4722_v8, 0.0 }
 0x768   : > { %v3931_v61 = vadd.f32 %v3930_v48, %v3929_v5  ;;  %v4032_v24 = vadd.f32 %v4031_v38, %v4030_v26  ;;  %v8781_v38 = vld [vmem:[%s7953_s1 + $0x90] sm:$0xff]  ;;  %v4045_v5 = vsel %vm645_vm1, %v3999_v3, 0.0 }
 0x76a   : > { %v8635_v30 = vpop.f32.mrf.mxu0  ;;  %v3933_v44 = vadd.f32 %v3932_v55, %v3931_v61  ;;  %v4034_v39 = vadd.f32 %v4033_v41, %v4032_v24  ;;  %v4001_v55 = vmul.f32 %v8773_v2, %v8773_v2  ;;  %v3946_v41 = vsel %vm645_vm1, %v8765_v37, 0.0 }
 0x76b   : > { %v4002_v24 = vmul.f32 %v8781_v38, %v8781_v38 }
 0x76c   : > { %v3935_v51 = vadd.f32 %v3934_v31, %v3933_v44  ;;  %v4036_v57 = vadd.f32 %v4035_v18, %v4034_v39  ;;  %v4047_v31 = vsel %vm645_vm1, %v4000_v7, 0.0  ;;  %v4049_v39 = vsel %vm645_vm1, %v4001_v55, 0.0  ;;  %v8818_v7 = vld [vmem:[%s7953_s1 + $0xa8] sm:$0xff] }
 0x76e   : > { %v3937_v49 = vadd.f32 %v3936_v52, %v3935_v51  ;;  %v4038_v50 = vadd.f32 %v4037_v59, %v4036_v57  ;;  %v4003_v59 = vmul.f32 %v8789_v9, %v8789_v9 }
 0x770   : > { %v3939_v23 = vadd.f32 %v3938_v13, %v3937_v49  ;;  %v4040_v29 = vadd.f32 %v4039_v32, %v4038_v50  ;;  %v3950_v13 = vsel %vm645_vm1, %v8781_v38, 0.0  ;;  %v4051_v32 = vsel %vm645_vm1, %v4002_v24, 0.0 }
 0x771   : > { %v4851_v49 = vmul.f32 %v4722_v8, %v4722_v8  ;;  %v3952_v50 = vsel %vm645_vm1, %v8789_v9, 0.0  ;;  %v4053_v3 = vsel %vm645_vm1, %v4003_v59, 0.0 }
 0x772   : > { %v8637_v20 = vpop.f32.mrf.mxu0  ;;  %v3941_v48 = vadd.f32 %v3940_v58, %v3939_v23  ;;  %v4042_v28 = vadd.f32 %v4041_v4, %v4040_v29  ;;  %v4004_v29 = vmul.f32 %v8807_v46, %v8807_v46 }
 0x774   : > { %v3943_v26 = vadd.f32 %v3942_v63, %v3941_v48  ;;  %v4044_v61 = vadd.f32 %v4043_v11, %v4042_v28  ;;  %v3954_v63 = vsel %vm645_vm1, %v8807_v46, 0.0  ;;  %v4895_v48 = vsel %vm645_vm1, %v4851_v49, 0.0 }
 0x775   : > { %v4795_v28 = vadd.f32 %v4794_v6, %v8626_v62  ;;  %v4055_v24 = vsel %vm645_vm1, %v4004_v29, 0.0  ;;  %v4896_v62 = vadd.f32 %v4895_v48, %v8632_v0 }
 0x776   : > { %v3945_v18 = vadd.f32 %v3944_v27, %v3943_v26  ;;  %v4046_v44 = vadd.f32 %v4045_v5, %v4044_v61  ;;  %v4725_v26 = vadd.f32 %v8540_v21, %v8611_v15  ;;  %v4730_v61 = vadd.f32 %v8540_v21, %v8635_v30 }
 0x777   : > { %v4005_v30 = vmul.f32 %v8818_v7, %v8818_v7 }
 0x778   : > { %v3947_v51 = vadd.f32 %v3946_v41, %v3945_v18  ;;  %v4048_v57 = vadd.f32 %v4047_v31, %v4046_v44  ;;  %v4727_v41 = vadd.f32 %v8540_v21, %v8630_v17  ;;  %v3956_v18 = vsel %vm645_vm1, %v8818_v7, 0.0 }
 0x779   : > { %v4796_v15 = vsel %vm645_vm1, %v4725_v26, 0.0  ;;  %v4852_v44 = vmul.f32 %v4725_v26, %v4725_v26  ;;  %v4854_v8 = vmul.f32 %v4730_v61, %v4730_v61  ;;  %v4057_v29 = vsel %vm645_vm1, %v4005_v30, 0.0 }
 0x77a   : > { %v8668_v10 = vpop.f32.mrf.mxu0  ;;  %v3949_v58 = vadd.f32 %v3948_v14, %v3947_v51  ;;  %v4050_v4 = vadd.f32 %v4049_v39, %v4048_v57  ;;  %v4732_v14 = vadd.f32 %v8540_v21, %v8637_v20  ;;  %v4798_v17 = vsel %vm645_vm1, %v4727_v41, 0.0 }
 0x77b   : > { %v4853_v39 = vmul.f32 %v4727_v41, %v4727_v41  ;;  %v4797_v59 = vadd.f32 %v4796_v15, %v4795_v28  ;;  %v4735_v51 = vadd.f32 %v8540_v21, %v8668_v10  ;;  %v4897_v0 = vsel %vm645_vm1, %v4852_v44, 0.0 }
 0x77c   : > { %v3951_v23 = vadd.f32 %v3950_v13, %v3949_v58  ;;  %v4052_v11 = vadd.f32 %v4051_v32, %v4050_v4  ;;  %v8843_v13 = vld [vmem:[%s7953_s1 + $0xb0] sm:$0xff]  ;;  %v4800_v57 = vsel %vm645_vm1, %v4730_v61, 0.0  ;;  %v4855_v32 = vmul.f32 %v4732_v14, %v4732_v14 }
 0x77d   : > { %v4899_v20 = vsel %vm645_vm1, %v4853_v39, 0.0  ;;  %v4898_v49 = vadd.f32 %v4897_v0, %v4896_v62  ;;  %v4799_v58 = vadd.f32 %v4798_v17, %v4797_v59  ;;  %v4901_v6 = vsel %vm645_vm1, %v4854_v8, 0.0  ;;  %v3813_v62 = vld [vmem:[%s6134_s23 + $0xf0] sm:$0xff]  ;;  %v8879_v8 = vld [vmem:[%s7953_s1 + $0xc8] sm:$0xff] }
 0x77e   : > { %v3953_v27 = vadd.f32 %v3952_v50, %v3951_v23  ;;  %v4054_v5 = vadd.f32 %v4053_v3, %v4052_v11  ;;  %v8849_v3 = vld [vmem:[%s7953_s1 + $0xb8] sm:$0xff]  ;;  %v4802_v10 = vsel %vm645_vm1, %v4732_v14, 0.0  ;;  %v4856_v23 = vmul.f32 %v4735_v51, %v4735_v51 }
 0x77f   : > { %v4006_v11 = vmul.f32 %v8843_v13, %v8843_v13  ;;  %v4900_v48 = vadd.f32 %v4899_v20, %v4898_v49  ;;  %v4804_v26 = vsel %vm645_vm1, %v4735_v51, 0.0  ;;  %v3960_v59 = vsel %vm645_vm1, %v8849_v3, 0.0  ;;  %v8886_v49 = vld [vmem:[%s7953_s1 + $0xd0] sm:$0xff] }
 0x780   : > { %v3955_v31 = vadd.f32 %v3954_v63, %v3953_v27  ;;  %v4056_v4 = vadd.f32 %v4055_v24, %v4054_v5  ;;  %v4801_v27 = vadd.f32 %v4800_v57, %v4799_v58  ;;  %v4903_v5 = vsel %vm645_vm1, %v4855_v32, 0.0  ;;  %v8869_v24 = vld [vmem:[%s7953_s1 + $0xc0] sm:$0xff] }
 0x781   : > { %v4902_v14 = vadd.f32 %v4901_v6, %v4900_v48  ;;  %v4905_v17 = vsel %vm645_vm1, %v4856_v23, 0.0  ;;  %v4059_v30 = vsel %vm645_vm1, %v4006_v11, 0.0  ;;  %v4008_v20 = vmul.f32 %v8869_v24, %v8869_v24 }
 0x782   : > { %v8715_v35 = vpop.f32.mrf.mxu0  ;;  %v3957_v50 = vadd.f32 %v3956_v18, %v3955_v31  ;;  %v4007_v31 = vmul.f32 %v8849_v3, %v8849_v3  ;;  %v4803_v15 = vadd.f32 %v4802_v10, %v4801_v27  ;;  %v4058_v23 = vadd.f32 %v4057_v29, %v4056_v4 }
 0x783   : > { %v4737_v63 = vadd.f32 %v8540_v21, %v8715_v35  ;;  %v3958_v35 = vsel %vm645_vm1, %v8843_v13, 0.0  ;;  %v4904_v51 = vadd.f32 %v4903_v5, %v4902_v14  ;;  %v3962_v11 = vsel %vm645_vm1, %v8869_v24, 0.0  ;;  %v8897_v5 = vld [vmem:[%s7953_s1 + $0xd8] sm:$0xff] }
 0x784   : > { %v4805_v0 = vadd.f32 %v4804_v26, %v4803_v15  ;;  %v3959_v10 = vadd.f32 %v3958_v35, %v3957_v50  ;;  %v4009_v48 = vmul.f32 %v8879_v8, %v8879_v8  ;;  %v4060_v4 = vadd.f32 %v4059_v30, %v4058_v23  ;;  %v3814_v14 = vld [vmem:[%s6134_s23 + $0xf8] sm:$0xff] }
 0x785   : > { %v4857_v41 = vmul.f32 %v4737_v63, %v4737_v63  ;;  %v4806_v39 = vsel %vm645_vm1, %v4737_v63, 0.0  ;;  %v4906_v58 = vadd.f32 %v4905_v17, %v4904_v51  ;;  %v4061_v63 = vsel %vm645_vm1, %v4007_v31, 0.0 }
 0x786   : > { %v4807_v6 = vadd.f32 %v4806_v39, %v4805_v0  ;;  %v3961_v50 = vadd.f32 %v3960_v59, %v3959_v10  ;;  %v3964_v35 = vsel %vm645_vm1, %v8879_v8, 0.0  ;;  %v4010_v31 = vmul.f32 %v8886_v49, %v8886_v49  ;;  %v5952_v59 = vld [vmem:[%s9551_s9] ss:$0 sm:$0xff]  ;;  %v8923_v0 = vld [vmem:[%s7953_s1 + $0xe8] sm:$0xff] }
 0x787   : > { %v4907_v57 = vsel %vm645_vm1, %v4857_v41, 0.0  ;;  %v4062_v17 = vadd.f32 %v4061_v63, %v4060_v4  ;;  %v4065_v39 = vsel %vm645_vm1, %v4009_v48, 0.0  ;;  %v4011_v30 = vmul.f32 %v8897_v5, %v8897_v5 }
 0x788   : > { %v4908_v26 = vadd.f32 %v4907_v57, %v4906_v58  ;;  %v4067_v57 = vsel %vm645_vm1, %v4010_v31, 0.0 }
 0x78a   : > { %v8757_v43 = vpop.f32.mrf.mxu0 }
 0x78b   : > { %v4740_v61 = vadd.f32 %v8540_v21, %v8757_v43 }
 0x78d   : > { %v4858_v43 = vmul.f32 %v4740_v61, %v4740_v61  ;;  %v4808_v32 = vsel %vm645_vm1, %v4740_v61, 0.0  ;;  %v4063_v61 = vsel %vm645_vm1, %v4008_v20, 0.0 }
 0x78e   : > { %v8899_v41 = vadd.f32 %v4808_v32, %v4807_v6  ;;  %v3968_v32 = vsel %vm645_vm1, %v8897_v5, 0.0 }
 0x78f   : > { %v4909_v27 = vsel %vm645_vm1, %v4858_v43, 0.0  ;;  %v3966_v43 = vsel %vm645_vm1, %v8886_v49, 0.0 }
 0x790   : > { %v8912_v15 = vadd.f32 %v4909_v27, %v4908_v26  ;;  %v4013_v27 = vmul.f32 %v8923_v0, %v8923_v0 }
 0x792   : > { %v8796_v52 = vpop.f32.mrf.mxu0 }
 0x79a   : > { %v8822_v55 = vpop.f32.mrf.mxu0 }
 0x7a2   : > { %v8858_v28 = vpop.f32.mrf.mxu0 }
 0x7aa   : > { %v8901_v29 = vpop.f32.mrf.mxu0 }
 0x7b2   : > { %v3777_v18 = vpop.f32.mrf.mxu1  ;;  %v4751_v4 = vpop.f32.mrf.mxu0 }
 0x7b3   : > { %v3778_v44 = vadd.f32 %v8366_v42, %v3777_v18  ;;  %v8909_v18 = vld [vmem:[%s7953_s1 + $0xe0] sm:$0xff] }
 0x7b4   : > { %v4012_v58 = vmul.f32 %v8909_v18, %v8909_v18  ;;  %v3970_v48 = vsel %vm645_vm1, %v8909_v18, 0.0 }
 0x7b5   : > { %v3845_v42 = vadd.f32 %v3813_v62, %v3778_v44  ;;  %v3963_v44 = vadd.f32 %v3962_v11, %v3961_v50  ;;  %v4069_v11 = vsel %vm645_vm1, %v4011_v30, 0.0 }
 0x7b7   : > { %3878 = vst.msk [vmem:[%s7953_s1 + $0xf0] sm:$0xff] %vm645_vm1, %v3845_v42  ;;  %v3965_v20 = vadd.f32 %v3964_v35, %v3963_v44  ;;  %v4064_v42 = vadd.f32 %v4063_v61, %v4062_v17  ;;  %v4071_v61 = vsel %vm645_vm1, %v4012_v58, 0.0  ;;  %v3972_v35 = vsel %vm645_vm1, %v8923_v0, 0.0 }
 0x7b8   : > { %v4073_v44 = vsel %vm645_vm1, %v4013_v27, 0.0 }
 0x7b9   : > { %v3967_v23 = vadd.f32 %v3966_v43, %v3965_v20  ;;  %v4066_v63 = vadd.f32 %v4065_v39, %v4064_v42 }
 0x7ba   : > { %v3779_v62 = vpop.f32.mrf.mxu1 }
 0x7bb   : > { %v3780_v51 = vadd.f32 %v5952_v59, %v3779_v62  ;;  %v3969_v26 = vadd.f32 %v3968_v32, %v3967_v23  ;;  %v4068_v50 = vadd.f32 %v4067_v57, %v4066_v63 }
 0x7bd   : > { %v3846_v6 = vadd.f32 %v3814_v14, %v3780_v51  ;;  %v3971_v62 = vadd.f32 %v3970_v48, %v3969_v26  ;;  %v4070_v14 = vadd.f32 %v4069_v11, %v4068_v50 }
 0x7be   : > { %v8931_v10 = vld [vmem:[%s7953_s1 + $0xf0] sm:$0xff] }
 0x7bf   : > { %3879 = vst.msk [vmem:[%s7953_s1 + $0xf8] sm:$0xff] %vm645_vm1, %v3846_v6  ;;  %v4014_v31 = vmul.f32 %v8931_v10, %v8931_v10  ;;  %v3974_v17 = vsel %vm645_vm1, %v8931_v10, 0.0  ;;  %v3973_v39 = vadd.f32 %v3972_v35, %v3971_v62  ;;  %v4072_v43 = vadd.f32 %v4071_v61, %v4070_v14  ;;  %v4754_v6 = vpop.f32.mrf.mxu0 }
 0x7c1   : > { %v4075_v30 = vsel %vm645_vm1, %v4014_v31, 0.0  ;;  %v3975_v51 = vadd.f32 %v3974_v17, %v3973_v39  ;;  %v4074_v20 = vadd.f32 %v4073_v44, %v4072_v43 }
 0x7c3   : > { %v4076_v58 = vadd.f32 %v4075_v30, %v4074_v20  ;;  %v4745_v20 = vadd.f32 %v8540_v21, %v8822_v55 }
 0x7c6   : > { %v8950_v59 = vld [vmem:[%s7953_s1 + $0xf8] sm:$0xff] }
 0x7c7   : > { %v3976_v42 = vsel %vm645_vm1, %v8950_v59, 0.0  ;;  %v4015_v57 = vmul.f32 %v8950_v59, %v8950_v59  ;;  %v4756_v31 = vpop.f32.mrf.mxu0 }
 0x7c8   : > { %v3977_v32 = vadd.f32 %v3976_v42, %v3975_v51  ;;  %v4742_v51 = vadd.f32 %v8540_v21, %v8796_v52  ;;  %v4747_v52 = vadd.f32 %v8540_v21, %v8858_v28 }
 0x7c9   : > { %v4077_v23 = vsel %vm645_vm1, %v4015_v57, 0.0 }
 0x7ca   : > { %v3978_v63 = vrot.slane %v3977_v32, 4  ;;  %v4078_v11 = vadd.f32 %v4077_v23, %v4076_v58 }
 0x7cc   : > { %v3979_v48 = vadd.f32 %v3978_v63, %v3977_v32  ;;  %v4079_v27 = vrot.slane %v4078_v11, 4  ;;  %v4810_v32 = vsel %vm645_vm1, %v4742_v51, 0.0  ;;  %v4812_v63 = vsel %vm645_vm1, %v4745_v20, 0.0 }
 0x7cd   : > { %v4811_v23 = vadd.f32 %v4810_v32, %v8899_v41  ;;  %v4750_v41 = vadd.f32 %v8540_v21, %v8901_v29 }
 0x7ce   : > { %v3980_v26 = vrot.slane %v3979_v48, 2  ;;  %v4080_v50 = vadd.f32 %v4079_v27, %v4078_v11 }
 0x7cf   : > { %v4759_v42 = vpop.f32.mrf.mxu0 }
 0x7d0   : > { %v3981_v61 = vadd.f32 %v3980_v26, %v3979_v48  ;;  %v4081_v35 = vrot.slane %v4080_v50, 2  ;;  %v4859_v48 = vmul.f32 %v4742_v51, %v4742_v51  ;;  %v4813_v26 = vadd.f32 %v4812_v63, %v4811_v23 }
 0x7d2   : > { %v3982_v62 = vrot.slane %v3981_v61, 1  ;;  %v4082_v14 = vadd.f32 %v4081_v35, %v4080_v50  ;;  %v4911_v55 = vsel %vm645_vm1, %v4859_v48, 0.0  ;;  %v4814_v35 = vsel %vm645_vm1, %v4747_v52, 0.0 }
 0x7d3   : > { %v9005_v48 = vadd.f32 %v8540_v21, %v4756_v31 }
 0x7d4   : > { %v3983_v44 = vadd.f32 %v3982_v62, %v3981_v61  ;;  %v4083_v17 = vrot.slane %v4082_v14, 1  ;;  %v4860_v61 = vmul.f32 %v4745_v20, %v4745_v20  ;;  %v4815_v62 = vadd.f32 %v4814_v35, %v4813_v26 }
 0x7d6   : > { %v8957_v39 = vmul.f32 0.00390625, %v3983_v44  ;;  %v4084_v43 = vadd.f32 %v4083_v17, %v4082_v14  ;;  %v8980_v17 = vadd.f32 %v8540_v21, %v4751_v4  ;;  %v4913_v29 = vsel %vm645_vm1, %v4860_v61, 0.0 }
 0x7d7   : > { %v4761_v50 = vpop.f32.mrf.mxu0  ;;  %v8993_v4 = vadd.f32 %v8540_v21, %v4754_v6 }
 0x7d8   : > { %v4086_v30 = vmul.f32 %v8957_v39, %v3983_v44  ;;  %v4101_v14 = vsub.f32 %v8646_v40, %v8957_v39  ;;  %v4816_v44 = vsel %vm645_vm1, %v4750_v41, 0.0  ;;  %v4102_v28 = vsub.f32 %v8640_v1, %v8957_v39 }
 0x7d9   : > { %v4817_v51 = vadd.f32 %v4816_v44, %v4815_v62  ;;  %v4104_v20 = vsub.f32 %v8651_v36, %v8957_v39  ;;  %v4109_v1 = vsub.f32 %v8695_v60, %v8957_v39  ;;  %v4111_v23 = vsub.f32 %v8713_v45, %v8957_v39 }
 0x7da   : > { %v4087_v57 = vsub.f32 %v4084_v43, %v4086_v30  ;;  %v4912_v43 = vadd.f32 %v4911_v55, %v8912_v15  ;;  %v4103_v30 = vsub.f32 %v8643_v25, %v8957_v39  ;;  %v4110_v15 = vsub.f32 %v8705_v53, %v8957_v39 }
 0x7db   : > { %v4112_v26 = vsub.f32 %v8723_v12, %v8957_v39  ;;  %v4861_v60 = vmul.f32 %v4747_v52, %v4747_v52  ;;  %v4113_v35 = vsub.f32 %v8731_v34, %v8957_v39  ;;  %v4822_v44 = vsel %vm645_vm1, %v9005_v48, 0.0 }
 0x7dc   : > { %v4088_v58 = vmax.f32 %v4087_v57, 0.0  ;;  %v4818_v57 = vsel %vm645_vm1, %v8980_v17, 0.0  ;;  %v4914_v55 = vadd.f32 %v4913_v29, %v4912_v43  ;;  %v4114_v31 = vsub.f32 %v8739_v16, %v8957_v39 }
 0x7dd   : > { %v4863_v40 = vmul.f32 %v8980_v17, %v8980_v17  ;;  %v4864_v36 = vmul.f32 %v8993_v4, %v8993_v4  ;;  %v9745_v34 = vsub.f32 %v8747_v19, %v8957_v39  ;;  %v9747_v19 = vsub.f32 %v8765_v37, %v8957_v39 }
 0x7de   : > { %v4089_v11 = vmul.f32 0.003921569, %v4088_v58  ;;  %v4819_v58 = vadd.f32 %v4818_v57, %v4817_v51  ;;  %v9014_v51 = vadd.f32 %v8540_v21, %v4759_v42  ;;  %v9027_v42 = vadd.f32 %v8540_v21, %v4761_v50 }
 0x7df   : > { %v4764_v6 = vpop.f32.mrf.mxu0  ;;  %v4120_v50 = vsub.f32 %v8789_v9, %v8957_v39  ;;  %v4124_v9 = vsub.f32 %v8849_v3, %v8957_v39  ;;  %v4919_v25 = vsel %vm645_vm1, %v4863_v40, 0.0  ;;  %v9748_v40 = vsub.f32 %v8773_v2, %v8957_v39 }
 0x7e0   : > { %v8967_v27 = vadd.f32 1e-05, %v4089_v11  ;;  %v4820_v11 = vsel %vm645_vm1, %v8993_v4, 0.0  ;;  %v9037_v43 = vadd.f32 %v8540_v21, %v4764_v6  ;;  %v4865_v4 = vmul.f32 %v9005_v48, %v9005_v48 }
 0x7e1   : > { %v4821_v61 = vadd.f32 %v4820_v11, %v4819_v58  ;;  %v4824_v58 = vsel %vm645_vm1, %v9014_v51, 0.0  ;;  %v4915_v11 = vsel %vm645_vm1, %v4861_v60, 0.0  ;;  %v9746_v48 = vsub.f32 %v8755_v47, %v8957_v39 }
 0x7e2   : > { %5929 = vrsqrt.f32 %v8967_v27  ;;  %vm4097_vm11 = vweird.f32 %v8967_v27  ;;  %v4866_v16 = vmul.f32 %v9014_v51, %v9014_v51  ;;  %v9749_v37 = vsub.f32 %v8781_v38, %v8957_v39 }
 0x7e3   : > { %v4823_v57 = vadd.f32 %v4822_v44, %v4821_v61  ;;  %v4862_v61 = vmul.f32 %v4750_v41, %v4750_v41  ;;  %v4125_v41 = vsub.f32 %v8869_v24, %v8957_v39  ;;  %v4868_v38 = vmul.f32 %v9037_v43, %v9037_v43 }
 0x7e4   : > { %v4925_v51 = vsel %vm645_vm1, %v4866_v16, 0.0 }
 0x7e5   : > { %v4825_v44 = vadd.f32 %v4824_v58, %v4823_v57  ;;  %v4917_v6 = vsel %vm645_vm1, %v4862_v61, 0.0 }
 0x7e7   : > { %v4766_v52 = vpop.f32.mrf.mxu0 }
 0x7e8   : > { %v5930_v32 = vpop.eup %5929 }
 0x7e9   : > { %v4092_v63 = vmul.f32 %v5930_v32, %v8967_v27  ;;  %vm4098_vm10 = vweird.f32 %v5930_v32  ;;  %v4828_v27 = vsel %vm645_vm1, %v9037_v43, 0.0  ;;  %v4929_v43 = vsel %vm645_vm1, %v4868_v38, 0.0 }
 0x7ea   : > { %vm4099_vm12 = vmor %vm4097_vm11, %vm4098_vm10 }
 0x7eb   : > { %v4093_v62 = vmul.f32 %v5930_v32, %v4092_v63  ;;  %v4123_v63 = vsub.f32 %v8843_v13, %v8957_v39 }
 0x7ed   : > { %v4094_v29 = vmul.f32 0.5, %v4093_v62  ;;  %v4826_v62 = vsel %vm645_vm1, %v9027_v42, 0.0 }
 0x7ee   : > { %v4827_v58 = vadd.f32 %v4826_v62, %v4825_v44  ;;  %v4767_v44 = vadd.f32 %v8540_v21, %v4766_v52  ;;  %v4132_v21 = vsub.f32 %v8950_v59, %v8957_v39 }
 0x7ef   : > { %v4095_v12 = vsub.f32 1.5, %v4094_v29  ;;  %v4916_v29 = vadd.f32 %v4915_v11, %v4914_v55  ;;  %v4131_v11 = vsub.f32 %v8931_v10, %v8957_v39 }
 0x7f0   : > { %v4830_v53 = vsel %vm645_vm1, %v4767_v44, 0.0 }
 0x7f1   : > { %v4096_v57 = vmul.f32 %v5930_v32, %v4095_v12  ;;  %v4918_v62 = vadd.f32 %v4917_v6, %v4916_v29  ;;  %v4130_v12 = vsub.f32 %v8923_v0, %v8957_v39 }
 0x7f3   : > { %v9055_v60 = vsel %vm4099_vm12, %v5930_v32, %v4096_v57  ;;  %v4129_v32 = vsub.f32 %v8909_v18, %v8957_v39  ;;  %v4829_v57 = vadd.f32 %v4828_v27, %v4827_v58 }
 0x7f4   : > { %v4133_v61 = vmul.f32 %v4101_v14, %v9055_v60  ;;  %v4134_v3 = vmul.f32 %v4102_v28, %v9055_v60  ;;  %v9078_v14 = vmul.f32 %v4109_v1, %v9055_v60  ;;  %v9086_v28 = vmul.f32 %v4103_v30, %v9055_v60 }
 0x7f5   : > { %v9092_v52 = vmul.f32 %v4104_v20, %v9055_v60  ;;  %v9098_v17 = vmul.f32 %v4110_v15, %v9055_v60  ;;  %v9104_v1 = vmul.f32 %v4111_v23, %v9055_v60  ;;  %v9111_v30 = vmul.f32 %v4112_v26, %v9055_v60 }
 0x7f6   : > { %v4165_v55 = vpack.c.bf16 %v4134_v3, %v4133_v61  ;;  %v4920_v20 = vadd.f32 %v4919_v25, %v4918_v62  ;;  %v4831_v29 = vadd.f32 %v4830_v53, %v4829_v57  ;;  %v9120_v45 = vmul.f32 %v4113_v35, %v9055_v60 }
 0x7f7   : > { %v4169_v15 = vpack.c.bf16 %v9098_v17, %v9078_v14  ;;  %v4921_v23 = vsel %vm645_vm1, %v4864_v36, 0.0  ;;  %v4170_v26 = vpack.c.bf16 %v9111_v30, %v9104_v1  ;;  %v9131_v58 = vmul.f32 %v4114_v31, %v9055_v60  ;;  %v5032_v30 = vld [vmem:[%s9558_s16] sm:$0x3] }
 0x7f8   : > { %5543 = vmatmul.msk.bf16.vlgmr.msra.gmra.mxu2 %vm645_vm1, %v4165_v55  ;;  %v4922_v6 = vadd.f32 %v4921_v23, %v4920_v20  ;;  %v4832_v27 = vrot.slane %v4831_v29, 4  ;;  %v9137_v35 = vmul.f32 %v9745_v34, %v9055_v60  ;;  %v9143_v55 = vmul.f32 %v9746_v48, %v9055_v60 }
 0x7f9   : > { %v4923_v61 = vsel %vm645_vm1, %v4865_v4, 0.0  ;;  %v4171_v31 = vpack.c.bf16 %v9131_v58, %v9120_v45  ;;  %v9154_v3 = vmul.f32 %v9747_v19, %v9055_v60  ;;  %v9162_v25 = vmul.f32 %v9748_v40, %v9055_v60 }
 0x7fa   : > { %v4924_v62 = vadd.f32 %v4923_v61, %v4922_v6  ;;  %v4833_v57 = vadd.f32 %v4832_v27, %v4831_v29  ;;  %v4172_v47 = vpack.c.bf16 %v9143_v55, %v9137_v35  ;;  %v4867_v36 = vmul.f32 %v9027_v42, %v9027_v42 }
 0x7fb   : > { %v9171_v53 = vmul.f32 %v9749_v37, %v9055_v60  ;;  %v9174_v20 = vmul.f32 %v4120_v50, %v9055_v60  ;;  %v4173_v2 = vpack.c.bf16 %v9162_v25, %v9154_v3  ;;  %v9750_v4 = vsub.f32 %v8807_v46, %v8957_v39 }
 0x7fc   : > { %v4926_v29 = vadd.f32 %v4925_v51, %v4924_v62  ;;  %v4834_v23 = vrot.slane %v4833_v57, 2  ;;  %v4927_v42 = vsel %vm645_vm1, %v4867_v36, 0.0  ;;  %v9751_v27 = vsub.f32 %v8818_v7, %v8957_v39 }
 0x7fd   : > { %v9182_v6 = vmul.f32 %v9750_v4, %v9055_v60  ;;  %v4174_v50 = vpack.c.bf16 %v9174_v20, %v9171_v53  ;;  %v9199_v46 = vmul.f32 %v4123_v63, %v9055_v60  ;;  %v9202_v16 = vmul.f32 %v4124_v9, %v9055_v60 }
 0x7fe   : > { %v9193_v34 = vmul.f32 %v9751_v27, %v9055_v60  ;;  %v4928_v48 = vadd.f32 %v4927_v42, %v4926_v29  ;;  %v4835_v61 = vadd.f32 %v4834_v23, %v4833_v57  ;;  %v4869_v19 = vmul.f32 %v4767_v44, %v4767_v44 }
 0x7ff   : > { %v9211_v7 = vmul.f32 %v4125_v41, %v9055_v60  ;;  %v4176_v13 = vpack.c.bf16 %v9202_v16, %v9199_v46  ;;  %v9752_v63 = vsub.f32 %v8879_v8, %v8957_v39  ;;  %v9753_v51 = vsub.f32 %v8886_v49, %v8957_v39 }
 0x800   : > { %v4175_v62 = vpack.c.bf16 %v9193_v34, %v9182_v6  ;;  %v4930_v57 = vadd.f32 %v4929_v43, %v4928_v48  ;;  %v4836_v40 = vrot.slane %v4835_v61, 1  ;;  %v4931_v44 = vsel %vm645_vm1, %v4869_v19, 0.0 }
 0x801   : > { %v9219_v9 = vmul.f32 %v9752_v63, %v9055_v60  ;;  %v9226_v24 = vmul.f32 %v9753_v51, %v9055_v60  ;;  %v9754_v41 = vsub.f32 %v8897_v5, %v8957_v39  ;;  %v9238_v8 = vmul.f32 %v4129_v32, %v9055_v60 }
 0x802   : > { %v4837_v37 = vadd.f32 %v4836_v40, %v4835_v61  ;;  %v4932_v29 = vadd.f32 %v4931_v44, %v4930_v57  ;;  %v9246_v49 = vmul.f32 %v4130_v12, %v9055_v60  ;;  %v4166_v5 = vpack.c.bf16 %v9092_v52, %v9086_v28 }
 0x803   : > { %v9232_v36 = vmul.f32 %v9754_v41, %v9055_v60  ;;  %v4177_v23 = vpack.c.bf16 %v9219_v9, %v9211_v7  ;;  %v9256_v18 = vmul.f32 %v4131_v11, %v9055_v60  ;;  %v9262_v32 = vmul.f32 %v4132_v21, %v9055_v60 }
 0x804   : > { %v4933_v0 = vrot.slane %v4932_v29, 4  ;;  %5931 = vrcp.f32 %v4837_v37  ;;  %v4179_v12 = vpack.c.bf16 %v9246_v49, %v9238_v8  ;;  %v4105_v27 = vsub.f32 %v8658_v33, %v8957_v39 }
 0x805   : > { %v4178_v4 = vpack.c.bf16 %v9232_v36, %v9226_v24  ;;  %v4180_v28 = vpack.c.bf16 %v9262_v32, %v9256_v18  ;;  %v4106_v21 = vsub.f32 %v8666_v54, %v8957_v39  ;;  %v4950_v61 = vand.u32 2147483648, %v4837_v37  ;;  %v4954_v54 = vld [vmem:[%s9556_s14] sm:$0xf] }
 0x806   : > { %v4934_v52 = vadd.f32 %v4933_v0, %v4932_v29  ;;  %vm4944_vm13 = vweird.f32 %v4837_v37  ;;  %v4948_v19 = vand.u32 2147483647, %v4837_v37  ;;  %v4137_v57 = vmul.f32 %v4105_v27, %v9055_v60  ;;  %5575 = vmatpush.msk.msrb.mxu2 %vm4959_vm3, %v4954_v54 }
 0x807   : > { %v4138_v40 = vmul.f32 %v4106_v21, %v9055_v60  ;;  %v4951_v44 = vor.u32 1.1754944e-38, %v4950_v61  ;;  %v4107_v0 = vsub.f32 %v8679_v22, %v8957_v39 }
 0x808   : > { %5544 = vmatmul.msk.bf16.gmra.mxu2 %vm645_vm1, %v4166_v5  ;;  %v4935_v10 = vrot.slane %v4934_v52, 2  ;;  %vm4949_vm2 = vcmp.eq.f32.partialorder %v4948_v19, 8.507059e+37 }
 0x809   : > { %v4167_v33 = vpack.c.bf16 %v4138_v40, %v4137_v57 }
 0x80a   : > { %v5932_v11 = vpop.eup %5931  ;;  %v4936_v42 = vadd.f32 %v4935_v10, %v4934_v52  ;;  %v4108_v52 = vsub.f32 %v8687_v56, %v8957_v39  ;;  %v4139_v10 = vmul.f32 %v4107_v0, %v9055_v60 }
 0x80b   : > { %v4940_v38 = vmul.f32 %v5932_v11, %v4837_v37  ;;  %vm4945_vm14 = vweird.f32 %v5932_v11 }
 0x80c   : > { %v4937_v48 = vrot.slane %v4936_v42, 1  ;;  %vm4946_vm15 = vmor %vm4944_vm13, %vm4945_vm14 }
 0x80d   : > { %v4941_v43 = vsub.f32 1.0, %v4940_v38 }
 0x80e   : > { %v4938_v51 = vadd.f32 %v4937_v48, %v4936_v42 }
 0x80f   : > { %v4942_v63 = vmul.f32 %v5932_v11, %v4941_v43  ;;  %v4955_v43 = vld [vmem:[%s9557_s15] sm:$0x1] }
 0x811   : > { %v4943_v41 = vadd.f32 %v5932_v11, %v4942_v63 }
 0x813   : > { %v4947_v29 = vsel %vm4946_vm15, %v5932_v11, %v4943_v41  ;;  %v4140_v11 = vmul.f32 %v4108_v52, %v9055_v60 }
 0x814   : > { %v4952_v5 = vsel %vm4949_vm2, %v4951_v44, %v4947_v29 }
 0x815   : > { %v4953_v37 = vmul.f32 %v4952_v5, %v4938_v51  ;;  %v4168_v42 = vpack.c.bf16 %v4140_v11, %v4139_v10 }
 0x818   : > { %5545 = vmatmul.msk.bf16.gmra.mxu2 %vm645_vm1, %v4167_v33 }
 0x828   : > { %5546 = vmatmul.msk.bf16.gmra.mxu2 %vm645_vm1, %v4168_v42 }
 0x838   : > { %5547 = vmatmul.msk.bf16.gmra.mxu2 %vm645_vm1, %v4169_v15  ;;  %v5086_v15 = vsel %vm965_vm0, %v5032_v30, 0 }
 0x839   : > { %5095 = vmatpush.bf16.msra.mxu3 %v5086_v15 }
 0x848   : > { %5548 = vmatmul.msk.bf16.gmra.mxu2 %vm645_vm1, %v4170_v26 }
 0x858   : > { %5549 = vmatmul.msk.bf16.gmra.mxu2 %vm645_vm1, %v4171_v31 }
 0x868   : > { %5550 = vmatmul.msk.bf16.gmra.mxu2 %vm645_vm1, %v4172_v47 }
 0x878   : > { %5551 = vmatmul.msk.bf16.gmra.mxu2 %vm645_vm1, %v4173_v2 }
 0x87b   : > { %v4246_v22 = vpop.f32.mrf.mxu2 }
 0x883   : > { %v4248_v56 = vpop.f32.mrf.mxu2 }
 0x888   : > { %5552 = vmatmul.msk.bf16.gmra.mxu2 %vm645_vm1, %v4174_v50 }
 0x88b   : > { %v4251_v39 = vpop.f32.mrf.mxu2 }
 0x893   : > { %v4253_v60 = vpop.f32.mrf.mxu2 }
 0x898   : > { %5553 = vmatmul.msk.bf16.gmra.mxu2 %vm645_vm1, %v4175_v62 }
 0x89b   : > { %v4256_v14 = vpop.f32.mrf.mxu2 }
 0x8a3   : > { %v4258_v17 = vpop.f32.mrf.mxu2 }
 0x8a8   : > { %5554 = vmatmul.msk.bf16.gmra.mxu2 %vm645_vm1, %v4176_v13 }
 0x8ab   : > { %v4261_v1 = vpop.f32.mrf.mxu2 }
 0x8b3   : > { %v4263_v45 = vpop.f32.mrf.mxu2 }
 0x8b8   : > { %5555 = vmatmul.msk.bf16.gmra.mxu2 %vm645_vm1, %v4177_v23  ;;  %v5667_v23 = vld [vmem:[%s9553_s11] ss:$0 sm:$0xff] }
 0x8b9   : > { %v4249_v18 = vadd.f32 %v5667_v23, %v4248_v56  ;;  %v4252_v32 = vadd.f32 %v5667_v23, %v4251_v39  ;;  %v4259_v38 = vadd.f32 %v5667_v23, %v4258_v17  ;;  %v4262_v27 = vadd.f32 %v5667_v23, %v4261_v1 }
 0x8ba   : > { %v4264_v21 = vadd.f32 %v5667_v23, %v4263_v45 }
 0x8bb   : > { %v4266_v26 = vpop.f32.mrf.mxu2 }
 0x8bc   : > { %v4267_v48 = vadd.f32 %v5667_v23, %v4266_v26 }
 0x8c3   : > { %v4268_v58 = vpop.f32.mrf.mxu2 }
 0x8c4   : > { %v4269_v61 = vadd.f32 %v5667_v23, %v4268_v58 }
 0x8c8   : > { %5556 = vmatmul.msk.bf16.gmra.mxu2 %vm645_vm1, %v4178_v4  ;;  %v4247_v4 = vadd.f32 %v5667_v23, %v4246_v22 }
 0x8cb   : > { %v4271_v35 = vpop.f32.mrf.mxu2 }
 0x8cc   : > { %v4272_v19 = vadd.f32 %v5667_v23, %v4271_v35 }
 0x8d3   : > { %v4273_v55 = vpop.f32.mrf.mxu2 }
 0x8d4   : > { %v4274_v57 = vadd.f32 %v5667_v23, %v4273_v55 }
 0x8d8   : > { %5557 = vmatmul.msk.bf16.gmra.mxu2 %vm645_vm1, %v4179_v12  ;;  %v4254_v12 = vadd.f32 %v5667_v23, %v4253_v60 }
 0x8db   : > { %v4276_v31 = vpop.f32.mrf.mxu2 }
 0x8dc   : > { %v4277_v40 = vadd.f32 %v5667_v23, %v4276_v31 }
 0x8e3   : > { %v4278_v3 = vpop.f32.mrf.mxu2 }
 0x8e4   : > { %v4279_v63 = vadd.f32 %v5667_v23, %v4278_v3 }
 0x8e8   : > { %5558 = vmatmul.msk.bf16.gmra.mxu2 %vm645_vm1, %v4180_v28  ;;  %v4257_v28 = vadd.f32 %v5667_v23, %v4256_v14 }
 0x8eb   : > { %v4281_v47 = vpop.f32.mrf.mxu2 }
 0x8ec   : > { %v4282_v44 = vadd.f32 %v5667_v23, %v4281_v47 }
 0x8f3   : > { %v4283_v25 = vpop.f32.mrf.mxu2 }
 0x8f4   : > { %v4284_v51 = vadd.f32 %v5667_v23, %v4283_v25 }
 0x8f8   : > { %5576 = vmatmul.msk.f32.vlgmr.msrb.gmra.mxu2 %vm645_vm1, %v4953_v37 }
 0x8fb   : > { %v4286_v53 = vpop.f32.mrf.mxu2 }
 0x8fc   : > { %v4287_v41 = vadd.f32 %v5667_v23, %v4286_v53 }
 0x903   : > { %v4288_v20 = vpop.f32.mrf.mxu2 }
 0x904   : > { %v4289_v33 = vadd.f32 %v5667_v23, %v4288_v20 }
 0x90b   : > { %v4291_v2 = vpop.f32.mrf.mxu2 }
 0x90c   : > { %v4292_v5 = vadd.f32 %v5667_v23, %v4291_v2 }
 0x913   : > { %v4293_v6 = vpop.f32.mrf.mxu2 }
 0x914   : > { %v4294_v54 = vadd.f32 %v5667_v23, %v4293_v6 }
 0x91b   : > { %v4296_v50 = vpop.f32.mrf.mxu2 }
 0x91c   : > { %v4297_v37 = vadd.f32 %v5667_v23, %v4296_v50 }
 0x923   : > { %v4298_v34 = vpop.f32.mrf.mxu2 }
 0x924   : > { %v4299_v52 = vadd.f32 %v5667_v23, %v4298_v34 }
 0x92b   : > { %v4301_v46 = vpop.f32.mrf.mxu2 }
 0x92c   : > { %v4302_v10 = vadd.f32 %v5667_v23, %v4301_v46 }
 0x933   : > { %v4303_v16 = vpop.f32.mrf.mxu2 }
 0x934   : > { %v4304_v11 = vadd.f32 %v5667_v23, %v4303_v16 }
 0x93b   : > { %v4306_v62 = vpop.f32.mrf.mxu2 }
 0x93c   : > { %v4307_v42 = vadd.f32 %v5667_v23, %v4306_v62 }
 0x943   : > { %v4308_v7 = vpop.f32.mrf.mxu2 }
 0x944   : > { %v4309_v22 = vadd.f32 %v5667_v23, %v4308_v7 }
 0x94b   : > { %v4311_v13 = vpop.f32.mrf.mxu2 }
 0x94c   : > { %v4312_v56 = vadd.f32 %v5667_v23, %v4311_v13 }
 0x953   : > { %v4313_v9 = vpop.f32.mrf.mxu2 }
 0x954   : > { %v4314_v39 = vadd.f32 %v5667_v23, %v4313_v9 }
 0x95b   : > { %v4316_v24 = vpop.f32.mrf.mxu2 }
 0x95c   : > { %v4317_v14 = vadd.f32 %v5667_v23, %v4316_v24 }
 0x963   : > { %v4318_v36 = vpop.f32.mrf.mxu2 }
 0x964   : > { %v4319_v17 = vadd.f32 %v5667_v23, %v4318_v36 }
 0x96b   : > { %v4321_v8 = vpop.f32.mrf.mxu2 }
 0x96c   : > { %v4322_v1 = vadd.f32 %v5667_v23, %v4321_v8 }
 0x973   : > { %v4323_v49 = vpop.f32.mrf.mxu2 }
 0x974   : > { %v4324_v30 = vadd.f32 %v5667_v23, %v4323_v49 }
 0x97b   : > { %v4980_v29 = vpop.f32.mrf.mxu2 }
 0x97c   : > { %v4981_v0 = vadd.f32 %v4980_v29, %v4955_v43 }
 0x97e   : > { %v4983_v60 = vperm.slane %v4981_v0, 0 }
 0x980   : > { %v4984_v15 = vmul.f32 %v4983_v60, %v4247_v4  ;;  %v4985_v45 = vmul.f32 %v4983_v60, %v4249_v18  ;;  %v4986_v26 = vmul.f32 %v4983_v60, %v4252_v32  ;;  %v4987_v58 = vmul.f32 %v4983_v60, %v4254_v12 }
 0x981   : > { %v4988_v35 = vmul.f32 %v4983_v60, %v4257_v28  ;;  %v4989_v55 = vmul.f32 %v4983_v60, %v4259_v38  ;;  %v4990_v31 = vmul.f32 %v4983_v60, %v4262_v27  ;;  %v4991_v3 = vmul.f32 %v4983_v60, %v4264_v21 }
 0x982   : > { %v4992_v47 = vmul.f32 %v4983_v60, %v4267_v48  ;;  %v4993_v25 = vmul.f32 %v4983_v60, %v4269_v61  ;;  %v4994_v53 = vmul.f32 %v4983_v60, %v4272_v19  ;;  %v4995_v20 = vmul.f32 %v4983_v60, %v4274_v57 }
 0x983   : > { %v4996_v2 = vmul.f32 %v4983_v60, %v4277_v40  ;;  %v4997_v6 = vmul.f32 %v4983_v60, %v4279_v63  ;;  %v4998_v50 = vmul.f32 %v4983_v60, %v4282_v44  ;;  %v4999_v34 = vmul.f32 %v4983_v60, %v4284_v51 }
 0x984   : > { %v5000_v46 = vmul.f32 %v4983_v60, %v4287_v41  ;;  %v5001_v16 = vmul.f32 %v4983_v60, %v4289_v33  ;;  %v5002_v62 = vmul.f32 %v4983_v60, %v4292_v5  ;;  %v5003_v7 = vmul.f32 %v4983_v60, %v4294_v54  ;;  %v9387_v54 = vld [vmem:[%s9559_s17] ss:$0 sm:$0xff] }
 0x985   : > { %v5004_v13 = vmul.f32 %v4983_v60, %v4297_v37  ;;  %v5005_v9 = vmul.f32 %v4983_v60, %v4299_v52  ;;  %v9345_v24 = vmul.f32 %v4983_v60, %v4302_v10  ;;  %v9347_v36 = vmul.f32 %v4983_v60, %v4304_v11  ;;  %v5953_v52 = vld [vmem:[%s7953_s1] sm:$0xff] }
 0x986   : > { %v9349_v8 = vmul.f32 %v4983_v60, %v4307_v42  ;;  %v9351_v23 = vmul.f32 %v4983_v60, %v4309_v22  ;;  %v9353_v49 = vmul.f32 %v4983_v60, %v4312_v56  ;;  %v9355_v4 = vmul.f32 %v4983_v60, %v4314_v39  ;;  %v5954_v22 = vld [vmem:[%s7953_s1 + $0x8] sm:$0xff] }
 0x987   : > { %v9357_v18 = vmul.f32 %v4983_v60, %v4317_v14  ;;  %v9359_v32 = vmul.f32 %v4983_v60, %v4319_v17  ;;  %v9361_v12 = vmul.f32 %v4983_v60, %v4322_v1  ;;  %v9363_v28 = vmul.f32 %v4983_v60, %v4324_v30  ;;  %v5955_v14 = vld [vmem:[%s7953_s1 + $0x10] sm:$0xff] }
 0x988   : > { %v5016_v38 = vpack.c.bf16 %v4985_v45, %v4984_v15  ;;  %v5017_v27 = vpack.c.bf16 %v4987_v58, %v4986_v26  ;;  %v5018_v21 = vpack.c.bf16 %v4989_v55, %v4988_v35  ;;  %v5019_v48 = vpack.c.bf16 %v4991_v3, %v4990_v31  ;;  %v5956_v15 = vld [vmem:[%s7953_s1 + $0x18] sm:$0xff]  ;;  %v5957_v35 = vld [vmem:[%s7953_s1 + $0x20] sm:$0xff] }
 0x989   : > { %v5020_v61 = vpack.c.bf16 %v4993_v25, %v4992_v47  ;;  %v5021_v43 = vpack.c.bf16 %v4995_v20, %v4994_v53  ;;  %v5022_v19 = vpack.c.bf16 %v4997_v6, %v4996_v2  ;;  %v5023_v57 = vpack.c.bf16 %v4999_v34, %v4998_v50  ;;  %v5958_v47 = vld [vmem:[%s7953_s1 + $0x28] sm:$0xff]  ;;  %v5959_v2 = vld [vmem:[%s7953_s1 + $0x30] sm:$0xff] }
 0x98a   : > { %v5024_v40 = vpack.c.bf16 %v5001_v16, %v5000_v46  ;;  %v5025_v63 = vpack.c.bf16 %v5003_v7, %v5002_v62  ;;  %v5026_v44 = vpack.c.bf16 %v5005_v9, %v5004_v13  ;;  %v5027_v51 = vpack.c.bf16 %v9347_v36, %v9345_v24  ;;  %5577 = vmatmul.msk.bf16.vlgmr.msra.gmra.mxu3 %vm645_vm1, %v5016_v38  ;;  %v5960_v46 = vld [vmem:[%s7953_s1 + $0x38] sm:$0xff]  ;;  %v5961_v13 = vld [vmem:[%s7953_s1 + $0x40] sm:$0xff] }
 0x98b   : > { %v5028_v41 = vpack.c.bf16 %v9351_v23, %v9349_v8  ;;  %v5029_v33 = vpack.c.bf16 %v9355_v4, %v9353_v49  ;;  %v5030_v29 = vpack.c.bf16 %v9359_v32, %v9357_v18  ;;  %v5031_v5 = vpack.c.bf16 %v9363_v28, %v9361_v12  ;;  %v5962_v8 = vld [vmem:[%s7953_s1 + $0x48] sm:$0xff] }
 0x99a   : > { %5578 = vmatmul.msk.bf16.gmra.mxu3 %vm645_vm1, %v5017_v27 }
 0x9aa   : > { %5579 = vmatmul.msk.bf16.gmra.mxu3 %vm645_vm1, %v5018_v21  ;;  %v5963_v21 = vld [vmem:[%s7953_s1 + $0x50] sm:$0xff] }
 0x9ba   : > { %5580 = vmatmul.msk.bf16.gmra.mxu3 %vm645_vm1, %v5019_v48 }
 0x9ca   : > { %5581 = vmatmul.msk.bf16.gmra.mxu3 %vm645_vm1, %v5020_v61 }
 0x9da   : > { %5582 = vmatmul.msk.bf16.gmra.mxu3 %vm645_vm1, %v5021_v43 }
 0x9ea   : > { %5583 = vmatmul.msk.bf16.gmra.mxu3 %vm645_vm1, %v5022_v19  ;;  %v5964_v19 = vld [vmem:[%s7953_s1 + $0x58] sm:$0xff] }
 0x9fa   : > { %5584 = vmatmul.msk.bf16.gmra.mxu3 %vm645_vm1, %v5023_v57 }
 0xa0a   : > { %5585 = vmatmul.msk.bf16.gmra.mxu3 %vm645_vm1, %v5024_v40  ;;  %v5965_v40 = vld [vmem:[%s7953_s1 + $0x60] sm:$0xff] }
 0xa0d   : > { %v5097_v37 = vpop.f32.mrf.mxu3 }
 0xa0e   : > { %v5098_v0 = vadd.f32 %v9387_v54, %v5097_v37 }
 0xa10   : > { %v5177_v10 = vadd.f32 %v5953_v52, %v5098_v0 }
 0xa12   : > { %5209 = vst.msk [vmem:[%s7953_s1] sm:$0xff] %vm645_vm1, %v5177_v10  ;;  %v5968_v10 = vld [vmem:[%s7953_s1 + $0x78] sm:$0xff] }
 0xa15   : > { %v5099_v11 = vpop.f32.mrf.mxu3 }
 0xa16   : > { %v5100_v42 = vadd.f32 %v9387_v54, %v5099_v11 }
 0xa18   : > { %v5178_v56 = vadd.f32 %v5954_v22, %v5100_v42 }
 0xa1a   : > { %5210 = vst.msk [vmem:[%s7953_s1 + $0x8] sm:$0xff] %vm645_vm1, %v5178_v56  ;;  %5586 = vmatmul.msk.bf16.gmra.mxu3 %vm645_vm1, %v5025_v63 }
 0xa1d   : > { %v5102_v39 = vpop.f32.mrf.mxu3 }
 0xa1e   : > { %v5103_v60 = vadd.f32 %v9387_v54, %v5102_v39  ;;  %v5970_v39 = vld [vmem:[%s7953_s1 + $0x88] sm:$0xff] }
 0xa20   : > { %v5179_v17 = vadd.f32 %v5955_v14, %v5103_v60 }
 0xa22   : > { %5211 = vst.msk [vmem:[%s7953_s1 + $0x10] sm:$0xff] %vm645_vm1, %v5179_v17 }
 0xa25   : > { %v5104_v1 = vpop.f32.mrf.mxu3 }
 0xa26   : > { %v5105_v30 = vadd.f32 %v9387_v54, %v5104_v1  ;;  %v5971_v1 = vld [vmem:[%s7953_s1 + $0x90] sm:$0xff] }
 0xa28   : > { %v5180_v45 = vadd.f32 %v5956_v15, %v5105_v30 }
 0xa2a   : > { %5212 = vst.msk [vmem:[%s7953_s1 + $0x18] sm:$0xff] %vm645_vm1, %v5180_v45  ;;  %5587 = vmatmul.msk.bf16.gmra.mxu3 %vm645_vm1, %v5026_v44 }
 0xa2d   : > { %v5107_v26 = vpop.f32.mrf.mxu3 }
 0xa2e   : > { %v5108_v58 = vadd.f32 %v9387_v54, %v5107_v26  ;;  %v5972_v26 = vld [vmem:[%s7953_s1 + $0x98] sm:$0xff] }
 0xa30   : > { %v5181_v55 = vadd.f32 %v5957_v35, %v5108_v58 }
 0xa32   : > { %5213 = vst.msk [vmem:[%s7953_s1 + $0x20] sm:$0xff] %vm645_vm1, %v5181_v55 }
 0xa35   : > { %v5109_v31 = vpop.f32.mrf.mxu3 }
 0xa36   : > { %v5110_v3 = vadd.f32 %v9387_v54, %v5109_v31  ;;  %v5973_v31 = vld [vmem:[%s7953_s1 + $0xa0] sm:$0xff] }
 0xa38   : > { %v5182_v25 = vadd.f32 %v5958_v47, %v5110_v3 }
 0xa3a   : > { %5214 = vst.msk [vmem:[%s7953_s1 + $0x28] sm:$0xff] %vm645_vm1, %v5182_v25  ;;  %5588 = vmatmul.msk.bf16.gmra.mxu3 %vm645_vm1, %v5027_v51 }
 0xa3d   : > { %v5112_v53 = vpop.f32.mrf.mxu3 }
 0xa3e   : > { %v5113_v20 = vadd.f32 %v9387_v54, %v5112_v53  ;;  %v5974_v53 = vld [vmem:[%s7953_s1 + $0xa8] sm:$0xff] }
 0xa40   : > { %v5183_v6 = vadd.f32 %v5959_v2, %v5113_v20 }
 0xa42   : > { %5215 = vst.msk [vmem:[%s7953_s1 + $0x30] sm:$0xff] %vm645_vm1, %v5183_v6 }
 0xa45   : > { %v5114_v50 = vpop.f32.mrf.mxu3 }
 0xa46   : > { %v5115_v34 = vadd.f32 %v9387_v54, %v5114_v50  ;;  %v5975_v50 = vld [vmem:[%s7953_s1 + $0xb0] sm:$0xff] }
 0xa48   : > { %v5184_v16 = vadd.f32 %v5960_v46, %v5115_v34 }
 0xa4a   : > { %5216 = vst.msk [vmem:[%s7953_s1 + $0x38] sm:$0xff] %vm645_vm1, %v5184_v16  ;;  %5589 = vmatmul.msk.bf16.gmra.mxu3 %vm645_vm1, %v5028_v41  ;;  %v5966_v41 = vld [vmem:[%s7953_s1 + $0x68] sm:$0xff] }
 0xa4d   : > { %v5117_v62 = vpop.f32.mrf.mxu3 }
 0xa4e   : > { %v5118_v7 = vadd.f32 %v9387_v54, %v5117_v62  ;;  %v5976_v62 = vld [vmem:[%s7953_s1 + $0xb8] sm:$0xff] }
 0xa50   : > { %v5185_v9 = vadd.f32 %v5961_v13, %v5118_v7 }
 0xa52   : > { %5217 = vst.msk [vmem:[%s7953_s1 + $0x40] sm:$0xff] %vm645_vm1, %v5185_v9 }
 0xa55   : > { %v5119_v24 = vpop.f32.mrf.mxu3 }
 0xa56   : > { %v5120_v36 = vadd.f32 %v9387_v54, %v5119_v24  ;;  %v5977_v24 = vld [vmem:[%s7953_s1 + $0xc0] sm:$0xff] }
 0xa58   : > { %v5186_v23 = vadd.f32 %v5962_v8, %v5120_v36 }
 0xa5a   : > { %5218 = vst.msk [vmem:[%s7953_s1 + $0x48] sm:$0xff] %vm645_vm1, %v5186_v23  ;;  %5590 = vmatmul.msk.bf16.gmra.mxu3 %vm645_vm1, %v5029_v33 }
 0xa5d   : > { %v5122_v38 = vpop.f32.mrf.mxu3 }
 0xa5e   : > { %v5123_v27 = vadd.f32 %v9387_v54, %v5122_v38  ;;  %v5978_v38 = vld [vmem:[%s7953_s1 + $0xc8] sm:$0xff] }
 0xa60   : > { %v5187_v48 = vadd.f32 %v5963_v21, %v5123_v27 }
 0xa62   : > { %5219 = vst.msk [vmem:[%s7953_s1 + $0x50] sm:$0xff] %vm645_vm1, %v5187_v48 }
 0xa65   : > { %v5124_v61 = vpop.f32.mrf.mxu3 }
 0xa66   : > { %v5125_v43 = vadd.f32 %v9387_v54, %v5124_v61  ;;  %v5979_v61 = vld [vmem:[%s7953_s1 + $0xd0] sm:$0xff] }
 0xa68   : > { %v5188_v57 = vadd.f32 %v5964_v19, %v5125_v43 }
 0xa6a   : > { %5220 = vst.msk [vmem:[%s7953_s1 + $0x58] sm:$0xff] %vm645_vm1, %v5188_v57  ;;  %5591 = vmatmul.msk.bf16.gmra.mxu3 %vm645_vm1, %v5030_v29  ;;  %v5967_v29 = vld [vmem:[%s7953_s1 + $0x70] sm:$0xff] }
 0xa6d   : > { %v5127_v49 = vpop.f32.mrf.mxu3 }
 0xa6e   : > { %v5128_v4 = vadd.f32 %v9387_v54, %v5127_v49  ;;  %v5980_v49 = vld [vmem:[%s7953_s1 + $0xd8] sm:$0xff] }
 0xa70   : > { %v5189_v63 = vadd.f32 %v5965_v40, %v5128_v4 }
 0xa72   : > { %5221 = vst.msk [vmem:[%s7953_s1 + $0x60] sm:$0xff] %vm645_vm1, %v5189_v63 }
 0xa75   : > { %v5129_v44 = vpop.f32.mrf.mxu3 }
 0xa76   : > { %v5130_v51 = vadd.f32 %v9387_v54, %v5129_v44  ;;  %v5981_v44 = vld [vmem:[%s7953_s1 + $0xe0] sm:$0xff] }
 0xa78   : > { %v5190_v33 = vadd.f32 %v5966_v41, %v5130_v51 }
 0xa7a   : > { %5222 = vst.msk [vmem:[%s7953_s1 + $0x68] sm:$0xff] %vm645_vm1, %v5190_v33  ;;  %5592 = vmatmul.msk.bf16.gmra.mxu3 %vm645_vm1, %v5031_v5  ;;  %v5969_v5 = vld [vmem:[%s7953_s1 + $0x80] sm:$0xff] }
 0xa7d   : > { %v5132_v18 = vpop.f32.mrf.mxu3 }
 0xa7e   : > { %v5133_v32 = vadd.f32 %v9387_v54, %v5132_v18  ;;  %v5982_v18 = vld [vmem:[%s7953_s1 + $0xe8] sm:$0xff] }
 0xa80   : > { %v5191_v37 = vadd.f32 %v5967_v29, %v5133_v32 }
 0xa82   : > { %5223 = vst.msk [vmem:[%s7953_s1 + $0x70] sm:$0xff] %vm645_vm1, %v5191_v37 }
 0xa85   : > { %v5134_v0 = vpop.f32.mrf.mxu3 }
 0xa86   : > { %v5135_v52 = vadd.f32 %v9387_v54, %v5134_v0  ;;  %v5983_v0 = vld [vmem:[%s7953_s1 + $0xf0] sm:$0xff] }
 0xa88   : > { %v5192_v11 = vadd.f32 %v5968_v10, %v5135_v52 }
 0xa8a   : > { %5224 = vst.msk [vmem:[%s7953_s1 + $0x78] sm:$0xff] %vm645_vm1, %v5192_v11 }
 0xa8d   : > { %v5137_v12 = vpop.f32.mrf.mxu3 }
 0xa8e   : > { %v5138_v28 = vadd.f32 %v9387_v54, %v5137_v12 }
 0xa90   : > { %v5193_v42 = vadd.f32 %v5969_v5, %v5138_v28 }
 0xa92   : > { %5225 = vst.msk [vmem:[%s7953_s1 + $0x80] sm:$0xff] %vm645_vm1, %v5193_v42 }
 0xa95   : > { %v5139_v22 = vpop.f32.mrf.mxu3 }
 0xa96   : > { %v5140_v56 = vadd.f32 %v9387_v54, %v5139_v22 }
 0xa98   : > { %v5194_v60 = vadd.f32 %v5970_v39, %v5140_v56 }
 0xa9a   : > { %5226 = vst.msk [vmem:[%s7953_s1 + $0x88] sm:$0xff] %vm645_vm1, %v5194_v60 }
 0xa9d   : > { %v5142_v14 = vpop.f32.mrf.mxu3 }
 0xa9e   : > { %v5143_v17 = vadd.f32 %v9387_v54, %v5142_v14 }
 0xaa0   : > { %v5195_v30 = vadd.f32 %v5971_v1, %v5143_v17 }
 0xaa2   : > { %5227 = vst.msk [vmem:[%s7953_s1 + $0x90] sm:$0xff] %vm645_vm1, %v5195_v30 }
 0xaa5   : > { %v5144_v15 = vpop.f32.mrf.mxu3 }
 0xaa6   : > { %v5145_v45 = vadd.f32 %v9387_v54, %v5144_v15 }
 0xaa8   : > { %v5196_v58 = vadd.f32 %v5972_v26, %v5145_v45 }
 0xaaa   : > { %5228 = vst.msk [vmem:[%s7953_s1 + $0x98] sm:$0xff] %vm645_vm1, %v5196_v58 }
 0xaad   : > { %v5147_v35 = vpop.f32.mrf.mxu3 }
 0xaae   : > { %v5148_v55 = vadd.f32 %v9387_v54, %v5147_v35 }
 0xab0   : > { %v5197_v3 = vadd.f32 %v5973_v31, %v5148_v55 }
 0xab2   : > { %5229 = vst.msk [vmem:[%s7953_s1 + $0xa0] sm:$0xff] %vm645_vm1, %v5197_v3 }
 0xab5   : > { %v5149_v47 = vpop.f32.mrf.mxu3 }
 0xab6   : > { %v5150_v25 = vadd.f32 %v9387_v54, %v5149_v47 }
 0xab8   : > { %v5198_v20 = vadd.f32 %v5974_v53, %v5150_v25 }
 0xaba   : > { %5230 = vst.msk [vmem:[%s7953_s1 + $0xa8] sm:$0xff] %vm645_vm1, %v5198_v20 }
 0xabd   : > { %v5152_v2 = vpop.f32.mrf.mxu3 }
 0xabe   : > { %v5153_v6 = vadd.f32 %v9387_v54, %v5152_v2 }
 0xac0   : > { %v5199_v34 = vadd.f32 %v5975_v50, %v5153_v6 }
 0xac2   : > { %5231 = vst.msk [vmem:[%s7953_s1 + $0xb0] sm:$0xff] %vm645_vm1, %v5199_v34 }
 0xac5   : > { %v5154_v46 = vpop.f32.mrf.mxu3 }
 0xac6   : > { %v5155_v16 = vadd.f32 %v9387_v54, %v5154_v46 }
 0xac8   : > { %v5200_v7 = vadd.f32 %v5976_v62, %v5155_v16 }
 0xaca   : > { %5232 = vst.msk [vmem:[%s7953_s1 + $0xb8] sm:$0xff] %vm645_vm1, %v5200_v7 }
 0xacd   : > { %v5157_v13 = vpop.f32.mrf.mxu3 }
 0xace   : > { %v5158_v9 = vadd.f32 %v9387_v54, %v5157_v13 }
 0xad0   : > { %v5201_v36 = vadd.f32 %v5977_v24, %v5158_v9 }
 0xad2   : > { %5233 = vst.msk [vmem:[%s7953_s1 + $0xc0] sm:$0xff] %vm645_vm1, %v5201_v36 }
 0xad5   : > { %v5159_v8 = vpop.f32.mrf.mxu3 }
 0xad6   : > { %v5160_v23 = vadd.f32 %v9387_v54, %v5159_v8 }
 0xad8   : > { %v5202_v27 = vadd.f32 %v5978_v38, %v5160_v23 }
 0xada   : > { %5234 = vst.msk [vmem:[%s7953_s1 + $0xc8] sm:$0xff] %vm645_vm1, %v5202_v27 }
 0xadd   : > { %v5162_v21 = vpop.f32.mrf.mxu3 }
 0xade   : > { %v5163_v48 = vadd.f32 %v9387_v54, %v5162_v21 }
 0xae0   : > { %v5203_v43 = vadd.f32 %v5979_v61, %v5163_v48 }
 0xae2   : > { %5235 = vst.msk [vmem:[%s7953_s1 + $0xd0] sm:$0xff] %vm645_vm1, %v5203_v43 }
 0xae5   : > { %v5164_v19 = vpop.f32.mrf.mxu3 }
 0xae6   : > { %v5165_v57 = vadd.f32 %v9387_v54, %v5164_v19 }
 0xae8   : > { %v5204_v4 = vadd.f32 %v5980_v49, %v5165_v57 }
 0xaea   : > { %5236 = vst.msk [vmem:[%s7953_s1 + $0xd8] sm:$0xff] %vm645_vm1, %v5204_v4 }
 0xaed   : > { %v5167_v40 = vpop.f32.mrf.mxu3 }
 0xaee   : > { %v5168_v63 = vadd.f32 %v9387_v54, %v5167_v40 }
 0xaf0   : > { %v5205_v51 = vadd.f32 %v5981_v44, %v5168_v63 }
 0xaf2   : > { %5237 = vst.msk [vmem:[%s7953_s1 + $0xe0] sm:$0xff] %vm645_vm1, %v5205_v51 }
 0xaf5   : > { %v5169_v41 = vpop.f32.mrf.mxu3 }
 0xaf6   : > { %v5170_v33 = vadd.f32 %v9387_v54, %v5169_v41 }
 0xaf8   : > { %v5206_v32 = vadd.f32 %v5982_v18, %v5170_v33 }
 0xafa   : > { %5238 = vst.msk [vmem:[%s7953_s1 + $0xe8] sm:$0xff] %vm645_vm1, %v5206_v32 }
 0xafd   : > { %v5172_v29 = vpop.f32.mrf.mxu3 }
 0xafe   : > { %v5173_v37 = vadd.f32 %v9387_v54, %v5172_v29 }
 0xb00   : > { %v5207_v52 = vadd.f32 %v5983_v0, %v5173_v37 }
 0xb02   : > { %5239 = vst.msk [vmem:[%s7953_s1 + $0xf0] sm:$0xff] %vm645_vm1, %v5207_v52 }
 0xb05   : > { %v5174_v10 = vpop.f32.mrf.mxu3 }
 0xb06   : > { %v5175_v11 = vadd.f32 %v9387_v54, %v5174_v10 }
 0xb08   : > { %v5208_v12 = vadd.f32 %v5175_v11, %v8950_v59 }
 0xb0a   : > { %5240 = vst.msk [vmem:[%s7953_s1 + $0xf8] sm:$0xff] %vm645_vm1, %v5208_v12 }
 0xb0b PF: > { %s28_s29 = sadd.s32 1, %s6006_s29   ;;  %s9755_s27 = smov %s6002_s28 }
 0xb0c   : > { %p25_p5 = scmp.ge.s32.totalorder %s28_s29, 4   ;;  %s9756_s28 = smov %s9758_s30 }
 0xb0e   :  { %27 = sbr.rel (!%p25_p5) target bundleno = 4 (0x4), region = 136 }

</bundles_post_ra>
